<compile_context>
chip_gen: v6e
topology: v6e:2x2x1
jax: 0.10.0
libtpu: 0.0.40
codegen_flags: <defaults>
</compile_context>

<pallas_src>
import jax
import jax.numpy as jnp
from jax.experimental import pallas as pl
from jax.experimental.pallas import tpu as pltpu


# ----------------------------- fused kernel -------------------------------- #

def fused_scse_decoder_kernel(
        x_ref,        # (B, Cin, H*W)      f32   NCHW block (spatial flattened)
        vecs_ref,     # (8, Cmax)          f32   row-packed per-channel vectors
        cols_ref,     # (Cmax, 8)          f32   col-packed per-channel vectors
        cgate_ref,    # (2, Cout, Ch)      f32   [w_l1, w_l2.T]
        w1_ref,       # (9, Cin, Cout)     bf16  conv1 taps
        w2_ref,       # (9, Cout, Cout)    bf16  conv2 taps
        wd_ref,       # (Cin, Cout)        bf16  1x1 downsampler
        o_ref,        # (B, Cout, H*W)     f32   NCHW output block
        pad1_ref,     # VMEM (B, H+2, W+2, Cin)  bf16 halo scratch
        pad2_ref):    # VMEM (B, H+2, W+2, Cout) bf16 halo scratch
    B, Cin, HW = x_ref.shape
    Cout = o_ref.shape[1]
    Ch = cgate_ref.shape[2]
    H = pad1_ref.shape[1] - 2
    W = pad1_ref.shape[2] - 2

    # Packed per-channel vectors (folded BN scale/shift + gate biases).
    s1 = vecs_ref[0:1, :Cin]
    b1 = vecs_ref[1:2, :Cin]
    s3 = vecs_ref[2:3, :Cin]
    b3 = vecs_ref[3:4, :Cin]
    s2 = vecs_ref[4:5, :Cout]
    b2 = vecs_ref[5:6, :Cout]
    bl1 = vecs_ref[6:7, :Ch]          # (1, Ch)
    wsp_col = cols_ref[:Cout, 0:1]    # (Cout, 1)  spatial-gate 1x1 conv weight
    bl2_col = cols_ref[:Cout, 1:2]    # (Cout, 1)  channel-gate L2 bias
    wl1 = cgate_ref[0]                # (Cout, Ch)
    wl2t = cgate_ref[1]               # (Cout, Ch)

    # ---- Zero ONLY the 1-pixel halo border (interior is fully overwritten
    # below; scratch persists per-core under megacore, so do it every step).
    def zero_border(pad_ref, c):
        pad_ref[:, 0:1, :, :] = jnp.zeros((B, 1, W + 2, c), jnp.bfloat16)
        pad_ref[:, H + 1:H + 2, :, :] = jnp.zeros((B, 1, W + 2, c), jnp.bfloat16)
        pad_ref[:, :, 0:1, :] = jnp.zeros((B, H + 2, 1, c), jnp.bfloat16)
        pad_ref[:, :, W + 1:W + 2, :] = jnp.zeros((B, H + 2, 1, c), jnp.bfloat16)

    zero_border(pad1_ref, Cin)
    zero_border(pad2_ref, Cout)

    # ---- Per image: NCHW -> pixels-major (one 2-D XLU transpose), BN1+ReLU
    # into the pad1 interior (bf16), BN3 (no ReLU) feeding the downsampler.
    # BN/ReLU arithmetic stays f32; cast only at the store / matmul boundary.
    xd_parts = []
    for b in range(B):                               # B is small and static
        xbT = jnp.transpose(x_ref[b])                # (H*W, Cin) f32
        a_b = jnp.maximum(xbT * s1 + b1, 0.0)        # BN1 + ReLU
        pad1_ref[b:b + 1, 1:H + 1, 1:W + 1, :] = (
            a_b.astype(jnp.bfloat16).reshape(1, H, W, Cin))
        xd_parts.append((xbT * s3 + b3).astype(jnp.bfloat16))   # BN3 (no ReLU)
    xd = xd_parts[0] if B == 1 else jnp.concatenate(xd_parts, axis=0)

    # ---- 3x3 conv = 9 accumulated bf16 MXU matmuls (no im2col concatenate).
    def conv3x3(pad_ref, w_ref, cin):
        acc = None
        for k in range(9):
            dy, dx = k // 3, k % 3
            tap = pad_ref[:, dy:dy + H, dx:dx + W, :].reshape(B * H * W, cin)
            part = jnp.dot(tap, w_ref[k], preferred_element_type=jnp.float32)
            acc = part if acc is None else acc + part
        return acc                                   # (B*H*W, Cout) f32

    # conv1 + BN2 + ReLU -> pad2 interior (bf16)
    bact = jnp.maximum(conv3x3(pad1_ref, w1_ref, Cin) * s2 + b2, 0.0)
    pad2_ref[:, 1:H + 1, 1:W + 1, :] = (
        bact.astype(jnp.bfloat16).reshape(B, H, W, Cout))

    # conv2 + downsampler (BN3 -> 1x1 conv) + residual ReLU
    e = jnp.maximum(
        conv3x3(pad2_ref, w2_ref, Cout)
        + jnp.dot(xd, wd_ref[...], preferred_element_type=jnp.float32),
        0.0)                                         # (B*H*W, Cout) f32

    # ---- SCSE gates on VPU/XLU + lane-dense NCHW output store per image. ---
    for b in range(B):
        eb = e[b * HW:(b + 1) * HW, :]               # (H*W, Cout)
        et = jnp.transpose(eb)                       # (Cout, H*W) lane-dense
        pooled = jnp.mean(et, axis=1, keepdims=True)                     # (Cout, 1)
        h = jnp.maximum(
            jnp.sum(wl1 * pooled, axis=0, keepdims=True) + bl1, 0.0)     # (1, Ch)
        cg = jax.nn.sigmoid(
            jnp.sum(wl2t * h, axis=1, keepdims=True) + bl2_col)          # (Cout, 1)
        sg = jax.nn.sigmoid(
            jnp.sum(et * wsp_col, axis=0, keepdims=True))                # (1, H*W)
        o_ref[b] = (sg + cg) * et                    # sg*e + cg*e


# ------------------------------- wrapper ------------------------------------ #

def _bn_fold(gamma, beta, mean, var, eps=1e-5):
    scale = gamma / jnp.sqrt(var + eps)
    shift = beta - mean * scale
    return scale, shift                              # (C,), (C,)


def _vmem_capacity_bytes():
    try:
        cap = int(getattr(pltpu.get_tpu_info(), "vmem_capacity_bytes"))
        if cap > 0:
            return cap
    except Exception:
        pass
    return 64 * 1024 * 1024                          # conservative (v7x per-core)


def _rough_vmem_bytes(B, H, W, Cin, Cout):
    hw = H * W
    blocks = 2 * (B * Cin * hw * 4 + B * Cout * hw * 4)        # dbl-buffered I/O
    pads = B * (H + 2) * (W + 2) * (Cin + Cout) * 2            # bf16 halo scratch
    weights = 2 * (9 * Cin * Cout + 9 * Cout * Cout + Cin * Cout)
    live = B * hw * (Cin + 3 * Cout) * 4                       # taps/acc/e in flight
    return blocks + pads + weights + live


def _pick_block_n(N, H, W, Cin, Cout, budget):
    best = 1
    min_grid = 2 if N >= 2 else 1           # keep >= 2 grid steps (megacore/v7x)
    for cand in range(1, min(N, 8) + 1):
        if N % cand:
            continue
        if N // cand < min_grid:
            continue
        if 4 * _rough_vmem_bytes(cand, H, W, Cin, Cout) <= budget:
            best = cand
    return best


def scse_decoder_forward(x_nchw, params, block_n=None):
    N, Cin, H, W = x_nchw.shape
    Cout = params["w_conv1"].shape[-1]
    Ch = params["w_l1"].shape[-1]
    HW = H * W

    # Free reshape of the NCHW input (no HBM transpose pass in the wrapper).
    x2 = x_nchw.reshape(N, Cin, HW).astype(jnp.float32)

    s1, b1 = _bn_fold(*params["bn1"])
    s2, b2 = _bn_fold(*params["bn2"])
    s3, b3 = _bn_fold(*params["bn3"])

    # Pack the ten tiny per-channel vectors into three small arrays.
    Cmax = max(Cin, Cout, Ch)
    vecs = jnp.zeros((8, Cmax), jnp.float32)
    vecs = vecs.at[0, :Cin].set(s1)
    vecs = vecs.at[1, :Cin].set(b1)
    vecs = vecs.at[2, :Cin].set(s3)
    vecs = vecs.at[3, :Cin].set(b3)
    vecs = vecs.at[4, :Cout].set(s2)
    vecs = vecs.at[5, :Cout].set(b2)
    vecs = vecs.at[6, :Ch].set(params["b_l1"].reshape(Ch))
    cols = jnp.zeros((Cmax, 8), jnp.float32)
    cols = cols.at[:Cout, 0].set(params["w_sp"].reshape(Cout))
    cols = cols.at[:Cout, 1].set(params["b_l2"].reshape(Cout))
    cgate = jnp.stack([params["w_l1"], params["w_l2"].T], axis=0)  # (2, Cout, Ch)

    w1 = params["w_conv1"].astype(jnp.bfloat16)      # (9, Cin, Cout)
    w2 = params["w_conv2"].astype(jnp.bfloat16)      # (9, Cout, Cout)
    wd = params["w_down"].astype(jnp.bfloat16)       # (Cin, Cout)

    budget = int(0.75 * _vmem_capacity_bytes())
    B = block_n if block_n is not None else _pick_block_n(N, H, W, Cin, Cout,
                                                          budget)
    assert N % B == 0, (N, B)
    grid_n = N // B
    vmem_limit = int(min(budget,
                         max(32 * 1024 * 1024,
                             4 * _rough_vmem_bytes(B, H, W, Cin, Cout))))

    def full(a):
        nd = a.ndim
        return pl.BlockSpec(a.shape, lambda n, _nd=nd: (0,) * _nd)

    conv_flops = 2 * N * HW * Cout * (9 * Cin + 9 * Cout + Cin)
    gate_flops = 4 * N * HW * Cout
    bytes_accessed = (4 * N * HW * (Cin + Cout)
                      + 2 * (int(w1.size) + int(w2.size) + int(wd.size))
                      + 4 * (int(vecs.size) + int(cols.size) + int(cgate.size)))

    out = pl.pallas_call(
        fused_scse_decoder_kernel,
        grid=(grid_n,),
        in_specs=[
            pl.BlockSpec((B, Cin, HW), lambda n: (n, 0, 0)),
            full(vecs), full(cols), full(cgate), full(w1), full(w2), full(wd),
        ],
        out_specs=pl.BlockSpec((B, Cout, HW), lambda n: (n, 0, 0)),
        out_shape=jax.ShapeDtypeStruct((N, Cout, HW), jnp.float32),
        scratch_shapes=[
            pltpu.VMEM((B, H + 2, W + 2, Cin), jnp.bfloat16),
            pltpu.VMEM((B, H + 2, W + 2, Cout), jnp.bfloat16),
        ],
        compiler_params=pltpu.CompilerParams(
            dimension_semantics=("parallel",),
            vmem_limit_bytes=vmem_limit),
        cost_estimate=pl.CostEstimate(
            flops=int(conv_flops + gate_flops),
            transcendentals=int(N * (HW + Cout + Ch)),
            bytes_accessed=int(bytes_accessed)),
    )(x2, vecs, cols, cgate, w1, w2, wd)

    return out.reshape(N, Cout, H, W)                # already NCHW


# ------------------------- params / reference ------------------------------- #

def init_params(key, cin, cout, reduction=16):
    ch = max(cout // reduction, 1)
    ks = jax.random.split(key, 16)

    def rn(k, shape, scale=0.1):
        return scale * jax.random.normal(k, shape, jnp.float32)

    def bn_params(k, c):
        k1, k2, k3, k4 = jax.random.split(k, 4)
        gamma = 1.0 + rn(k1, (c,))
        beta = rn(k2, (c,))
        mean = rn(k3, (c,))
        var = 1.0 + 0.1 * jnp.abs(jax.random.normal(k4, (c,), jnp.float32))
        return (gamma, beta, mean, var)

    return {
        "bn1": bn_params(ks[0], cin),
        "w_conv1": rn(ks[1], (9, cin, cout)),
        "bn2": bn_params(ks[2], cout),
        "w_conv2": rn(ks[3], (9, cout, cout)),
        "bn3": bn_params(ks[4], cin),
        "w_down": rn(ks[5], (cin, cout)),
        "w_l1": rn(ks[6], (cout, ch)),
        "b_l1": rn(ks[7], (1, ch)),
        "w_l2": rn(ks[8], (ch, cout)),
        "b_l2": rn(ks[9], (1, cout)),
        "w_sp": rn(ks[10], (cout, 1)),
    }


def reference_forward(x_nchw, params):
    hp = jax.lax.Precision.HIGHEST
    x = jnp.transpose(x_nchw, (0, 2, 3, 1)).astype(jnp.float32)

    def bn(t, p, eps=1e-5):
        g, b, m, v = p
        return (t - m) / jnp.sqrt(v + eps) * g + b

    def conv3x3(xp, w):
        H, W = xp.shape[1] - 2, xp.shape[2] - 2
        out = 0.0
        for dy in range(3):
            for dx in range(3):
                out = out + jnp.einsum("nhwc,co->nhwo",
                                       xp[:, dy:dy + H, dx:dx + W, :],
                                       w[dy * 3 + dx], precision=hp)
        return out

    a = jax.nn.relu(bn(x, params["bn1"]))
    a_pad = jnp.pad(a, ((0, 0), (1, 1), (1, 1), (0, 0)))
    b = jax.nn.relu(bn(conv3x3(a_pad, params["w_conv1"]), params["bn2"]))
    b_pad = jnp.pad(b, ((0, 0), (1, 1), (1, 1), (0, 0)))
    c = conv3x3(b_pad, params["w_conv2"])
    d = jnp.einsum("nhwc,co->nhwo", bn(x, params["bn3"]), params["w_down"],
                   precision=hp)
    e = jax.nn.relu(c + d)
    pooled = jnp.mean(e, axis=(1, 2))                               # (N, C)
    h = jax.nn.relu(pooled @ params["w_l1"] + params["b_l1"])
    cg = jax.nn.sigmoid(h @ params["w_l2"] + params["b_l2"])        # (N, C)
    sg = jax.nn.sigmoid(jnp.einsum("nhwc,co->nhwo", e, params["w_sp"],
                                   precision=hp))                   # (N,H,W,1)
    out = sg * e + cg[:, None, None, :] * e
    return jnp.transpose(out, (0, 3, 1, 2))


# ------------------------------- main --------------------------------------- #

if __name__ == "__main__":
    key = jax.random.PRNGKey(0)
    kx, kp = jax.random.split(key)

    N, Cin, Cout, H, W = 2, 32, 32, 16, 16
    x = jax.random.normal(kx, (N, Cin, H, W), jnp.float32)
    params = init_params(kp, Cin, Cout)

    # Case 1: auto block_n (-> 1 image per step, grid of 2).
    out = jax.block_until_ready(scse_decoder_forward(x, params))
    ref = jax.block_until_ready(reference_forward(x, params))
    assert out.shape == (N, Cout, H, W)
    assert jnp.allclose(out, ref, rtol=5e-2, atol=5e-2), (
        float(jnp.max(jnp.abs(out - ref))))

    # Case 2: batched images-per-step path (2 images per step, grid of 2).
    N2 = 4
    x2 = jax.random.normal(jax.random.fold_in(kx, 1), (N2, Cin, H, W),
                           jnp.float32)
    out2 = jax.block_until_ready(scse_decoder_forward(x2, params, block_n=2))
    ref2 = jax.block_until_ready(reference_forward(x2, params))
    assert out2.shape == (N2, Cout, H, W)
    assert jnp.allclose(out2, ref2, rtol=5e-2, atol=5e-2), (
        float(jnp.max(jnp.abs(out2 - ref2))))

    print("KERNEL_OK")
</pallas_src>

<mosaic_0001>
module attributes {stable_mosaic.version = 11 : i64} {
  func.func @fused_scse_decoder_kernel(%arg0: i32, %arg1: memref<1x32x256xf32, #tpu.memory_space<vmem>>, %arg2: memref<8x32xf32, #tpu.memory_space<vmem>>, %arg3: memref<32x8xf32, #tpu.memory_space<vmem>>, %arg4: memref<2x32x2xf32, #tpu.memory_space<vmem>>, %arg5: memref<9x32x32xbf16, #tpu.memory_space<vmem>>, %arg6: memref<9x32x32xbf16, #tpu.memory_space<vmem>>, %arg7: memref<32x32xbf16, #tpu.memory_space<vmem>>, %arg8: memref<1x32x256xf32, #tpu.memory_space<vmem>>, %arg9: memref<1x18x18x32xbf16, #tpu.memory_space<vmem>>, %arg10: memref<1x18x18x32xbf16, #tpu.memory_space<vmem>>) attributes {dimension_semantics = [#tpu.dimension_semantics<parallel>], iteration_bounds = array<i64: 2>, scalar_prefetch = 0 : i64, scratch_operands = 2 : i64, tpu.core_type = #tpu.core_type<tc>, window_params = [{transform_indices = @transform_0, window_bounds = array<i64: 1, 32, 256>}, {pipeline_mode = #tpu.pipeline_mode<synchronous>, transform_indices = @transform_1, window_bounds = array<i64: 8, 32>}, {pipeline_mode = #tpu.pipeline_mode<synchronous>, transform_indices = @transform_2, window_bounds = array<i64: 32, 8>}, {pipeline_mode = #tpu.pipeline_mode<synchronous>, transform_indices = @transform_3, window_bounds = array<i64: 2, 32, 2>}, {pipeline_mode = #tpu.pipeline_mode<synchronous>, transform_indices = @transform_4, window_bounds = array<i64: 9, 32, 32>}, {pipeline_mode = #tpu.pipeline_mode<synchronous>, transform_indices = @transform_5, window_bounds = array<i64: 9, 32, 32>}, {pipeline_mode = #tpu.pipeline_mode<synchronous>, transform_indices = @transform_6, window_bounds = array<i64: 32, 32>}, {transform_indices = @transform_7, window_bounds = array<i64: 1, 32, 256>}]} {
    %c0 = arith.constant 0 : index
    %c0_0 = arith.constant 0 : index
    %0 = vector.load %arg2[%c0, %c0_0] : memref<8x32xf32, #tpu.memory_space<vmem>>, vector<1x32xf32>
    %c1 = arith.constant 1 : index
    %c0_1 = arith.constant 0 : index
    %1 = vector.load %arg2[%c1, %c0_1] : memref<8x32xf32, #tpu.memory_space<vmem>>, vector<1x32xf32>
    %c2 = arith.constant 2 : index
    %c0_2 = arith.constant 0 : index
    %2 = vector.load %arg2[%c2, %c0_2] : memref<8x32xf32, #tpu.memory_space<vmem>>, vector<1x32xf32>
    %c3 = arith.constant 3 : index
    %c0_3 = arith.constant 0 : index
    %3 = vector.load %arg2[%c3, %c0_3] : memref<8x32xf32, #tpu.memory_space<vmem>>, vector<1x32xf32>
    %c4 = arith.constant 4 : index
    %c0_4 = arith.constant 0 : index
    %4 = vector.load %arg2[%c4, %c0_4] : memref<8x32xf32, #tpu.memory_space<vmem>>, vector<1x32xf32>
    %c5 = arith.constant 5 : index
    %c0_5 = arith.constant 0 : index
    %5 = vector.load %arg2[%c5, %c0_5] : memref<8x32xf32, #tpu.memory_space<vmem>>, vector<1x32xf32>
    %c6 = arith.constant 6 : index
    %c0_6 = arith.constant 0 : index
    %6 = vector.load %arg2[%c6, %c0_6] : memref<8x32xf32, #tpu.memory_space<vmem>>, vector<1x2xf32>
    %c0_7 = arith.constant 0 : index
    %c0_8 = arith.constant 0 : index
    %7 = vector.load %arg3[%c0_7, %c0_8] : memref<32x8xf32, #tpu.memory_space<vmem>>, vector<32x1xf32>
    %c0_9 = arith.constant 0 : index
    %c1_10 = arith.constant 1 : index
    %8 = vector.load %arg3[%c0_9, %c1_10] : memref<32x8xf32, #tpu.memory_space<vmem>>, vector<32x1xf32>
    %c0_11 = arith.constant 0 : index
    %c0_12 = arith.constant 0 : index
    %c0_13 = arith.constant 0 : index
    %9 = vector.load %arg4[%c0_11, %c0_12, %c0_13] : memref<2x32x2xf32, #tpu.memory_space<vmem>>, vector<1x32x2xf32>
    %10 = vector.shape_cast %9 : vector<1x32x2xf32> to vector<32x2xf32>
    %c1_14 = arith.constant 1 : index
    %c0_15 = arith.constant 0 : index
    %c0_16 = arith.constant 0 : index
    %11 = vector.load %arg4[%c1_14, %c0_15, %c0_16] : memref<2x32x2xf32, #tpu.memory_space<vmem>>, vector<1x32x2xf32>
    %12 = vector.shape_cast %11 : vector<1x32x2xf32> to vector<32x2xf32>
    %cst = arith.constant 0.000000e+00 : bf16
    %13 = vector.broadcast %cst : bf16 to vector<1x1x18x32xbf16>
    %c0_17 = arith.constant 0 : index
    %c0_18 = arith.constant 0 : index
    %c0_19 = arith.constant 0 : index
    %c0_20 = arith.constant 0 : index
    %14 = vector.load %arg9[%c0_17, %c0_18, %c0_19, %c0_20] : memref<1x18x18x32xbf16, #tpu.memory_space<vmem>>, vector<1x1x18x32xbf16>
    tpu.vector_store %arg9[%c0_17, %c0_18, %c0_19, %c0_20], %13 {strides = array<i32>} : memref<1x18x18x32xbf16, #tpu.memory_space<vmem>>, vector<1x1x18x32xbf16>,
    %cst_21 = arith.constant 0.000000e+00 : bf16
    %15 = vector.broadcast %cst_21 : bf16 to vector<1x1x18x32xbf16>
    %c0_22 = arith.constant 0 : index
    %c17 = arith.constant 17 : index
    %c0_23 = arith.constant 0 : index
    %c0_24 = arith.constant 0 : index
    %16 = vector.load %arg9[%c0_22, %c17, %c0_23, %c0_24] : memref<1x18x18x32xbf16, #tpu.memory_space<vmem>>, vector<1x1x18x32xbf16>
    tpu.vector_store %arg9[%c0_22, %c17, %c0_23, %c0_24], %15 {strides = array<i32>} : memref<1x18x18x32xbf16, #tpu.memory_space<vmem>>, vector<1x1x18x32xbf16>,
    %cst_25 = arith.constant 0.000000e+00 : bf16
    %17 = vector.broadcast %cst_25 : bf16 to vector<1x18x1x32xbf16>
    %c0_26 = arith.constant 0 : index
    %c0_27 = arith.constant 0 : index
    %c0_28 = arith.constant 0 : index
    %c0_29 = arith.constant 0 : index
    %18 = vector.load %arg9[%c0_26, %c0_27, %c0_28, %c0_29] : memref<1x18x18x32xbf16, #tpu.memory_space<vmem>>, vector<1x18x1x32xbf16>
    tpu.vector_store %arg9[%c0_26, %c0_27, %c0_28, %c0_29], %17 {strides = array<i32>} : memref<1x18x18x32xbf16, #tpu.memory_space<vmem>>, vector<1x18x1x32xbf16>,
    %cst_30 = arith.constant 0.000000e+00 : bf16
    %19 = vector.broadcast %cst_30 : bf16 to vector<1x18x1x32xbf16>
    %c0_31 = arith.constant 0 : index
    %c0_32 = arith.constant 0 : index
    %c17_33 = arith.constant 17 : index
    %c0_34 = arith.constant 0 : index
    %20 = vector.load %arg9[%c0_31, %c0_32, %c17_33, %c0_34] : memref<1x18x18x32xbf16, #tpu.memory_space<vmem>>, vector<1x18x1x32xbf16>
    tpu.vector_store %arg9[%c0_31, %c0_32, %c17_33, %c0_34], %19 {strides = array<i32>} : memref<1x18x18x32xbf16, #tpu.memory_space<vmem>>, vector<1x18x1x32xbf16>,
    %cst_35 = arith.constant 0.000000e+00 : bf16
    %21 = vector.broadcast %cst_35 : bf16 to vector<1x1x18x32xbf16>
    %c0_36 = arith.constant 0 : index
    %c0_37 = arith.constant 0 : index
    %c0_38 = arith.constant 0 : index
    %c0_39 = arith.constant 0 : index
    %22 = vector.load %arg10[%c0_36, %c0_37, %c0_38, %c0_39] : memref<1x18x18x32xbf16, #tpu.memory_space<vmem>>, vector<1x1x18x32xbf16>
    tpu.vector_store %arg10[%c0_36, %c0_37, %c0_38, %c0_39], %21 {strides = array<i32>} : memref<1x18x18x32xbf16, #tpu.memory_space<vmem>>, vector<1x1x18x32xbf16>,
    %cst_40 = arith.constant 0.000000e+00 : bf16
    %23 = vector.broadcast %cst_40 : bf16 to vector<1x1x18x32xbf16>
    %c0_41 = arith.constant 0 : index
    %c17_42 = arith.constant 17 : index
    %c0_43 = arith.constant 0 : index
    %c0_44 = arith.constant 0 : index
    %24 = vector.load %arg10[%c0_41, %c17_42, %c0_43, %c0_44] : memref<1x18x18x32xbf16, #tpu.memory_space<vmem>>, vector<1x1x18x32xbf16>
    tpu.vector_store %arg10[%c0_41, %c17_42, %c0_43, %c0_44], %23 {strides = array<i32>} : memref<1x18x18x32xbf16, #tpu.memory_space<vmem>>, vector<1x1x18x32xbf16>,
    %cst_45 = arith.constant 0.000000e+00 : bf16
    %25 = vector.broadcast %cst_45 : bf16 to vector<1x18x1x32xbf16>
    %c0_46 = arith.constant 0 : index
    %c0_47 = arith.constant 0 : index
    %c0_48 = arith.constant 0 : index
    %c0_49 = arith.constant 0 : index
    %26 = vector.load %arg10[%c0_46, %c0_47, %c0_48, %c0_49] : memref<1x18x18x32xbf16, #tpu.memory_space<vmem>>, vector<1x18x1x32xbf16>
    tpu.vector_store %arg10[%c0_46, %c0_47, %c0_48, %c0_49], %25 {strides = array<i32>} : memref<1x18x18x32xbf16, #tpu.memory_space<vmem>>, vector<1x18x1x32xbf16>,
    %cst_50 = arith.constant 0.000000e+00 : bf16
    %27 = vector.broadcast %cst_50 : bf16 to vector<1x18x1x32xbf16>
    %c0_51 = arith.constant 0 : index
    %c0_52 = arith.constant 0 : index
    %c17_53 = arith.constant 17 : index
    %c0_54 = arith.constant 0 : index
    %28 = vector.load %arg10[%c0_51, %c0_52, %c17_53, %c0_54] : memref<1x18x18x32xbf16, #tpu.memory_space<vmem>>, vector<1x18x1x32xbf16>
    tpu.vector_store %arg10[%c0_51, %c0_52, %c17_53, %c0_54], %27 {strides = array<i32>} : memref<1x18x18x32xbf16, #tpu.memory_space<vmem>>, vector<1x18x1x32xbf16>,
    %c0_55 = arith.constant 0 : index
    %c0_56 = arith.constant 0 : index
    %c0_57 = arith.constant 0 : index
    %29 = vector.load %arg1[%c0_55, %c0_56, %c0_57] : memref<1x32x256xf32, #tpu.memory_space<vmem>>, vector<1x32x256xf32>
    %30 = vector.shape_cast %29 : vector<1x32x256xf32> to vector<32x256xf32>
    %31 = tpu.transpose %30, [1, 0] : vector<32x256xf32> -> vector<256x32xf32>
    %32 = vector.broadcast %0 : vector<1x32xf32> to vector<256x32xf32>
    %33 = arith.mulf %31, %32 : vector<256x32xf32>
    %34 = vector.broadcast %1 : vector<1x32xf32> to vector<256x32xf32>
    %35 = arith.addf %33, %34 : vector<256x32xf32>
    %cst_58 = arith.constant 0.000000e+00 : f32
    %36 = vector.broadcast %cst_58 : f32 to vector<256x32xf32>
    %37 = arith.maximumf %35, %36 : vector<256x32xf32>
    %38 = arith.truncf %37 : vector<256x32xf32> to vector<256x32xbf16>
    %39 = vector.shape_cast %38 : vector<256x32xbf16> to vector<1x16x16x32xbf16>
    %c0_59 = arith.constant 0 : index
    %c1_60 = arith.constant 1 : index
    %c1_61 = arith.constant 1 : index
    %c0_62 = arith.constant 0 : index
    %40 = vector.load %arg9[%c0_59, %c1_60, %c1_61, %c0_62] : memref<1x18x18x32xbf16, #tpu.memory_space<vmem>>, vector<1x16x16x32xbf16>
    tpu.vector_store %arg9[%c0_59, %c1_60, %c1_61, %c0_62], %39 {strides = array<i32>} : memref<1x18x18x32xbf16, #tpu.memory_space<vmem>>, vector<1x16x16x32xbf16>,
    %41 = vector.broadcast %2 : vector<1x32xf32> to vector<256x32xf32>
    %42 = arith.mulf %31, %41 : vector<256x32xf32>
    %43 = vector.broadcast %3 : vector<1x32xf32> to vector<256x32xf32>
    %44 = arith.addf %42, %43 : vector<256x32xf32>
    %45 = arith.truncf %44 : vector<256x32xf32> to vector<256x32xbf16>
    %c0_63 = arith.constant 0 : index
    %c0_64 = arith.constant 0 : index
    %c0_65 = arith.constant 0 : index
    %c0_66 = arith.constant 0 : index
    %46 = vector.load %arg9[%c0_63, %c0_64, %c0_65, %c0_66] : memref<1x18x18x32xbf16, #tpu.memory_space<vmem>>, vector<1x16x16x32xbf16>
    %47 = vector.shape_cast %46 : vector<1x16x16x32xbf16> to vector<256x32xbf16>
    %c0_67 = arith.constant 0 : index
    %c0_68 = arith.constant 0 : index
    %c0_69 = arith.constant 0 : index
    %48 = vector.load %arg5[%c0_67, %c0_68, %c0_69] : memref<9x32x32xbf16, #tpu.memory_space<vmem>>, vector<1x32x32xbf16>
    %49 = vector.shape_cast %48 : vector<1x32x32xbf16> to vector<32x32xbf16>
    %cst_70 = arith.constant dense<0.000000e+00> : vector<256x32xf32>
    %50 = tpu.matmul %47, %49, %cst_70 {dimension_numbers = #tpu.dot_dimension_numbers<[1], [0], [0], [1], [0, 0, 1, 1], [], []>} : vector<256x32xbf16>, vector<32x32xbf16>, vector<256x32xf32> -> vector<256x32xf32>
    %c0_71 = arith.constant 0 : index
    %c0_72 = arith.constant 0 : index
    %c1_73 = arith.constant 1 : index
    %c0_74 = arith.constant 0 : index
    %51 = vector.load %arg9[%c0_71, %c0_72, %c1_73, %c0_74] : memref<1x18x18x32xbf16, #tpu.memory_space<vmem>>, vector<1x16x16x32xbf16>
    %52 = vector.shape_cast %51 : vector<1x16x16x32xbf16> to vector<256x32xbf16>
    %c1_75 = arith.constant 1 : index
    %c0_76 = arith.constant 0 : index
    %c0_77 = arith.constant 0 : index
    %53 = vector.load %arg5[%c1_75, %c0_76, %c0_77] : memref<9x32x32xbf16, #tpu.memory_space<vmem>>, vector<1x32x32xbf16>
    %54 = vector.shape_cast %53 : vector<1x32x32xbf16> to vector<32x32xbf16>
    %cst_78 = arith.constant dense<0.000000e+00> : vector<256x32xf32>
    %55 = tpu.matmul %52, %54, %cst_78 {dimension_numbers = #tpu.dot_dimension_numbers<[1], [0], [0], [1], [0, 0, 1, 1], [], []>} : vector<256x32xbf16>, vector<32x32xbf16>, vector<256x32xf32> -> vector<256x32xf32>
    %56 = arith.addf %50, %55 : vector<256x32xf32>
    %c0_79 = arith.constant 0 : index
    %c0_80 = arith.constant 0 : index
    %c2_81 = arith.constant 2 : index
    %c0_82 = arith.constant 0 : index
    %57 = vector.load %arg9[%c0_79, %c0_80, %c2_81, %c0_82] : memref<1x18x18x32xbf16, #tpu.memory_space<vmem>>, vector<1x16x16x32xbf16>
    %58 = vector.shape_cast %57 : vector<1x16x16x32xbf16> to vector<256x32xbf16>
    %c2_83 = arith.constant 2 : index
    %c0_84 = arith.constant 0 : index
    %c0_85 = arith.constant 0 : index
    %59 = vector.load %arg5[%c2_83, %c0_84, %c0_85] : memref<9x32x32xbf16, #tpu.memory_space<vmem>>, vector<1x32x32xbf16>
    %60 = vector.shape_cast %59 : vector<1x32x32xbf16> to vector<32x32xbf16>
    %cst_86 = arith.constant dense<0.000000e+00> : vector<256x32xf32>
    %61 = tpu.matmul %58, %60, %cst_86 {dimension_numbers = #tpu.dot_dimension_numbers<[1], [0], [0], [1], [0, 0, 1, 1], [], []>} : vector<256x32xbf16>, vector<32x32xbf16>, vector<256x32xf32> -> vector<256x32xf32>
    %62 = arith.addf %56, %61 : vector<256x32xf32>
    %c0_87 = arith.constant 0 : index
    %c1_88 = arith.constant 1 : index
    %c0_89 = arith.constant 0 : index
    %c0_90 = arith.constant 0 : index
    %63 = vector.load %arg9[%c0_87, %c1_88, %c0_89, %c0_90] : memref<1x18x18x32xbf16, #tpu.memory_space<vmem>>, vector<1x16x16x32xbf16>
    %64 = vector.shape_cast %63 : vector<1x16x16x32xbf16> to vector<256x32xbf16>
    %c3_91 = arith.constant 3 : index
    %c0_92 = arith.constant 0 : index
    %c0_93 = arith.constant 0 : index
    %65 = vector.load %arg5[%c3_91, %c0_92, %c0_93] : memref<9x32x32xbf16, #tpu.memory_space<vmem>>, vector<1x32x32xbf16>
    %66 = vector.shape_cast %65 : vector<1x32x32xbf16> to vector<32x32xbf16>
    %cst_94 = arith.constant dense<0.000000e+00> : vector<256x32xf32>
    %67 = tpu.matmul %64, %66, %cst_94 {dimension_numbers = #tpu.dot_dimension_numbers<[1], [0], [0], [1], [0, 0, 1, 1], [], []>} : vector<256x32xbf16>, vector<32x32xbf16>, vector<256x32xf32> -> vector<256x32xf32>
    %68 = arith.addf %62, %67 : vector<256x32xf32>
    %c0_95 = arith.constant 0 : index
    %c1_96 = arith.constant 1 : index
    %c1_97 = arith.constant 1 : index
    %c0_98 = arith.constant 0 : index
    %69 = vector.load %arg9[%c0_95, %c1_96, %c1_97, %c0_98] : memref<1x18x18x32xbf16, #tpu.memory_space<vmem>>, vector<1x16x16x32xbf16>
    %70 = vector.shape_cast %69 : vector<1x16x16x32xbf16> to vector<256x32xbf16>
    %c4_99 = arith.constant 4 : index
    %c0_100 = arith.constant 0 : index
    %c0_101 = arith.constant 0 : index
    %71 = vector.load %arg5[%c4_99, %c0_100, %c0_101] : memref<9x32x32xbf16, #tpu.memory_space<vmem>>, vector<1x32x32xbf16>
    %72 = vector.shape_cast %71 : vector<1x32x32xbf16> to vector<32x32xbf16>
    %cst_102 = arith.constant dense<0.000000e+00> : vector<256x32xf32>
    %73 = tpu.matmul %70, %72, %cst_102 {dimension_numbers = #tpu.dot_dimension_numbers<[1], [0], [0], [1], [0, 0, 1, 1], [], []>} : vector<256x32xbf16>, vector<32x32xbf16>, vector<256x32xf32> -> vector<256x32xf32>
    %74 = arith.addf %68, %73 : vector<256x32xf32>
    %c0_103 = arith.constant 0 : index
    %c1_104 = arith.constant 1 : index
    %c2_105 = arith.constant 2 : index
    %c0_106 = arith.constant 0 : index
    %75 = vector.load %arg9[%c0_103, %c1_104, %c2_105, %c0_106] : memref<1x18x18x32xbf16, #tpu.memory_space<vmem>>, vector<1x16x16x32xbf16>
    %76 = vector.shape_cast %75 : vector<1x16x16x32xbf16> to vector<256x32xbf16>
    %c5_107 = arith.constant 5 : index
    %c0_108 = arith.constant 0 : index
    %c0_109 = arith.constant 0 : index
    %77 = vector.load %arg5[%c5_107, %c0_108, %c0_109] : memref<9x32x32xbf16, #tpu.memory_space<vmem>>, vector<1x32x32xbf16>
    %78 = vector.shape_cast %77 : vector<1x32x32xbf16> to vector<32x32xbf16>
    %cst_110 = arith.constant dense<0.000000e+00> : vector<256x32xf32>
    %79 = tpu.matmul %76, %78, %cst_110 {dimension_numbers = #tpu.dot_dimension_numbers<[1], [0], [0], [1], [0, 0, 1, 1], [], []>} : vector<256x32xbf16>, vector<32x32xbf16>, vector<256x32xf32> -> vector<256x32xf32>
    %80 = arith.addf %74, %79 : vector<256x32xf32>
    %c0_111 = arith.constant 0 : index
    %c2_112 = arith.constant 2 : index
    %c0_113 = arith.constant 0 : index
    %c0_114 = arith.constant 0 : index
    %81 = vector.load %arg9[%c0_111, %c2_112, %c0_113, %c0_114] : memref<1x18x18x32xbf16, #tpu.memory_space<vmem>>, vector<1x16x16x32xbf16>
    %82 = vector.shape_cast %81 : vector<1x16x16x32xbf16> to vector<256x32xbf16>
    %c6_115 = arith.constant 6 : index
    %c0_116 = arith.constant 0 : index
    %c0_117 = arith.constant 0 : index
    %83 = vector.load %arg5[%c6_115, %c0_116, %c0_117] : memref<9x32x32xbf16, #tpu.memory_space<vmem>>, vector<1x32x32xbf16>
    %84 = vector.shape_cast %83 : vector<1x32x32xbf16> to vector<32x32xbf16>
    %cst_118 = arith.constant dense<0.000000e+00> : vector<256x32xf32>
    %85 = tpu.matmul %82, %84, %cst_118 {dimension_numbers = #tpu.dot_dimension_numbers<[1], [0], [0], [1], [0, 0, 1, 1], [], []>} : vector<256x32xbf16>, vector<32x32xbf16>, vector<256x32xf32> -> vector<256x32xf32>
    %86 = arith.addf %80, %85 : vector<256x32xf32>
    %c0_119 = arith.constant 0 : index
    %c2_120 = arith.constant 2 : index
    %c1_121 = arith.constant 1 : index
    %c0_122 = arith.constant 0 : index
    %87 = vector.load %arg9[%c0_119, %c2_120, %c1_121, %c0_122] : memref<1x18x18x32xbf16, #tpu.memory_space<vmem>>, vector<1x16x16x32xbf16>
    %88 = vector.shape_cast %87 : vector<1x16x16x32xbf16> to vector<256x32xbf16>
    %c7 = arith.constant 7 : index
    %c0_123 = arith.constant 0 : index
    %c0_124 = arith.constant 0 : index
    %89 = vector.load %arg5[%c7, %c0_123, %c0_124] : memref<9x32x32xbf16, #tpu.memory_space<vmem>>, vector<1x32x32xbf16>
    %90 = vector.shape_cast %89 : vector<1x32x32xbf16> to vector<32x32xbf16>
    %cst_125 = arith.constant dense<0.000000e+00> : vector<256x32xf32>
    %91 = tpu.matmul %88, %90, %cst_125 {dimension_numbers = #tpu.dot_dimension_numbers<[1], [0], [0], [1], [0, 0, 1, 1], [], []>} : vector<256x32xbf16>, vector<32x32xbf16>, vector<256x32xf32> -> vector<256x32xf32>
    %92 = arith.addf %86, %91 : vector<256x32xf32>
    %c0_126 = arith.constant 0 : index
    %c2_127 = arith.constant 2 : index
    %c2_128 = arith.constant 2 : index
    %c0_129 = arith.constant 0 : index
    %93 = vector.load %arg9[%c0_126, %c2_127, %c2_128, %c0_129] : memref<1x18x18x32xbf16, #tpu.memory_space<vmem>>, vector<1x16x16x32xbf16>
    %94 = vector.shape_cast %93 : vector<1x16x16x32xbf16> to vector<256x32xbf16>
    %c8 = arith.constant 8 : index
    %c0_130 = arith.constant 0 : index
    %c0_131 = arith.constant 0 : index
    %95 = vector.load %arg5[%c8, %c0_130, %c0_131] : memref<9x32x32xbf16, #tpu.memory_space<vmem>>, vector<1x32x32xbf16>
    %96 = vector.shape_cast %95 : vector<1x32x32xbf16> to vector<32x32xbf16>
    %cst_132 = arith.constant dense<0.000000e+00> : vector<256x32xf32>
    %97 = tpu.matmul %94, %96, %cst_132 {dimension_numbers = #tpu.dot_dimension_numbers<[1], [0], [0], [1], [0, 0, 1, 1], [], []>} : vector<256x32xbf16>, vector<32x32xbf16>, vector<256x32xf32> -> vector<256x32xf32>
    %98 = arith.addf %92, %97 : vector<256x32xf32>
    %99 = vector.broadcast %4 : vector<1x32xf32> to vector<256x32xf32>
    %100 = arith.mulf %98, %99 : vector<256x32xf32>
    %101 = vector.broadcast %5 : vector<1x32xf32> to vector<256x32xf32>
    %102 = arith.addf %100, %101 : vector<256x32xf32>
    %cst_133 = arith.constant 0.000000e+00 : f32
    %103 = vector.broadcast %cst_133 : f32 to vector<256x32xf32>
    %104 = arith.maximumf %102, %103 : vector<256x32xf32>
    %105 = arith.truncf %104 : vector<256x32xf32> to vector<256x32xbf16>
    %106 = vector.shape_cast %105 : vector<256x32xbf16> to vector<1x16x16x32xbf16>
    %c0_134 = arith.constant 0 : index
    %c1_135 = arith.constant 1 : index
    %c1_136 = arith.constant 1 : index
    %c0_137 = arith.constant 0 : index
    %107 = vector.load %arg10[%c0_134, %c1_135, %c1_136, %c0_137] : memref<1x18x18x32xbf16, #tpu.memory_space<vmem>>, vector<1x16x16x32xbf16>
    tpu.vector_store %arg10[%c0_134, %c1_135, %c1_136, %c0_137], %106 {strides = array<i32>} : memref<1x18x18x32xbf16, #tpu.memory_space<vmem>>, vector<1x16x16x32xbf16>,
    %c0_138 = arith.constant 0 : index
    %c0_139 = arith.constant 0 : index
    %c0_140 = arith.constant 0 : index
    %c0_141 = arith.constant 0 : index
    %108 = vector.load %arg10[%c0_138, %c0_139, %c0_140, %c0_141] : memref<1x18x18x32xbf16, #tpu.memory_space<vmem>>, vector<1x16x16x32xbf16>
    %109 = vector.shape_cast %108 : vector<1x16x16x32xbf16> to vector<256x32xbf16>
    %c0_142 = arith.constant 0 : index
    %c0_143 = arith.constant 0 : index
    %c0_144 = arith.constant 0 : index
    %110 = vector.load %arg6[%c0_142, %c0_143, %c0_144] : memref<9x32x32xbf16, #tpu.memory_space<vmem>>, vector<1x32x32xbf16>
    %111 = vector.shape_cast %110 : vector<1x32x32xbf16> to vector<32x32xbf16>
    %cst_145 = arith.constant dense<0.000000e+00> : vector<256x32xf32>
    %112 = tpu.matmul %109, %111, %cst_145 {dimension_numbers = #tpu.dot_dimension_numbers<[1], [0], [0], [1], [0, 0, 1, 1], [], []>} : vector<256x32xbf16>, vector<32x32xbf16>, vector<256x32xf32> -> vector<256x32xf32>
    %c0_146 = arith.constant 0 : index
    %c0_147 = arith.constant 0 : index
    %c1_148 = arith.constant 1 : index
    %c0_149 = arith.constant 0 : index
    %113 = vector.load %arg10[%c0_146, %c0_147, %c1_148, %c0_149] : memref<1x18x18x32xbf16, #tpu.memory_space<vmem>>, vector<1x16x16x32xbf16>
    %114 = vector.shape_cast %113 : vector<1x16x16x32xbf16> to vector<256x32xbf16>
    %c1_150 = arith.constant 1 : index
    %c0_151 = arith.constant 0 : index
    %c0_152 = arith.constant 0 : index
    %115 = vector.load %arg6[%c1_150, %c0_151, %c0_152] : memref<9x32x32xbf16, #tpu.memory_space<vmem>>, vector<1x32x32xbf16>
    %116 = vector.shape_cast %115 : vector<1x32x32xbf16> to vector<32x32xbf16>
    %cst_153 = arith.constant dense<0.000000e+00> : vector<256x32xf32>
    %117 = tpu.matmul %114, %116, %cst_153 {dimension_numbers = #tpu.dot_dimension_numbers<[1], [0], [0], [1], [0, 0, 1, 1], [], []>} : vector<256x32xbf16>, vector<32x32xbf16>, vector<256x32xf32> -> vector<256x32xf32>
    %118 = arith.addf %112, %117 : vector<256x32xf32>
    %c0_154 = arith.constant 0 : index
    %c0_155 = arith.constant 0 : index
    %c2_156 = arith.constant 2 : index
    %c0_157 = arith.constant 0 : index
    %119 = vector.load %arg10[%c0_154, %c0_155, %c2_156, %c0_157] : memref<1x18x18x32xbf16, #tpu.memory_space<vmem>>, vector<1x16x16x32xbf16>
    %120 = vector.shape_cast %119 : vector<1x16x16x32xbf16> to vector<256x32xbf16>
    %c2_158 = arith.constant 2 : index
    %c0_159 = arith.constant 0 : index
    %c0_160 = arith.constant 0 : index
    %121 = vector.load %arg6[%c2_158, %c0_159, %c0_160] : memref<9x32x32xbf16, #tpu.memory_space<vmem>>, vector<1x32x32xbf16>
    %122 = vector.shape_cast %121 : vector<1x32x32xbf16> to vector<32x32xbf16>
    %cst_161 = arith.constant dense<0.000000e+00> : vector<256x32xf32>
    %123 = tpu.matmul %120, %122, %cst_161 {dimension_numbers = #tpu.dot_dimension_numbers<[1], [0], [0], [1], [0, 0, 1, 1], [], []>} : vector<256x32xbf16>, vector<32x32xbf16>, vector<256x32xf32> -> vector<256x32xf32>
    %124 = arith.addf %118, %123 : vector<256x32xf32>
    %c0_162 = arith.constant 0 : index
    %c1_163 = arith.constant 1 : index
    %c0_164 = arith.constant 0 : index
    %c0_165 = arith.constant 0 : index
    %125 = vector.load %arg10[%c0_162, %c1_163, %c0_164, %c0_165] : memref<1x18x18x32xbf16, #tpu.memory_space<vmem>>, vector<1x16x16x32xbf16>
    %126 = vector.shape_cast %125 : vector<1x16x16x32xbf16> to vector<256x32xbf16>
    %c3_166 = arith.constant 3 : index
    %c0_167 = arith.constant 0 : index
    %c0_168 = arith.constant 0 : index
    %127 = vector.load %arg6[%c3_166, %c0_167, %c0_168] : memref<9x32x32xbf16, #tpu.memory_space<vmem>>, vector<1x32x32xbf16>
    %128 = vector.shape_cast %127 : vector<1x32x32xbf16> to vector<32x32xbf16>
    %cst_169 = arith.constant dense<0.000000e+00> : vector<256x32xf32>
    %129 = tpu.matmul %126, %128, %cst_169 {dimension_numbers = #tpu.dot_dimension_numbers<[1], [0], [0], [1], [0, 0, 1, 1], [], []>} : vector<256x32xbf16>, vector<32x32xbf16>, vector<256x32xf32> -> vector<256x32xf32>
    %130 = arith.addf %124, %129 : vector<256x32xf32>
    %c0_170 = arith.constant 0 : index
    %c1_171 = arith.constant 1 : index
    %c1_172 = arith.constant 1 : index
    %c0_173 = arith.constant 0 : index
    %131 = vector.load %arg10[%c0_170, %c1_171, %c1_172, %c0_173] : memref<1x18x18x32xbf16, #tpu.memory_space<vmem>>, vector<1x16x16x32xbf16>
    %132 = vector.shape_cast %131 : vector<1x16x16x32xbf16> to vector<256x32xbf16>
    %c4_174 = arith.constant 4 : index
    %c0_175 = arith.constant 0 : index
    %c0_176 = arith.constant 0 : index
    %133 = vector.load %arg6[%c4_174, %c0_175, %c0_176] : memref<9x32x32xbf16, #tpu.memory_space<vmem>>, vector<1x32x32xbf16>
    %134 = vector.shape_cast %133 : vector<1x32x32xbf16> to vector<32x32xbf16>
    %cst_177 = arith.constant dense<0.000000e+00> : vector<256x32xf32>
    %135 = tpu.matmul %132, %134, %cst_177 {dimension_numbers = #tpu.dot_dimension_numbers<[1], [0], [0], [1], [0, 0, 1, 1], [], []>} : vector<256x32xbf16>, vector<32x32xbf16>, vector<256x32xf32> -> vector<256x32xf32>
    %136 = arith.addf %130, %135 : vector<256x32xf32>
    %c0_178 = arith.constant 0 : index
    %c1_179 = arith.constant 1 : index
    %c2_180 = arith.constant 2 : index
    %c0_181 = arith.constant 0 : index
    %137 = vector.load %arg10[%c0_178, %c1_179, %c2_180, %c0_181] : memref<1x18x18x32xbf16, #tpu.memory_space<vmem>>, vector<1x16x16x32xbf16>
    %138 = vector.shape_cast %137 : vector<1x16x16x32xbf16> to vector<256x32xbf16>
    %c5_182 = arith.constant 5 : index
    %c0_183 = arith.constant 0 : index
    %c0_184 = arith.constant 0 : index
    %139 = vector.load %arg6[%c5_182, %c0_183, %c0_184] : memref<9x32x32xbf16, #tpu.memory_space<vmem>>, vector<1x32x32xbf16>
    %140 = vector.shape_cast %139 : vector<1x32x32xbf16> to vector<32x32xbf16>
    %cst_185 = arith.constant dense<0.000000e+00> : vector<256x32xf32>
    %141 = tpu.matmul %138, %140, %cst_185 {dimension_numbers = #tpu.dot_dimension_numbers<[1], [0], [0], [1], [0, 0, 1, 1], [], []>} : vector<256x32xbf16>, vector<32x32xbf16>, vector<256x32xf32> -> vector<256x32xf32>
    %142 = arith.addf %136, %141 : vector<256x32xf32>
    %c0_186 = arith.constant 0 : index
    %c2_187 = arith.constant 2 : index
    %c0_188 = arith.constant 0 : index
    %c0_189 = arith.constant 0 : index
    %143 = vector.load %arg10[%c0_186, %c2_187, %c0_188, %c0_189] : memref<1x18x18x32xbf16, #tpu.memory_space<vmem>>, vector<1x16x16x32xbf16>
    %144 = vector.shape_cast %143 : vector<1x16x16x32xbf16> to vector<256x32xbf16>
    %c6_190 = arith.constant 6 : index
    %c0_191 = arith.constant 0 : index
    %c0_192 = arith.constant 0 : index
    %145 = vector.load %arg6[%c6_190, %c0_191, %c0_192] : memref<9x32x32xbf16, #tpu.memory_space<vmem>>, vector<1x32x32xbf16>
    %146 = vector.shape_cast %145 : vector<1x32x32xbf16> to vector<32x32xbf16>
    %cst_193 = arith.constant dense<0.000000e+00> : vector<256x32xf32>
    %147 = tpu.matmul %144, %146, %cst_193 {dimension_numbers = #tpu.dot_dimension_numbers<[1], [0], [0], [1], [0, 0, 1, 1], [], []>} : vector<256x32xbf16>, vector<32x32xbf16>, vector<256x32xf32> -> vector<256x32xf32>
    %148 = arith.addf %142, %147 : vector<256x32xf32>
    %c0_194 = arith.constant 0 : index
    %c2_195 = arith.constant 2 : index
    %c1_196 = arith.constant 1 : index
    %c0_197 = arith.constant 0 : index
    %149 = vector.load %arg10[%c0_194, %c2_195, %c1_196, %c0_197] : memref<1x18x18x32xbf16, #tpu.memory_space<vmem>>, vector<1x16x16x32xbf16>
    %150 = vector.shape_cast %149 : vector<1x16x16x32xbf16> to vector<256x32xbf16>
    %c7_198 = arith.constant 7 : index
    %c0_199 = arith.constant 0 : index
    %c0_200 = arith.constant 0 : index
    %151 = vector.load %arg6[%c7_198, %c0_199, %c0_200] : memref<9x32x32xbf16, #tpu.memory_space<vmem>>, vector<1x32x32xbf16>
    %152 = vector.shape_cast %151 : vector<1x32x32xbf16> to vector<32x32xbf16>
    %cst_201 = arith.constant dense<0.000000e+00> : vector<256x32xf32>
    %153 = tpu.matmul %150, %152, %cst_201 {dimension_numbers = #tpu.dot_dimension_numbers<[1], [0], [0], [1], [0, 0, 1, 1], [], []>} : vector<256x32xbf16>, vector<32x32xbf16>, vector<256x32xf32> -> vector<256x32xf32>
    %154 = arith.addf %148, %153 : vector<256x32xf32>
    %c0_202 = arith.constant 0 : index
    %c2_203 = arith.constant 2 : index
    %c2_204 = arith.constant 2 : index
    %c0_205 = arith.constant 0 : index
    %155 = vector.load %arg10[%c0_202, %c2_203, %c2_204, %c0_205] : memref<1x18x18x32xbf16, #tpu.memory_space<vmem>>, vector<1x16x16x32xbf16>
    %156 = vector.shape_cast %155 : vector<1x16x16x32xbf16> to vector<256x32xbf16>
    %c8_206 = arith.constant 8 : index
    %c0_207 = arith.constant 0 : index
    %c0_208 = arith.constant 0 : index
    %157 = vector.load %arg6[%c8_206, %c0_207, %c0_208] : memref<9x32x32xbf16, #tpu.memory_space<vmem>>, vector<1x32x32xbf16>
    %158 = vector.shape_cast %157 : vector<1x32x32xbf16> to vector<32x32xbf16>
    %cst_209 = arith.constant dense<0.000000e+00> : vector<256x32xf32>
    %159 = tpu.matmul %156, %158, %cst_209 {dimension_numbers = #tpu.dot_dimension_numbers<[1], [0], [0], [1], [0, 0, 1, 1], [], []>} : vector<256x32xbf16>, vector<32x32xbf16>, vector<256x32xf32> -> vector<256x32xf32>
    %160 = arith.addf %154, %159 : vector<256x32xf32>
    %c0_210 = arith.constant 0 : index
    %c0_211 = arith.constant 0 : index
    %161 = vector.load %arg7[%c0_210, %c0_211] : memref<32x32xbf16, #tpu.memory_space<vmem>>, vector<32x32xbf16>
    %cst_212 = arith.constant dense<0.000000e+00> : vector<256x32xf32>
    %162 = tpu.matmul %45, %161, %cst_212 {dimension_numbers = #tpu.dot_dimension_numbers<[1], [0], [0], [1], [0, 0, 1, 1], [], []>} : vector<256x32xbf16>, vector<32x32xbf16>, vector<256x32xf32> -> vector<256x32xf32>
    %163 = arith.addf %160, %162 : vector<256x32xf32>
    %cst_213 = arith.constant 0.000000e+00 : f32
    %164 = vector.broadcast %cst_213 : f32 to vector<256x32xf32>
    %165 = arith.maximumf %163, %164 : vector<256x32xf32>
    %166 = tpu.transpose %165, [1, 0] : vector<256x32xf32> -> vector<32x256xf32>
    %cst_214 = arith.constant dense<0.000000e+00> : vector<32xf32>
    %167 = vector.multi_reduction <add>, %166, %cst_214 [1] : vector<32x256xf32> to vector<32xf32>
    %168 = vector.shape_cast %167 : vector<32xf32> to vector<32x1xf32>
    %cst_215 = arith.constant 2.560000e+02 : f32
    %169 = vector.broadcast %cst_215 : f32 to vector<32x1xf32>
    %170 = arith.divf %168, %169 : vector<32x1xf32>
    %171 = vector.broadcast %170 : vector<32x1xf32> to vector<32x2xf32>
    %172 = arith.mulf %10, %171 : vector<32x2xf32>
    %cst_216 = arith.constant dense<0.000000e+00> : vector<2xf32>
    %173 = vector.multi_reduction <add>, %172, %cst_216 [0] : vector<32x2xf32> to vector<2xf32>
    %174 = vector.shape_cast %173 : vector<2xf32> to vector<1x2xf32>
    %175 = arith.addf %174, %6 : vector<1x2xf32>
    %cst_217 = arith.constant 0.000000e+00 : f32
    %176 = vector.broadcast %cst_217 : f32 to vector<1x2xf32>
    %177 = arith.maximumf %175, %176 : vector<1x2xf32>
    %178 = vector.broadcast %177 : vector<1x2xf32> to vector<32x2xf32>
    %179 = arith.mulf %12, %178 : vector<32x2xf32>
    %cst_218 = arith.constant dense<0.000000e+00> : vector<32xf32>
    %180 = vector.multi_reduction <add>, %179, %cst_218 [1] : vector<32x2xf32> to vector<32xf32>
    %181 = vector.shape_cast %180 : vector<32xf32> to vector<32x1xf32>
    %182 = arith.addf %181, %8 : vector<32x1xf32>
    %183 = arith.negf %182 : vector<32x1xf32>
    %184 = math.exp %183 : vector<32x1xf32>
    %cst_219 = arith.constant 1.000000e+00 : f32
    %185 = vector.broadcast %cst_219 : f32 to vector<32x1xf32>
    %186 = arith.addf %185, %184 : vector<32x1xf32>
    %187 = arith.divf %185, %186 : vector<32x1xf32>
    %188 = vector.broadcast %7 : vector<32x1xf32> to vector<32x256xf32>
    %189 = arith.mulf %166, %188 : vector<32x256xf32>
    %cst_220 = arith.constant dense<0.000000e+00> : vector<256xf32>
    %190 = vector.multi_reduction <add>, %189, %cst_220 [0] : vector<32x256xf32> to vector<256xf32>
    %191 = vector.shape_cast %190 : vector<256xf32> to vector<1x256xf32>
    %192 = arith.negf %191 : vector<1x256xf32>
    %193 = math.exp %192 : vector<1x256xf32>
    %cst_221 = arith.constant 1.000000e+00 : f32
    %194 = vector.broadcast %cst_221 : f32 to vector<1x256xf32>
    %195 = arith.addf %194, %193 : vector<1x256xf32>
    %196 = arith.divf %194, %195 : vector<1x256xf32>
    %197 = vector.broadcast %196 : vector<1x256xf32> to vector<32x256xf32>
    %198 = vector.broadcast %187 : vector<32x1xf32> to vector<32x256xf32>
    %199 = arith.addf %197, %198 : vector<32x256xf32>
    %200 = arith.mulf %199, %166 : vector<32x256xf32>
    %c0_222 = arith.constant 0 : index
    %c0_223 = arith.constant 0 : index
    %c0_224 = arith.constant 0 : index
    %201 = vector.load %arg8[%c0_222, %c0_223, %c0_224] : memref<1x32x256xf32, #tpu.memory_space<vmem>>, vector<1x32x256xf32>
    %202 = vector.shape_cast %201 : vector<1x32x256xf32> to vector<32x256xf32>
    %203 = vector.shape_cast %200 : vector<32x256xf32> to vector<1x32x256xf32>
    tpu.vector_store %arg8[%c0_222, %c0_223, %c0_224], %203 {strides = array<i32>} : memref<1x32x256xf32, #tpu.memory_space<vmem>>, vector<1x32x256xf32>,
    return
  }
  func.func @transform_0(%arg0: i32) -> (i32, i32, i32) {
    %c0_i32 = arith.constant 0 : i32
    %c0_i32_0 = arith.constant 0 : i32
    %c0_i32_1 = arith.constant 0 : i32
    return %arg0, %c0_i32, %c0_i32_0 : i32, i32, i32
  }
  func.func @transform_1(%arg0: i32) -> (i32, i32) {
    %c0_i32 = arith.constant 0 : i32
    %c0_i32_0 = arith.constant 0 : i32
    %c0_i32_1 = arith.constant 0 : i32
    return %c0_i32, %c0_i32_0 : i32, i32
  }
  func.func @transform_2(%arg0: i32) -> (i32, i32) {
    %c0_i32 = arith.constant 0 : i32
    %c0_i32_0 = arith.constant 0 : i32
    %c0_i32_1 = arith.constant 0 : i32
    return %c0_i32, %c0_i32_0 : i32, i32
  }
  func.func @transform_3(%arg0: i32) -> (i32, i32, i32) {
    %c0_i32 = arith.constant 0 : i32
    %c0_i32_0 = arith.constant 0 : i32
    %c0_i32_1 = arith.constant 0 : i32
    %c0_i32_2 = arith.constant 0 : i32
    return %c0_i32, %c0_i32_0, %c0_i32_1 : i32, i32, i32
  }
  func.func @transform_4(%arg0: i32) -> (i32, i32, i32) {
    %c0_i32 = arith.constant 0 : i32
    %c0_i32_0 = arith.constant 0 : i32
    %c0_i32_1 = arith.constant 0 : i32
    %c0_i32_2 = arith.constant 0 : i32
    return %c0_i32, %c0_i32_0, %c0_i32_1 : i32, i32, i32
  }
  func.func @transform_5(%arg0: i32) -> (i32, i32, i32) {
    %c0_i32 = arith.constant 0 : i32
    %c0_i32_0 = arith.constant 0 : i32
    %c0_i32_1 = arith.constant 0 : i32
    %c0_i32_2 = arith.constant 0 : i32
    return %c0_i32, %c0_i32_0, %c0_i32_1 : i32, i32, i32
  }
  func.func @transform_6(%arg0: i32) -> (i32, i32) {
    %c0_i32 = arith.constant 0 : i32
    %c0_i32_0 = arith.constant 0 : i32
    %c0_i32_1 = arith.constant 0 : i32
    return %c0_i32, %c0_i32_0 : i32, i32
  }
  func.func @transform_7(%arg0: i32) -> (i32, i32, i32) {
    %c0_i32 = arith.constant 0 : i32
    %c0_i32_0 = arith.constant 0 : i32
    %c0_i32_1 = arith.constant 0 : i32
    return %arg0, %c0_i32, %c0_i32_0 : i32, i32, i32
  }
}

</mosaic_0001>

<bundles_post_ra>
// kernel: tpu_custom_call.1
= control target key start
LH: loop header
LB: loop body
LE: loop exit
PB: predicated region body
PF: predicated region fallthrough
CT: control target
= control target key end

     0   :  { %s19878_s0 = inlined_call_operand.hbm [shape: f32[2,32,256], index: 0, kind: input, shape index: {}]   ;;  %s19879_s1 = inlined_call_operand.vmem [shape: f32[8,32], index: 1, kind: input, shape index: {}]   ;;  %s19880_s2 = inlined_call_operand.vmem [shape: f32[32,8], index: 2, kind: input, shape index: {}]   ;;  %s19881_s3 = inlined_call_operand.vmem [shape: f32[2,32,2], index: 3, kind: input, shape index: {}]   ;;  %s19882_s4 = inlined_call_operand.hbm [shape: bf16[9,32,32], index: 4, kind: input, shape index: {}]   ;;  %s19883_s5 = inlined_call_operand.hbm [shape: bf16[9,32,32], index: 5, kind: input, shape index: {}]   ;;  %s19884_s6 = inlined_call_operand.vmem [shape: bf16[32,32], index: 6, kind: input, shape index: {}]   ;;  %s19885_s7 = inlined_call_operand.hbm [shape: f32[2,32,256], index: 7, kind: output, shape index: {}]  }
   0x1   :  { %19977 = sst [smem:[#allocation101_spill]] %s19882_s4 }
   0x2   :  { %12 = vsyncpa [#allocation5], 0 }
   0x3   :  { %14 = vsyncpa [#allocation5 + $0x1], 0 }
   0x4   :  { %15 = vsyncpa [#allocation8], 0 }
   0x5   :  { %16 = vsyncpa [#allocation6], 0 }
   0x6   :  { %18 = vsyncpa [#allocation6 + $0x1], 0  ;;  %s14377_s24 = smov 0   ;;  %s14379_s25 = smov 0  }
   0x7   :  { %s14381_s26 = smov 0   ;;  %s14383_s27 = smov 0  }
   0x8 LB: > { %s14398_s28 = sadd.s32 4294967295, %s14323_s27   ;;  %s11983_s29 = sadd.s32 4294967294, %s14323_s27   ;;  %s14323_s27 = sphi %s14383_s27, %s20454_s27   ;;  %s14319_s26 = sphi %s14381_s26, %s20453_s26   ;;  %s14315_s25 = sphi %s14379_s25, %s20452_s25   ;;  %s14311_s24 = sphi %s14377_s24, %s20451_s24  }
   0x9   : > { %p44_p0 = scmp.ne.s32.totalorder %s14315_s25, %s14311_s24  ;;  %p19886_p1 = scmp.eq.s32.totalorder %s14398_s28, 0 }
   0xa   : > { %p200_p3 = scmp.eq.s32.totalorder %s11983_s29, 1  ;;  %p11984_p5 = scmp.ge.s32.totalorder %s14323_s27, 1 }
   0xb   : > { %p14407_p4 = por %p19886_p1, %p44_p0  ;;  %p207_p7 = scmp.lt.s32.totalorder %s14323_s27, 3 }
   0xc   : > { %p14412_p6 = por %p200_p3, %p44_p0  ;;  %s14325_s10 = smov [#allocation7]  }
   0xd   : > { %s19978_s30 = scalar_select %p14407_p4, 1, 0 }
   0xe   : > { %s19979_s8 = scalar_select %p14412_p6, 1, 0 }
   0xf   : > { %p14417_p8 = pnand %p11984_p5, %p207_p7  ;;  %s228_s11 = sshll.u32 %s14325_s10, 4  ;;  %s229_s11 = int_to_ptr.vmem [resolvable:$true] %s228_s11 }
  0x10   : > { %s14326_s13 = smov [#allocation9]   ;;  %s14186_s15 = scalar_lea.vmem %s229_s11, 2304 }
  0x11   : > { %s19980_s9 = scalar_select %p14417_p8, 1, 0 }
  0x12   : > { %p13915_p9 = pneg %p14417_p8  ;;  %s241_s14 = sshll.u32 %s14326_s13, 4  ;;  %s242_s14 = int_to_ptr.vmem [resolvable:$true] %s241_s14 }
  0x13   : > { %p14187_p13 = scmp.ne.s32.totalorder %s229_s11, %s14186_s15  ;;  %p14194_p5 = scmp.lt.s32.totalorder %s229_s11, %s229_s11 }
  0x14   : > { %p14426_p11 = pnand %p13915_p9, %p19886_p1  ;;  %p14195_p7 = scmp.lt.s32.totalorder %s14186_s15, %s14186_s15 }
  0x16   : > { %p14177_p12 = pneg %p14426_p11  ;;  %p14196_p10 = por %p14195_p7, %p14194_p5 }
  0x18   : > { %p14189_p0 = pnand %p14187_p13, %p14177_p12 }
  0x1a   : > { %p14190_p3 = pneg %p14189_p0 }
  0x1c   : > { %p14197_p9 = pnand %p14196_p10, %p14190_p3 }
  0x1e   : > { %14200 = shalt.err (!%p14197_p9)
}
  0x1f   : > { %s14327_s16 = smov 64   ;;  %s14328_s17 = smov 4  }
  0x20   : > { %s19982_s4 = sld [smem:[#allocation101_spill]]  ;;  %s14212_s20 = scalar_lea.vmem %s242_s14, 2304 }
  0x21   : > { %p14213_p1 = scmp.ne.s32.totalorder %s242_s14, %s14212_s20  ;;  %p14220_p2 = scmp.lt.s32.totalorder %s242_s14, %s242_s14 }
  0x22   : > { %p14221_p6 = scmp.lt.s32.totalorder %s14212_s20, %s14212_s20 }
  0x23   : > { %p14215_p13 = pnand %p14213_p1, %p14177_p12 }
  0x24   : > { %p14222_p5 = por %p14221_p6, %p14220_p2 }
  0x25   : > { %p14216_p0 = pneg %p14215_p13 }
  0x26   : > { %13918 = dma.hbm_to_vmem [thread:$0]  (!%p14426_p11), %s19982_s4, 2304, %s229_s11, [#allocation8], %s14327_s16, %s14327_s16, %s14328_s17  }
  0x27   : > { %p14223_p10 = pnand %p14222_p5, %p14216_p0 }
  0x29   : > { %14226 = shalt.err (!%p14223_p10)
}
  0x2a   : > { %13921 = dma.hbm_to_vmem [thread:$0]  (!%p14426_p11), %s19883_s5, 2304, %s242_s14, [#allocation8], %s14327_s16, %s14327_s16, %s14328_s17  }
  0x2b   : > { %s14449_s23 = sadd.s32 1, %s14323_s27   ;;  %s31_s29 = sadd.s32 1, %s14319_s26 }
  0x2c   : > { %s28_s10 = ssub.s32 %s14323_s27, %s14449_s23  ;;  %p38_p1 = scmp.ne.s32.totalorder %s14319_s26, %s14315_s25 }
  0x2d   : > { %p29_p2 = scmp.eq.s32.totalorder %s28_s10, 0  ;;  %p39_p6 = scmp.eq.s32.totalorder %s14323_s27, 0 }
  0x2e   : > { %p19983_p12 = scmp.eq.s32.totalorder %s14398_s28, 1  ;;  %p13932_p7 = scmp.lt.s32.totalorder %s14323_s27, 2 }
  0x2f   : > { %s14465_s12 = scalar_select %p29_p2, %s14319_s26, %s31_s29  }
  0x30   : > { %p14459_p3 = por %p19983_p12, %p38_p1  ;;  %p40_p9 = por %p39_p6, %p38_p1 }
  0x31   : > { %s258_s13 = sand.u32 1, %s14319_s26   ;;  %s12807_s14 = sshll.u32 %s14323_s27, 10 }
  0x32   : > { %s19984_s11 = scalar_select %p14459_p3, 1, 0 }
  0x33   : > { %s11988_s15 = sshll.u32 %s258_s13, 6  ;;  %s14472_s18 = scalar_lea.hbm %s19878_s0, %s12807_s14 }
  0x34   : > { %s262_s19 = scalar_lea.vmem [#allocation4], %s11988_s15  ;;  %p14476_p11 = pnand %p13932_p7, %p40_p9 }
  0x35   : > { %s269_s20 = sshll.u32 %s262_s19, 4  ;;  %s14480_s22 = scalar_lea.sflag [#allocation5], %s258_s13  ;;  %s14474_s20 = int_to_ptr.vmem [resolvable:$true] %s269_s20 }
  0x36   : > { %s14227_s29 = scalar_lea.hbm %s14472_s18, 1024  ;;  %p14229_p0 = pneg %p14476_p11 }
  0x37   : > { %p14228_p13 = scmp.ne.s32.totalorder %s14472_s18, %s14227_s29  ;;  %s14232_s15 = scalar_lea.hbm %s19878_s0, 2048 }
  0x38   : > { %p14233_p1 = scmp.lt.s32.totalorder %s14472_s18, %s19878_s0  ;;  %p14234_p2 = scmp.lt.s32.totalorder %s14232_s15, %s14227_s29 }
  0x39   : > { %p14230_p5 = pnand %p14229_p0, %p14228_p13 }
  0x3a   : > { %p14235_p6 = por %p14234_p2, %p14233_p1 }
  0x3b   : > { %p14231_p10 = pneg %p14230_p5 }
  0x3d   : > { %p14236_p12 = pnand %p14235_p6, %p14231_p10 }
  0x3f   : > { %14239 = shalt.err (!%p14236_p12)
}
  0x40   : > { %s14240_s13 = scalar_lea.vmem %s14474_s20, 1024  ;;  %s14329_s19 = smov [#allocation4]  }
  0x41   : > { %p14241_p7 = scmp.ne.s32.totalorder %s14474_s20, %s14240_s13  ;;  %s14245_s4 = sshll.u32 %s14329_s19, 4  ;;  %s14246_s4 = int_to_ptr.vmem [resolvable:$false] %s14245_s4 }
  0x42   : > { %s14247_s10 = scalar_lea.vmem %s14246_s4, 2048  ;;  %p14248_p5 = scmp.lt.s32.totalorder %s14474_s20, %s14246_s4 }
  0x43   : > { %p14243_p9 = pnand %p14241_p7, %p14229_p0  ;;  %p14249_p3 = scmp.lt.s32.totalorder %s14247_s10, %s14240_s13 }
  0x45   : > { %p14244_p13 = pneg %p14243_p9  ;;  %p14250_p4 = por %p14249_p3, %p14248_p5 }
  0x47   : > { %p14251_p8 = pnand %p14250_p4, %p14244_p13 }
  0x49   : > { %14254 = shalt.err (!%p14251_p8)
}
  0x4a   : > { %s14330_s29 = smov 256   ;;  %s14331_s14 = smov 16  }
  0x4b   : > { %13925 = dma.hbm_to_vmem [thread:$0]  (!%p14476_p11), %s14472_s18, 1024, %s14474_s20, %s14480_s22, %s14330_s29, %s14330_s29, %s14331_s14  }
  0x4c   : > { %p19986_p0 = scmp.ne.s32.totalorder %s19980_s9, 0 }
  0x4e   : > { %281 = sbr.rel (%p19986_p0) target bundleno = 2052 (0x804), region = 48 }
  0x53   : > { %s14504_s15 = sand.u32 1, %s14315_s25   ;;  %p19987_p4 = scmp.ne.s32.totalorder %s19978_s30, 0 }
  0x54   : > { %s11992_s4 = sshll.u32 %s14504_s15, 6  ;;  %s284_s16 = scalar_lea.sflag [#allocation5], %s14504_s15 }
  0x55   : > { %s14510_s17 = scalar_lea.vmem [#allocation4], %s11992_s4 }
  0x56   : > { %14298 = dma.done.wait (%p19987_p4), %s284_s16, 1024  }
  0x57   : > { %14300 = vsyncadd (%p19987_p4), %s284_s16, 4294966272  ;;  %p19988_p8 = scmp.eq.s32.totalorder %s14398_s28, 0 }
  0x59   : > { %14302 = dma.done.wait (%p19988_p8), [#allocation8], 4608   ;;  %p19989_p3 = pmov %p19988_p8 }
  0x5a   : > { %vm350_vm0 = vcmask 253952   ;;  %vm357_vm1 = vsmask.f32 256  ;;  %v584_v0 = vld [vmem:[%s14510_s17] sm:$0xff]  ;;  %v585_v1 = vld [vmem:[%s14510_s17 + $0x8] sm:$0xff]  ;;  %v586_v2 = vld [vmem:[%s14510_s17 + $0x10] sm:$0xff] }
  0x5b   : > { %14304 = vsyncadd (%p19989_p3), [#allocation8], 4294962688  ;;  %592 = vxpose.xlu0.b32.start [1/4] (short) %v584_v0, 128  ;;  %624 = vxpose.xlu1.b32.start [1/4] (short) %v585_v1, 128  ;;  %v19990_v3 = vmov 0  ;;  %v587_v4 = vld [vmem:[%s14510_s17 + $0x18] sm:$0xff]  ;;  %vm347_vm3 = vcmask 257024   ;;  %v588_v5 = vld [vmem:[%s14510_s17 + $0x20] sm:$0xff] }
  0x5c   : > { %vm14525_vm2 = vmand %vm350_vm0, %vm357_vm1  ;;  %vm413_vm4 = vsmask.f32 7938  ;;  %v362_v6 = vld [vmem:[#allocation2 + $0xc] sm:$0x1]  ;;  %v589_v7 = vld [vmem:[%s14510_s17 + $0x28] sm:$0xff]  ;;  %v19993_v9 = vmov 0 }
  0x5d   : > { %v19991_v3 = vsel %vm14525_vm2, 4294967295, %v19990_v3  ;;  %v363_v8 = vsel %vm14525_vm2, 0, %v362_v6  ;;  %vm14536_vm5 = vmand %vm350_vm0, %vm413_vm4  ;;  %v418_v10 = vld [vmem:[#allocation2 + $0x14] sm:$0x1]  ;;  %v590_v12 = vld [vmem:[%s14510_s17 + $0x30] sm:$0xff]  ;;  %v19890_v13 = vmov 0  }
  0x5e   : > { %19992 = vst [vmem:[#allocation14_spill] sm:$0xff] %v19991_v3  ;;  %364 = vst [vmem:[#allocation2 + $0xc] sm:$0x1] %v363_v8  ;;  %v19994_v9 = vsel %vm14536_vm5, 4294967295, %v19993_v9  ;;  %v419_v11 = vsel %vm14536_vm5, 0, %v418_v10  ;;  %v591_v15 = vld [vmem:[%s14510_s17 + $0x38] sm:$0xff] }
  0x5f   : > { %593 = vxpose.xlu0.b32.cont [2/4] (short) %v586_v2, 128  ;;  %625 = vxpose.xlu1.b32.cont [2/4] (short) %v587_v4, 128  ;;  %19995 = vst [vmem:[#allocation15_spill] sm:$0xff] %v19994_v9  ;;  %420 = vst [vmem:[#allocation2 + $0x14] sm:$0x1] %v419_v11  ;;  %v365_v14 = vld [vmem:[#allocation2 + $0x18] sm:$0x1]  ;;  %v13983_v34 = vld [vmem:[#allocation7 + $0x18] sm:$0xff]  }
  0x60   : > { %348 = vst.msk [vmem:[#allocation2] sm:$0xf] %vm347_vm3, %v19890_v13  ;;  %349 = vst.msk [vmem:[#allocation2 + $0x4] sm:$0xf] %vm347_vm3, %v19890_v13  ;;  %v366_v16 = vsel %vm14525_vm2, 0, %v365_v14  ;;  %13215 = vmatprep.subr.bf16.mxu0 %v13983_v34  ;;  %13899 = vmatprep.subr.bf16.mxu1 %v13983_v34  ;;  %v13984_v44 = vld [vmem:[#allocation7 + $0x10] sm:$0xff]  }
  0x61   : > { %351 = vst.msk [vmem:[#allocation2 + $0x8] sm:$0x1] %vm350_vm0, %v19890_v13  ;;  %355 = vst.msk [vmem:[#allocation2 + $0xd4] sm:$0x1] %vm350_vm0, %v19890_v13  ;;  %v421_v17 = vld [vmem:[#allocation2 + $0x20] sm:$0x1]  ;;  %13216 = vmatpush3.bf16.msra.mxu0 %v13983_v34  ;;  %13901 = vmatpush3.bf16.msra.mxu1 %v13983_v34 }
  0x62   : > { %353 = vst.msk [vmem:[#allocation2 + $0xcc] sm:$0xf] %vm347_vm3, %v19890_v13  ;;  %354 = vst.msk [vmem:[#allocation2 + $0xd0] sm:$0xf] %vm347_vm3, %v19890_v13  ;;  %v422_v19 = vsel %vm14536_vm5, 0, %v421_v17  ;;  %13217 = vmatprep.subr.bf16.mxu0 %v13984_v44  ;;  %13900 = vmatprep.subr.bf16.mxu1 %v13984_v44  ;;  %vm1885_vm9 = vcmask 261120  }
  0x63   : > { %469 = vst.msk [vmem:[#allocation3] sm:$0xf] %vm347_vm3, %v19890_v13  ;;  %470 = vst.msk [vmem:[#allocation3 + $0x4] sm:$0xf] %vm347_vm3, %v19890_v13  ;;  %594 = vxpose.xlu0.b32.cont [3/4] (short) %v588_v5, 128  ;;  %626 = vxpose.xlu1.b32.cont [3/4] (short) %v589_v7, 128  ;;  %v368_v21 = vld [vmem:[#allocation2 + $0x24] sm:$0x1] }
  0x64   : > { %471 = vst.msk [vmem:[#allocation3 + $0x8] sm:$0x1] %vm350_vm0, %v19890_v13  ;;  %475 = vst.msk [vmem:[#allocation3 + $0xd4] sm:$0x1] %vm350_vm0, %v19890_v13  ;;  %v369_v23 = vsel %vm14525_vm2, 0, %v368_v21  ;;  %vm2444_vm13 = vcmask 1042432  }
  0x65   : > { %473 = vst.msk [vmem:[#allocation3 + $0xcc] sm:$0xf] %vm347_vm3, %v19890_v13  ;;  %474 = vst.msk [vmem:[#allocation3 + $0xd0] sm:$0xf] %vm347_vm3, %v19890_v13  ;;  %v424_v25 = vld [vmem:[#allocation2 + $0x2c] sm:$0x1]  ;;  %13218 = vmatpush3.bf16.msra.mxu0 %v13984_v44  ;;  %13902 = vmatpush3.bf16.msra.mxu1 %v13984_v44 }
  0x66   : > { %367 = vst [vmem:[#allocation2 + $0x18] sm:$0x1] %v366_v16  ;;  %423 = vst [vmem:[#allocation2 + $0x20] sm:$0x1] %v422_v19  ;;  %v425_v26 = vsel %vm14536_vm5, 0, %v424_v25  ;;  %vm2445_vm14 = vcmask 1046532  }
  0x67   : > { %595 = vxpose.xlu0.b32.end [4/4] (short) %v590_v12, 128  ;;  %627 = vxpose.xlu1.b32.end [4/4] (short) %v591_v15, 128  ;;  %v359_v18 = vld [vmem:[#allocation2] sm:$0x1]  ;;  %370 = vst [vmem:[#allocation2 + $0x24] sm:$0x1] %v369_v23  ;;  %426 = vst [vmem:[#allocation2 + $0x2c] sm:$0x1] %v425_v26 }
  0x68   : > { %v360_v20 = vsel %vm14525_vm2, 0, %v359_v18  ;;  %v415_v22 = vld [vmem:[#allocation2 + $0x8] sm:$0x1]  ;;  %v1382_v28 = vld [vmem:[#allocation2 + $0x4] sm:$0xf]  ;;  %vm14691_vm10 = vmand %vm347_vm3, %vm413_vm4  ;;  %vm11711_vm0 = vcmask 15360  }
  0x69   : > { %361 = vst [vmem:[#allocation2] sm:$0x1] %v360_v20  ;;  %v416_v24 = vsel %vm14536_vm5, 0, %v415_v22  ;;  %v1446_v31 = vshll.u32 %v1382_v28, 16  ;;  %v1450_v32 = vshrl.u32 %v1382_v28, 16  ;;  %vm15104_vm15 = vmor %vm2444_vm13, %vm2445_vm14  ;;  %s325_s14 = scalar_lea.vmem [#allocation10], %s11992_s4 }
  0x6a   : > { %417 = vst [vmem:[#allocation2 + $0x8] sm:$0x1] %v416_v24  ;;  %v371_v33 = vld [vmem:[#allocation2 + $0x30] sm:$0x1]  ;;  %vm1433_vm6 = vsmask.f32 3328 }
  0x6b   : > { %v372_v37 = vsel %vm14525_vm2, 0, %v371_v33  ;;  %v1448_v39 = vrot.slane %v1446_v31, 5  ;;  %vm1434_vm7 = vsmask.f32 7440  ;;  %v1452_v41 = vrot.slane %v1450_v32, 4  ;;  %s12872_s16 = sshll.u32 %s14398_s28, 10 }
  0x6c   : > { %373 = vst [vmem:[#allocation2 + $0x30] sm:$0x1] %v372_v37  ;;  %v427_v43 = vld [vmem:[#allocation2 + $0x38] sm:$0x1]  ;;  %v386_v47 = vld [vmem:[#allocation2 + $0x6c] sm:$0x1]  ;;  %vm14584_vm8 = vmor %vm1433_vm6, %vm1434_vm7  ;;  %s19831_s9 = scalar_lea.hbm %s19885_s7, %s12872_s16 }
  0x6d   : > { %v1453_v46 = vor.u32 %v1452_v41, %v1448_v39  ;;  %v428_v48 = vsel %vm14536_vm5, 0, %v427_v43  ;;  %v387_v51 = vsel %vm14525_vm2, 0, %v386_v47  ;;  %v442_v54 = vld [vmem:[#allocation2 + $0x74] sm:$0x1]  ;;  %v374_v56 = vld [vmem:[#allocation2 + $0x3c] sm:$0x1] }
  0x6e   : > { %429 = vst [vmem:[#allocation2 + $0x38] sm:$0x1] %v428_v48  ;;  %388 = vst [vmem:[#allocation2 + $0x6c] sm:$0x1] %v387_v51  ;;  %v443_v55 = vsel %vm14536_vm5, 0, %v442_v54  ;;  %v375_v58 = vsel %vm14525_vm2, 0, %v374_v56 }
  0x6f   : > { %v1454_v53 = vrot.slane %v1453_v46, 4  ;;  %444 = vst [vmem:[#allocation2 + $0x74] sm:$0x1] %v443_v55  ;;  %376 = vst [vmem:[#allocation2 + $0x3c] sm:$0x1] %v375_v58  ;;  %s11891_s4 = sshll.u32 %s325_s14, 4  ;;  %s19833_s4 = int_to_ptr.vmem [resolvable:$true] %s11891_s4 }
  0x70   : > { %v1381_v27 = vld [vmem:[#allocation2] sm:$0xf]  ;;  %v430_v60 = vld [vmem:[#allocation2 + $0x44] sm:$0x1]  ;;  %v389_v61 = vld [vmem:[#allocation2 + $0x78] sm:$0x1] }
  0x71   : > { %v1437_v29 = vshrl.u32 %v1381_v27, 16  ;;  %v1440_v30 = vshll.u32 %v1381_v27, 16  ;;  %v1417_v38 = vld [vmem:[#allocation2 + $0x8] sm:$0x1]  ;;  %v431_v62 = vsel %vm14536_vm5, 0, %v430_v60  ;;  %v390_v63 = vsel %vm14525_vm2, 0, %v389_v61 }
  0x72   : > { %v1456_v42 = vshll.u32 %v1417_v38, 16  ;;  %432 = vst [vmem:[#allocation2 + $0x44] sm:$0x1] %v431_v62  ;;  %391 = vst [vmem:[#allocation2 + $0x78] sm:$0x1] %v390_v63  ;;  %s11878_s28 = scalar_lea.sflag [#allocation6], %s14504_s15 }
  0x73   : > { %v1439_v35 = vrot.slane %v1437_v29, 4  ;;  %v1442_v36 = vrot.slane %v1440_v30, 5  ;;  %v445_v0 = vld [vmem:[#allocation2 + $0x80] sm:$0x1]  ;;  %v377_v2 = vld [vmem:[#allocation2 + $0x48] sm:$0x1] }
  0x74   : > { %v1458_v50 = vrot.slane %v1456_v42, 5  ;;  %v446_v1 = vsel %vm14536_vm5, 0, %v445_v0  ;;  %v378_v4 = vsel %vm14525_vm2, 0, %v377_v2  ;;  %v392_v5 = vld [vmem:[#allocation2 + $0x84] sm:$0x1]  ;;  %s14255_s18 = scalar_lea.vmem %s19833_s4, 1024 }
  0x75   : > { %v1443_v40 = vor.u32 %v1442_v36, %v1439_v35  ;;  %447 = vst [vmem:[#allocation2 + $0x80] sm:$0x1] %v446_v1  ;;  %379 = vst [vmem:[#allocation2 + $0x48] sm:$0x1] %v378_v4  ;;  %v393_v6 = vsel %vm14525_vm2, 0, %v392_v5  ;;  %p14256_p11 = scmp.ne.s32.totalorder %s19833_s4, %s14255_s18  ;;  %p20448_p10 = scmp.ne.s32.totalorder %s19984_s11, 0 }
  0x76   : > { %v1459_v57 = vsel %vm14584_vm8, %v1454_v53, %v1458_v50  ;;  %394 = vst [vmem:[#allocation2 + $0x84] sm:$0x1] %v393_v6  ;;  %v433_v7 = vld [vmem:[#allocation2 + $0x50] sm:$0x1]  ;;  %v448_v10 = vld [vmem:[#allocation2 + $0x8c] sm:$0x1] }
  0x77   : > { %v1444_v45 = vrot.slane %v1443_v40, 4  ;;  %v434_v8 = vsel %vm14536_vm5, 0, %v433_v7  ;;  %v449_v11 = vsel %vm14536_vm5, 0, %v448_v10  ;;  %v380_v12 = vld [vmem:[#allocation2 + $0x54] sm:$0x1]  ;;  %p14257_p1 = pnand %p14256_p11, %p20448_p10  ;;  %s14334_s20 = smov [#allocation10]  }
  0x78   : > { %435 = vst [vmem:[#allocation2 + $0x50] sm:$0x1] %v434_v8  ;;  %450 = vst [vmem:[#allocation2 + $0x8c] sm:$0x1] %v449_v11  ;;  %v381_v14 = vsel %vm14525_vm2, 0, %v380_v12  ;;  %s14259_s21 = sshll.u32 %s14334_s20, 4  ;;  %s14260_s21 = int_to_ptr.vmem [resolvable:$false] %s14259_s21 }
  0x79   : > { %v1449_v52 = vsel %vm14584_vm8, %v1444_v45, %v1448_v39  ;;  %382 = vst [vmem:[#allocation2 + $0x54] sm:$0x1] %v381_v14  ;;  %v395_v15 = vld [vmem:[#allocation2 + $0x90] sm:$0x1]  ;;  %v436_v17 = vld [vmem:[#allocation2 + $0x5c] sm:$0x1]  ;;  %p14258_p2 = pneg %p14257_p1  ;;  %p14262_p6 = scmp.lt.s32.totalorder %s19833_s4, %s14260_s21 }
  0x7a   : > { %v12036_v59 = vcombine.low %v1449_v52, %v1459_v57  ;;  %v396_v16 = vsel %vm14525_vm2, 0, %v395_v15  ;;  %v437_v18 = vsel %vm14536_vm5, 0, %v436_v17  ;;  %v451_v19 = vld [vmem:[#allocation2 + $0x98] sm:$0x1]  ;;  %v383_v21 = vld [vmem:[#allocation2 + $0x60] sm:$0x1] }
  0x7b   : > { %397 = vst [vmem:[#allocation2 + $0x90] sm:$0x1] %v396_v16  ;;  %438 = vst [vmem:[#allocation2 + $0x5c] sm:$0x1] %v437_v18  ;;  %v452_v20 = vsel %vm14536_vm5, 0, %v451_v19  ;;  %v384_v22 = vsel %vm14525_vm2, 0, %v383_v21 }
  0x7c   : > { %13219 = vmatprep.mubr.msk.bf16.mxu0 %vm1885_vm9, %v12036_v59  ;;  %453 = vst [vmem:[#allocation2 + $0x98] sm:$0x1] %v452_v20  ;;  %385 = vst [vmem:[#allocation2 + $0x60] sm:$0x1] %v384_v22  ;;  %v398_v23 = vld [vmem:[#allocation2 + $0x9c] sm:$0x1] }
  0x7d   : > { %v399_v24 = vsel %vm14525_vm2, 0, %v398_v23  ;;  %v439_v25 = vld [vmem:[#allocation2 + $0x68] sm:$0x1]  ;;  %v454_v27 = vld [vmem:[#allocation2 + $0xa4] sm:$0x1]  ;;  %v14685_v14 = vld [vmem:[#allocation7 + $0x28] sm:$0xff]  }
  0x7e   : > { %400 = vst [vmem:[#allocation2 + $0x9c] sm:$0x1] %v399_v24  ;;  %v440_v26 = vsel %vm14536_vm5, 0, %v439_v25  ;;  %v455_v28 = vsel %vm14536_vm5, 0, %v454_v27  ;;  %v401_v29 = vld [vmem:[#allocation2 + $0xa8] sm:$0x1]  ;;  %13287 = vmatprep.subr.bf16.mxu0 %v14685_v14 }
  0x7f   : > { %441 = vst [vmem:[#allocation2 + $0x68] sm:$0x1] %v440_v26  ;;  %456 = vst [vmem:[#allocation2 + $0xa4] sm:$0x1] %v455_v28  ;;  %v402_v30 = vsel %vm14525_vm2, 0, %v401_v29  ;;  %v20002_v19 = vmov 0 }
  0x80   : > { %403 = vst [vmem:[#allocation2 + $0xa8] sm:$0x1] %v402_v30  ;;  %v457_v31 = vld [vmem:[#allocation2 + $0xb0] sm:$0x1]  ;;  %v404_v33 = vld [vmem:[#allocation2 + $0xb4] sm:$0x1] }
  0x81   : > { %v458_v32 = vsel %vm14536_vm5, 0, %v457_v31  ;;  %v405_v34 = vsel %vm14525_vm2, 0, %v404_v33  ;;  %v14638_v35 = vld [vmem:[%s19879_s1] ss:$0 sm:$0xff]  ;;  %v460_v36 = vld [vmem:[#allocation2 + $0xbc] sm:$0x1] }
  0x82   : > { %459 = vst [vmem:[#allocation2 + $0xb0] sm:$0x1] %v458_v32  ;;  %406 = vst [vmem:[#allocation2 + $0xb4] sm:$0x1] %v405_v34  ;;  %v14643_v37 = vld [vmem:[%s19879_s1 + $0x2] ss:$0 sm:$0xff] }
  0x83   : > { %v461_v38 = vsel %vm14536_vm5, 0, %v460_v36  ;;  %v14650_v40 = vld [vmem:[%s19879_s1 + $0x1] ss:$0 sm:$0xff]  ;;  %v14658_v45 = vld [vmem:[%s19879_s1 + $0x3] ss:$0 sm:$0xff]  ;;  %v20003_v19 = vsel %vm14691_vm10, 4294967295, %v20002_v19 }
  0x84   : > { %462 = vst [vmem:[#allocation2 + $0xbc] sm:$0x1] %v461_v38  ;;  %20004 = vst [vmem:[#allocation20_spill] sm:$0xff] %v20003_v19  ;;  %v1181_v20 = vld [vmem:[#allocation2 + $0xc] sm:$0xf]  ;;  %s14261_s22 = scalar_lea.vmem %s14260_s21, 2048 }
  0x85   : > { %vm856_vm11 = vsmask.f32 4368  ;;  %v1237_v29 = vld [vmem:[#allocation2 + $0x6c] sm:$0xf]  ;;  %p14263_p12 = scmp.lt.s32.totalorder %s14261_s22, %s14255_s18 }
  0x86   : > { %vm14713_vm12 = vmor %vm357_vm1, %vm856_vm11 }
  0x87   : > { %p14264_p7 = por %p14263_p12, %p14262_p6 }
  0x89   : > { %p14265_p9 = pnand %p14264_p7, %p14258_p2 }
  0xd7   : > { %v608_v39 = vpop.trf.xlu0  ;;  %v640_v42 = vpop.trf.xlu1 }
  0xd8   : > { %v660_v41 = vmul.f32 %v14638_v35, %v608_v39  ;;  %v1297_v43 = vmul.f32 %v14643_v37, %v608_v39  ;;  %v676_v44 = vmul.f32 %v14638_v35, %v640_v42  ;;  %v1313_v47 = vmul.f32 %v14643_v37, %v640_v42  ;;  %v13987_v42 = vld [vmem:[#allocation7 + $0x8] sm:$0xff]  }
  0xd9   : > { %13251 = vmatprep.subr.bf16.mxu1 %v13987_v42 }
  0xda   : > { %v696_v46 = vadd.f32 %v14650_v40, %v660_v41  ;;  %v712_v50 = vadd.f32 %v14650_v40, %v676_v44  ;;  %v14666_v55 = vadd.f32 %v14658_v45, %v1297_v43  ;;  %v14675_v62 = vadd.f32 %v14658_v45, %v1313_v47  ;;  %v1185_v44 = vld [vmem:[#allocation2 + $0x14] sm:$0x1] }
  0xdb   : > { %v609_v48 = vpop.trf.xlu0  ;;  %v641_v54 = vpop.trf.xlu1  ;;  %v20006_v43 = vmov 0 }
  0xdc   : > { %v728_v51 = vmax.f32 %v696_v46, 0.0  ;;  %v661_v52 = vmul.f32 %v14638_v35, %v609_v48  ;;  %v1298_v53 = vmul.f32 %v14643_v37, %v609_v48  ;;  %19998 = vst [vmem:[#allocation16_spill] sm:$0xff] %v14666_v55  ;;  %v744_v56 = vmax.f32 %v712_v50, 0.0  ;;  %20000 = vst [vmem:[#allocation18_spill] sm:$0xff] %v14675_v62 }
  0xdd   : > { %v677_v57 = vmul.f32 %v14638_v35, %v641_v54  ;;  %v1314_v58 = vmul.f32 %v14643_v37, %v641_v54  ;;  %v20007_v43 = vsel %vm14713_vm12, 4294967295, %v20006_v43 }
  0xde   : > { %v12808_v59 = vpack.c.bf16 %v728_v51, %v728_v51  ;;  %v697_v60 = vadd.f32 %v14650_v40, %v661_v52  ;;  %v14672_v61 = vadd.f32 %v14658_v45, %v1298_v53  ;;  %v12824_v0 = vpack.c.bf16 %v744_v56, %v744_v56  ;;  %20008 = vst [vmem:[#allocation22_spill] sm:$0xff] %v20007_v43 }
  0xdf   : > { %v610_v63 = vpop.trf.xlu0  ;;  %v713_v1 = vadd.f32 %v14650_v40, %v677_v57  ;;  %v14679_v2 = vadd.f32 %v14658_v45, %v1314_v58  ;;  %v14701_v25 = vpop.trf.xlu1 }
  0xe0   : > { %19999 = vst [vmem:[#allocation17_spill] sm:$0xff] %v14672_v61  ;;  %v859_v4 = vshrl.u32 %v12808_v59, 16  ;;  %v862_v5 = vshll.u32 %v12808_v59, 16  ;;  %v729_v6 = vmax.f32 %v697_v60, 0.0  ;;  %v662_v8 = vmul.f32 %v14638_v35, %v610_v63 }
  0xe1   : > { %20001 = vst [vmem:[#allocation19_spill] sm:$0xff] %v14679_v2  ;;  %v1299_v10 = vmul.f32 %v14643_v37, %v610_v63  ;;  %v995_v11 = vshrl.u32 %v12824_v0, 16  ;;  %v998_v12 = vshll.u32 %v12824_v0, 16  ;;  %v745_v17 = vmax.f32 %v713_v1, 0.0 }
  0xe2   : > { %v861_v15 = vrot.slane %v859_v4, 7  ;;  %v12809_v16 = vpack.c.bf16 %v729_v6, %v729_v6  ;;  %v698_v21 = vadd.f32 %v14650_v40, %v662_v8  ;;  %v678_v30 = vmul.f32 %v14638_v35, %v14701_v25 }
  0xe3   : > { %v14697_v22 = vadd.f32 %v14658_v45, %v1299_v10  ;;  %v611_v23 = vpop.trf.xlu0  ;;  %v14699_v24 = vrot.slane %v995_v11, 7  ;;  %v12825_v41 = vpack.c.bf16 %v745_v17, %v745_v17 }
  0xe4   : > { %v864_v26 = vor.u32 %v862_v5, %v861_v15  ;;  %v865_v27 = vrot.slane %v861_v15, 4  ;;  %v867_v28 = vshrl.u32 %v12809_v16, 16  ;;  %v730_v31 = vmax.f32 %v698_v21, 0.0 }
  0xe5   : > { %20005 = vst [vmem:[#allocation21_spill] sm:$0xff] %v14697_v22  ;;  %v663_v32 = vmul.f32 %v14638_v35, %v611_v23  ;;  %v1300_v33 = vmul.f32 %v14643_v37, %v611_v23  ;;  %v1000_v34 = vor.u32 %v998_v12, %v14699_v24  ;;  %v870_v39 = vshll.u32 %v12809_v16, 16  ;;  %v1188_v12 = vld [vmem:[#allocation2 + $0x18] sm:$0xf] }
  0xe6   : > { %v1182_v36 = vsel %vm14691_vm10, %v864_v26, %v1181_v20  ;;  %v869_v38 = vrot.slane %v867_v28, 7  ;;  %v12810_v46 = vpack.c.bf16 %v730_v31, %v730_v31  ;;  %v1001_v60 = vrot.slane %v14699_v24, 4 }
  0xe7   : > { %1183 = vst [vmem:[#allocation2 + $0xc] sm:$0xf] %v1182_v36  ;;  %v699_v47 = vadd.f32 %v14650_v40, %v663_v32  ;;  %v14719_v48 = vadd.f32 %v14658_v45, %v1300_v33  ;;  %v612_v50 = vpop.trf.xlu0  ;;  %v1238_v51 = vsel %vm14691_vm10, %v1000_v34, %v1237_v29  ;;  %v1003_v11 = vshrl.u32 %v12825_v41, 16 }
  0xe8   : > { %v872_v52 = vor.u32 %v870_v39, %v869_v38  ;;  %v874_v53 = vrot.slane %v869_v38, 4  ;;  %v664_v54 = vmul.f32 %v14638_v35, %v612_v50  ;;  %v1301_v56 = vmul.f32 %v14643_v37, %v612_v50  ;;  %1239 = vst [vmem:[#allocation2 + $0x6c] sm:$0xf] %v1238_v51 }
  0xe9   : > { %20009 = vst [vmem:[#allocation23_spill] sm:$0xff] %v14719_v48  ;;  %v876_v57 = vshrl.u32 %v12810_v46, 16  ;;  %v731_v58 = vmax.f32 %v699_v47, 0.0  ;;  %v879_v1 = vshll.u32 %v12810_v46, 16  ;;  %v714_v20 = vadd.f32 %v14650_v40, %v678_v30 }
  0xea   : > { %v873_v63 = vsel %vm14713_vm12, %v865_v27, %v872_v52  ;;  %v1186_v0 = vsel %vm14525_vm2, %v874_v53, %v1185_v44  ;;  %v700_v4 = vadd.f32 %v14650_v40, %v664_v54  ;;  %v14735_v8 = vadd.f32 %v14658_v45, %v1301_v56  ;;  %v1192_v27 = vld [vmem:[#allocation2 + $0x20] sm:$0x1] }
  0xeb   : > { %1184 = vst.msk [vmem:[#allocation2 + $0x10] sm:$0xf] %vm347_vm3, %v873_v63  ;;  %1187 = vst [vmem:[#allocation2 + $0x14] sm:$0x1] %v1186_v0  ;;  %v878_v5 = vrot.slane %v876_v57, 7  ;;  %v12811_v6 = vpack.c.bf16 %v731_v58, %v731_v58  ;;  %v613_v10 = vpop.trf.xlu0  ;;  %v1006_v26 = vshll.u32 %v12825_v41, 16 }
  0xec   : > { %20010 = vst [vmem:[#allocation24_spill] sm:$0xff] %v14735_v8  ;;  %v732_v15 = vmax.f32 %v700_v4, 0.0  ;;  %v665_v16 = vmul.f32 %v14638_v35, %v613_v10  ;;  %v1302_v17 = vmul.f32 %v14643_v37, %v613_v10  ;;  %v1005_v32 = vrot.slane %v1003_v11, 7  ;;  %v1195_v63 = vld [vmem:[#allocation2 + $0x24] sm:$0xf] }
  0xed   : > { %v881_v21 = vor.u32 %v879_v1, %v878_v5  ;;  %v882_v23 = vrot.slane %v878_v5, 4  ;;  %v884_v24 = vshrl.u32 %v12811_v6, 16  ;;  %v887_v36 = vshll.u32 %v12811_v6, 16  ;;  %v1241_v4 = vld [vmem:[#allocation2 + $0x74] sm:$0x1] }
  0xee   : > { %v12812_v28 = vpack.c.bf16 %v732_v15, %v732_v15  ;;  %v701_v29 = vadd.f32 %v14650_v40, %v665_v16  ;;  %v14742_v31 = vadd.f32 %v14658_v45, %v1302_v17  ;;  %v746_v39 = vmax.f32 %v714_v20, 0.0 }
  0xef   : > { %v1189_v33 = vsel %vm14691_vm10, %v881_v21, %v1188_v12  ;;  %v886_v34 = vrot.slane %v884_v24, 7  ;;  %v614_v38 = vpop.trf.xlu0  ;;  %v1008_v54 = vor.u32 %v1006_v26, %v1005_v32  ;;  %v1010_v56 = vrot.slane %v1005_v32, 4  ;;  %v1199_v26 = vld [vmem:[#allocation2 + $0x2c] sm:$0x1] }
  0xf0   : > { %20011 = vst [vmem:[#allocation25_spill] sm:$0xff] %v14742_v31  ;;  %1190 = vst [vmem:[#allocation2 + $0x18] sm:$0xf] %v1189_v33  ;;  %v893_v30 = vshrl.u32 %v12812_v28, 16  ;;  %v896_v42 = vshll.u32 %v12812_v28, 16  ;;  %v733_v44 = vmax.f32 %v701_v29, 0.0  ;;  %v666_v50 = vmul.f32 %v14638_v35, %v614_v38 }
  0xf1   : > { %v889_v46 = vor.u32 %v887_v36, %v886_v34  ;;  %v891_v47 = vrot.slane %v886_v34, 4  ;;  %v1303_v51 = vmul.f32 %v14643_v37, %v614_v38  ;;  %v1315_v5 = vmul.f32 %v14643_v37, %v14701_v25 }
  0xf2   : > { %v895_v52 = vrot.slane %v893_v30, 7  ;;  %v12813_v53 = vpack.c.bf16 %v733_v44, %v733_v44  ;;  %v702_v0 = vadd.f32 %v14650_v40, %v666_v50  ;;  %v1009_v20 = vsel %vm14713_vm12, %v1001_v60, %v1008_v54 }
  0xf3   : > { %v890_v57 = vsel %vm14713_vm12, %v882_v23, %v889_v46  ;;  %v1193_v58 = vsel %vm14525_vm2, %v891_v47, %v1192_v27  ;;  %v615_v1 = vpop.trf.xlu0  ;;  %v14759_v12 = vadd.f32 %v14658_v45, %v1303_v51  ;;  %1240 = vst.msk [vmem:[#allocation2 + $0x70] sm:$0xf] %vm347_vm3, %v1009_v20  ;;  %v1242_v24 = vsel %vm14525_vm2, %v1010_v56, %v1241_v4  ;;  %v643_v47 = vpop.trf.xlu1 }
  0xf4   : > { %1191 = vst.msk [vmem:[#allocation2 + $0x1c] sm:$0xf] %vm347_vm3, %v890_v57  ;;  %1194 = vst [vmem:[#allocation2 + $0x20] sm:$0x1] %v1193_v58  ;;  %v898_v6 = vor.u32 %v896_v42, %v895_v52  ;;  %v899_v10 = vrot.slane %v895_v52, 4  ;;  %v901_v11 = vshrl.u32 %v12813_v53, 16  ;;  %v667_v16 = vmul.f32 %v14638_v35, %v615_v1 }
  0xf5   : > { %20012 = vst [vmem:[#allocation26_spill] sm:$0xff] %v14759_v12  ;;  %v734_v15 = vmax.f32 %v702_v0, 0.0  ;;  %v1304_v17 = vmul.f32 %v14643_v37, %v615_v1  ;;  %v904_v23 = vshll.u32 %v12813_v53, 16  ;;  %1243 = vst [vmem:[#allocation2 + $0x74] sm:$0x1] %v1242_v24  ;;  %v12826_v32 = vpack.c.bf16 %v746_v39, %v746_v39 }
  0xf6   : > { %v1196_v25 = vsel %vm14691_vm10, %v898_v6, %v1195_v63  ;;  %v903_v21 = vrot.slane %v901_v11, 7  ;;  %v703_v28 = vadd.f32 %v14650_v40, %v667_v16  ;;  %v14776_v38 = vadd.f32 %v14658_v45, %v1315_v5  ;;  %v1202_v63 = vld [vmem:[#allocation2 + $0x30] sm:$0xf]  ;;  %v1206_v16 = vld [vmem:[#allocation2 + $0x38] sm:$0x1] }
  0xf7   : > { %1197 = vst [vmem:[#allocation2 + $0x24] sm:$0xf] %v1196_v25  ;;  %v12814_v27 = vpack.c.bf16 %v734_v15, %v734_v15  ;;  %v14772_v29 = vadd.f32 %v14658_v45, %v1304_v17  ;;  %v616_v60 = vpop.trf.xlu0  ;;  %v1012_v56 = vshrl.u32 %v12826_v32, 16  ;;  %v1015_v57 = vshll.u32 %v12826_v32, 16  ;;  %v1244_v25 = vld [vmem:[#allocation2 + $0x78] sm:$0xf] }
  0xf8   : > { %v906_v33 = vor.u32 %v904_v23, %v903_v21  ;;  %v908_v34 = vrot.slane %v903_v21, 4  ;;  %v668_v36 = vmul.f32 %v14638_v35, %v616_v60  ;;  %20014 = vst [vmem:[#allocation28_spill] sm:$0xff] %v14776_v38  ;;  %v735_v42 = vmax.f32 %v703_v28, 0.0 }
  0xf9   : > { %20013 = vst [vmem:[#allocation27_spill] sm:$0xff] %v14772_v29  ;;  %v910_v30 = vshrl.u32 %v12814_v27, 16  ;;  %v1305_v46 = vmul.f32 %v14643_v37, %v616_v60  ;;  %v913_v51 = vshll.u32 %v12814_v27, 16  ;;  %v679_v5 = vmul.f32 %v14638_v35, %v643_v47  ;;  %v1383_v60 = vld [vmem:[#allocation2 + $0xc] sm:$0xf] }
  0xfa   : > { %v907_v50 = vsel %vm14713_vm12, %v899_v10, %v906_v33  ;;  %v1200_v39 = vsel %vm14525_vm2, %v908_v34, %v1199_v26  ;;  %v704_v52 = vadd.f32 %v14650_v40, %v668_v36  ;;  %v12815_v54 = vpack.c.bf16 %v735_v42, %v735_v42 }
  0xfb   : > { %1198 = vst.msk [vmem:[#allocation2 + $0x28] sm:$0xf] %vm347_vm3, %v907_v50  ;;  %1201 = vst [vmem:[#allocation2 + $0x2c] sm:$0x1] %v1200_v39  ;;  %v912_v53 = vrot.slane %v910_v30, 7  ;;  %v617_v58 = vpop.trf.xlu0  ;;  %v14791_v15 = vadd.f32 %v14658_v45, %v1305_v46  ;;  %v14793_v20 = vrot.slane %v1012_v56, 7  ;;  %v715_v27 = vadd.f32 %v14650_v40, %v679_v5 }
  0xfc   : > { %v736_v0 = vmax.f32 %v704_v52, 0.0  ;;  %v669_v1 = vmul.f32 %v14638_v35, %v617_v58  ;;  %v1306_v4 = vmul.f32 %v14643_v37, %v617_v58  ;;  %v918_v10 = vshrl.u32 %v12815_v54, 16  ;;  %v14820_v5 = vld [vmem:[#allocation2 + $0x14] sm:$0x1]  ;;  %v14880_v50 = vld [vmem:[#allocation7 + $0x48] sm:$0xff]  }
  0xfd   : > { %v915_v6 = vor.u32 %v913_v51, %v912_v53  ;;  %v921_v11 = vshll.u32 %v12815_v54, 16  ;;  %20015 = vst [vmem:[#allocation29_spill] sm:$0xff] %v14791_v15  ;;  %v1316_v28 = vmul.f32 %v14643_v37, %v643_v47  ;;  %v916_v32 = vrot.slane %v912_v53, 4  ;;  %v1209_v51 = vld [vmem:[#allocation2 + $0x3c] sm:$0xf] }
  0xfe   : > { %v12816_v17 = vpack.c.bf16 %v736_v0, %v736_v0  ;;  %v705_v21 = vadd.f32 %v14650_v40, %v669_v1  ;;  %v14797_v23 = vadd.f32 %v14658_v45, %v1306_v4  ;;  %v920_v26 = vrot.slane %v918_v10, 7  ;;  %v14811_v53 = vld [vmem:[#allocation2 + $0x10] sm:$0xf]  ;;  %v3240_v43 = vld [vmem:[#allocation2 + $0x20] sm:$0x1] }
  0xff   : > { %v1203_v24 = vsel %vm14691_vm10, %v915_v6, %v1202_v63  ;;  %v1017_v36 = vor.u32 %v1015_v57, %v14793_v20  ;;  %v747_v54 = vmax.f32 %v715_v27, 0.0  ;;  %v14809_v47 = vadd.f32 %v14658_v45, %v1316_v28  ;;  %v644_v27 = vpop.trf.xlu1  ;;  %v1220_v4 = vld [vmem:[#allocation2 + $0x50] sm:$0x1]  ;;  %v15868_v19 = vld [vmem:[#allocation2 + $0x20] sm:$0x1] }
 0x100   : > { %20016 = vst [vmem:[#allocation30_spill] sm:$0xff] %v14797_v23  ;;  %1204 = vst [vmem:[#allocation2 + $0x30] sm:$0xf] %v1203_v24  ;;  %v927_v33 = vshrl.u32 %v12816_v17, 16  ;;  %v930_v34 = vshll.u32 %v12816_v17, 16  ;;  %v923_v30 = vor.u32 %v921_v11, %v920_v26  ;;  %v925_v42 = vrot.slane %v920_v26, 4 }
 0x101   : > { %v737_v46 = vmax.f32 %v705_v21, 0.0  ;;  %v1245_v52 = vsel %vm14691_vm10, %v1017_v36, %v1244_v25  ;;  %20017 = vst [vmem:[#allocation31_spill] sm:$0xff] %v14809_v47  ;;  %v1461_v63 = vshrl.u32 %v1383_v60, 16  ;;  %v12827_v1 = vpack.c.bf16 %v747_v54, %v747_v54  ;;  %v618_v25 = vpop.trf.xlu0 }
 0x102   : > { %v929_v39 = vrot.slane %v927_v33, 7  ;;  %v924_v56 = vsel %vm14713_vm12, %v916_v32, %v923_v30  ;;  %v1207_v57 = vsel %vm14525_vm2, %v925_v42, %v1206_v16  ;;  %1246 = vst [vmem:[#allocation2 + $0x78] sm:$0xf] %v1245_v52  ;;  %v1464_v17 = vshll.u32 %v1383_v60, 16  ;;  %v1213_v32 = vld [vmem:[#allocation2 + $0x44] sm:$0x1] }
 0x103   : > { %v12817_v58 = vpack.c.bf16 %v737_v46, %v737_v46  ;;  %1205 = vst.msk [vmem:[#allocation2 + $0x34] sm:$0xf] %vm347_vm3, %v924_v56  ;;  %1208 = vst [vmem:[#allocation2 + $0x38] sm:$0x1] %v1207_v57  ;;  %v1463_v11 = vrot.slane %v1461_v63, 4  ;;  %v1020_v21 = vshrl.u32 %v12827_v1, 16 }
 0x104   : > { %v932_v0 = vor.u32 %v930_v34, %v929_v39  ;;  %v1023_v24 = vshll.u32 %v12827_v1, 16  ;;  %v1470_v26 = vshll.u32 %v14811_v53, 16  ;;  %v1466_v33 = vrot.slane %v1464_v17, 5  ;;  %v1248_v46 = vld [vmem:[#allocation2 + $0x80] sm:$0x1] }
 0x105   : > { %v935_v6 = vshrl.u32 %v12817_v58, 16  ;;  %v938_v10 = vshll.u32 %v12817_v58, 16  ;;  %v1474_v34 = vshrl.u32 %v14811_v53, 16  ;;  %v1480_v36 = vshll.u32 %v14820_v5, 16 }
 0x106   : > { %v1210_v16 = vsel %vm14691_vm10, %v932_v0, %v1209_v51  ;;  %v933_v30 = vrot.slane %v929_v39, 4  ;;  %v1018_v60 = vrot.slane %v14793_v20, 4  ;;  %v1022_v42 = vrot.slane %v1020_v21, 7 }
 0x107   : > { %1211 = vst [vmem:[#allocation2 + $0x3c] sm:$0xf] %v1210_v16  ;;  %v937_v28 = vrot.slane %v935_v6, 7  ;;  %v1472_v52 = vrot.slane %v1470_v26, 5  ;;  %v1467_v56 = vor.u32 %v1466_v33, %v1463_v11  ;;  %v1476_v57 = vrot.slane %v1474_v34, 4  ;;  %v619_v16 = vpop.trf.xlu0  ;;  %v645_v26 = vpop.trf.xlu1 }
 0x108   : > { %v1025_v58 = vor.u32 %v1023_v24, %v1022_v42  ;;  %v1027_v63 = vrot.slane %v1022_v42, 4  ;;  %v1482_v0 = vrot.slane %v1480_v36, 5  ;;  %v670_v1 = vmul.f32 %v14638_v35, %v618_v25  ;;  %v1385_v42 = vld [vmem:[#allocation2 + $0x18] sm:$0xf] }
 0x109   : > { %v940_v51 = vor.u32 %v938_v10, %v937_v28  ;;  %v942_v54 = vrot.slane %v937_v28, 4  ;;  %v1468_v17 = vrot.slane %v1467_v56, 4  ;;  %v1477_v20 = vor.u32 %v1476_v57, %v1472_v52 }
 0x10a   : > { %v1026_v10 = vsel %vm14713_vm12, %v1018_v60, %v1025_v58  ;;  %v1249_v11 = vsel %vm14525_vm2, %v1027_v63, %v1248_v46  ;;  %v706_v21 = vadd.f32 %v14650_v40, %v670_v1  ;;  %v1307_v24 = vmul.f32 %v14643_v37, %v618_v25  ;;  %v13986_v63 = vld [vmem:[#allocation7 + $0x20] sm:$0xff]  }
 0x10b   : > { %v941_v6 = vsel %vm14713_vm12, %v933_v30, %v940_v51  ;;  %v1214_v39 = vsel %vm14525_vm2, %v942_v54, %v1213_v32  ;;  %1247 = vst.msk [vmem:[#allocation2 + $0x7c] sm:$0xf] %vm347_vm3, %v1026_v10  ;;  %1250 = vst [vmem:[#allocation2 + $0x80] sm:$0x1] %v1249_v11  ;;  %v1473_v28 = vsel %vm14584_vm8, %v1468_v17, %v1472_v52  ;;  %v1478_v32 = vrot.slane %v1477_v20, 4 }
 0x10c   : > { %1212 = vst.msk [vmem:[#allocation2 + $0x40] sm:$0xf] %vm347_vm3, %v941_v6  ;;  %1215 = vst [vmem:[#allocation2 + $0x44] sm:$0x1] %v1214_v39  ;;  %v680_v33 = vmul.f32 %v14638_v35, %v644_v27  ;;  %v1317_v34 = vmul.f32 %v14643_v37, %v644_v27  ;;  %v738_v36 = vmax.f32 %v706_v21, 0.0  ;;  %v14846_v30 = vadd.f32 %v14658_v45, %v1307_v24 }
 0x10d   : > { %v671_v60 = vmul.f32 %v14638_v35, %v619_v16  ;;  %v1308_v25 = vmul.f32 %v14643_v37, %v619_v16  ;;  %v1483_v46 = vsel %vm14584_vm8, %v1478_v32, %v1482_v0  ;;  %v681_v54 = vmul.f32 %v14638_v35, %v645_v26  ;;  %v14863_v39 = vld [vmem:[#allocation2 + $0x1c] sm:$0xf] }
 0x10e   : > { %20018 = vst [vmem:[#allocation32_spill] sm:$0xff] %v14846_v30  ;;  %v716_v51 = vadd.f32 %v14650_v40, %v680_v33  ;;  %v14854_v52 = vadd.f32 %v14658_v45, %v1317_v34  ;;  %v12037_v27 = vcombine.low %v1473_v28, %v1483_v46  ;;  %v12818_v56 = vpack.c.bf16 %v738_v36, %v738_v36  ;;  %v1216_v33 = vld [vmem:[#allocation2 + $0x48] sm:$0xf] }
 0x10f   : > { %v707_v57 = vadd.f32 %v14650_v40, %v671_v60  ;;  %v14859_v58 = vadd.f32 %v14658_v45, %v1308_v25  ;;  %v717_v6 = vadd.f32 %v14650_v40, %v681_v54  ;;  %v1318_v0 = vmul.f32 %v14643_v37, %v645_v26 }
 0x110   : > { %20019 = vst [vmem:[#allocation33_spill] sm:$0xff] %v14854_v52  ;;  %v748_v1 = vmax.f32 %v716_v51, 0.0  ;;  %v1485_v17 = vshrl.u32 %v1385_v42, 16  ;;  %13220 = vmatmul.mubr.msk.bf16.vlgmr.msra.gmra.mxu0 %vm1885_vm9, %v12037_v27  ;;  %v944_v20 = vshrl.u32 %v12818_v56, 16  ;;  %v947_v16 = vshll.u32 %v12818_v56, 16 }
 0x111   : > { %20020 = vst [vmem:[#allocation34_spill] sm:$0xff] %v14859_v58  ;;  %v739_v10 = vmax.f32 %v707_v57, 0.0  ;;  %v749_v24 = vmax.f32 %v717_v6, 0.0  ;;  %v14869_v28 = vadd.f32 %v14658_v45, %v1318_v0  ;;  %13288 = vmatpush3.bf16.msra.mxu0 %v14685_v14  ;;  %v1488_v36 = vshll.u32 %v1385_v42, 16  ;;  %v14875_v27 = vld [vmem:[#allocation2 + $0x20] sm:$0x1]  ;;  %v620_v0 = vpop.trf.xlu0 }
 0x112   : > { %v12828_v21 = vpack.c.bf16 %v748_v1, %v748_v1  ;;  %v1487_v32 = vrot.slane %v1485_v17, 4  ;;  %v946_v26 = vrot.slane %v944_v20, 7  ;;  %v1494_v60 = vshll.u32 %v14863_v39, 16  ;;  %13289 = vmatprep.subr.bf16.mxu0 %v13986_v63  ;;  %v1251_v1 = vld [vmem:[#allocation2 + $0x84] sm:$0xf]  ;;  %v646_v17 = vpop.trf.xlu1 }
 0x113   : > { %20021 = vst [vmem:[#allocation35_spill] sm:$0xff] %v14869_v28  ;;  %v12819_v34 = vpack.c.bf16 %v739_v10, %v739_v10  ;;  %v12829_v51 = vpack.c.bf16 %v749_v24, %v749_v24  ;;  %v1490_v13 = vrot.slane %v1488_v36, 5  ;;  %v1498_v18 = vshrl.u32 %v14863_v39, 16 }
 0x114   : > { %v1029_v25 = vshrl.u32 %v12828_v21, 16  ;;  %v1032_v46 = vshll.u32 %v12828_v21, 16  ;;  %v949_v56 = vor.u32 %v947_v16, %v946_v26  ;;  %v950_v57 = vrot.slane %v946_v26, 4 }
 0x115   : > { %v952_v6 = vshrl.u32 %v12819_v34, 16  ;;  %v955_v14 = vshll.u32 %v12819_v34, 16  ;;  %v1037_v42 = vshrl.u32 %v12829_v51, 16  ;;  %v1040_v10 = vshll.u32 %v12829_v51, 16  ;;  %13290 = vmatpush3.bf16.msra.mxu0 %v13986_v63  ;;  %v1255_v51 = vld [vmem:[#allocation2 + $0x8c] sm:$0x1] }
 0x116   : > { %v1031_v20 = vrot.slane %v1029_v25, 7  ;;  %v1217_v21 = vsel %vm14691_vm10, %v949_v56, %v1216_v33  ;;  %v1496_v54 = vrot.slane %v1494_v60, 5  ;;  %v1491_v34 = vor.u32 %v1490_v13, %v1487_v32  ;;  %13359 = vmatprep.subr.bf16.mxu0 %v14880_v50 }
 0x117   : > { %v954_v24 = vrot.slane %v952_v6, 7  ;;  %1218 = vst [vmem:[#allocation2 + $0x48] sm:$0xf] %v1217_v21  ;;  %v1039_v11 = vrot.slane %v1037_v42, 7  ;;  %v1500_v36 = vrot.slane %v1498_v18, 4  ;;  %v1504_v63 = vshll.u32 %v14875_v27, 16  ;;  %v621_v18 = vpop.trf.xlu0 }
 0x118   : > { %v1034_v16 = vor.u32 %v1032_v46, %v1031_v20  ;;  %v1035_v26 = vrot.slane %v1031_v20, 4  ;;  %v1492_v6 = vrot.slane %v1491_v34, 4  ;;  %v647_v20 = vpop.trf.xlu1  ;;  %v1319_v21 = vmul.f32 %v14643_v37, %v646_v17  ;;  %v1387_v34 = vld [vmem:[#allocation2 + $0x24] sm:$0xf] }
 0x119   : > { %v957_v25 = vor.u32 %v955_v14, %v954_v24  ;;  %v959_v44 = vrot.slane %v954_v24, 4  ;;  %v1042_v56 = vor.u32 %v1040_v10, %v1039_v11  ;;  %v1044_v60 = vrot.slane %v1039_v11, 4 }
 0x11a   : > { %v1252_v33 = vsel %vm14691_vm10, %v1034_v16, %v1251_v1  ;;  %v1501_v46 = vor.u32 %v1500_v36, %v1496_v54  ;;  %v1506_v14 = vrot.slane %v1504_v63, 5  ;;  %v1497_v42 = vsel %vm14584_vm8, %v1492_v6, %v1496_v54 }
 0x11b   : > { %1253 = vst [vmem:[#allocation2 + $0x84] sm:$0xf] %v1252_v33  ;;  %v958_v13 = vsel %vm14713_vm12, %v950_v57, %v957_v25  ;;  %v1221_v32 = vsel %vm14525_vm2, %v959_v44, %v1220_v4  ;;  %v1043_v11 = vsel %vm14713_vm12, %v1035_v26, %v1042_v56  ;;  %v1256_v1 = vsel %vm14525_vm2, %v1044_v60, %v1255_v51 }
 0x11c   : > { %1219 = vst.msk [vmem:[#allocation2 + $0x4c] sm:$0xf] %vm347_vm3, %v958_v13  ;;  %1222 = vst [vmem:[#allocation2 + $0x50] sm:$0x1] %v1221_v32  ;;  %v672_v57 = vmul.f32 %v14638_v35, %v620_v0  ;;  %v1502_v44 = vrot.slane %v1501_v46, 4  ;;  %v1309_v4 = vmul.f32 %v14643_v37, %v620_v0  ;;  %v682_v10 = vmul.f32 %v14638_v35, %v646_v17 }
 0x11d   : > { %1254 = vst.msk [vmem:[#allocation2 + $0x88] sm:$0xf] %vm347_vm3, %v1043_v11  ;;  %1257 = vst [vmem:[#allocation2 + $0x8c] sm:$0x1] %v1256_v1  ;;  %v673_v16 = vmul.f32 %v14638_v35, %v621_v18  ;;  %v1310_v26 = vmul.f32 %v14643_v37, %v621_v18  ;;  %v683_v54 = vmul.f32 %v14638_v35, %v647_v20  ;;  %v1509_v32 = vshrl.u32 %v1387_v34, 16 }
 0x11e   : > { %v708_v24 = vadd.f32 %v14650_v40, %v672_v57  ;;  %v1507_v25 = vsel %vm14584_vm8, %v1502_v44, %v1506_v14  ;;  %v14909_v51 = vadd.f32 %v14658_v45, %v1309_v4  ;;  %v718_v0 = vadd.f32 %v14650_v40, %v682_v10  ;;  %v14933_v18 = vld [vmem:[#allocation2 + $0x2c] sm:$0x1] }
 0x11f   : > { %v14913_v36 = vadd.f32 %v14658_v45, %v1319_v21  ;;  %v12038_v17 = vcombine.low %v1497_v42, %v1507_v25  ;;  %v709_v33 = vadd.f32 %v14650_v40, %v673_v16  ;;  %v14917_v56 = vadd.f32 %v14658_v45, %v1310_v26  ;;  %v14927_v21 = vld [vmem:[#allocation2 + $0x28] sm:$0xf] }
 0x120   : > { %20022 = vst [vmem:[#allocation36_spill] sm:$0xff] %v14909_v51  ;;  %v740_v63 = vmax.f32 %v708_v24, 0.0  ;;  %v750_v60 = vmax.f32 %v718_v0, 0.0  ;;  %v719_v6 = vadd.f32 %v14650_v40, %v683_v54  ;;  %v1320_v13 = vmul.f32 %v14643_v37, %v647_v20  ;;  %v1223_v24 = vld [vmem:[#allocation2 + $0x54] sm:$0xf] }
 0x121   : > { %20023 = vst [vmem:[#allocation37_spill] sm:$0xff] %v14913_v36  ;;  %20024 = vst [vmem:[#allocation38_spill] sm:$0xff] %v14917_v56  ;;  %13223 = vmatprep.mubr.msk.bf16.mxu0 %vm1885_vm9, %v12038_v17  ;;  %v741_v14 = vmax.f32 %v709_v33, 0.0  ;;  %v1512_v11 = vshll.u32 %v1387_v34, 16  ;;  %v1511_v44 = vrot.slane %v1509_v32, 4 }
 0x122   : > { %v12820_v46 = vpack.c.bf16 %v740_v63, %v740_v63  ;;  %v12830_v1 = vpack.c.bf16 %v750_v60, %v750_v60  ;;  %v751_v42 = vmax.f32 %v719_v6, 0.0  ;;  %v14925_v57 = vadd.f32 %v14658_v45, %v1320_v13  ;;  %v1258_v17 = vld [vmem:[#allocation2 + $0x90] sm:$0xf]  ;;  %v14931_v60 = vpop.trf.xlu0  ;;  %v1227_v13 = vld [vmem:[#allocation2 + $0x5c] sm:$0x1] }
 0x123   : > { %v12821_v10 = vpack.c.bf16 %v741_v14, %v741_v14  ;;  %v1514_v20 = vrot.slane %v1512_v11, 5  ;;  %20026 = vst [vmem:[#allocation40_spill] sm:$0xff] %v14931_v60  ;;  %v1518_v11 = vshll.u32 %v14927_v21, 16 }
 0x124   : > { %20025 = vst [vmem:[#allocation39_spill] sm:$0xff] %v14925_v57  ;;  %v961_v4 = vshrl.u32 %v12820_v46, 16  ;;  %v1046_v16 = vshrl.u32 %v12830_v1, 16  ;;  %v1049_v26 = vshll.u32 %v12830_v1, 16  ;;  %v12831_v54 = vpack.c.bf16 %v751_v42, %v751_v42  ;;  %v648_v1 = vpop.trf.xlu1  ;;  %v1262_v57 = vld [vmem:[#allocation2 + $0x98] sm:$0x1] }
 0x125   : > { %v964_v34 = vshll.u32 %v12820_v46, 16  ;;  %v969_v63 = vshrl.u32 %v12821_v10, 16  ;;  %v1515_v33 = vor.u32 %v1514_v20, %v1511_v44  ;;  %v972_v25 = vshll.u32 %v12821_v10, 16 }
 0x126   : > { %v963_v0 = vrot.slane %v961_v4, 7  ;;  %v1048_v6 = vrot.slane %v1046_v16, 7  ;;  %v1054_v32 = vshrl.u32 %v12831_v54, 16  ;;  %v1057_v14 = vshll.u32 %v12831_v54, 16 }
 0x127   : > { %v971_v59 = vrot.slane %v969_v63, 7  ;;  %v1520_v36 = vrot.slane %v1518_v11, 5  ;;  %v1522_v54 = vshrl.u32 %v14927_v21, 16  ;;  %v1516_v63 = vrot.slane %v1515_v33, 4 }
 0x128   : > { %v966_v42 = vor.u32 %v964_v34, %v963_v0  ;;  %v967_v41 = vrot.slane %v963_v0, 4  ;;  %v1051_v4 = vor.u32 %v1049_v26, %v1048_v6  ;;  %v1052_v46 = vrot.slane %v1048_v6, 4 }
 0x129   : > { %v1056_v7 = vrot.slane %v1054_v32, 7  ;;  %v974_v20 = vor.u32 %v972_v25, %v971_v59  ;;  %v976_v16 = vrot.slane %v971_v59, 4  ;;  %v1528_v59 = vshll.u32 %v14933_v18, 16  ;;  %v14946_v25 = vpop.trf.xlu0  ;;  %v14958_v32 = vld [vmem:[#allocation2 + $0x8] sm:$0x1] }
 0x12a   : > { %v1224_v44 = vsel %vm14691_vm10, %v966_v42, %v1223_v24  ;;  %v1259_v52 = vsel %vm14691_vm10, %v1051_v4, %v1258_v17  ;;  %v1524_v24 = vrot.slane %v1522_v54, 4  ;;  %20027 = vst [vmem:[#allocation41_spill] sm:$0xff] %v14946_v25  ;;  %v684_v6 = vmul.f32 %v14638_v35, %v648_v1  ;;  %v1389_v4 = vld [vmem:[#allocation2 + $0x30] sm:$0xf] }
 0x12b   : > { %1225 = vst [vmem:[#allocation2 + $0x54] sm:$0xf] %v1224_v44  ;;  %v1059_v34 = vor.u32 %v1057_v14, %v1056_v7  ;;  %v1061_v0 = vrot.slane %v1056_v7, 4  ;;  %1260 = vst [vmem:[#allocation2 + $0x90] sm:$0xf] %v1259_v52  ;;  %v975_v10 = vsel %vm14713_vm12, %v967_v41, %v974_v20  ;;  %v1228_v26 = vsel %vm14525_vm2, %v976_v16, %v1227_v13  ;;  %v649_v52 = vpop.trf.xlu1 }
 0x12c   : > { %1226 = vst.msk [vmem:[#allocation2 + $0x58] sm:$0xf] %vm347_vm3, %v975_v10  ;;  %1229 = vst [vmem:[#allocation2 + $0x5c] sm:$0x1] %v1228_v26  ;;  %v674_v41 = vmul.f32 %v14638_v35, %v14931_v60  ;;  %v1525_v33 = vor.u32 %v1524_v24, %v1520_v36  ;;  %v1321_v13 = vmul.f32 %v14643_v37, %v648_v1  ;;  %v1530_v44 = vrot.slane %v1528_v59, 5 }
 0x12d   : > { %v1060_v17 = vsel %vm14713_vm12, %v1052_v46, %v1059_v34  ;;  %v1263_v7 = vsel %vm14525_vm2, %v1061_v0, %v1262_v57  ;;  %v1521_v11 = vsel %vm14584_vm8, %v1516_v63, %v1520_v36  ;;  %v675_v42 = vmul.f32 %v14638_v35, %v14946_v25  ;;  %v1234_v24 = vld [vmem:[#allocation2 + $0x68] sm:$0x1] }
 0x12e   : > { %1261 = vst.msk [vmem:[#allocation2 + $0x94] sm:$0xf] %vm347_vm3, %v1060_v17  ;;  %1264 = vst [vmem:[#allocation2 + $0x98] sm:$0x1] %v1263_v7  ;;  %v710_v57 = vadd.f32 %v14650_v40, %v674_v41  ;;  %v1526_v46 = vrot.slane %v1525_v33, 4  ;;  %v720_v20 = vadd.f32 %v14650_v40, %v684_v6  ;;  %v685_v16 = vmul.f32 %v14638_v35, %v649_v52 }
 0x12f   : > { %v14969_v54 = vadd.f32 %v14658_v45, %v1321_v13  ;;  %v711_v34 = vadd.f32 %v14650_v40, %v675_v42  ;;  %v1322_v36 = vmul.f32 %v14643_v37, %v649_v52  ;;  %v1533_v26 = vshrl.u32 %v1389_v4, 16  ;;  %v14977_v7 = vpop.trf.xlu1 }
 0x130   : > { %v742_v1 = vmax.f32 %v710_v57, 0.0  ;;  %v1531_v0 = vsel %vm14584_vm8, %v1526_v46, %v1530_v44  ;;  %v752_v63 = vmax.f32 %v720_v20, 0.0  ;;  %v721_v10 = vadd.f32 %v14650_v40, %v685_v16  ;;  %v14983_v40 = vld [vmem:[#allocation2 + $0x34] sm:$0xf] }
 0x131   : > { %20028 = vst [vmem:[#allocation42_spill] sm:$0xff] %v14969_v54  ;;  %v12039_v59 = vcombine.low %v1521_v11, %v1531_v0  ;;  %v743_v35 = vmax.f32 %v711_v34, 0.0  ;;  %v14980_v6 = vadd.f32 %v14658_v45, %v1322_v36  ;;  %v1535_v37 = vrot.slane %v1533_v26, 4  ;;  %v1230_v36 = vld [vmem:[#allocation2 + $0x60] sm:$0xf] }
 0x132   : > { %v12822_v17 = vpack.c.bf16 %v742_v1, %v742_v1  ;;  %v12832_v41 = vpack.c.bf16 %v752_v63, %v752_v63  ;;  %v753_v33 = vmax.f32 %v721_v10, 0.0  ;;  %v1536_v42 = vshll.u32 %v1389_v4, 16  ;;  %v1269_v54 = vld [vmem:[#allocation2 + $0xa4] sm:$0x1] }
 0x133   : > { %20029 = vst [vmem:[#allocation43_spill] sm:$0xff] %v14980_v6  ;;  %13224 = vmatmul.mubr.msk.bf16.gmra.mxu0 %vm1885_vm9, %v12039_v59  ;;  %v12823_v57 = vpack.c.bf16 %v743_v35, %v743_v35  ;;  %v1542_v26 = vshll.u32 %v14983_v40, 16  ;;  %v1265_v35 = vld [vmem:[#allocation2 + $0x9c] sm:$0xf] }
 0x134   : > { %v978_v52 = vshrl.u32 %v12822_v17, 16  ;;  %v981_v13 = vshll.u32 %v12822_v17, 16  ;;  %v1063_v46 = vshrl.u32 %v12832_v41, 16  ;;  %v1066_v11 = vshll.u32 %v12832_v41, 16 }
 0x135   : > { %v12833_v44 = vpack.c.bf16 %v753_v33, %v753_v33  ;;  %v986_v1 = vshrl.u32 %v12823_v57, 16  ;;  %v989_v34 = vshll.u32 %v12823_v57, 16  ;;  %v1538_v45 = vrot.slane %v1536_v42, 5  ;;  %v651_v33 = vpop.trf.xlu1 }
 0x136   : > { %v980_v16 = vrot.slane %v978_v52, 7  ;;  %v1065_v0 = vrot.slane %v1063_v46, 7  ;;  %v14988_v52 = vld [vmem:[#allocation2 + $0x38] sm:$0x1]  ;;  %v1544_v57 = vrot.slane %v1542_v26, 5 }
 0x137   : > { %v1071_v63 = vshrl.u32 %v12833_v44, 16  ;;  %v1074_v10 = vshll.u32 %v12833_v44, 16  ;;  %v988_v4 = vrot.slane %v986_v1, 7  ;;  %v1539_v41 = vor.u32 %v1538_v45, %v1535_v37  ;;  %v14997_v45 = vld [vmem:[#allocation2 + $0x40] sm:$0xf] }
 0x138   : > { %v983_v59 = vor.u32 %v981_v13, %v980_v16  ;;  %v984_v17 = vrot.slane %v980_v16, 4  ;;  %v1068_v14 = vor.u32 %v1066_v11, %v1065_v0  ;;  %v1069_v28 = vrot.slane %v1065_v0, 4  ;;  %v14992_v13 = vld [vmem:[#allocation2 + $0x3c] sm:$0xf]  ;;  %v14135_v26 = vld [vmem:[%s19879_s1] ss:$0 sm:$0xff] }
 0x139   : > { %v1073_v20 = vrot.slane %v1071_v63, 7  ;;  %v991_v46 = vor.u32 %v989_v34, %v988_v4  ;;  %v993_v44 = vrot.slane %v988_v4, 4  ;;  %v1540_v6 = vrot.slane %v1539_v41, 4  ;;  %v14137_v41 = vld [vmem:[%s19879_s1 + $0x1] ss:$0 sm:$0xff] }
 0x13a   : > { %v1231_v42 = vsel %vm14691_vm10, %v983_v59, %v1230_v36  ;;  %v1266_v37 = vsel %vm14691_vm10, %v1068_v14, %v1265_v35  ;;  %v1546_v1 = vshrl.u32 %v14983_v40, 16  ;;  %v1552_v63 = vshll.u32 %v14988_v52, 16  ;;  %v14136_v59 = vld [vmem:[%s19879_s1 + $0x2] ss:$0 sm:$0xff] }
 0x13b   : > { %1232 = vst [vmem:[#allocation2 + $0x60] sm:$0xf] %v1231_v42  ;;  %v1076_v16 = vor.u32 %v1074_v10, %v1073_v20  ;;  %v1078_v11 = vrot.slane %v1073_v20, 4  ;;  %1267 = vst [vmem:[#allocation2 + $0x9c] sm:$0xf] %v1266_v37  ;;  %v992_v36 = vsel %vm14713_vm12, %v984_v17, %v991_v46  ;;  %v1235_v34 = vsel %vm14525_vm2, %v993_v44, %v1234_v24 }
 0x13c   : > { %v1545_v0 = vsel %vm14584_vm8, %v1540_v6, %v1544_v57  ;;  %1233 = vst.msk [vmem:[#allocation2 + $0x64] sm:$0xf] %vm347_vm3, %v992_v36  ;;  %1236 = vst [vmem:[#allocation2 + $0x68] sm:$0x1] %v1235_v34  ;;  %v1548_v10 = vrot.slane %v1546_v1, 4  ;;  %v686_v24 = vmul.f32 %v14135_v26, %v14977_v7  ;;  %v1554_v6 = vrot.slane %v1552_v63, 5 }
 0x13d   : > { %v1077_v14 = vsel %vm14713_vm12, %v1069_v28, %v1076_v16  ;;  %v1270_v20 = vsel %vm14525_vm2, %v1078_v11, %v1269_v54  ;;  %v1323_v28 = vmul.f32 %v14136_v59, %v14977_v7  ;;  %v687_v17 = vmul.f32 %v14135_v26, %v651_v33  ;;  %v652_v54 = vpop.trf.xlu1  ;;  %v14138_v37 = vld [vmem:[%s19879_s1 + $0x3] ss:$0 sm:$0xff] }
 0x13e   : > { %1268 = vst.msk [vmem:[#allocation2 + $0xa0] sm:$0xf] %vm347_vm3, %v1077_v14  ;;  %1271 = vst [vmem:[#allocation2 + $0xa4] sm:$0x1] %v1270_v20  ;;  %v1324_v35 = vmul.f32 %v14136_v59, %v651_v33  ;;  %v1549_v4 = vor.u32 %v1548_v10, %v1544_v57  ;;  %v722_v42 = vadd.f32 %v14137_v41, %v686_v24  ;;  %v1557_v46 = vshrl.u32 %v14992_v13, 16 }
 0x13f   : > { %v1560_v44 = vshll.u32 %v14992_v13, 16  ;;  %v15028_v16 = vadd.f32 %v14138_v37, %v1323_v28  ;;  %v723_v7 = vadd.f32 %v14137_v41, %v687_v17  ;;  %v15032_v33 = vld [vmem:[#allocation2 + $0x44] sm:$0x1]  ;;  %v1566_v57 = vshll.u32 %v14997_v45, 16 }
 0x140   : > { %v15030_v11 = vadd.f32 %v14138_v37, %v1324_v35  ;;  %v1550_v1 = vrot.slane %v1549_v4, 4  ;;  %v754_v36 = vmax.f32 %v722_v42, 0.0  ;;  %v1559_v34 = vrot.slane %v1557_v46, 4 }
 0x141   : > { %20030 = vst [vmem:[#allocation44_spill] sm:$0xff] %v15028_v16  ;;  %v1562_v63 = vrot.slane %v1560_v44, 5  ;;  %v755_v14 = vmax.f32 %v723_v7, 0.0  ;;  %v1568_v10 = vrot.slane %v1566_v57, 5  ;;  %v1570_v24 = vshrl.u32 %v14997_v45, 16  ;;  %v653_v46 = vpop.trf.xlu1 }
 0x142   : > { %20031 = vst [vmem:[#allocation45_spill] sm:$0xff] %v15030_v11  ;;  %v1555_v28 = vsel %vm14584_vm8, %v1550_v1, %v1554_v6  ;;  %v12834_v17 = vpack.c.bf16 %v754_v36, %v754_v36  ;;  %v1576_v38 = vshll.u32 %v15032_v33, 16  ;;  %v688_v42 = vmul.f32 %v14135_v26, %v652_v54 }
 0x143   : > { %v1563_v35 = vor.u32 %v1562_v63, %v1559_v34  ;;  %v12040_v47 = vcombine.low %v1545_v0, %v1555_v28  ;;  %v12835_v62 = vpack.c.bf16 %v755_v14, %v755_v14  ;;  %v1572_v4 = vrot.slane %v1570_v24, 4  ;;  %v1272_v34 = vld [vmem:[#allocation2 + $0xa8] sm:$0xf] }
 0x144   : > { %v1080_v44 = vshrl.u32 %v12834_v17, 16  ;;  %v1083_v7 = vshll.u32 %v12834_v17, 16  ;;  %v1578_v51 = vrot.slane %v1576_v38, 5  ;;  %v724_v11 = vadd.f32 %v14137_v41, %v688_v42  ;;  %v1276_v38 = vld [vmem:[#allocation2 + $0xb0] sm:$0x1] }
 0x145   : > { %v1564_v2 = vrot.slane %v1563_v35, 4  ;;  %13227 = vmatprep.mubr.msk.bf16.mxu0 %vm1885_vm9, %v12040_v47  ;;  %v1088_v57 = vshrl.u32 %v12835_v62, 16  ;;  %v1091_v20 = vshll.u32 %v12835_v62, 16  ;;  %v1573_v16 = vor.u32 %v1572_v4, %v1568_v10  ;;  %v15980_v9 = vld [vmem:[#allocation2 + $0x68] sm:$0x1] }
 0x146   : > { %v1082_v6 = vrot.slane %v1080_v44, 7  ;;  %v1325_v36 = vmul.f32 %v14136_v59, %v652_v54  ;;  %v689_v0 = vmul.f32 %v14135_v26, %v653_v46  ;;  %v756_v24 = vmax.f32 %v724_v11, 0.0  ;;  %v15054_v11 = vld [vmem:[#allocation2 + $0x4c] sm:$0xf]  ;;  %20083 = vst [vmem:[#allocation81_spill] sm:$0xff] %v15980_v9 }
 0x147   : > { %v1569_v1 = vsel %vm14584_vm8, %v1564_v2, %v1568_v10  ;;  %v1090_v63 = vrot.slane %v1088_v57, 7  ;;  %v1574_v14 = vrot.slane %v1573_v16, 4  ;;  %v1326_v28 = vmul.f32 %v14136_v59, %v653_v46  ;;  %v15048_v2 = vld [vmem:[#allocation2 + $0x48] sm:$0xf]  ;;  %v15056_v10 = vld [vmem:[#allocation2 + $0x50] sm:$0x1] }
 0x148   : > { %v1085_v17 = vor.u32 %v1083_v7, %v1082_v6  ;;  %v1086_v35 = vrot.slane %v1082_v6, 4  ;;  %v15044_v56 = vadd.f32 %v14138_v37, %v1325_v36  ;;  %v725_v47 = vadd.f32 %v14137_v41, %v689_v0  ;;  %v15062_v7 = vld [vmem:[#allocation2 + $0x54] sm:$0xf]  ;;  %v15070_v0 = vld [vmem:[#allocation2 + $0x58] sm:$0xf] }
 0x149   : > { %v1093_v62 = vor.u32 %v1091_v20, %v1090_v63  ;;  %v1095_v4 = vrot.slane %v1090_v63, 4  ;;  %v1579_v42 = vsel %vm14584_vm8, %v1574_v14, %v1578_v51  ;;  %v12836_v44 = vpack.c.bf16 %v756_v24, %v756_v24  ;;  %v15078_v6 = vld [vmem:[#allocation2 + $0x5c] sm:$0x1] }
 0x14a   : > { %20032 = vst [vmem:[#allocation46_spill] sm:$0xff] %v15044_v56  ;;  %v1273_v26 = vsel %vm14691_vm10, %v1085_v17, %v1272_v34  ;;  %v12041_v54 = vcombine.low %v1569_v1, %v1579_v42  ;;  %v757_v16 = vmax.f32 %v725_v47, 0.0  ;;  %v15052_v59 = vadd.f32 %v14138_v37, %v1326_v28  ;;  %v1279_v37 = vld [vmem:[#allocation2 + $0xb4] sm:$0xf] }
 0x14b   : > { %1274 = vst [vmem:[#allocation2 + $0xa8] sm:$0xf] %v1273_v26  ;;  %v1094_v41 = vsel %vm14713_vm12, %v1086_v35, %v1093_v62  ;;  %v1277_v51 = vsel %vm14525_vm2, %v1095_v4, %v1276_v38  ;;  %v1097_v20 = vshrl.u32 %v12836_v44, 16  ;;  %v1100_v46 = vshll.u32 %v12836_v44, 16 }
 0x14c   : > { %20033 = vst [vmem:[#allocation47_spill] sm:$0xff] %v15052_v59  ;;  %1275 = vst.msk [vmem:[#allocation2 + $0xac] sm:$0xf] %vm347_vm3, %v1094_v41  ;;  %13228 = vmatmul.mubr.msk.bf16.gmra.mxu0 %vm1885_vm9, %v12041_v54  ;;  %v12837_v57 = vpack.c.bf16 %v757_v16, %v757_v16  ;;  %v1581_v1 = vshrl.u32 %v15048_v2, 16  ;;  %v1584_v36 = vshll.u32 %v15048_v2, 16  ;;  %v1590_v63 = vshll.u32 %v15054_v11, 16 }
 0x14d   : > { %1278 = vst [vmem:[#allocation2 + $0xb0] sm:$0x1] %v1277_v51  ;;  %v1099_v34 = vrot.slane %v1097_v20, 7  ;;  %v1594_v14 = vshrl.u32 %v15054_v11, 16  ;;  %v1600_v24 = vshll.u32 %v15056_v10, 16  ;;  %v1605_v16 = vshrl.u32 %v15062_v7, 16 }
 0x14e   : > { %v1105_v28 = vshrl.u32 %v12837_v57, 16  ;;  %v1108_v17 = vshll.u32 %v12837_v57, 16  ;;  %v1583_v35 = vrot.slane %v1581_v1, 4  ;;  %v1586_v38 = vrot.slane %v1584_v36, 5  ;;  %v1283_v51 = vld [vmem:[#allocation2 + $0xbc] sm:$0x1] }
 0x14f   : > { %v1102_v47 = vor.u32 %v1100_v46, %v1099_v34  ;;  %v1103_v62 = vrot.slane %v1099_v34, 4  ;;  %v1592_v4 = vrot.slane %v1590_v63, 5  ;;  %v1596_v42 = vrot.slane %v1594_v14, 4  ;;  %v2396_v14 = vld [vmem:[#allocation2] sm:$0xe] }
 0x150   : > { %v1107_v44 = vrot.slane %v1105_v28, 7  ;;  %v1587_v26 = vor.u32 %v1586_v38, %v1583_v35  ;;  %v1602_v54 = vrot.slane %v1600_v24, 5  ;;  %v1608_v57 = vshll.u32 %v15062_v7, 16 }
 0x151   : > { %v1280_v41 = vsel %vm14691_vm10, %v1102_v47, %v1279_v37  ;;  %v1597_v20 = vor.u32 %v1596_v42, %v1592_v4  ;;  %v1614_v1 = vshll.u32 %v15070_v0, 16  ;;  %v1607_v63 = vrot.slane %v1605_v16, 4  ;;  %v15083_v37 = vld [vmem:[#allocation2 + $0x60] sm:$0xf] }
 0x152   : > { %1281 = vst [vmem:[#allocation2 + $0xb4] sm:$0xf] %v1280_v41  ;;  %v1110_v46 = vor.u32 %v1108_v17, %v1107_v44  ;;  %v1112_v36 = vrot.slane %v1107_v44, 4  ;;  %v1588_v34 = vrot.slane %v1587_v26, 4  ;;  %v1610_v28 = vrot.slane %v1608_v57, 5 }
 0x153   : > { %v1598_v24 = vrot.slane %v1597_v20, 4  ;;  %v1616_v35 = vrot.slane %v1614_v1, 5  ;;  %v1618_v38 = vshrl.u32 %v15070_v0, 16  ;;  %v1624_v44 = vshll.u32 %v15078_v6, 16  ;;  %v15092_v26 = vld [vmem:[#allocation2 + $0x64] sm:$0xf] }
 0x154   : > { %v1111_v47 = vsel %vm14713_vm12, %v1103_v62, %v1110_v46  ;;  %v1284_v42 = vsel %vm14525_vm2, %v1112_v36, %v1283_v51  ;;  %v1593_v17 = vsel %vm14584_vm8, %v1588_v34, %v1592_v4  ;;  %v1611_v41 = vor.u32 %v1610_v28, %v1607_v63  ;;  %v15098_v51 = vld [vmem:[#allocation2 + $0x4] sm:$0xf] }
 0x155   : > { %1282 = vst.msk [vmem:[#allocation2 + $0xb8] sm:$0xf] %vm347_vm3, %v1111_v47  ;;  %1285 = vst [vmem:[#allocation2 + $0xbc] sm:$0x1] %v1284_v42  ;;  %v1603_v16 = vsel %vm14584_vm8, %v1598_v24, %v1602_v54  ;;  %v1620_v20 = vrot.slane %v1618_v38, 4  ;;  %v12104_v57 = vrot.slane %v2396_v14, 9 }
 0x156   : > { %v2459_v62 = vrot.slane %v14820_v5, 5  ;;  %v12042_v1 = vcombine.low %v1593_v17, %v1603_v16  ;;  %v2449_v4 = vrot.slane %v15098_v51, 5  ;;  %v1629_v46 = vshrl.u32 %v15083_v37, 16  ;;  %v15108_v54 = vld [vmem:[#allocation2 + $0x68] sm:$0x1] }
 0x157   : > { %v1612_v36 = vrot.slane %v1611_v41, 4  ;;  %v1621_v34 = vor.u32 %v1620_v20, %v1616_v35  ;;  %v20034_v47 = vmov 0  ;;  %v1632_v63 = vshll.u32 %v15083_v37, 16  ;;  %v2397_v42 = vld [vmem:[#allocation2 + $0xc] sm:$0xe] }
 0x158   : > { %v20035_v47 = vsel %vm15104_vm15, 4294967295, %v20034_v47  ;;  %v1638_v5 = vshll.u32 %v15092_v26, 16  ;;  %13231 = vmatprep.mubr.msk.bf16.mxu0 %vm1885_vm9, %v12042_v1  ;;  %v2450_v14 = vsel %vm15104_vm15, %v12104_v57, %v2449_v4  ;;  %v2451_v24 = vrot.slane %v2449_v4, 4  ;;  %v15123_v4 = vld [vmem:[#allocation2 + $0x6c] sm:$0xf] }
 0x159   : > { %20036 = vst [vmem:[#allocation48_spill] sm:$0xff] %v20035_v47  ;;  %v1631_v28 = vrot.slane %v1629_v46, 4  ;;  %v1642_v38 = vshrl.u32 %v15092_v26, 16  ;;  %v1622_v17 = vrot.slane %v1621_v34, 4  ;;  %v1626_v16 = vrot.slane %v1624_v44, 5 }
 0x15a   : > { %v1634_v41 = vrot.slane %v1632_v63, 5  ;;  %v1640_v20 = vrot.slane %v1638_v5, 5  ;;  %v1617_v56 = vsel %vm14584_vm8, %v1612_v36, %v1616_v35  ;;  %v20037_v59 = vrot.slane %v14958_v32, 5  ;;  %v15125_v46 = vld [vmem:[#allocation2 + $0x70] sm:$0xf] }
 0x15b   : > { %v1644_v30 = vrot.slane %v1642_v38, 4  ;;  %v1648_v57 = vshll.u32 %v15108_v54, 16  ;;  %v1627_v44 = vsel %vm14584_vm8, %v1622_v17, %v1626_v16  ;;  %v12105_v5 = vrot.slane %v2397_v42, 9  ;;  %v2398_v42 = vld [vmem:[#allocation2 + $0x18] sm:$0xe] }
 0x15c   : > { %v2453_v1 = vsel %vm15104_vm15, %v2451_v24, %v20037_v59  ;;  %v1635_v63 = vor.u32 %v1634_v41, %v1631_v28  ;;  %v12043_v58 = vcombine.low %v1617_v56, %v1627_v44  ;;  %v20038_v32 = vrot.slane %v14811_v53, 5  ;;  %v15145_v16 = vld [vmem:[#allocation2 + $0x74] sm:$0x1] }
 0x15d   : > { %v12120_v34 = vcombine.low %v2450_v14, %v2453_v1  ;;  %v1645_v35 = vor.u32 %v1644_v30, %v1640_v20  ;;  %v1650_v36 = vrot.slane %v1648_v57, 5  ;;  %v1653_v25 = vshrl.u32 %v15123_v4, 16 }
 0x15e   : > { %v2458_v60 = vrot.slane %v20038_v32, 4  ;;  %v1636_v59 = vrot.slane %v1635_v63, 4  ;;  %v20039_v24 = vmov %v20038_v32  ;;  %v1656_v15 = vshll.u32 %v15123_v4, 16  ;;  %13232 = vmatmul.mubr.msk.bf16.gmra.mxu0 %vm1885_vm9, %v12043_v58  ;;  %v15147_v58 = vld [vmem:[#allocation2 + $0x78] sm:$0xf] }
 0x15f   : > { %v2457_v38 = vsel %vm15104_vm15, %v12105_v5, %v20039_v24  ;;  %v1646_v14 = vrot.slane %v1645_v35, 4  ;;  %v1662_v56 = vshll.u32 %v15125_v46, 16  ;;  %v1666_v28 = vshrl.u32 %v15125_v46, 16  ;;  %13291 = vmatprep.mubr.msk.bf16.mxu0 %vm1885_vm9, %v12120_v34 }
 0x160   : > { %v2460_v30 = vsel %vm15104_vm15, %v2458_v60, %v2459_v62  ;;  %v1641_v53 = vsel %vm14584_vm8, %v1636_v59, %v1640_v20  ;;  %v1655_v41 = vrot.slane %v1653_v25, 4  ;;  %v1658_v1 = vrot.slane %v1656_v15, 5  ;;  %v15153_v20 = vld [vmem:[#allocation2 + $0x7c] sm:$0xf]  ;;  %v15156_v25 = vld [vmem:[#allocation2 + $0x80] sm:$0x1] }
 0x161   : > { %v12121_v17 = vcombine.low %v2457_v38, %v2460_v30  ;;  %v1651_v60 = vsel %vm14584_vm8, %v1646_v14, %v1650_v36  ;;  %v1664_v62 = vrot.slane %v1662_v56, 5  ;;  %v1668_v57 = vrot.slane %v1666_v28, 4  ;;  %v2399_v36 = vld [vmem:[#allocation2 + $0x24] sm:$0xe]  ;;  %v13994_v56 = vld [vmem:[#allocation7 + $0x40] sm:$0xff]  }
 0x162   : > { %v1672_v44 = vshll.u32 %v15145_v16, 16  ;;  %v12044_v63 = vcombine.low %v1641_v53, %v1651_v60  ;;  %v1659_v5 = vor.u32 %v1658_v1, %v1655_v41  ;;  %v12106_v34 = vrot.slane %v2398_v42, 9 }
 0x163   : > { %v2463_v35 = vrot.slane %v14863_v39, 5  ;;  %v1669_v32 = vor.u32 %v1668_v57, %v1664_v62  ;;  %v2466_v15 = vrot.slane %v14875_v27, 5  ;;  %v1677_v24 = vshrl.u32 %v15147_v58, 16 }
 0x164   : > { %v1674_v59 = vrot.slane %v1672_v44, 5  ;;  %13235 = vmatprep.mubr.msk.bf16.mxu1 %vm1885_vm9, %v12044_v63  ;;  %v1660_v38 = vrot.slane %v1659_v5, 4  ;;  %v1680_v39 = vshll.u32 %v15147_v58, 16  ;;  %v1686_v53 = vshll.u32 %v15153_v20, 16  ;;  %v15170_v44 = vld [vmem:[#allocation2 + $0x84] sm:$0xf] }
 0x165   : > { %v2464_v14 = vsel %vm15104_vm15, %v12106_v34, %v2463_v35  ;;  %v2465_v30 = vrot.slane %v2463_v35, 4  ;;  %v1670_v28 = vrot.slane %v1669_v32, 4  ;;  %v1679_v42 = vrot.slane %v1677_v24, 4  ;;  %v13988_v63 = vld [vmem:[#allocation7] sm:$0xff]   ;;  %v15175_v24 = vld [vmem:[#allocation2 + $0x88] sm:$0xf] }
 0x166   : > { %v1690_v27 = vshrl.u32 %v15153_v20, 16  ;;  %v1665_v41 = vsel %vm14584_vm8, %v1660_v38, %v1664_v62  ;;  %v1682_v60 = vrot.slane %v1680_v39, 5  ;;  %v1696_v57 = vshll.u32 %v15156_v25, 16  ;;  %13292 = vmatmul.mubr.msk.bf16.vlgmr.msra.gmra.mxu0 %vm1885_vm9, %v12121_v17 }
 0x167   : > { %v2467_v1 = vsel %vm15104_vm15, %v2465_v30, %v2466_v15  ;;  %v1675_v5 = vsel %vm14584_vm8, %v1670_v28, %v1674_v59  ;;  %v1688_v35 = vrot.slane %v1686_v53, 5  ;;  %v12107_v15 = vrot.slane %v2399_v36, 9  ;;  %13360 = vmatpush3.bf16.msra.mxu0 %v14880_v50  ;;  %v15182_v28 = vld [vmem:[#allocation7 + $0x68] sm:$0xff]   ;;  %v15185_v53 = vld [vmem:[#allocation2 + $0x8c] sm:$0x1] }
 0x168   : > { %v12122_v34 = vcombine.low %v2464_v14, %v2467_v1  ;;  %v1692_v32 = vrot.slane %v1690_v27, 4  ;;  %v12045_v62 = vcombine.low %v1665_v41, %v1675_v5  ;;  %v1683_v38 = vor.u32 %v1682_v60, %v1679_v42  ;;  %v2400_v14 = vld [vmem:[#allocation2 + $0x30] sm:$0xe]  ;;  %13361 = vmatprep.subr.bf16.mxu0 %v13994_v56 }
 0x169   : > { %v1698_v23 = vrot.slane %v1696_v57, 5  ;;  %v2470_v39 = vrot.slane %v14927_v21, 5  ;;  %v2473_v17 = vrot.slane %v14933_v18, 5  ;;  %v1701_v59 = vshrl.u32 %v15170_v44, 16  ;;  %v14140_v21 = vld [vmem:[#allocation7 + $0x8] sm:$0xff]  }
 0x16a   : > { %13295 = vmatprep.mubr.msk.bf16.mxu0 %vm1885_vm9, %v12122_v34  ;;  %v1693_v30 = vor.u32 %v1692_v32, %v1688_v35  ;;  %13236 = vmatmul.mubr.msk.bf16.vlgmr.msra.gmra.mxu1 %vm1885_vm9, %v12045_v62  ;;  %v1684_v42 = vrot.slane %v1683_v38, 4  ;;  %v1704_v50 = vshll.u32 %v15170_v44, 16  ;;  %v1710_v36 = vshll.u32 %v15175_v24, 16  ;;  %v15194_v62 = vld [vmem:[#allocation2 + $0x90] sm:$0xf] }
 0x16b   : > { %v1714_v27 = vshrl.u32 %v15175_v24, 16  ;;  %13252 = vmatpush3.bf16.msra.mxu1 %v14140_v21  ;;  %v2471_v41 = vsel %vm15104_vm15, %v12107_v15, %v2470_v39  ;;  %v2472_v1 = vrot.slane %v2470_v39, 4  ;;  %v1703_v60 = vrot.slane %v1701_v59, 4  ;;  %13362 = vmatpush3.bf16.msra.mxu0 %v13994_v56  ;;  %v15201_v59 = vld [vmem:[#allocation2 + $0x94] sm:$0xf]  ;;  %v15203_v21 = vld [vmem:[#allocation7 + $0x38] sm:$0xff]  }
 0x16c   : > { %v1694_v18 = vrot.slane %v1693_v30, 4  ;;  %v1689_v57 = vsel %vm14584_vm8, %v1684_v42, %v1688_v35  ;;  %v1706_v5 = vrot.slane %v1704_v50, 5  ;;  %v1712_v34 = vrot.slane %v1710_v36, 5  ;;  %13253 = vmatprep.subr.bf16.mxu1 %v13988_v63  ;;  %13431 = vmatprep.subr.bf16.mxu0 %v15182_v28 }
 0x16d   : > { %v1716_v32 = vrot.slane %v1714_v27, 4  ;;  %v2474_v30 = vsel %vm15104_vm15, %v2472_v1, %v2473_v17  ;;  %v1720_v15 = vshll.u32 %v15185_v53, 16  ;;  %v12108_v39 = vrot.slane %v2400_v14, 9 }
 0x16e   : > { %v1699_v38 = vsel %vm14584_vm8, %v1694_v18, %v1698_v23  ;;  %v12123_v42 = vcombine.low %v2471_v41, %v2474_v30  ;;  %v1707_v50 = vor.u32 %v1706_v5, %v1703_v60  ;;  %v2477_v27 = vrot.slane %v14983_v40, 5  ;;  %v15221_v30 = vld [vmem:[#allocation2 + $0x98] sm:$0x1] }
 0x16f   : > { %v12046_v35 = vcombine.low %v1689_v57, %v1699_v38  ;;  %v1717_v36 = vor.u32 %v1716_v32, %v1712_v34  ;;  %v1722_v56 = vrot.slane %v1720_v15, 5  ;;  %v2480_v23 = vrot.slane %v14988_v52, 5  ;;  %13254 = vmatpush3.bf16.msra.mxu1 %v13988_v63  ;;  %v2401_v32 = vld [vmem:[#allocation2 + $0x3c] sm:$0xe] }
 0x170   : > { %v1725_v17 = vshrl.u32 %v15194_v62, 16  ;;  %13296 = vmatmul.mubr.msk.bf16.gmra.mxu0 %vm1885_vm9, %v12123_v42  ;;  %v1708_v14 = vrot.slane %v1707_v50, 4  ;;  %v1728_v1 = vshll.u32 %v15194_v62, 16  ;;  %v1734_v41 = vshll.u32 %v15201_v59, 16  ;;  %13323 = vmatprep.subr.bf16.mxu1 %v15203_v21  ;;  %v15223_v42 = vld [vmem:[#allocation2 + $0x9c] sm:$0xf] }
 0x171   : > { %13239 = vmatprep.mubr.msk.bf16.mxu1 %vm1885_vm9, %v12046_v35  ;;  %v1718_v18 = vrot.slane %v1717_v36, 4  ;;  %v2478_v60 = vsel %vm15104_vm15, %v12108_v39, %v2477_v27  ;;  %v2479_v57 = vrot.slane %v2477_v27, 4  ;;  %v1738_v52 = vshrl.u32 %v15201_v59, 16 }
 0x172   : > { %v1727_v5 = vrot.slane %v1725_v17, 4  ;;  %v1713_v63 = vsel %vm14584_vm8, %v1708_v14, %v1712_v34  ;;  %v1730_v15 = vrot.slane %v1728_v1, 5  ;;  %v1736_v35 = vrot.slane %v1734_v41, 5  ;;  %v15229_v14 = vld [vmem:[#allocation2 + $0xa0] sm:$0xf] }
 0x173   : > { %v1723_v38 = vsel %vm14584_vm8, %v1718_v18, %v1722_v56  ;;  %v2481_v50 = vsel %vm15104_vm15, %v2479_v57, %v2480_v23  ;;  %v1740_v36 = vrot.slane %v1738_v52, 4  ;;  %v1744_v27 = vshll.u32 %v15221_v30, 16  ;;  %v2402_v52 = vld [vmem:[#allocation2 + $0x48] sm:$0xe] }
 0x174   : > { %v12047_v39 = vcombine.low %v1713_v63, %v1723_v38  ;;  %v12124_v17 = vcombine.low %v2478_v60, %v2481_v50  ;;  %v1731_v12 = vor.u32 %v1730_v15, %v1727_v5  ;;  %v12109_v29 = vrot.slane %v2401_v32, 9  ;;  %v15238_v63 = vld [vmem:[#allocation2 + $0xa4] sm:$0x1] }
 0x175   : > { %v2484_v34 = vrot.slane %v14997_v45, 5  ;;  %v1741_v56 = vor.u32 %v1740_v36, %v1736_v35  ;;  %v1746_v18 = vrot.slane %v1744_v27, 5  ;;  %v2487_v1 = vrot.slane %v15032_v33, 5  ;;  %v15247_v36 = vld [vmem:[#allocation2 + $0xa8] sm:$0xf] }
 0x176   : > { %13240 = vmatmul.mubr.msk.bf16.gmra.mxu1 %vm1885_vm9, %v12047_v39  ;;  %v1749_v41 = vshrl.u32 %v15223_v42, 16  ;;  %13299 = vmatprep.mubr.msk.bf16.mxu0 %vm1885_vm9, %v12124_v17  ;;  %v1732_v23 = vrot.slane %v1731_v12, 4  ;;  %v1752_v5 = vshll.u32 %v15223_v42, 16  ;;  %v1758_v15 = vshll.u32 %v15229_v14, 16 }
 0x177   : > { %v2485_v60 = vsel %vm15104_vm15, %v12109_v29, %v2484_v34  ;;  %v2486_v57 = vrot.slane %v2484_v34, 4  ;;  %v1742_v32 = vrot.slane %v1741_v56, 4  ;;  %v1762_v33 = vshrl.u32 %v15229_v14, 16 }
 0x178   : > { %v1751_v38 = vrot.slane %v1749_v41, 4  ;;  %v1737_v39 = vsel %vm14584_vm8, %v1732_v23, %v1736_v35  ;;  %v1754_v50 = vrot.slane %v1752_v5, 5  ;;  %v1768_v29 = vshll.u32 %v15238_v63, 16  ;;  %v15251_v41 = vld [vmem:[#allocation2 + $0xac] sm:$0xf] }
 0x179   : > { %v2488_v12 = vsel %vm15104_vm15, %v2486_v57, %v2487_v1  ;;  %v1747_v27 = vsel %vm14584_vm8, %v1742_v32, %v1746_v18  ;;  %v1760_v34 = vrot.slane %v1758_v15, 5  ;;  %v1764_v56 = vrot.slane %v1762_v33, 4  ;;  %v2403_v15 = vld [vmem:[#allocation2 + $0x54] sm:$0xe] }
 0x17a   : > { %v12125_v17 = vcombine.low %v2485_v60, %v2488_v12  ;;  %v12048_v8 = vcombine.low %v1737_v39, %v1747_v27  ;;  %v1755_v31 = vor.u32 %v1754_v50, %v1751_v38  ;;  %v1770_v22 = vrot.slane %v1768_v29, 5  ;;  %v15263_v12 = vld [vmem:[#allocation2 + $0xb0] sm:$0x1]  ;;  %v15267_v27 = vld [vmem:[#allocation2 + $0xb4] sm:$0xf] }
 0x17b   : > { %v12110_v35 = vrot.slane %v2402_v52, 9  ;;  %v1765_v1 = vor.u32 %v1764_v56, %v1760_v34  ;;  %v2491_v23 = vrot.slane %v15054_v11, 5  ;;  %v2494_v57 = vrot.slane %v15056_v10, 5 }
 0x17c   : > { %13300 = vmatmul.mubr.msk.bf16.gmra.mxu0 %vm1885_vm9, %v12125_v17  ;;  %v1773_v5 = vshrl.u32 %v15247_v36, 16  ;;  %13243 = vmatprep.mubr.msk.bf16.mxu1 %vm1885_vm9, %v12048_v8  ;;  %v1756_v18 = vrot.slane %v1755_v31, 4  ;;  %v1776_v60 = vshll.u32 %v15247_v36, 16  ;;  %v1782_v32 = vshll.u32 %v15251_v41, 16 }
 0x17d   : > { %v1786_v38 = vshrl.u32 %v15251_v41, 16  ;;  %v1766_v52 = vrot.slane %v1765_v1, 4  ;;  %v2492_v33 = vsel %vm15104_vm15, %v12110_v35, %v2491_v23  ;;  %v2493_v39 = vrot.slane %v2491_v23, 4  ;;  %v15274_v23 = vld [vmem:[#allocation2 + $0xb8] sm:$0xf] }
 0x17e   : > { %v1775_v10 = vrot.slane %v1773_v5, 4  ;;  %v1761_v50 = vsel %vm14584_vm8, %v1756_v18, %v1760_v34  ;;  %v1778_v8 = vrot.slane %v1776_v60, 5  ;;  %v1784_v31 = vrot.slane %v1782_v32, 5 }
 0x17f   : > { %v1788_v29 = vrot.slane %v1786_v38, 4  ;;  %v1771_v17 = vsel %vm14584_vm8, %v1766_v52, %v1770_v22  ;;  %v2495_v56 = vsel %vm15104_vm15, %v2493_v39, %v2494_v57  ;;  %v1792_v35 = vshll.u32 %v15263_v12, 16 }
 0x180   : > { %v12111_v1 = vrot.slane %v2403_v15, 9  ;;  %v12049_v5 = vcombine.low %v1761_v50, %v1771_v17  ;;  %v12126_v48 = vcombine.low %v2492_v33, %v2495_v56  ;;  %v1779_v55 = vor.u32 %v1778_v8, %v1775_v10  ;;  %v2404_v56 = vld [vmem:[#allocation2 + $0x60] sm:$0xe] }
 0x181   : > { %v1789_v34 = vor.u32 %v1788_v29, %v1784_v31  ;;  %v1794_v18 = vrot.slane %v1792_v35, 5  ;;  %v2498_v60 = vrot.slane %v15070_v0, 5  ;;  %v2501_v32 = vrot.slane %v15078_v6, 5  ;;  %v2405_v6 = vld [vmem:[#allocation2 + $0x6c] sm:$0xe] }
 0x182   : > { %v1797_v38 = vshrl.u32 %v15267_v27, 16  ;;  %13244 = vmatmul.mubr.msk.bf16.gmra.mxu1 %vm1885_vm9, %v12049_v5  ;;  %13303 = vmatprep.mubr.msk.bf16.mxu0 %vm1885_vm9, %v12126_v48  ;;  %v1780_v22 = vrot.slane %v1779_v55, 4  ;;  %v1800_v15 = vshll.u32 %v15267_v27, 16  ;;  %v1806_v52 = vshll.u32 %v15274_v23, 16  ;;  %v15290_v55 = vld [vmem:[#allocation2 + $0xbc] sm:$0x1] }
 0x183   : > { %v1790_v57 = vrot.slane %v1789_v34, 4  ;;  %v2499_v33 = vsel %vm15104_vm15, %v12111_v1, %v2498_v60  ;;  %v2500_v39 = vrot.slane %v2498_v60, 4  ;;  %v1810_v50 = vshrl.u32 %v15274_v23, 16 }
 0x184   : > { %v1799_v10 = vrot.slane %v1797_v38, 4  ;;  %v1785_v8 = vsel %vm14584_vm8, %v1780_v22, %v1784_v31  ;;  %v1802_v29 = vrot.slane %v1800_v15, 5  ;;  %v1808_v17 = vrot.slane %v1806_v52, 5  ;;  %v2406_v22 = vld [vmem:[#allocation2 + $0x78] sm:$0xe] }
 0x185   : > { %v1795_v48 = vsel %vm14584_vm8, %v1790_v57, %v1794_v18  ;;  %v2502_v1 = vsel %vm15104_vm15, %v2500_v39, %v2501_v32  ;;  %v1812_v5 = vrot.slane %v1810_v50, 4  ;;  %v1816_v34 = vshll.u32 %v15290_v55, 16  ;;  %v14141_v39 = vld [vmem:[#allocation2] sm:$0xf] }
 0x186   : > { %v12050_v35 = vcombine.low %v1785_v8, %v1795_v48  ;;  %v2508_v60 = vrot.slane %v15108_v54, 5  ;;  %v12127_v38 = vcombine.low %v2499_v33, %v2502_v1  ;;  %v1803_v61 = vor.u32 %v1802_v29, %v1799_v10 }
 0x187   : > { %v2505_v31 = vrot.slane %v15092_v26, 5  ;;  %v1813_v18 = vor.u32 %v1812_v5, %v1808_v17  ;;  %v1818_v57 = vrot.slane %v1816_v34, 5  ;;  %v12112_v15 = vrot.slane %v2404_v56, 9 }
 0x188   : > { %13247 = vmatprep.mubr.msk.bf16.mxu1 %vm1885_vm9, %v12050_v35  ;;  %v12113_v52 = vrot.slane %v2405_v6, 9  ;;  %13304 = vmatmul.mubr.msk.bf16.gmra.mxu0 %vm1885_vm9, %v12127_v38  ;;  %v1804_v8 = vrot.slane %v1803_v61, 4  ;;  %v12070_v50 = vcombine.low %v14141_v39, %v15098_v51  ;;  %v2512_v54 = vrot.slane %v15125_v46, 5  ;;  %v2407_v35 = vld [vmem:[#allocation2 + $0x84] sm:$0xe] }
 0x189   : > { %v2507_v32 = vrot.slane %v2505_v31, 4  ;;  %v1814_v33 = vrot.slane %v1813_v18, 4  ;;  %v2506_v10 = vsel %vm15104_vm15, %v12112_v15, %v2505_v31  ;;  %v2515_v48 = vrot.slane %v15145_v16, 5  ;;  %v2408_v38 = vld [vmem:[#allocation2 + $0x90] sm:$0xe] }
 0x18a   : > { %v12114_v29 = vrot.slane %v2406_v22, 9  ;;  %v1809_v6 = vsel %vm14584_vm8, %v1804_v8, %v1808_v17  ;;  %v2513_v56 = vsel %vm15104_vm15, %v12113_v52, %v2512_v54  ;;  %v2514_v51 = vrot.slane %v2512_v54, 4 }
 0x18b   : > { %v2509_v61 = vsel %vm15104_vm15, %v2507_v32, %v2508_v60  ;;  %v1819_v1 = vsel %vm14584_vm8, %v1814_v33, %v1818_v57  ;;  %v2519_v34 = vrot.slane %v15153_v20, 5  ;;  %v2522_v16 = vrot.slane %v15156_v25, 5  ;;  %v2409_v32 = vld [vmem:[#allocation2 + $0x9c] sm:$0xe] }
 0x18c   : > { %v12128_v5 = vcombine.low %v2506_v10, %v2509_v61  ;;  %v12051_v31 = vcombine.low %v1809_v6, %v1819_v1  ;;  %v2516_v17 = vsel %vm15104_vm15, %v2514_v51, %v2515_v48  ;;  %v12115_v22 = vrot.slane %v2407_v35, 9  ;;  %v14142_v10 = vld [vmem:[#allocation2 + $0xc] sm:$0xf]  ;;  %v14143_v48 = vld [vmem:[#allocation2 + $0x10] sm:$0xf] }
 0x18d   : > { %v2520_v60 = vsel %vm15104_vm15, %v12114_v29, %v2519_v34  ;;  %v2521_v18 = vrot.slane %v2519_v34, 4  ;;  %v2526_v15 = vrot.slane %v15175_v24, 5  ;;  %v12129_v57 = vcombine.low %v2513_v56, %v2516_v17  ;;  %v2410_v61 = vld [vmem:[#allocation2 + $0xa8] sm:$0xe]  ;;  %v14145_v34 = vld [vmem:[#allocation2 + $0x1c] sm:$0xf] }
 0x18e   : > { %13307 = vmatprep.mubr.msk.bf16.mxu0 %vm1885_vm9, %v12128_v5  ;;  %13248 = vmatmul.mubr.msk.bf16.gmra.mxu1 %vm1885_vm9, %v12051_v31  ;;  %v2529_v52 = vrot.slane %v15185_v53, 5  ;;  %v12116_v25 = vrot.slane %v2408_v38, 9  ;;  %v2533_v8 = vrot.slane %v15201_v59, 5  ;;  %v2536_v33 = vrot.slane %v15221_v30, 5  ;;  %v2411_v30 = vld [vmem:[#allocation2 + $0xb4] sm:$0xe] }
 0x18f   : > { %13255 = vmatprep.mubr.msk.bf16.mxu1 %vm1885_vm9, %v12070_v50  ;;  %v2523_v39 = vsel %vm15104_vm15, %v2521_v18, %v2522_v16  ;;  %v2528_v54 = vrot.slane %v2526_v15, 4  ;;  %v12071_v29 = vcombine.low %v14142_v10, %v14143_v48  ;;  %v2527_v53 = vsel %vm15104_vm15, %v12115_v22, %v2526_v15  ;;  %v14144_v5 = vld [vmem:[#allocation2 + $0x18] sm:$0xf]  ;;  %v15335_v38 = vld [vmem:[#allocation2 + $0x24] sm:$0xf] }
 0x190   : > { %13308 = vmatmul.mubr.msk.bf16.gmra.mxu0 %vm1885_vm9, %v12129_v57  ;;  %v12130_v35 = vcombine.low %v2520_v60, %v2523_v39  ;;  %v2535_v6 = vrot.slane %v2533_v8, 4  ;;  %v12117_v56 = vrot.slane %v2409_v32, 9  ;;  %v2540_v51 = vrot.slane %v15229_v14, 5  ;;  %v15337_v31 = vld [vmem:[#allocation2 + $0x28] sm:$0xf]  ;;  %v13995_v48 = vld [vmem:[#allocation7 + $0x30] sm:$0xff]  }
 0x191   : > { %v2530_v50 = vsel %vm15104_vm15, %v2528_v54, %v2529_v52  ;;  %v2543_v1 = vrot.slane %v15238_v63, 5  ;;  %v12072_v16 = vcombine.low %v14144_v5, %v14145_v34  ;;  %v2534_v22 = vsel %vm15104_vm15, %v12116_v25, %v2533_v8  ;;  %v15343_v60 = vld [vmem:[#allocation2 + $0x30] sm:$0xf]  ;;  %v3235_v32 = vld [vmem:[#allocation2 + $0xc] sm:$0xf] }
 0x192   : > { %13311 = vmatprep.mubr.msk.bf16.mxu0 %vm1885_vm9, %v12130_v35  ;;  %v2537_v18 = vsel %vm15104_vm15, %v2535_v6, %v2536_v33  ;;  %v2542_v15 = vrot.slane %v2540_v51, 4  ;;  %v12118_v57 = vrot.slane %v2410_v61, 9  ;;  %v2547_v52 = vrot.slane %v15251_v41, 5  ;;  %v3236_v8 = vld [vmem:[#allocation2 + $0x10] sm:$0xf] }
 0x193   : > { %v12131_v39 = vcombine.low %v2527_v53, %v2530_v50  ;;  %v12119_v10 = vrot.slane %v2411_v30, 9  ;;  %v2554_v25 = vrot.slane %v15274_v23, 5  ;;  %v15355_v35 = vsel %vm15104_vm15, %v12117_v56, %v2540_v51  ;;  %v3237_v34 = vld [vmem:[#allocation2 + $0x14] sm:$0x1]  ;;  %v3241_v63 = vld [vmem:[#allocation2 + $0x24] sm:$0xf] }
 0x194   : > { %v2544_v33 = vsel %vm15104_vm15, %v2542_v15, %v2543_v1  ;;  %v2549_v6 = vrot.slane %v2547_v52, 4  ;;  %v2550_v61 = vrot.slane %v15263_v12, 5  ;;  %v12132_v53 = vcombine.low %v2534_v22, %v2537_v18  ;;  %v3238_v15 = vld [vmem:[#allocation2 + $0x18] sm:$0xf]  ;;  %v15376_v18 = vld [vmem:[#allocation7 + $0x58] sm:$0xff]  }
 0x195   : > { %v2556_v30 = vrot.slane %v2554_v25, 4  ;;  %v2557_v5 = vrot.slane %v15290_v55, 5  ;;  %v2548_v56 = vsel %vm15104_vm15, %v12118_v57, %v2547_v52  ;;  %v3284_v51 = vshrl.u32 %v3235_v32, 16 }
 0x196   : > { %13256 = vmatmul.mubr.msk.bf16.vlgmr.msra.gmra.mxu1 %vm1885_vm9, %v12071_v29  ;;  %v3287_v1 = vshll.u32 %v3235_v32, 16  ;;  %v3293_v12 = vshll.u32 %v3236_v8, 16  ;;  %v12133_v29 = vcombine.low %v15355_v35, %v2544_v33  ;;  %v15372_v22 = vsel %vm15104_vm15, %v12119_v10, %v2554_v25 }
 0x197   : > { %13324 = vmatpush3.bf16.msra.mxu1 %v15203_v21  ;;  %13259 = vmatprep.mubr.msk.bf16.mxu1 %vm1885_vm9, %v12072_v16  ;;  %v3297_v55 = vshrl.u32 %v3236_v8, 16  ;;  %v3239_v16 = vld [vmem:[#allocation2 + $0x1c] sm:$0xf]  ;;  %v2551_v57 = vsel %vm15104_vm15, %v2549_v6, %v2550_v61  ;;  %v3286_v52 = vrot.slane %v3284_v51, 4  ;;  %v15383_v10 = vsel %vm15104_vm15, %v2556_v30, %v2557_v5  ;;  %v3242_v51 = vld [vmem:[#allocation2 + $0x28] sm:$0xf] }
 0x198   : > { %13312 = vmatmul.mubr.msk.bf16.gmra.mxu0 %vm1885_vm9, %v12131_v39  ;;  %13325 = vmatprep.subr.bf16.mxu1 %v13995_v48  ;;  %v3289_v32 = vrot.slane %v3287_v1, 5  ;;  %v3295_v39 = vrot.slane %v3293_v12, 5  ;;  %v3303_v35 = vshll.u32 %v3237_v34, 16  ;;  %v3308_v33 = vshrl.u32 %v3238_v15, 16 }
 0x199   : > { %13315 = vmatprep.mubr.msk.bf16.mxu0 %vm1885_vm9, %v12132_v53  ;;  %v3299_v25 = vrot.slane %v3297_v55, 4  ;;  %v3311_v21 = vshll.u32 %v3238_v15, 16  ;;  %v3317_v50 = vshll.u32 %v3239_v16, 16  ;;  %v3321_v54 = vshrl.u32 %v3239_v16, 16 }
 0x19a   : > { %v3290_v8 = vor.u32 %v3289_v32, %v3286_v52  ;;  %v12134_v53 = vcombine.low %v2548_v56, %v2551_v57  ;;  %v3310_v6 = vrot.slane %v3308_v33, 4  ;;  %v12079_v61 = vcombine.low %v15123_v4, %v15125_v46  ;;  %v3245_v33 = vld [vmem:[#allocation2 + $0x34] sm:$0xf] }
 0x19b   : > { %13326 = vmatpush3.bf16.msra.mxu1 %v13995_v48  ;;  %v3300_v17 = vor.u32 %v3299_v25, %v3295_v39  ;;  %v12135_v30 = vcombine.low %v15372_v22, %v15383_v10  ;;  %v3313_v5 = vrot.slane %v3311_v21, 5  ;;  %v3319_v34 = vrot.slane %v3317_v50, 5  ;;  %v3243_v21 = vld [vmem:[#allocation2 + $0x2c] sm:$0x1] }
 0x19c   : > { %13395 = vmatprep.subr.bf16.mxu1 %v15376_v18  ;;  %v3323_v1 = vrot.slane %v3321_v54, 4  ;;  %v20040_v48 = vcombine.low %v15335_v38, %v15337_v31  ;;  %v3305_v12 = vrot.slane %v3303_v35, 5  ;;  %v3332_v15 = vshrl.u32 %v3241_v63, 16 }
 0x19d   : > { %v3301_v56 = vrot.slane %v3300_v17, 4  ;;  %v3335_v55 = vshll.u32 %v3241_v63, 16  ;;  %v20041_v16 = vcombine.low %v15343_v60, %v14983_v40  ;;  %v3291_v57 = vrot.slane %v3290_v8, 4  ;;  %v3244_v17 = vld [vmem:[#allocation2 + $0x30] sm:$0xf] }
 0x19e   : > { %13260 = vmatmul.mubr.msk.bf16.gmra.mxu1 %vm1885_vm9, %v20040_v48  ;;  %v3324_v52 = vor.u32 %v3323_v1, %v3319_v34  ;;  %v3327_v22 = vshll.u32 %v3240_v43, 16  ;;  %v3341_v50 = vshll.u32 %v3242_v51, 16  ;;  %v3314_v54 = vor.u32 %v3313_v5, %v3310_v6 }
 0x19f   : > { %13263 = vmatprep.mubr.msk.bf16.mxu1 %vm1885_vm9, %v20041_v16  ;;  %v3334_v38 = vrot.slane %v3332_v15, 4  ;;  %v3337_v31 = vrot.slane %v3335_v55, 5  ;;  %v3345_v32 = vshrl.u32 %v3242_v51, 16  ;;  %v3306_v63 = vsel %vm14584_vm8, %v3301_v56, %v3305_v12  ;;  %v3246_v12 = vld [vmem:[#allocation2 + $0x38] sm:$0x1] }
 0x1a0   : > { %13316 = vmatmul.mubr.msk.bf16.gmra.mxu0 %vm1885_vm9, %v12133_v29  ;;  %v12078_v40 = vcombine.low %v15083_v37, %v15092_v26  ;;  %v3325_v60 = vrot.slane %v3324_v52, 4  ;;  %v3343_v10 = vrot.slane %v3341_v50, 5  ;;  %v3351_v35 = vshll.u32 %v3243_v21, 16  ;;  %v3247_v15 = vld [vmem:[#allocation2 + $0x3c] sm:$0xf] }
 0x1a1   : > { %13319 = vmatprep.mubr.msk.bf16.mxu0 %vm1885_vm9, %v12134_v53  ;;  %v3338_v43 = vor.u32 %v3337_v31, %v3334_v38  ;;  %v3347_v25 = vrot.slane %v3345_v32, 4  ;;  %v12080_v29 = vcombine.low %v15147_v58, %v15153_v20  ;;  %v3296_v8 = vsel %vm14584_vm8, %v3291_v57, %v3295_v39  ;;  %v3248_v50 = vld [vmem:[#allocation2 + $0x40] sm:$0xf] }
 0x1a2   : > { %v3329_v6 = vrot.slane %v3327_v22, 5  ;;  %v3356_v53 = vshrl.u32 %v3244_v17, 16  ;;  %v3359_v51 = vshll.u32 %v3244_v17, 16  ;;  %v12188_v5 = vcombine.low %v3296_v8, %v3306_v63  ;;  %v3249_v8 = vld [vmem:[#allocation2 + $0x44] sm:$0x1] }
 0x1a3   : > { %v3315_v1 = vrot.slane %v3314_v54, 4  ;;  %v3339_v48 = vrot.slane %v3338_v43, 4  ;;  %v3348_v56 = vor.u32 %v3347_v25, %v3343_v10  ;;  %v3365_v52 = vshll.u32 %v3245_v33, 16  ;;  %v14149_v37 = vld [vmem:[%s19879_s1] ss:$0 sm:$0xff] }
 0x1a4   : > { %v3358_v55 = vrot.slane %v3356_v53, 4  ;;  %v3361_v16 = vrot.slane %v3359_v51, 5  ;;  %v3369_v21 = vshrl.u32 %v3245_v33, 16  ;;  %v20042_v38 = vcombine.low %v14992_v13, %v14997_v45 }
 0x1a5   : > { %v3330_v39 = vsel %vm14584_vm8, %v3325_v60, %v3329_v6  ;;  %v3349_v57 = vrot.slane %v3348_v56, 4  ;;  %v3353_v22 = vrot.slane %v3351_v35, 5  ;;  %v12081_v54 = vcombine.low %v15170_v44, %v15175_v24  ;;  %v3250_v35 = vld [vmem:[#allocation2 + $0x48] sm:$0xf] }
 0x1a6   : > { %13264 = vmatmul.mubr.msk.bf16.gmra.mxu1 %vm1885_vm9, %v20042_v38  ;;  %v20043_v31 = vcombine.low %v15048_v2, %v15054_v11  ;;  %v15420_v32 = vrot.slane %v3365_v52, 5  ;;  %v3371_v17 = vrot.slane %v3369_v21, 4  ;;  %v3375_v63 = vshll.u32 %v3246_v12, 16 }
 0x1a7   : > { %v3380_v13 = vshrl.u32 %v3247_v15, 16  ;;  %v3320_v45 = vsel %vm14584_vm8, %v3315_v1, %v3319_v34  ;;  %v3354_v60 = vsel %vm14584_vm8, %v3349_v57, %v3353_v22  ;;  %v3383_v43 = vshll.u32 %v3247_v15, 16  ;;  %v15431_v1 = vld [vmem:[#allocation2 + $0x4c] sm:$0xf] }
 0x1a8   : > { %13267 = vmatprep.mubr.msk.bf16.mxu1 %vm1885_vm9, %v20043_v31  ;;  %13320 = vmatmul.mubr.msk.bf16.gmra.mxu0 %vm1885_vm9, %v12135_v30  ;;  %v3389_v25 = vshll.u32 %v3248_v50, 16  ;;  %v12189_v2 = vcombine.low %v3320_v45, %v3330_v39  ;;  %v3344_v11 = vsel %vm14584_vm8, %v3339_v48, %v3343_v10  ;;  %v3362_v33 = vor.u32 %v3361_v16, %v3358_v55  ;;  %v407_v16 = vld [vmem:[#allocation2 + $0xc0] sm:$0x1]  ;;  %v14014_v45 = vld [vmem:[#allocation7 + $0x60] sm:$0xff]  }
 0x1a9   : > { %13363 = vmatprep.mubr.msk.bf16.mxu0 %vm1885_vm9, %v12188_v5  ;;  %v3382_v6 = vrot.slane %v3380_v13, 4  ;;  %v3372_v30 = vor.u32 %v3371_v17, %v15420_v32  ;;  %v3385_v53 = vrot.slane %v3383_v43, 5  ;;  %v3393_v34 = vshrl.u32 %v3248_v50, 16  ;;  %v15435_v5 = vld [vmem:[#allocation2 + $0x50] sm:$0x1] }
 0x1aa   : > { %v3391_v51 = vrot.slane %v3389_v25, 5  ;;  %v12190_v56 = vcombine.low %v3344_v11, %v3354_v60  ;;  %v3377_v12 = vrot.slane %v3375_v63, 5  ;;  %v12082_v15 = vcombine.low %v15194_v62, %v15201_v59 }
 0x1ab   : > { %v3404_v52 = vshrl.u32 %v3250_v35, 16  ;;  %v3386_v21 = vor.u32 %v3385_v53, %v3382_v6  ;;  %v3395_v10 = vrot.slane %v3393_v34, 4  ;;  %v3399_v48 = vshll.u32 %v3249_v8, 16 }
 0x1ac   : > { %v3407_v55 = vshll.u32 %v3250_v35, 16  ;;  %v3363_v38 = vrot.slane %v3362_v33, 4  ;;  %v3413_v57 = vshll.u32 %v15431_v1, 16  ;;  %v3417_v50 = vshrl.u32 %v15431_v1, 16  ;;  %v15450_v35 = vpop.trf.xlu1 }
 0x1ad   : > { %v3406_v39 = vrot.slane %v3404_v52, 4  ;;  %v20044_v22 = vcombine.low %v15062_v7, %v15070_v0  ;;  %v3373_v31 = vrot.slane %v3372_v30, 4  ;;  %v3387_v17 = vrot.slane %v3386_v21, 4  ;;  %20045 = vst [vmem:[#allocation49_spill] sm:$0xff] %v15450_v35  ;;  %v3253_v0 = vld [vmem:[#allocation2 + $0x54] sm:$0xf] }
 0x1ae   : > { %v3396_v63 = vor.u32 %v3395_v10, %v3391_v51  ;;  %v3409_v13 = vrot.slane %v3407_v55, 5  ;;  %v15447_v60 = vrot.slane %v3413_v57, 5  ;;  %v3419_v43 = vrot.slane %v3417_v50, 4  ;;  %v15466_v30 = vld [vmem:[#allocation2 + $0x58] sm:$0xf] }
 0x1af   : > { %13268 = vmatmul.mubr.msk.bf16.gmra.mxu1 %vm1885_vm9, %v20044_v22  ;;  %v3423_v25 = vshll.u32 %v15435_v5, 16  ;;  %v408_v7 = vsel %vm14525_vm2, 0, %v407_v16  ;;  %v3401_v33 = vrot.slane %v3399_v48, 5  ;;  %v690_v26 = vmul.f32 %v14149_v37, %v15450_v35  ;;  %v15476_v21 = vld [vmem:[#allocation7 + $0x88] sm:$0xff]   ;;  %v463_v50 = vld [vmem:[#allocation2 + $0xc8] sm:$0x1] }
 0x1b0   : > { %13271 = vmatprep.mubr.msk.bf16.mxu1 %vm1885_vm9, %v12078_v40  ;;  %13364 = vmatmul.mubr.msk.bf16.vlgmr.msra.gmra.mxu0 %vm1885_vm9, %v12189_v2  ;;  %v3397_v11 = vrot.slane %v3396_v63, 4  ;;  %v3410_v8 = vor.u32 %v3409_v13, %v3406_v39  ;;  %409 = vst [vmem:[#allocation2 + $0xc0] sm:$0x1] %v408_v7  ;;  %v3368_v40 = vsel %vm14584_vm8, %v3363_v38, %v15420_v32  ;;  %v3428_v52 = vshrl.u32 %v3253_v0, 16  ;;  %v15480_v55 = vld [vmem:[#allocation2 + $0x5c] sm:$0x1] }
 0x1b1   : > { %13367 = vmatprep.mubr.msk.bf16.mxu0 %vm1885_vm9, %v12190_v56  ;;  %v3420_v6 = vor.u32 %v3419_v43, %v15447_v60  ;;  %v12083_v2 = vcombine.low %v15223_v42, %v15229_v14  ;;  %13432 = vmatpush3.bf16.msra.mxu0 %v15182_v28  ;;  %v3378_v53 = vsel %vm14584_vm8, %v3373_v31, %v3377_v12  ;;  %v14150_v56 = vld [vmem:[%s19879_s1 + $0x1] ss:$0 sm:$0xff]  ;;  %v3425_v28 = vrot.slane %v3423_v25, 5  ;;  %v15484_v43 = vpop.trf.xlu1 }
 0x1b2   : > { %v3402_v34 = vsel %vm14584_vm8, %v3397_v11, %v3401_v33  ;;  %v726_v32 = vadd.f32 %v14150_v56, %v690_v26  ;;  %13433 = vmatprep.subr.bf16.mxu0 %v14014_v45  ;;  %v3392_v10 = vsel %vm14584_vm8, %v3387_v17, %v3391_v51  ;;  %v3431_v12 = vshll.u32 %v3253_v0, 16  ;;  %20046 = vst [vmem:[#allocation50_spill] sm:$0xff] %v15484_v43  ;;  %v3256_v0 = vld [vmem:[#allocation2 + $0x60] sm:$0xf]  ;;  %v15502_v11 = vld [vmem:[#allocation2 + $0x64] sm:$0xf] }
 0x1b3   : > { %v3421_v48 = vrot.slane %v3420_v6, 4  ;;  %v3411_v16 = vrot.slane %v3410_v8, 4  ;;  %v3430_v39 = vrot.slane %v3428_v52, 4  ;;  %v3437_v57 = vshll.u32 %v15466_v30, 16  ;;  %v15512_v52 = vld [vmem:[#allocation2 + $0x68] sm:$0x1] }
 0x1b4   : > { %v758_v38 = vmax.f32 %v726_v32, 0.0  ;;  %v12191_v22 = vcombine.low %v3368_v40, %v3378_v53  ;;  %v12192_v31 = vcombine.low %v3392_v10, %v3402_v34  ;;  %v3433_v63 = vrot.slane %v3431_v12, 5 }
 0x1b5   : > { %v3441_v13 = vshrl.u32 %v15466_v30, 16  ;;  %13434 = vmatpush3.bf16.msra.mxu0 %v14014_v45  ;;  %v3426_v51 = vsel %vm14584_vm8, %v3421_v48, %v3425_v28  ;;  %v3439_v25 = vrot.slane %v3437_v57, 5  ;;  %v12084_v7 = vcombine.low %v15247_v36, %v15251_v41 }
 0x1b6   : > { %v12838_v17 = vpack.c.bf16 %v758_v38, %v758_v38  ;;  %13503 = vmatprep.subr.bf16.mxu0 %v15476_v21  ;;  %v3434_v45 = vor.u32 %v3433_v63, %v3430_v39  ;;  %v3447_v46 = vshll.u32 %v15480_v55, 16  ;;  %v3416_v33 = vsel %vm14584_vm8, %v3411_v16, %v15447_v60 }
 0x1b7   : > { %13272 = vmatmul.mubr.msk.bf16.gmra.mxu1 %vm1885_vm9, %v12079_v61  ;;  %v3443_v4 = vrot.slane %v3441_v13, 4  ;;  %v464_v61 = vsel %vm14536_vm5, 0, %v463_v50  ;;  %v691_v58 = vmul.f32 %v14149_v37, %v15484_v43  ;;  %v3452_v40 = vshrl.u32 %v3256_v0, 16  ;;  %v1286_v60 = vld [vmem:[#allocation2 + $0xc0] sm:$0xf] }
 0x1b8   : > { %13275 = vmatprep.mubr.msk.bf16.mxu1 %vm1885_vm9, %v12080_v29  ;;  %13368 = vmatmul.mubr.msk.bf16.gmra.mxu0 %vm1885_vm9, %v12191_v22  ;;  %v1114_v8 = vshrl.u32 %v12838_v17, 16  ;;  %v1117_v26 = vshll.u32 %v12838_v17, 16  ;;  %465 = vst [vmem:[#allocation2 + $0xc8] sm:$0x1] %v464_v61  ;;  %v3435_v20 = vrot.slane %v3434_v45, 4  ;;  %v3455_v6 = vshll.u32 %v3256_v0, 16 }
 0x1b9   : > { %13371 = vmatprep.mubr.msk.bf16.mxu0 %vm1885_vm9, %v12192_v31  ;;  %v3444_v29 = vor.u32 %v3443_v4, %v3439_v25  ;;  %v12193_v53 = vcombine.low %v3416_v33, %v3426_v51  ;;  %v727_v32 = vadd.f32 %v14150_v56, %v691_v58  ;;  %v3461_v10 = vshll.u32 %v15502_v11, 16  ;;  %v3259_v50 = vld [vmem:[#allocation2 + $0x6c] sm:$0xf]  ;;  %v15529_v0 = vld [vmem:[#allocation2 + $0x70] sm:$0xf] }
 0x1ba   : > { %v15510_v34 = vrot.slane %v1114_v8, 7  ;;  %v3449_v28 = vrot.slane %v3447_v46, 5  ;;  %v3454_v12 = vrot.slane %v3452_v40, 4  ;;  %v3457_v16 = vrot.slane %v3455_v6, 5  ;;  %v3262_v8 = vld [vmem:[#allocation2 + $0x78] sm:$0xf] }
 0x1bb   : > { %v3445_v48 = vrot.slane %v3444_v29, 4  ;;  %v3440_v39 = vsel %vm14584_vm8, %v3435_v20, %v3439_v25  ;;  %v759_v57 = vmax.f32 %v727_v32, 0.0  ;;  %v3463_v31 = vrot.slane %v3461_v10, 5  ;;  %v15878_v43 = vld [vmem:[#allocation2 + $0x38] sm:$0x1] }
 0x1bc   : > { %v1119_v37 = vor.u32 %v1117_v26, %v15510_v34  ;;  %v1120_v38 = vrot.slane %v15510_v34, 4  ;;  %v3458_v22 = vor.u32 %v3457_v16, %v3454_v12  ;;  %v3465_v63 = vshrl.u32 %v15502_v11, 16 }
 0x1bd   : > { %v3450_v56 = vsel %vm14584_vm8, %v3445_v48, %v3449_v28  ;;  %v12839_v17 = vpack.c.bf16 %v759_v57, %v759_v57  ;;  %v3471_v25 = vshll.u32 %v15512_v52, 16  ;;  %v12085_v44 = vcombine.low %v15267_v27, %v15274_v23  ;;  %v15594_v27 = vld [vmem:[#allocation2 + $0xa0] sm:$0xf] }
 0x1be   : > { %v1287_v13 = vsel %vm14691_vm10, %v1119_v37, %v1286_v60  ;;  %v12194_v51 = vcombine.low %v3440_v39, %v3450_v56  ;;  %v3459_v45 = vrot.slane %v3458_v22, 4  ;;  %v3467_v4 = vrot.slane %v3465_v63, 4  ;;  %v15546_v37 = vld [vmem:[#allocation2 + $0x7c] sm:$0xf]  ;;  %v3265_v22 = vld [vmem:[#allocation2 + $0x84] sm:$0xf] }
 0x1bf   : > { %13276 = vmatmul.mubr.msk.bf16.gmra.mxu1 %vm1885_vm9, %v12081_v54  ;;  %1288 = vst [vmem:[#allocation2 + $0xc0] sm:$0xf] %v1287_v13  ;;  %v3476_v24 = vshrl.u32 %v3259_v50, 16  ;;  %v1122_v54 = vshrl.u32 %v12839_v17, 16  ;;  %v1125_v46 = vshll.u32 %v12839_v17, 16  ;;  %v3473_v61 = vrot.slane %v3471_v25, 5 }
 0x1c0   : > { %13279 = vmatprep.mubr.msk.bf16.mxu1 %vm1885_vm9, %v12082_v15  ;;  %13372 = vmatmul.mubr.msk.bf16.gmra.mxu0 %vm1885_vm9, %v12193_v53  ;;  %v3479_v33 = vshll.u32 %v3259_v50, 16  ;;  %v3464_v62 = vsel %vm14584_vm8, %v3459_v45, %v3463_v31  ;;  %v3468_v59 = vor.u32 %v3467_v4, %v3463_v31  ;;  %v15541_v15 = vld [vmem:[#allocation2 + $0x74] sm:$0x1]  ;;  %v3485_v58 = vshll.u32 %v15529_v0, 16  ;;  %v1290_v53 = vld [vmem:[#allocation2 + $0xc8] sm:$0x1] }
 0x1c1   : > { %13375 = vmatprep.mubr.msk.bf16.mxu0 %vm1885_vm9, %v12194_v51  ;;  %v3478_v26 = vrot.slane %v3476_v24, 4  ;;  %v1124_v20 = vrot.slane %v1122_v54, 7  ;;  %v3489_v40 = vshrl.u32 %v15529_v0, 16  ;;  %v3495_v6 = vshll.u32 %v15541_v15, 16  ;;  %v15558_v25 = vld [vmem:[#allocation2 + $0x80] sm:$0x1] }
 0x1c2   : > { %v3481_v29 = vrot.slane %v3479_v33, 5  ;;  %v3469_v34 = vrot.slane %v3468_v59, 4  ;;  %v3487_v32 = vrot.slane %v3485_v58, 5  ;;  %v3500_v10 = vshrl.u32 %v3262_v8, 16  ;;  %v15567_v45 = vld [vmem:[#allocation2 + $0x88] sm:$0xf] }
 0x1c3   : > { %v3503_v60 = vshll.u32 %v3262_v8, 16  ;;  %v1127_v48 = vor.u32 %v1125_v46, %v1124_v20  ;;  %v1129_v28 = vrot.slane %v1124_v20, 4  ;;  %v3491_v16 = vrot.slane %v3489_v40, 4  ;;  %v15578_v40 = vld [vmem:[#allocation2 + $0x8c] sm:$0x1] }
 0x1c4   : > { %v3482_v12 = vor.u32 %v3481_v29, %v3478_v26  ;;  %v3474_v39 = vsel %vm14584_vm8, %v3469_v34, %v3473_v61  ;;  %v3497_v57 = vrot.slane %v3495_v6, 5  ;;  %v3502_v50 = vrot.slane %v3500_v10, 4  ;;  %v3268_v26 = vld [vmem:[#allocation2 + $0x90] sm:$0xf] }
 0x1c5   : > { %v3505_v56 = vrot.slane %v3503_v60, 5  ;;  %v1128_v63 = vsel %vm14713_vm12, %v1120_v38, %v1127_v48  ;;  %v1291_v13 = vsel %vm14525_vm2, %v1129_v28, %v1290_v53  ;;  %v12195_v51 = vcombine.low %v3464_v62, %v3474_v39  ;;  %v15581_v53 = vld [vmem:[#allocation2 + $0x94] sm:$0xf]  ;;  %v14002_v48 = vld [vmem:[#allocation2 + $0xc] sm:$0xff]  }
 0x1c6   : > { %v3483_v17 = vrot.slane %v3482_v12, 4  ;;  %1289 = vst.msk [vmem:[#allocation2 + $0xc4] sm:$0xf] %vm347_vm3, %v1128_v63  ;;  %1292 = vst [vmem:[#allocation2 + $0xc8] sm:$0x1] %v1291_v13  ;;  %v3492_v42 = vor.u32 %v3491_v16, %v3487_v32  ;;  %v3513_v38 = vshrl.u32 %v15546_v37, 16 }
 0x1c7   : > { %13280 = vmatmul.mubr.msk.bf16.gmra.mxu1 %vm1885_vm9, %v12083_v2  ;;  %v3506_v14 = vor.u32 %v3505_v56, %v3502_v50  ;;  %v3509_v2 = vshll.u32 %v15546_v37, 16  ;;  %v3519_v36 = vshll.u32 %v15558_v25, 16  ;;  %v3524_v41 = vshrl.u32 %v3265_v22, 16  ;;  %v3271_v63 = vld [vmem:[#allocation2 + $0x9c] sm:$0xf] }
 0x1c8   : > { %13283 = vmatprep.mubr.msk.bf16.mxu1 %vm1885_vm9, %v12084_v7  ;;  %13376 = vmatmul.mubr.msk.bf16.gmra.mxu0 %vm1885_vm9, %v12195_v51  ;;  %v3488_v4 = vsel %vm14584_vm8, %v3483_v17, %v3487_v32  ;;  %v3527_v7 = vshll.u32 %v3265_v22, 16  ;;  %v3493_v24 = vrot.slane %v3492_v42, 4  ;;  %v3515_v61 = vrot.slane %v3513_v38, 4 }
 0x1c9   : > { %v3507_v54 = vrot.slane %v3506_v14, 4  ;;  %v3511_v46 = vrot.slane %v3509_v2, 5  ;;  %v3521_v33 = vrot.slane %v3519_v36, 5  ;;  %v3526_v8 = vrot.slane %v3524_v41, 4  ;;  %v15598_v14 = vld [vmem:[#allocation2 + $0x98] sm:$0x1] }
 0x1ca   : > { %v3529_v62 = vrot.slane %v3527_v7, 5  ;;  %v3533_v59 = vshll.u32 %v15567_v45, 16  ;;  %v3498_v58 = vsel %vm14584_vm8, %v3493_v24, %v3497_v57  ;;  %v3537_v6 = vshrl.u32 %v15567_v45, 16 }
 0x1cb   : > { %v3512_v20 = vsel %vm14584_vm8, %v3507_v54, %v3511_v46  ;;  %v3516_v29 = vor.u32 %v3515_v61, %v3511_v46  ;;  %v12196_v34 = vcombine.low %v3488_v4, %v3498_v58  ;;  %v3543_v60 = vshll.u32 %v15578_v40, 16 }
 0x1cc   : > { %v3530_v32 = vor.u32 %v3529_v62, %v3526_v8  ;;  %v3535_v10 = vrot.slane %v3533_v59, 5  ;;  %v3539_v12 = vrot.slane %v3537_v6, 4  ;;  %v3548_v16 = vshrl.u32 %v3268_v26, 16  ;;  %v14004_v8 = vld [vmem:[#allocation2 + $0x18] sm:$0xff]  }
 0x1cd   : > { %v3517_v28 = vrot.slane %v3516_v29, 4  ;;  %v3551_v39 = vshll.u32 %v3268_v26, 16  ;;  %13379 = vmatprep.mubr.msk.bf16.mxu0 %vm1885_vm9, %v12196_v34  ;;  %v3545_v50 = vrot.slane %v3543_v60, 5  ;;  %v3557_v56 = vshll.u32 %v15581_v53, 16  ;;  %v15608_v34 = vld [vmem:[#allocation2 + $0xa4] sm:$0x1] }
 0x1ce   : > { %v3531_v57 = vrot.slane %v3530_v32, 4  ;;  %v3561_v22 = vshrl.u32 %v15581_v53, 16  ;;  %v3540_v51 = vor.u32 %v3539_v12, %v3535_v10  ;;  %v3550_v17 = vrot.slane %v3548_v16, 4  ;;  %v14015_v60 = vld [vmem:[#allocation7 + $0x50] sm:$0xff]  }
 0x1cf   : > { %13284 = vmatmul.mubr.msk.bf16.gmra.mxu1 %vm1885_vm9, %v12085_v44  ;;  %v3522_v13 = vsel %vm14584_vm8, %v3517_v28, %v3521_v33  ;;  %v3553_v42 = vrot.slane %v3551_v39, 5  ;;  %v3559_v2 = vrot.slane %v3557_v56, 5  ;;  %v3567_v41 = vshll.u32 %v15598_v14, 16  ;;  %v3274_v33 = vld [vmem:[#allocation2 + $0xa8] sm:$0xf] }
 0x1d0   : > { %13327 = vmatprep.mubr.msk.bf16.mxu1 %vm1885_vm9, %v14002_v48  ;;  %v12197_v23 = vcombine.low %v3512_v20, %v3522_v13  ;;  %v3536_v44 = vsel %vm14584_vm8, %v3531_v57, %v3535_v10  ;;  %v3563_v38 = vrot.slane %v3561_v22, 4  ;;  %v3541_v4 = vrot.slane %v3540_v51, 4  ;;  %v15606_v20 = vld [vmem:[#allocation2 + $0xac] sm:$0xf]  ;;  %v14005_v48 = vld [vmem:[#allocation2 + $0x24] sm:$0xff]  }
 0x1d1   : > { %v3554_v36 = vor.u32 %v3553_v42, %v3550_v17  ;;  %v3572_v7 = vshrl.u32 %v3271_v63, 16  ;;  %v3575_v54 = vshll.u32 %v3271_v63, 16  ;;  %v3581_v46 = vshll.u32 %v15594_v27, 16  ;;  %v3277_v63 = vld [vmem:[#allocation2 + $0xb4] sm:$0xf] }
 0x1d2   : > { %13380 = vmatmul.mubr.msk.bf16.gmra.mxu0 %vm1885_vm9, %v12197_v23  ;;  %v3564_v24 = vor.u32 %v3563_v38, %v3559_v2  ;;  %v3585_v61 = vshrl.u32 %v15594_v27, 16  ;;  %v3546_v62 = vsel %vm14584_vm8, %v3541_v4, %v3545_v50  ;;  %v3569_v26 = vrot.slane %v3567_v41, 5  ;;  %v15620_v42 = vld [vmem:[#allocation2 + $0xb0] sm:$0x1]  ;;  %v15625_v41 = vld [vmem:[#allocation7 + $0x78] sm:$0xff]  }
 0x1d3   : > { %v3555_v59 = vrot.slane %v3554_v36, 4  ;;  %v3574_v58 = vrot.slane %v3572_v7, 4  ;;  %v12198_v29 = vcombine.low %v3536_v44, %v3546_v62  ;;  %v3577_v32 = vrot.slane %v3575_v54, 5  ;;  %v15622_v44 = vld [vmem:[#allocation2 + $0xb8] sm:$0xf] }
 0x1d4   : > { %v3565_v6 = vrot.slane %v3564_v24, 4  ;;  %v3583_v10 = vrot.slane %v3581_v46, 5  ;;  %v3587_v12 = vrot.slane %v3585_v61, 4  ;;  %v3591_v16 = vshll.u32 %v15608_v34, 16  ;;  %v3280_v62 = vld [vmem:[#allocation2 + $0xc0] sm:$0xf] }
 0x1d5   : > { %v3560_v28 = vsel %vm14584_vm8, %v3555_v59, %v3559_v2  ;;  %v3596_v39 = vshrl.u32 %v3274_v33, 16  ;;  %13383 = vmatprep.mubr.msk.bf16.mxu0 %vm1885_vm9, %v12198_v29  ;;  %v3578_v50 = vor.u32 %v3577_v32, %v3574_v58  ;;  %v3599_v56 = vshll.u32 %v3274_v33, 16  ;;  %v14007_v32 = vld [vmem:[#allocation2 + $0x30] sm:$0xff]  }
 0x1d6   : > { %v3570_v57 = vsel %vm14584_vm8, %v3565_v6, %v3569_v26  ;;  %v3605_v22 = vshll.u32 %v15606_v20, 16  ;;  %v3588_v51 = vor.u32 %v3587_v12, %v3583_v10  ;;  %v3593_v17 = vrot.slane %v3591_v16, 5  ;;  %v15634_v6 = vld [vmem:[#allocation2 + $0xc4] sm:$0xf]  ;;  %v15636_v16 = vld [vmem:[#allocation2 + $0xbc] sm:$0x1] }
 0x1d7   : > { %13328 = vmatmul.mubr.msk.bf16.vlgmr.msra.gmra.mxu1 %vm1885_vm9, %v14004_v8  ;;  %v12199_v13 = vcombine.low %v3560_v28, %v3570_v57  ;;  %v3598_v23 = vrot.slane %v3596_v39, 4  ;;  %v3579_v2 = vrot.slane %v3578_v50, 4  ;;  %v3601_v38 = vrot.slane %v3599_v56, 5  ;;  %v14008_v39 = vld [vmem:[#allocation2 + $0x3c] sm:$0xff]  }
 0x1d8   : > { %13396 = vmatpush3.bf16.msra.mxu1 %v15376_v18  ;;  %13331 = vmatprep.mubr.msk.bf16.mxu1 %vm1885_vm9, %v14005_v48  ;;  %v3607_v4 = vrot.slane %v3605_v22, 5  ;;  %v3609_v36 = vshrl.u32 %v15606_v20, 16  ;;  %v3589_v7 = vrot.slane %v3588_v51, 4  ;;  %v3615_v18 = vshll.u32 %v15620_v42, 16 }
 0x1d9   : > { %13397 = vmatprep.subr.bf16.mxu1 %v14015_v60  ;;  %v3620_v24 = vshrl.u32 %v3277_v63, 16  ;;  %v3623_v54 = vshll.u32 %v3277_v63, 16  ;;  %v3584_v46 = vsel %vm14584_vm8, %v3579_v2, %v3583_v10  ;;  %v3602_v61 = vor.u32 %v3601_v38, %v3598_v23 }
 0x1da   : > { %13384 = vmatmul.mubr.msk.bf16.gmra.mxu0 %vm1885_vm9, %v12199_v13  ;;  %v3611_v33 = vrot.slane %v3609_v36, 4  ;;  %v3629_v8 = vshll.u32 %v15622_v44, 16  ;;  %v3594_v59 = vsel %vm14584_vm8, %v3589_v7, %v3593_v17  ;;  %v3617_v26 = vrot.slane %v3615_v18, 5  ;;  %v15645_v13 = vld [vmem:[#allocation2 + $0xc8] sm:$0x1] }
 0x1db   : > { %v3622_v58 = vrot.slane %v3620_v24, 4  ;;  %v3625_v29 = vrot.slane %v3623_v54, 5  ;;  %v12200_v48 = vcombine.low %v3584_v46, %v3594_v59  ;;  %v3603_v28 = vrot.slane %v3602_v61, 4 }
 0x1dc   : > { %13398 = vmatpush3.bf16.msra.mxu1 %v14015_v60  ;;  %v3612_v12 = vor.u32 %v3611_v33, %v3607_v4  ;;  %v3631_v10 = vrot.slane %v3629_v8, 5  ;;  %v3633_v50 = vshrl.u32 %v15622_v44, 16  ;;  %v3639_v56 = vshll.u32 %v15636_v16, 16 }
 0x1dd   : > { %13467 = vmatprep.subr.bf16.mxu1 %v15625_v41  ;;  %v3626_v57 = vor.u32 %v3625_v29, %v3622_v58  ;;  %v3644_v22 = vshrl.u32 %v3280_v62, 16  ;;  %13387 = vmatprep.mubr.msk.bf16.mxu0 %vm1885_vm9, %v12200_v48  ;;  %v3608_v60 = vsel %vm14584_vm8, %v3603_v28, %v3607_v4  ;;  %v3647_v51 = vshll.u32 %v3280_v62, 16  ;;  %v14009_v58 = vld [vmem:[#allocation2 + $0x48] sm:$0xff]   ;;  %v14010_v28 = vld [vmem:[#allocation2 + $0x54] sm:$0xff]  }
 0x1de   : > { %v3613_v63 = vrot.slane %v3612_v12, 4  ;;  %v3653_v17 = vshll.u32 %v15634_v6, 16  ;;  %v3635_v2 = vrot.slane %v3633_v50, 4  ;;  %v3657_v24 = vshrl.u32 %v15634_v6, 16 }
 0x1df   : > { %13332 = vmatmul.mubr.msk.bf16.gmra.mxu1 %vm1885_vm9, %v14007_v32  ;;  %v3627_v23 = vrot.slane %v3626_v57, 4  ;;  %v3646_v38 = vrot.slane %v3644_v22, 4  ;;  %v3649_v7 = vrot.slane %v3647_v51, 5  ;;  %v3641_v46 = vrot.slane %v3639_v56, 5  ;;  %v14012_v56 = vld [vmem:[#allocation2 + $0x18] sm:$0xff]  }
 0x1e0   : > { %13335 = vmatprep.mubr.msk.bf16.mxu1 %vm1885_vm9, %v14008_v39  ;;  %v3618_v36 = vsel %vm14584_vm8, %v3613_v63, %v3617_v26  ;;  %v3655_v18 = vrot.slane %v3653_v17, 5  ;;  %v3636_v4 = vor.u32 %v3635_v2, %v3631_v10  ;;  %v3663_v61 = vshll.u32 %v15645_v13, 16  ;;  %v3978_v22 = vld [vmem:[#allocation2 + $0x48] sm:$0xe]  ;;  %v410_v51 = vld [vmem:[#allocation2 + $0xcc] sm:$0x1] }
 0x1e1   : > { %v12201_v54 = vcombine.low %v3608_v60, %v3618_v36  ;;  %v3650_v33 = vor.u32 %v3649_v7, %v3646_v38  ;;  %v3659_v8 = vrot.slane %v3657_v24, 4  ;;  %v3632_v62 = vsel %vm14584_vm8, %v3627_v23, %v3631_v10  ;;  %v14011_v60 = vld [vmem:[#allocation2 + $0x60] sm:$0xff]   ;;  %v14013_v17 = vld [vmem:[#allocation2 + $0x6c] sm:$0xff]   ;;  %v3979_v2 = vld [vmem:[#allocation2 + $0x54] sm:$0xe] }
 0x1e2   : > { %v3637_v59 = vrot.slane %v3636_v4, 4  ;;  %v3665_v32 = vrot.slane %v3663_v61, 5  ;;  %v4074_v63 = vrot.slane %v15431_v1, 5  ;;  %v12227_v23 = vrot.slane %v3978_v22, 9  ;;  %v3980_v24 = vld [vmem:[#allocation2 + $0x60] sm:$0xe] }
 0x1e3   : > { %13388 = vmatmul.mubr.msk.bf16.gmra.mxu0 %vm1885_vm9, %v12201_v54  ;;  %v3651_v29 = vrot.slane %v3650_v33, 4  ;;  %v3660_v26 = vor.u32 %v3659_v8, %v3655_v18  ;;  %v4077_v36 = vrot.slane %v15435_v5, 5  ;;  %v4081_v7 = vrot.slane %v15466_v30, 5  ;;  %v3981_v54 = vld [vmem:[#allocation2 + $0x6c] sm:$0xe]  ;;  %v14016_v30 = vld [vmem:[#allocation2 + $0x24] sm:$0xff]  }
 0x1e4   : > { %v3642_v48 = vsel %vm14584_vm8, %v3637_v59, %v3641_v46  ;;  %v4076_v38 = vrot.slane %v4074_v63, 4  ;;  %v411_v1 = vsel %vm14525_vm2, 0, %v410_v51  ;;  %v12228_v46 = vrot.slane %v3979_v2, 9  ;;  %v14018_v59 = vld [vmem:[#allocation2 + $0x30] sm:$0xff]   ;;  %v14020_v2 = vld [vmem:[#allocation2 + $0x3c] sm:$0xff]  }
 0x1e5   : > { %v12202_v12 = vcombine.low %v3632_v62, %v3642_v48  ;;  %v3656_v39 = vsel %vm14584_vm8, %v3651_v29, %v3655_v18  ;;  %v3661_v57 = vrot.slane %v3660_v26, 4  ;;  %v15674_v18 = vsel %vm15104_vm15, %v12227_v23, %v4074_v63  ;;  %412 = vst [vmem:[#allocation2 + $0xcc] sm:$0x1] %v411_v1  ;;  %v14040_v62 = vld [vmem:[#allocation7 + $0x80] sm:$0xff]   ;;  %v15842_v51 = vld [vmem:[#allocation2 + $0x40] sm:$0xf] }
 0x1e6   : > { %v15680_v4 = vsel %vm15104_vm15, %v4076_v38, %v4077_v36  ;;  %v4083_v61 = vrot.slane %v4081_v7, 4  ;;  %v4084_v5 = vrot.slane %v15480_v55, 5  ;;  %v4088_v8 = vrot.slane %v15502_v11, 5  ;;  %v14041_v55 = vld [vmem:[#allocation7 + $0x70] sm:$0xff]  }
 0x1e7   : > { %13336 = vmatmul.mubr.msk.bf16.gmra.mxu1 %vm1885_vm9, %v14009_v58  ;;  %13391 = vmatprep.mubr.msk.bf16.mxu0 %vm1885_vm9, %v12202_v12  ;;  %v3666_v10 = vsel %vm14584_vm8, %v3661_v57, %v3665_v32  ;;  %v15688_v58 = vsel %vm15104_vm15, %v12228_v46, %v4081_v7  ;;  %v12229_v26 = vrot.slane %v3980_v24, 9  ;;  %v12230_v32 = vrot.slane %v3981_v54, 9  ;;  %v3982_v12 = vld [vmem:[#allocation2 + $0x78] sm:$0xe]  ;;  %v14022_v7 = vld [vmem:[#allocation2 + $0x48] sm:$0xff]  }
 0x1e8   : > { %13339 = vmatprep.mubr.msk.bf16.mxu1 %vm1885_vm9, %v14010_v28  ;;  %v12203_v50 = vcombine.low %v3656_v39, %v3666_v10  ;;  %v15692_v29 = vsel %vm15104_vm15, %v4083_v61, %v4084_v5  ;;  %v4090_v48 = vrot.slane %v4088_v8, 4  ;;  %v4091_v11 = vrot.slane %v15512_v52, 5  ;;  %v14017_v39 = vld [vmem:[#allocation2 + $0x78] sm:$0xff]   ;;  %v14019_v10 = vld [vmem:[#allocation2 + $0x84] sm:$0xff]   ;;  %v3984_v46 = vld [vmem:[#allocation2 + $0x90] sm:$0xe] }
 0x1e9   : > { %v4095_v28 = vrot.slane %v15529_v0, 5  ;;  %v4098_v57 = vrot.slane %v15541_v15, 5  ;;  %v12231_v15 = vrot.slane %v3982_v12, 9  ;;  %v4105_v23 = vrot.slane %v15558_v25, 5 }
 0x1ea   : > { %v15710_v52 = vsel %vm15104_vm15, %v4090_v48, %v4091_v11  ;;  %v4109_v54 = vrot.slane %v15567_v45, 5  ;;  %v4112_v61 = vrot.slane %v15578_v40, 5  ;;  %v3985_v40 = vld [vmem:[#allocation2 + $0x9c] sm:$0xe]  ;;  %v4116_v48 = vrot.slane %v15581_v53, 5 }
 0x1eb   : > { %13392 = vmatmul.mubr.msk.bf16.gmra.mxu0 %vm1885_vm9, %v12203_v50  ;;  %v15702_v50 = vpop.f32.mrf.mxu0  ;;  %v15714_v0 = vsel %vm15104_vm15, %v12230_v32, %v4095_v28  ;;  %v4097_v22 = vrot.slane %v4095_v28, 4  ;;  %v4119_v11 = vrot.slane %v15598_v14, 5  ;;  %v12234_v28 = vrot.slane %v3985_v40, 9  ;;  %v14031_v32 = vld [vmem:[#allocation2 + $0x84] sm:$0xff]  }
 0x1ec   : > { %13435 = vmatprep.mubr.msk.bf16.mxu0 %vm1885_vm9, %v14012_v56  ;;  %20048 = vst [vmem:[#allocation51_spill] sm:$0xff] %v15702_v50  ;;  %v15706_v56 = vsel %vm15104_vm15, %v12229_v26, %v4088_v8  ;;  %v14023_v8 = vld [vmem:[#allocation2 + $0x9c] sm:$0xff]   ;;  %v4133_v40 = vrot.slane %v15620_v42, 5 }
 0x1ed   : > { %v15722_v63 = vsel %vm15104_vm15, %v4097_v22, %v4098_v57  ;;  %v15728_v38 = vpop.f32.mrf.mxu0  ;;  %v14151_v57 = vld [vmem:[#allocation2 + $0x10] sm:$0xf]  ;;  %v14153_v42 = vld [vmem:[#allocation2 + $0x1c] sm:$0xf] }
 0x1ee   : > { %20049 = vst [vmem:[#allocation52_spill] sm:$0xff] %v15728_v38 }
 0x1ef   : > { %13340 = vmatmul.mubr.msk.bf16.gmra.mxu1 %vm1885_vm9, %v14011_v60  ;;  %v3983_v60 = vld [vmem:[#allocation2 + $0x84] sm:$0xe] }
 0x1f0   : > { %13343 = vmatprep.mubr.msk.bf16.mxu1 %vm1885_vm9, %v14013_v17  ;;  %v4102_v17 = vrot.slane %v15546_v37, 5  ;;  %v12232_v36 = vrot.slane %v3983_v60, 9  ;;  %v14021_v37 = vld [vmem:[#allocation2 + $0x90] sm:$0xff]   ;;  %v4123_v60 = vrot.slane %v15594_v27, 5  ;;  %v15836_v27 = vld [vmem:[#allocation2 + $0x28] sm:$0xf] }
 0x1f1   : > { %v19930_v33 = vrot.slane %v15836_v27, 5 }
 0x1f2   : > { %v15732_v1 = vsel %vm15104_vm15, %v12231_v15, %v4102_v17  ;;  %v4104_v24 = vrot.slane %v4102_v17, 4  ;;  %v15744_v5 = vsel %vm15104_vm15, %v12232_v36, %v4109_v54  ;;  %v4118_v15 = vrot.slane %v4116_v48, 4  ;;  %v3986_v17 = vld [vmem:[#allocation2 + $0xa8] sm:$0xe] }
 0x1f3   : > { %13436 = vmatmul.mubr.msk.bf16.vlgmr.msra.gmra.mxu0 %vm1885_vm9, %v14016_v30  ;;  %v4111_v30 = vrot.slane %v4109_v54, 4  ;;  %v15777_v36 = vsel %vm15104_vm15, %v12234_v28, %v4123_v60  ;;  %v3987_v54 = vld [vmem:[#allocation2 + $0xb4] sm:$0xe] }
 0x1f4   : > { %13439 = vmatprep.mubr.msk.bf16.mxu0 %vm1885_vm9, %v14018_v59  ;;  %13504 = vmatpush3.bf16.msra.mxu0 %v15476_v21  ;;  %v15740_v25 = vsel %vm15104_vm15, %v4104_v24, %v4105_v23  ;;  %v12233_v59 = vrot.slane %v3984_v46, 9  ;;  %v14026_v23 = vld [vmem:[#allocation2 + $0x60] sm:$0xff]   ;;  %v15773_v14 = vsel %vm15104_vm15, %v4118_v15, %v4119_v11  ;;  %20054 = vst [vmem:[#allocation57_spill] sm:$0xff] %v15777_v36  ;;  %v14025_v24 = vld [vmem:[#allocation2 + $0xa8] sm:$0xff]   ;;  %v14027_v46 = vld [vmem:[#allocation2 + $0xb4] sm:$0xff]  }
 0x1f5   : > { %13505 = vmatprep.subr.bf16.mxu0 %v14040_v62  ;;  %v15753_v26 = vsel %vm15104_vm15, %v4111_v30, %v4112_v61  ;;  %20053 = vst [vmem:[#allocation56_spill] sm:$0xff] %v15773_v14  ;;  %v3973_v30 = vld [vmem:[#allocation2 + $0xc] sm:$0xe]  ;;  %v14152_v11 = vld [vmem:[#allocation2 + $0x14] sm:$0x1] }
 0x1f6   : > { %v15764_v22 = vsel %vm15104_vm15, %v12233_v59, %v4116_v48  ;;  %v4130_v59 = vrot.slane %v15606_v20, 5  ;;  %v4042_v28 = vrot.slane %v14152_v11, 5  ;;  %v14154_v11 = vld [vmem:[#allocation2 + $0x28] sm:$0xf]  ;;  %v15845_v21 = vld [vmem:[#allocation2 + $0x34] sm:$0xf] }
 0x1f7   : > { %13344 = vmatmul.mubr.msk.bf16.gmra.mxu1 %vm1885_vm9, %v14017_v39  ;;  %v14024_v39 = vld [vmem:[#allocation2 + $0x54] sm:$0xff]   ;;  %v5573_v36 = vld [vmem:[#allocation2 + $0x84] sm:$0xe] }
 0x1f8   : > { %13347 = vmatprep.mubr.msk.bf16.mxu1 %vm1885_vm9, %v14019_v10  ;;  %13506 = vmatpush3.bf16.msra.mxu0 %v14040_v62  ;;  %v15746_v62 = vpop.f32.mrf.mxu0  ;;  %v4039_v10 = vrot.slane %v14151_v57, 5  ;;  %v4132_v15 = vrot.slane %v4130_v59, 4 }
 0x1f9   : > { %20050 = vst [vmem:[#allocation53_spill] sm:$0xff] %v15746_v62 }
 0x1fa   : > { %v15760_v12 = vpop.f32.mrf.mxu0  ;;  %v4041_v61 = vrot.slane %v4039_v10, 4 }
 0x1fb   : > { %13440 = vmatmul.mubr.msk.bf16.gmra.mxu0 %vm1885_vm9, %v14020_v2  ;;  %20051 = vst [vmem:[#allocation54_spill] sm:$0xff] %v15760_v12  ;;  %v4126_v2 = vrot.slane %v15608_v34, 5  ;;  %v12235_v34 = vrot.slane %v3986_v17, 9  ;;  %v3988_v17 = vld [vmem:[#allocation2 + $0xc0] sm:$0xe] }
 0x1fc   : > { %13443 = vmatprep.mubr.msk.bf16.mxu0 %vm1885_vm9, %v14022_v7  ;;  %v15769_v53 = vpop.f32.mrf.mxu0  ;;  %v4125_v7 = vrot.slane %v4123_v60, 4  ;;  %v4137_v60 = vrot.slane %v15622_v44, 5  ;;  %v4043_v20 = vsel %vm15104_vm15, %v4041_v61, %v4042_v28  ;;  %v12237_v28 = vrot.slane %v3988_v17, 9  ;;  %v3975_v17 = vld [vmem:[#allocation2 + $0x24] sm:$0xe] }
 0x1fd   : > { %20052 = vst [vmem:[#allocation55_spill] sm:$0xff] %v15769_v53  ;;  %v15796_v57 = vsel %vm15104_vm15, %v12235_v34, %v4130_v59  ;;  %v15804_v34 = vsel %vm15104_vm15, %v4132_v15, %v4133_v40  ;;  %v3974_v15 = vld [vmem:[#allocation2 + $0x18] sm:$0xe]  ;;  %v12224_v45 = vrot.slane %v3975_v17, 9  ;;  %v15854_v17 = vld [vmem:[#allocation2 + $0x40] sm:$0xf] }
 0x1fe   : > { %v15792_v48 = vpop.f32.mrf.mxu0  ;;  %20057 = vst [vmem:[#allocation60_spill] sm:$0xff] %v15796_v57  ;;  %20058 = vst [vmem:[#allocation61_spill] sm:$0xff] %v15804_v34  ;;  %v4139_v59 = vrot.slane %v4137_v60, 4  ;;  %v5647_v53 = vrot.slane %v15878_v43, 5 }
 0x1ff   : > { %13348 = vmatmul.mubr.msk.bf16.gmra.mxu1 %vm1885_vm9, %v14021_v37  ;;  %v15784_v37 = vsel %vm15104_vm15, %v4125_v7, %v4126_v2  ;;  %20056 = vst [vmem:[#allocation59_spill] sm:$0xff] %v15792_v48  ;;  %v12222_v2 = vrot.slane %v3973_v30, 9  ;;  %v4046_v7 = vrot.slane %v14153_v42, 5  ;;  %v14029_v42 = vld [vmem:[#allocation2 + $0xc0] sm:$0xff]   ;;  %v14036_v48 = vld [vmem:[#allocation2 + $0xa8] sm:$0xff]  }
 0x200   : > { %13351 = vmatprep.mubr.msk.bf16.mxu1 %vm1885_vm9, %v14023_v8  ;;  %20055 = vst [vmem:[#allocation58_spill] sm:$0xff] %v15784_v37  ;;  %v15813_v30 = vpop.f32.mrf.mxu0  ;;  %v14157_v8 = vld [vmem:[#allocation2 + $0x34] sm:$0xf] }
 0x201   : > { %v4040_v61 = vsel %vm15104_vm15, %v12222_v2, %v4039_v10  ;;  %20060 = vst [vmem:[#allocation63_spill] sm:$0xff] %v15813_v30  ;;  %v4144_v10 = vrot.slane %v15634_v6, 5  ;;  %v4147_v2 = vrot.slane %v15645_v13, 5  ;;  %v12223_v6 = vrot.slane %v3974_v15, 9 }
 0x202   : > { %v12238_v40 = vcombine.low %v4040_v61, %v4043_v20  ;;  %v15828_v20 = vpop.f32.mrf.mxu0 }
 0x203   : > { %13444 = vmatmul.mubr.msk.bf16.gmra.mxu0 %vm1885_vm9, %v14024_v39  ;;  %v12236_v39 = vrot.slane %v3987_v54, 9  ;;  %v4053_v54 = vrot.slane %v14154_v11, 5  ;;  %20062 = vst [vmem:[#allocation65_spill] sm:$0xff] %v15828_v20  ;;  %v15834_v61 = vsel %vm15104_vm15, %v12237_v28, %v4144_v10  ;;  %v4067_v28 = vrot.slane %v15842_v51, 5 }
 0x204   : > { %13447 = vmatprep.mubr.msk.bf16.mxu0 %vm1885_vm9, %v14026_v23  ;;  %v14028_v23 = vld [vmem:[#allocation2 + $0x6c] sm:$0xff]   ;;  %20063 = vst [vmem:[#allocation66_spill] sm:$0xff] %v15834_v61  ;;  %v4047_v51 = vsel %vm15104_vm15, %v12223_v6, %v4046_v7  ;;  %v3977_v6 = vld [vmem:[#allocation2 + $0x3c] sm:$0xe] }
 0x205   : > { %v15808_v44 = vsel %vm15104_vm15, %v12236_v39, %v4137_v60  ;;  %v4048_v60 = vrot.slane %v4046_v7, 4  ;;  %v4055_v11 = vrot.slane %v4053_v54, 4  ;;  %v15880_v7 = vld [vmem:[#allocation2 + $0x4c] sm:$0xf] }
 0x206   : > { %20059 = vst [vmem:[#allocation62_spill] sm:$0xff] %v15808_v44  ;;  %v5658_v12 = vrot.slane %v15880_v7, 5 }
 0x207   : > { %13352 = vmatmul.mubr.msk.bf16.gmra.mxu1 %vm1885_vm9, %v14025_v24  ;;  %v4140_v24 = vrot.slane %v15636_v16, 5  ;;  %v14156_v16 = vld [vmem:[#allocation2 + $0x2c] sm:$0x1] }
 0x208   : > { %13355 = vmatprep.mubr.msk.bf16.mxu1 %vm1885_vm9, %v14027_v46  ;;  %v14030_v46 = vld [vmem:[#allocation2 + $0x78] sm:$0xff]   ;;  %v4056_v13 = vrot.slane %v14156_v16, 5 }
 0x209   : > { %v15820_v39 = vsel %vm15104_vm15, %v4139_v59, %v4140_v24  ;;  %v15830_v59 = vld [vmem:[#allocation2 + $0x1c] sm:$0xf] }
 0x20a   : > { %20061 = vst [vmem:[#allocation64_spill] sm:$0xff] %v15820_v39  ;;  %v4057_v15 = vsel %vm15104_vm15, %v4055_v11, %v4056_v13  ;;  %v5564_v13 = vld [vmem:[#allocation2 + $0x18] sm:$0xe]  ;;  %v4884_v61 = vshll.u32 %v15830_v59, 16  ;;  %v14038_v39 = vld [vmem:[#allocation2 + $0xc0] sm:$0xff]  }
 0x20b   : > { %13448 = vmatmul.mubr.msk.bf16.gmra.mxu0 %vm1885_vm9, %v14028_v23  ;;  %v4146_v23 = vrot.slane %v4144_v10, 4  ;;  %v3976_v10 = vld [vmem:[#allocation2 + $0x30] sm:$0xe]  ;;  %v12340_v20 = vrot.slane %v5564_v13, 9 }
 0x20c   : > { %13451 = vmatprep.mubr.msk.bf16.mxu0 %vm1885_vm9, %v14030_v46  ;;  %v14155_v46 = vld [vmem:[#allocation2 + $0x20] sm:$0x1]  ;;  %v16005_v37 = vrot.slane %v4884_v61, 5  ;;  %v14039_v61 = vld [vmem:[#allocation2 + $0xcc] sm:$0xff]  }
 0x20d   : > { %v4049_v24 = vrot.slane %v14155_v46, 5  ;;  %v15840_v46 = vpop.f32.mrf.mxu0  ;;  %v15849_v16 = vsel %vm15104_vm15, %v4146_v23, %v4147_v2  ;;  %v4054_v23 = vsel %vm15104_vm15, %v12224_v45, %v4053_v54  ;;  %v14159_v45 = vld [vmem:[#allocation2 + $0x38] sm:$0x1] }
 0x20e   : > { %20064 = vst [vmem:[#allocation67_spill] sm:$0xff] %v15840_v46  ;;  %20065 = vst [vmem:[#allocation68_spill] sm:$0xff] %v15849_v16  ;;  %v12240_v35 = vcombine.low %v4054_v23, %v4057_v15  ;;  %v4063_v54 = vrot.slane %v14159_v45, 5  ;;  %v5565_v23 = vld [vmem:[#allocation2 + $0x24] sm:$0xe]  ;;  %v5633_v45 = vrot.slane %v15868_v19, 5 }
 0x20f   : > { %13356 = vmatmul.mubr.msk.bf16.gmra.mxu1 %vm1885_vm9, %v14029_v42  ;;  %v4060_v42 = vrot.slane %v14157_v8, 5  ;;  %v14033_v8 = vld [vmem:[#allocation2 + $0x90] sm:$0xff]   ;;  %v15866_v31 = vpop.f32.mrf.mxu0 }
 0x210   : > { %13399 = vmatprep.mubr.msk.bf16.mxu1 %vm1885_vm9, %v12238_v40  ;;  %v4050_v40 = vsel %vm15104_vm15, %v4048_v60, %v4049_v24  ;;  %v5630_v60 = vrot.slane %v15830_v59, 5  ;;  %v12225_v24 = vrot.slane %v3976_v10, 9  ;;  %20066 = vst [vmem:[#allocation69_spill] sm:$0xff] %v15866_v31  ;;  %v14160_v10 = vld [vmem:[#allocation2 + $0x44] sm:$0x1] }
 0x211   : > { %v12239_v2 = vcombine.low %v4047_v51, %v4050_v40  ;;  %v4062_v11 = vrot.slane %v4060_v42, 4  ;;  %v4070_v51 = vrot.slane %v14160_v10, 5  ;;  %v12226_v10 = vrot.slane %v3977_v6, 9  ;;  %v15893_v46 = vpop.f32.mrf.mxu0  ;;  %v5567_v6 = vld [vmem:[#allocation2 + $0x3c] sm:$0xe] }
 0x212   : > { %v5632_v40 = vrot.slane %v5630_v60, 4  ;;  %v4061_v15 = vsel %vm15104_vm15, %v12225_v24, %v4060_v42  ;;  %v15889_v42 = vld [vmem:[#allocation2 + $0x44] sm:$0x1]  ;;  %v14035_v24 = vld [vmem:[#allocation2 + $0x9c] sm:$0xff]   ;;  %20068 = vst [vmem:[#allocation70_spill] sm:$0xff] %v15893_v46 }
 0x213   : > { %13452 = vmatmul.mubr.msk.bf16.gmra.mxu0 %vm1885_vm9, %v14031_v32  ;;  %v4069_v32 = vrot.slane %v4067_v28, 4  ;;  %v4068_v13 = vsel %vm15104_vm15, %v12226_v10, %v4067_v28  ;;  %v15921_v28 = vld [vmem:[#allocation2 + $0x58] sm:$0xf] }
 0x214   : > { %13455 = vmatprep.mubr.msk.bf16.mxu0 %vm1885_vm9, %v14033_v8  ;;  %v15872_v8 = vld [vmem:[#allocation2 + $0x2c] sm:$0x1]  ;;  %20070 = vst [vmem:[#allocation71_spill] sm:$0xff] %v15921_v28  ;;  %v4826_v10 = vld [vmem:[#allocation2 + $0x18] sm:$0xf] }
 0x215   : > { %v4071_v31 = vsel %vm15104_vm15, %v4069_v32, %v4070_v51  ;;  %v15909_v51 = vsel %vm15104_vm15, %v12340_v20, %v5630_v60  ;;  %v15923_v60 = vpop.f32.mrf.mxu0  ;;  %v4875_v34 = vshrl.u32 %v4826_v10, 16  ;;  %v4878_v57 = vshll.u32 %v4826_v10, 16 }
 0x216   : > { %v12242_v20 = vcombine.low %v4068_v13, %v4071_v31  ;;  %20071 = vst [vmem:[#allocation72_spill] sm:$0xff] %v15923_v60  ;;  %v15948_v13 = vld [vmem:[#allocation2 + $0x70] sm:$0xf]  ;;  %v14037_v60 = vld [vmem:[#allocation2 + $0xb4] sm:$0xff]  }
 0x217   : > { %13400 = vmatmul.mubr.msk.bf16.vlgmr.msra.gmra.mxu1 %vm1885_vm9, %v12239_v2  ;;  %v4064_v2 = vsel %vm15104_vm15, %v4062_v11, %v4063_v54  ;;  %v5566_v11 = vld [vmem:[#allocation2 + $0x30] sm:$0xe]  ;;  %v20069_v54 = vrot.slane %v15854_v17, 5  ;;  %20076 = vst [vmem:[#allocation75_spill] sm:$0xff] %v15948_v13  ;;  %v5679_v16 = vrot.slane %v15948_v13, 5 }
 0x218   : > { %13468 = vmatpush3.bf16.msra.mxu1 %v15625_v41  ;;  %13403 = vmatprep.mubr.msk.bf16.mxu1 %vm1885_vm9, %v12240_v35  ;;  %v5639_v41 = vrot.slane %v19930_v33, 4  ;;  %v20067_v35 = vrot.slane %v15845_v21, 5  ;;  %v15899_v33 = vsel %vm15104_vm15, %v5632_v40, %v5633_v45  ;;  %v12241_v32 = vcombine.low %v4061_v15, %v4064_v2  ;;  %v5568_v45 = vld [vmem:[#allocation2 + $0x48] sm:$0xe] }
 0x219   : > { %13469 = vmatprep.subr.bf16.mxu1 %v14041_v55  ;;  %v5653_v30 = vrot.slane %v20069_v54, 4  ;;  %v5654_v40 = vrot.slane %v15889_v42, 5  ;;  %v12341_v54 = vrot.slane %v5565_v23, 9  ;;  %v12343_v2 = vrot.slane %v5567_v6, 9  ;;  %v15931_v23 = vld [vmem:[#allocation2 + $0x50] sm:$0x1] }
 0x21a   : > { %v5646_v3 = vrot.slane %v20067_v35, 4  ;;  %v5640_v35 = vrot.slane %v15872_v8, 5  ;;  %20072 = vst [vmem:[#allocation73_spill] sm:$0xff] %v15931_v23  ;;  %v5569_v6 = vld [vmem:[#allocation2 + $0x54] sm:$0xe] }
 0x21b   : > { %13456 = vmatmul.mubr.msk.bf16.gmra.mxu0 %vm1885_vm9, %v14035_v24  ;;  %v12342_v24 = vrot.slane %v5566_v11, 9  ;;  %v12345_v50 = vrot.slane %v5569_v6, 9 }
 0x21c   : > { %13470 = vmatpush3.bf16.msra.mxu1 %v14041_v55  ;;  %13459 = vmatprep.mubr.msk.bf16.mxu0 %vm1885_vm9, %v14036_v48  ;;  %v15915_v46 = vsel %vm15104_vm15, %v5639_v41, %v5640_v35  ;;  %v15919_v15 = vsel %vm15104_vm15, %v5646_v3, %v5647_v53  ;;  %v15929_v48 = vsel %vm15104_vm15, %v5653_v30, %v5654_v40  ;;  %v15933_v41 = vld [vmem:[#allocation2 + $0x64] sm:$0xf]  ;;  %v20074_v3 = vrot.slane %v15836_v27, 5  ;;  %v15966_v55 = vld [vmem:[#allocation2 + $0x74] sm:$0x1] }
 0x21d   : > { %20073 = vst [vmem:[#allocation74_spill] sm:$0xff] %v15933_v41  ;;  %v20075_v53 = vrot.slane %v15845_v21, 5  ;;  %v12344_v30 = vrot.slane %v5568_v45, 9  ;;  %v5660_v35 = vrot.slane %v5658_v12, 4  ;;  %v15963_v45 = vld [vmem:[#allocation2 + $0x5c] sm:$0x1] }
 0x21e   : > { %v15940_v31 = vsel %vm15104_vm15, %v12341_v54, %v20074_v3  ;;  %v20078_v3 = vrot.slane %v15854_v17, 5  ;;  %20079 = vst [vmem:[#allocation77_spill] sm:$0xff] %v15963_v45  ;;  %20080 = vst [vmem:[#allocation78_spill] sm:$0xff] %v15966_v55  ;;  %v5672_v62 = vrot.slane %v15933_v41, 5  ;;  %v4888_v40 = vshrl.u32 %v15830_v59, 16 }
 0x21f   : > { %13404 = vmatmul.mubr.msk.bf16.gmra.mxu1 %vm1885_vm9, %v12241_v32  ;;  %v15946_v11 = vsel %vm15104_vm15, %v12342_v24, %v20075_v53  ;;  %v15951_v32 = vpop.f32.mrf.mxu0  ;;  %v5665_v53 = vrot.slane %v15921_v28, 5  ;;  %v15974_v54 = vsel %vm15104_vm15, %v12344_v30, %v5658_v12  ;;  %v5572_v30 = vld [vmem:[#allocation2 + $0x78] sm:$0xe]  ;;  %v5668_v59 = vrot.slane %v15963_v45, 5  ;;  %v15998_v28 = vld [vmem:[#allocation2 + $0x80] sm:$0x1] }
 0x220   : > { %13407 = vmatprep.mubr.msk.bf16.mxu1 %vm1885_vm9, %v12242_v20  ;;  %20077 = vst [vmem:[#allocation76_spill] sm:$0xff] %v15951_v32  ;;  %v15961_v24 = vsel %vm15104_vm15, %v12343_v2, %v20078_v3  ;;  %v5571_v20 = vld [vmem:[#allocation2 + $0x6c] sm:$0xe]  ;;  %v15968_v32 = vld [vmem:[#allocation2 + $0x7c] sm:$0xf]  ;;  %v5661_v2 = vrot.slane %v15931_v23, 5 }
 0x221   : > { %20081 = vst [vmem:[#allocation79_spill] sm:$0xff] %v15968_v32  ;;  %v5570_v3 = vld [vmem:[#allocation2 + $0x60] sm:$0xe]  ;;  %v15978_v38 = vpop.f32.mrf.mxu0  ;;  %v5686_v44 = vrot.slane %v15968_v32, 5  ;;  %v5667_v13 = vrot.slane %v5665_v53, 4  ;;  %v12347_v10 = vrot.slane %v5571_v20, 9 }
 0x222   : > { %20082 = vst [vmem:[#allocation80_spill] sm:$0xff] %v15978_v38  ;;  %v15987_v12 = vsel %vm15104_vm15, %v5660_v35, %v5661_v2  ;;  %v15995_v38 = vsel %vm15104_vm15, %v12345_v50, %v5665_v53  ;;  %v12346_v41 = vrot.slane %v5570_v3, 9  ;;  %v5674_v35 = vrot.slane %v5672_v62, 4  ;;  %v4829_v32 = vld [vmem:[#allocation2 + $0x24] sm:$0xf] }
 0x223   : > { %13460 = vmatmul.mubr.msk.bf16.gmra.mxu0 %vm1885_vm9, %v14037_v60  ;;  %v15991_v6 = vpop.f32.mrf.mxu0  ;;  %v5675_v2 = vrot.slane %v15980_v9, 5  ;;  %v5682_v60 = vrot.slane %v15966_v55, 5  ;;  %v5681_v23 = vrot.slane %v5679_v16, 4  ;;  %v12348_v50 = vrot.slane %v5572_v30, 9  ;;  %v16007_v45 = vld [vmem:[#allocation2 + $0x88] sm:$0xf] }
 0x224   : > { %20084 = vst [vmem:[#allocation82_spill] sm:$0xff] %v15991_v6  ;;  %13463 = vmatprep.mubr.msk.bf16.mxu0 %vm1885_vm9, %v14038_v39  ;;  %v4890_v53 = vrot.slane %v4888_v40, 4  ;;  %v20086_v3 = vcombine.low %v15674_v18, %v15680_v4  ;;  %v5688_v39 = vrot.slane %v5686_v44, 4  ;;  %v5689_v20 = vrot.slane %v15998_v28, 5 }
 0x225   : > { %v16003_v6 = vpop.f32.mrf.mxu0  ;;  %v4877_v9 = vrot.slane %v4875_v34, 4  ;;  %v4880_v55 = vrot.slane %v4878_v57, 5  ;;  %v4899_v30 = vshrl.u32 %v4829_v32, 16  ;;  %v4902_v14 = vshll.u32 %v4829_v32, 16 }
 0x226   : > { %20085 = vst [vmem:[#allocation83_spill] sm:$0xff] %v16003_v6  ;;  %v20087_v6 = vcombine.low %v15688_v58, %v15692_v29  ;;  %v4908_v18 = vshll.u32 %v15836_v27, 16  ;;  %v4912_v4 = vshrl.u32 %v15836_v27, 16  ;;  %v16028_v57 = vsel %vm15104_vm15, %v12346_v41, %v5672_v62 }
 0x227   : > { %13408 = vmatmul.mubr.msk.bf16.gmra.mxu1 %vm1885_vm9, %v20086_v3  ;;  %v16018_v40 = vpop.f32.mrf.mxu0  ;;  %v16024_v3 = vsel %vm15104_vm15, %v5667_v13, %v5668_v59  ;;  %v16032_v58 = vsel %vm15104_vm15, %v5674_v35, %v5675_v2  ;;  %v16036_v29 = vsel %vm15104_vm15, %v12347_v10, %v5679_v16  ;;  %v16042_v27 = vsel %vm15104_vm15, %v5681_v23, %v5682_v60  ;;  %v16057_v35 = vld [vmem:[#allocation2 + $0x8c] sm:$0x1] }
 0x228   : > { %13411 = vmatprep.mubr.msk.bf16.mxu1 %vm1885_vm9, %v20087_v6  ;;  %v16046_v13 = vsel %vm15104_vm15, %v12348_v50, %v5686_v44  ;;  %v4891_v62 = vor.u32 %v4890_v53, %v16005_v37  ;;  %v5693_v41 = vrot.slane %v16007_v45, 5  ;;  %v16054_v16 = vsel %vm15104_vm15, %v5688_v39, %v5689_v20  ;;  %v16078_v39 = vld [vmem:[#allocation2 + $0x94] sm:$0xf] }
 0x229   : > { %v16038_v34 = vpop.f32.mrf.mxu0  ;;  %v4881_v6 = vor.u32 %v4880_v55, %v4877_v9  ;;  %v4894_v59 = vshll.u32 %v15868_v19, 16  ;;  %v12349_v23 = vrot.slane %v5573_v36, 9  ;;  %v4901_v2 = vrot.slane %v4899_v30, 4  ;;  %v5574_v36 = vld [vmem:[#allocation2 + $0x90] sm:$0xe] }
 0x22a   : > { %v16050_v32 = vpop.f32.mrf.mxu1  ;;  %v4904_v10 = vrot.slane %v4902_v14, 5  ;;  %v16062_v60 = vrot.slane %v4908_v18, 5  ;;  %v4914_v50 = vrot.slane %v4912_v4, 4  ;;  %v20090_v53 = vcombine.low %v15909_v51, %v15899_v33  ;;  %v4832_v18 = vld [vmem:[#allocation2 + $0x30] sm:$0xf] }
 0x22b   : > { %20088 = vst [vmem:[#allocation84_spill] sm:$0xff] %v16050_v32  ;;  %13464 = vmatmul.mubr.msk.bf16.gmra.mxu0 %vm1885_vm9, %v14039_v61  ;;  %v16060_v44 = vpop.f32.mrf.mxu0  ;;  %v4892_v51 = vrot.slane %v4891_v62, 4  ;;  %v5695_v61 = vrot.slane %v5693_v41, 4  ;;  %v5696_v30 = vrot.slane %v16057_v35, 5  ;;  %v20093_v4 = vcombine.low %v15706_v56, %v15710_v52 }
 0x22c   : > { %20089 = vst [vmem:[#allocation85_spill] sm:$0xff] %v16060_v44  ;;  %13507 = vmatprep.mubr.msk.bf16.mxu0 %vm1885_vm9, %v20090_v53  ;;  %v16068_v9 = vpop.f32.mrf.mxu1  ;;  %v4882_v14 = vrot.slane %v4881_v6, 4  ;;  %v4896_v55 = vrot.slane %v4894_v59, 5  ;;  %v4932_v19 = vshll.u32 %v15845_v21, 16  ;;  %v20095_v62 = vcombine.low %v15714_v0, %v15722_v63  ;;  %v4835_v59 = vld [vmem:[#allocation2 + $0x3c] sm:$0xf] }
 0x22d   : > { %20091 = vst [vmem:[#allocation86_spill] sm:$0xff] %v16068_v9  ;;  %v16080_v20 = vpop.f32.mrf.mxu0  ;;  %v4936_v9 = vshrl.u32 %v15845_v21, 16  ;;  %v16099_v33 = vsel %vm15104_vm15, %v12349_v23, %v5693_v41  ;;  %v4905_v56 = vor.u32 %v4904_v10, %v4901_v2  ;;  %v4915_v52 = vor.u32 %v4914_v50, %v16062_v60 }
 0x22e   : > { %20092 = vst [vmem:[#allocation87_spill] sm:$0xff] %v16080_v20  ;;  %v16089_v53 = vpop.f32.mrf.mxu1  ;;  %v5700_v6 = vrot.slane %v16078_v39, 5  ;;  %v4923_v21 = vshrl.u32 %v4832_v18, 16  ;;  %v4926_v32 = vshll.u32 %v4832_v18, 16  ;;  %v4956_v0 = vshll.u32 %v15854_v17, 16 }
 0x22f   : > { %13412 = vmatmul.mubr.msk.bf16.gmra.mxu1 %vm1885_vm9, %v20093_v4  ;;  %20094 = vst [vmem:[#allocation88_spill] sm:$0xff] %v16089_v53  ;;  %v16105_v53 = vld [vmem:[#allocation2 + $0x98] sm:$0x1]  ;;  %v4960_v63 = vshrl.u32 %v15854_v17, 16  ;;  %v4897_v41 = vsel %vm14584_vm8, %v4892_v51, %v4896_v55  ;;  %v16115_v23 = vsel %vm15104_vm15, %v5695_v61, %v5696_v30  ;;  %v4918_v2 = vshll.u32 %v15872_v8, 16 }
 0x230   : > { %13415 = vmatprep.mubr.msk.bf16.mxu1 %vm1885_vm9, %v20095_v62  ;;  %v16103_v4 = vpop.f32.mrf.mxu0  ;;  %v16109_v62 = vpop.f32.mrf.mxu1  ;;  %v12350_v10 = vrot.slane %v5574_v36, 9  ;;  %v4938_v18 = vrot.slane %v4936_v9, 4  ;;  %v16122_v20 = vld [vmem:[#allocation2 + $0xa0] sm:$0xf]  ;;  %v4947_v17 = vshrl.u32 %v4835_v59, 16  ;;  %v4950_v44 = vshll.u32 %v4835_v59, 16 }
 0x231   : > { %20096 = vst [vmem:[#allocation89_spill] sm:$0xff] %v16103_v4  ;;  %20097 = vst [vmem:[#allocation90_spill] sm:$0xff] %v16109_v62  ;;  %v16120_v4 = vrot.slane %v4932_v19, 5  ;;  %v20099_v62 = vcombine.low %v15940_v31, %v15915_v46  ;;  %v4906_v55 = vrot.slane %v4905_v56, 4  ;;  %v4916_v51 = vrot.slane %v4915_v52, 4 }
 0x232   : > { %v16118_v50 = vpop.f32.mrf.mxu0  ;;  %v5702_v61 = vrot.slane %v5700_v6, 4  ;;  %v5703_v8 = vrot.slane %v16105_v53, 5  ;;  %v20100_v36 = vcombine.low %v15946_v11, %v15919_v15  ;;  %v4925_v19 = vrot.slane %v4923_v21, 4  ;;  %v16137_v46 = vld [vmem:[#allocation2 + $0xac] sm:$0xf] }
 0x233   : > { %20098 = vst [vmem:[#allocation91_spill] sm:$0xff] %v16118_v50  ;;  %13508 = vmatmul.mubr.msk.bf16.vlgmr.msra.gmra.mxu0 %vm1885_vm9, %v20099_v62  ;;  %v4928_v30 = vrot.slane %v4926_v32, 5  ;;  %v16135_v59 = vrot.slane %v4956_v0, 5  ;;  %v4962_v50 = vrot.slane %v4960_v63, 4  ;;  %v4887_v56 = vsel %vm14584_vm8, %v4882_v14, %v16005_v37  ;;  %v16147_v52 = vld [vmem:[#allocation2 + $0xa4] sm:$0x1] }
 0x234   : > { %13511 = vmatprep.mubr.msk.bf16.mxu0 %vm1885_vm9, %v20100_v36  ;;  %v16133_v9 = vpop.f32.mrf.mxu0  ;;  %v4942_v11 = vshll.u32 %v15878_v43, 16  ;;  %v5707_v32 = vrot.slane %v16122_v20, 5  ;;  %v20102_v21 = vcombine.low %v15732_v1, %v15740_v25  ;;  %v4920_v0 = vrot.slane %v4918_v2, 5  ;;  %v5575_v62 = vld [vmem:[#allocation2 + $0x9c] sm:$0xe] }
 0x235   : > { %v4939_v63 = vor.u32 %v4938_v18, %v16120_v4  ;;  %v4949_v36 = vrot.slane %v4947_v17, 4  ;;  %v4952_v37 = vrot.slane %v4950_v44, 5  ;;  %v20103_v14 = vcombine.low %v15744_v5, %v15753_v26  ;;  %v5576_v44 = vld [vmem:[#allocation2 + $0xa8] sm:$0xe]  ;;  %v16180_v17 = vld [vmem:[#allocation2 + $0xb0] sm:$0x1] }
 0x236   : > { %v16139_v31 = vpop.f32.mrf.mxu1  ;;  %v16161_v15 = vpop.f32.mrf.mxu0  ;;  %v4911_v1 = vsel %vm14584_vm8, %v4906_v55, %v16062_v60  ;;  %v16170_v25 = vsel %vm15104_vm15, %v12350_v10, %v5700_v6  ;;  %v5714_v2 = vrot.slane %v16137_v46, 5  ;;  %v4921_v5 = vsel %vm14584_vm8, %v4916_v51, %v4920_v0  ;;  %20105 = vst [vmem:[#allocation94_spill] sm:$0xff] %v16180_v17  ;;  %v4838_v60 = vld [vmem:[#allocation2 + $0x48] sm:$0xf] }
 0x237   : > { %20101 = vst [vmem:[#allocation92_spill] sm:$0xff] %v16139_v31  ;;  %13416 = vmatmul.mubr.msk.bf16.gmra.mxu1 %vm1885_vm9, %v20102_v21  ;;  %v16163_v31 = vcombine.low %v4887_v56, %v4897_v41  ;;  %v16177_v26 = vsel %vm15104_vm15, %v5702_v61, %v5703_v8  ;;  %v4929_v41 = vor.u32 %v4928_v30, %v4925_v19  ;;  %v4944_v55 = vrot.slane %v4942_v11, 5 }
 0x238   : > { %13419 = vmatprep.mubr.msk.bf16.mxu1 %vm1885_vm9, %v20103_v14  ;;  %v16159_v43 = vpop.f32.mrf.mxu1  ;;  %v4963_v18 = vor.u32 %v4962_v50, %v16135_v59  ;;  %v12351_v56 = vrot.slane %v5575_v62, 9  ;;  %v5709_v6 = vrot.slane %v5707_v32, 4  ;;  %v5710_v10 = vrot.slane %v16147_v52, 5 }
 0x239   : > { %20104 = vst [vmem:[#allocation93_spill] sm:$0xff] %v16159_v43  ;;  %v4940_v14 = vrot.slane %v4939_v63, 4  ;;  %v4953_v43 = vor.u32 %v4952_v37, %v4949_v36  ;;  %v4966_v51 = vshll.u32 %v15889_v42, 16  ;;  %v12352_v0 = vrot.slane %v5576_v44, 9 }
 0x23a   : > { %v16183_v21 = vpop.f32.mrf.mxu1  ;;  %v20107_v61 = vcombine.low %v15961_v24, %v15929_v48  ;;  %v5716_v8 = vrot.slane %v5714_v2, 4  ;;  %v5717_v19 = vrot.slane %v16180_v17, 5  ;;  %v4971_v30 = vshrl.u32 %v4838_v60, 16 }
 0x23b   : > { %20106 = vst [vmem:[#allocation95_spill] sm:$0xff] %v16183_v21  ;;  %v4974_v11 = vshll.u32 %v4838_v60, 16  ;;  %v20109_v62 = vcombine.low %v15974_v54, %v15987_v12  ;;  %v4930_v63 = vrot.slane %v4929_v41, 4  ;;  %v4964_v42 = vrot.slane %v4963_v18, 4  ;;  %v20111_v12 = vld [vmem:[#allocation56_spill] sm:$0xff] }
 0x23c   : > { %13512 = vmatmul.mubr.msk.bf16.gmra.mxu0 %vm1885_vm9, %v20107_v61  ;;  %v16190_v50 = vpop.f32.mrf.mxu0  ;;  %v4980_v36 = vshll.u32 %v15880_v7, 16  ;;  %v4984_v48 = vshrl.u32 %v15880_v7, 16  ;;  %v16201_v37 = vcombine.low %v4911_v1, %v4921_v5  ;;  %v16207_v60 = vsel %vm15104_vm15, %v12351_v56, %v5707_v32  ;;  %v16217_v7 = vpop.f32.mrf.mxu1  ;;  %v20114_v56 = vld [vmem:[#allocation57_spill] sm:$0xff]  ;;  %v20115_v61 = vld [vmem:[#allocation58_spill] sm:$0xff] }
 0x23d   : > { %20108 = vst [vmem:[#allocation96_spill] sm:$0xff] %v16190_v50  ;;  %13515 = vmatprep.mubr.msk.bf16.mxu0 %vm1885_vm9, %v20109_v62  ;;  %v16211_v54 = vsel %vm15104_vm15, %v5709_v6, %v5710_v10  ;;  %v20112_v41 = vcombine.low %v15764_v22, %v20111_v12  ;;  %20113 = vst [vmem:[#allocation56_spill] sm:$0xff] %v16217_v7  ;;  %v4945_v1 = vsel %vm14584_vm8, %v4940_v14, %v4944_v55  ;;  %v20117_v12 = vld [vmem:[#allocation73_spill] sm:$0xff] }
 0x23e   : > { %v16199_v24 = vpop.f32.mrf.mxu0  ;;  %v4954_v5 = vrot.slane %v4953_v43, 4  ;;  %v4968_v18 = vrot.slane %v4966_v51, 5  ;;  %v16223_v32 = vsel %vm15104_vm15, %v12352_v0, %v5714_v2  ;;  %v20116_v6 = vcombine.low %v20114_v56, %v20115_v61  ;;  %v5577_v0 = vld [vmem:[#allocation2 + $0xb4] sm:$0xe] }
 0x23f   : > { %20110 = vst [vmem:[#allocation97_spill] sm:$0xff] %v16199_v24  ;;  %13420 = vmatmul.mubr.msk.bf16.gmra.mxu1 %vm1885_vm9, %v20112_v41  ;;  %v16231_v22 = vsel %vm15104_vm15, %v5716_v8, %v5717_v19  ;;  %v4973_v10 = vrot.slane %v4971_v30, 4  ;;  %v4976_v62 = vrot.slane %v4974_v11, 5  ;;  %v4990_v41 = vshll.u32 %v20117_v12, 16  ;;  %v16247_v19 = vld [vmem:[#allocation2 + $0xb8] sm:$0xf] }
 0x240   : > { %13423 = vmatprep.mubr.msk.bf16.mxu1 %vm1885_vm9, %v20116_v6  ;;  %v16234_v55 = vpop.f32.mrf.mxu0  ;;  %v4935_v43 = vsel %vm14584_vm8, %v4930_v63, %v16120_v4  ;;  %v4969_v2 = vsel %vm14584_vm8, %v4964_v42, %v4968_v18  ;;  %v16241_v14 = vrot.slane %v4980_v36, 5  ;;  %v4986_v51 = vrot.slane %v4984_v48, 4  ;;  %20119 = vst [vmem:[#allocation58_spill] sm:$0xff] %v16247_v19  ;;  %v4841_v30 = vld [vmem:[#allocation2 + $0x54] sm:$0xf]  ;;  %v20120_v11 = vld [vmem:[#allocation71_spill] sm:$0xff] }
 0x241   : > { %20118 = vst [vmem:[#allocation57_spill] sm:$0xff] %v16234_v55  ;;  %v16243_v56 = vcombine.low %v4935_v43, %v4945_v1  ;;  %v5004_v61 = vshll.u32 %v20120_v11, 16  ;;  %v5008_v6 = vshrl.u32 %v20120_v11, 16  ;;  %v4959_v63 = vsel %vm14584_vm8, %v4954_v5, %v16135_v59  ;;  %v4844_v36 = vld [vmem:[#allocation2 + $0x60] sm:$0xf]  ;;  %v20122_v48 = vld [vmem:[#allocation74_spill] sm:$0xff] }
 0x242   : > { %v16251_v4 = vpop.f32.mrf.mxu1  ;;  %v5028_v1 = vshll.u32 %v20122_v48, 16  ;;  %v5032_v18 = vshrl.u32 %v20122_v48, 16  ;;  %v20123_v12 = vcombine.low %v15995_v38, %v16024_v3  ;;  %v16264_v43 = vcombine.low %v4959_v63, %v4969_v2  ;;  %v4847_v59 = vld [vmem:[#allocation2 + $0x6c] sm:$0xf]  ;;  %v16274_v48 = vpop.f32.mrf.mxu0  ;;  %v16277_v3 = vld [vmem:[#allocation2 + $0xbc] sm:$0x1] }
 0x243   : > { %20121 = vst [vmem:[#allocation73_spill] sm:$0xff] %v16251_v4  ;;  %v4977_v11 = vor.u32 %v4976_v62, %v4973_v10  ;;  %v16266_v8 = vrot.slane %v4990_v41, 5  ;;  %v12353_v44 = vrot.slane %v5577_v0, 9  ;;  %v20124_v5 = vcombine.low %v16028_v57, %v16032_v58  ;;  %20126 = vst [vmem:[#allocation74_spill] sm:$0xff] %v16274_v48  ;;  %v20128_v57 = vld [vmem:[#allocation60_spill] sm:$0xff]  ;;  %v20129_v58 = vld [vmem:[#allocation61_spill] sm:$0xff] }
 0x244   : > { %13516 = vmatmul.mubr.msk.bf16.gmra.mxu0 %vm1885_vm9, %v20123_v12  ;;  %v16272_v42 = vpop.f32.mrf.mxu1  ;;  %v4987_v38 = vor.u32 %v4986_v51, %v16241_v14  ;;  %20127 = vst [vmem:[#allocation98_spill] sm:$0xff] %v16277_v3  ;;  %v5721_v2 = vrot.slane %v16247_v19, 5  ;;  %v4995_v10 = vshrl.u32 %v4841_v30, 16  ;;  %v4998_v62 = vshll.u32 %v4841_v30, 16  ;;  %v20132_v19 = vld [vmem:[#allocation62_spill] sm:$0xff]  ;;  %v20133_v48 = vld [vmem:[#allocation64_spill] sm:$0xff] }
 0x245   : > { %13519 = vmatprep.mubr.msk.bf16.mxu0 %vm1885_vm9, %v20124_v5  ;;  %20125 = vst [vmem:[#allocation71_spill] sm:$0xff] %v16272_v42  ;;  %v16280_v41 = vrot.slane %v5004_v61, 5  ;;  %v5010_v0 = vrot.slane %v5008_v6, 4  ;;  %v5019_v63 = vshrl.u32 %v4844_v36, 16  ;;  %v5022_v12 = vshll.u32 %v4844_v36, 16 }
 0x246   : > { %v20130_v5 = vcombine.low %v20128_v57, %v20129_v58  ;;  %v16286_v7 = vpop.f32.mrf.mxu1  ;;  %v16288_v42 = vrot.slane %v5028_v1, 5  ;;  %v5034_v51 = vrot.slane %v5032_v18, 4  ;;  %v5043_v4 = vshrl.u32 %v4847_v59, 16  ;;  %v16295_v36 = vld [vmem:[#allocation2 + $0xc4] sm:$0xf]  ;;  %v20136_v57 = vld [vmem:[#allocation75_spill] sm:$0xff] }
 0x247   : > { %20131 = vst [vmem:[#allocation60_spill] sm:$0xff] %v16286_v7  ;;  %v5046_v21 = vshll.u32 %v4847_v59, 16  ;;  %v20134_v30 = vcombine.low %v20132_v19, %v20133_v48  ;;  %v4978_v61 = vrot.slane %v4977_v11, 4  ;;  %v5724_v6 = vrot.slane %v16277_v3, 5  ;;  %20135 = vst [vmem:[#allocation61_spill] sm:$0xff] %v16295_v36 }
 0x248   : > { %13424 = vmatmul.mubr.msk.bf16.gmra.mxu1 %vm1885_vm9, %v20130_v5  ;;  %v5052_v58 = vshll.u32 %v20136_v57, 16  ;;  %v5056_v5 = vshrl.u32 %v20136_v57, 16  ;;  %v16299_v7 = vpop.f32.mrf.mxu0  ;;  %v4988_v1 = vrot.slane %v4987_v38, 4  ;;  %v16303_v18 = vsel %vm15104_vm15, %v12353_v44, %v5721_v2  ;;  %v4850_v48 = vld [vmem:[#allocation2 + $0x78] sm:$0xf]  ;;  %v16308_v24 = vpop.f32.mrf.mxu1 }
 0x249   : > { %13427 = vmatprep.mubr.msk.bf16.mxu1 %vm1885_vm9, %v20134_v30  ;;  %20137 = vst [vmem:[#allocation62_spill] sm:$0xff] %v16299_v7  ;;  %v4997_v59 = vrot.slane %v4995_v10, 4  ;;  %v5000_v19 = vrot.slane %v4998_v62, 5  ;;  %v5723_v30 = vrot.slane %v5721_v2, 4  ;;  %v5011_v11 = vor.u32 %v5010_v0, %v16280_v41  ;;  %v16306_v3 = vld [vmem:[#allocation2 + $0xc8] sm:$0x1] }
 0x24a   : > { %20138 = vst [vmem:[#allocation64_spill] sm:$0xff] %v16306_v3  ;;  %v5021_v17 = vrot.slane %v5019_v63, 4  ;;  %v5024_v55 = vrot.slane %v5022_v12, 5  ;;  %20139 = vst [vmem:[#allocation75_spill] sm:$0xff] %v16308_v24  ;;  %v16310_v57 = vpop.f32.mrf.mxu0  ;;  %v5578_v7 = vld [vmem:[#allocation2 + $0xc0] sm:$0xe]  ;;  %v5035_v44 = vor.u32 %v5034_v51, %v16288_v42  ;;  %v20141_v2 = vcombine.low %v16036_v29, %v16042_v27 }
 0x24b   : > { %20140 = vst [vmem:[#allocation99_spill] sm:$0xff] %v16310_v57  ;;  %v5728_v38 = vrot.slane %v16295_v36, 5  ;;  %v5045_v50 = vrot.slane %v5043_v4, 4  ;;  %v5048_v10 = vrot.slane %v5046_v21, 5  ;;  %v16318_v62 = vrot.slane %v5052_v58, 5  ;;  %v20144_v4 = vld [vmem:[#allocation77_spill] sm:$0xff] }
 0x24c   : > { %13520 = vmatmul.mubr.msk.bf16.gmra.mxu0 %vm1885_vm9, %v20141_v2  ;;  %v5058_v0 = vrot.slane %v5056_v5, 4  ;;  %v5067_v63 = vshrl.u32 %v4850_v48, 16  ;;  %v5070_v12 = vshll.u32 %v4850_v48, 16  ;;  %v20142_v24 = vcombine.low %v16046_v13, %v16054_v16  ;;  %v16324_v57 = vpop.f32.mrf.mxu0  ;;  %v20145_v13 = vld [vmem:[#allocation81_spill] sm:$0xff]  ;;  %v20147_v2 = vld [vmem:[#allocation66_spill] sm:$0xff] }
 0x24d   : > { %20143 = vst [vmem:[#allocation100_spill] sm:$0xff] %v16324_v57  ;;  %v4983_v21 = vsel %vm14584_vm8, %v4978_v61, %v16241_v14  ;;  %v4993_v29 = vsel %vm14584_vm8, %v4988_v1, %v16266_v8  ;;  %v5001_v27 = vor.u32 %v5000_v19, %v4997_v59  ;;  %v5014_v51 = vshll.u32 %v20144_v4, 16  ;;  %v20148_v57 = vld [vmem:[#allocation68_spill] sm:$0xff]  ;;  %v20150_v59 = vld [vmem:[#allocation78_spill] sm:$0xff] }
 0x24e   : > { %13523 = vmatprep.mubr.msk.bf16.mxu0 %vm1885_vm9, %v20142_v24  ;;  %v12354_v58 = vrot.slane %v5578_v7, 9  ;;  %v5731_v5 = vrot.slane %v16306_v3, 5  ;;  %v5025_v48 = vor.u32 %v5024_v55, %v5021_v17  ;;  %v5038_v16 = vshll.u32 %v20145_v13, 16  ;;  %v16335_v24 = vpop.f32.mrf.mxu1  ;;  %v16341_v14 = vpop.f32.mrf.mxu0 }
 0x24f   : > { %20146 = vst [vmem:[#allocation77_spill] sm:$0xff] %v16335_v24  ;;  %v20149_v36 = vcombine.low %v20147_v2, %v20148_v57  ;;  %v5012_v61 = vrot.slane %v5011_v11, 4  ;;  %v5730_v8 = vrot.slane %v5728_v38, 4  ;;  %v5036_v1 = vrot.slane %v5035_v44, 4  ;;  %v20151_v24 = vld [vmem:[#allocation79_spill] sm:$0xff] }
 0x250   : > { %v5062_v19 = vshll.u32 %v20150_v59, 16  ;;  %v5049_v17 = vor.u32 %v5048_v10, %v5045_v50  ;;  %v5059_v7 = vor.u32 %v5058_v0, %v16318_v62  ;;  %v5069_v55 = vrot.slane %v5067_v63, 4  ;;  %v16347_v13 = vpop.f32.mrf.mxu1  ;;  %v16349_v57 = vpop.f32.mrf.mxu0 }
 0x251   : > { %13428 = vmatmul.mubr.msk.bf16.gmra.mxu1 %vm1885_vm9, %v20149_v36  ;;  %v5072_v4 = vrot.slane %v5070_v12, 5  ;;  %v5002_v36 = vrot.slane %v5001_v27, 4  ;;  %v5016_v2 = vrot.slane %v5014_v51, 5  ;;  %v5076_v11 = vshll.u32 %v20151_v24, 16 }
 0x252   : > { %13471 = vmatprep.mubr.msk.bf16.mxu1 %vm1885_vm9, %v16163_v31  ;;  %v5080_v44 = vshrl.u32 %v20151_v24, 16  ;;  %v16353_v3 = vcombine.low %v4983_v21, %v4993_v29  ;;  %v16357_v31 = vsel %vm15104_vm15, %v5723_v30, %v5724_v6  ;;  %v5026_v50 = vrot.slane %v5025_v48, 4  ;;  %v16359_v0 = vpop.f32.mrf.mxu1  ;;  %v16361_v63 = vpop.f32.mrf.mxu0  ;;  %v4853_v6 = vld [vmem:[#allocation2 + $0x84] sm:$0xf] }
 0x253   : > { %v5040_v10 = vrot.slane %v5038_v16, 5  ;;  %20152 = vst [vmem:[#allocation81_spill] sm:$0xff] %v16359_v0  ;;  %v5017_v12 = vsel %vm14584_vm8, %v5012_v61, %v5016_v2  ;;  %v16367_v27 = vsel %vm15104_vm15, %v12354_v58, %v5728_v38  ;;  %v16371_v21 = vsel %vm15104_vm15, %v5730_v8, %v5731_v5 }
 0x254   : > { %v16373_v29 = vrot.slane %v5062_v19, 5  ;;  %v20153_v30 = vcombine.low %v16099_v33, %v16115_v23  ;;  %v16381_v48 = vrot.slane %v5049_v17, 4  ;;  %v16383_v16 = vrot.slane %v5059_v7, 4  ;;  %v16385_v58 = vpop.f32.mrf.mxu1  ;;  %v16391_v24 = vpop.f32.mrf.mxu0  ;;  %v4856_v19 = vld [vmem:[#allocation2 + $0x90] sm:$0xf] }
 0x255   : > { %v5041_v51 = vsel %vm14584_vm8, %v5036_v1, %v5040_v10  ;;  %v5073_v38 = vor.u32 %v5072_v4, %v5069_v55  ;;  %20154 = vst [vmem:[#allocation66_spill] sm:$0xff] %v16385_v58  ;;  %v20155_v5 = vcombine.low %v16170_v25, %v16177_v26  ;;  %v5007_v23 = vsel %vm14584_vm8, %v5002_v36, %v16280_v41  ;;  %v466_v17 = vld [vmem:[#allocation2 + $0xd4] sm:$0x1]  ;;  %v5579_v58 = vld [vmem:[#allocation2 + $0xcc] sm:$0xe] }
 0x256   : > { %13524 = vmatmul.mubr.msk.bf16.gmra.mxu0 %vm1885_vm9, %v20153_v30  ;;  %v16398_v61 = vrot.slane %v5076_v11, 5  ;;  %v5082_v8 = vrot.slane %v5080_v44, 4  ;;  %v16400_v1 = vcombine.low %v5007_v23, %v5017_v12  ;;  %v5031_v25 = vsel %vm14584_vm8, %v5026_v50, %v16288_v42  ;;  %v13257_v7 = vpop.f32.mrf.mxu1  ;;  %v16407_v55 = vpop.f32.mrf.mxu0 }
 0x257   : > { %13527 = vmatprep.mubr.msk.bf16.mxu0 %vm1885_vm9, %v20155_v5  ;;  %v5091_v26 = vshrl.u32 %v4853_v6, 16  ;;  %v5094_v59 = vshll.u32 %v4853_v6, 16  ;;  %20156 = vst [vmem:[#allocation68_spill] sm:$0xff] %v16407_v55  ;;  %v16411_v4 = vcombine.low %v5031_v25, %v5041_v51  ;;  %v5086_v36 = vshll.u32 %v15998_v28, 16 }
 0x258   : > { %v5100_v2 = vshll.u32 %v16007_v45, 16  ;;  %v16425_v11 = vrot.slane %v5073_v38, 4  ;;  %v5104_v44 = vshrl.u32 %v16007_v45, 16  ;;  %v2269_v28 = vpop.f32.mrf.mxu1  ;;  %v16428_v50 = vpop.f32.mrf.mxu0  ;;  %v5083_v10 = vor.u32 %v5082_v8, %v16398_v61  ;;  %v16435_v38 = vld [vmem:[#allocation2 + $0xd0] sm:$0xf]  ;;  %v20158_v45 = vld [vmem:[#allocation51_spill] sm:$0xff] }
 0x259   : > { %13472 = vmatmul.mubr.msk.bf16.vlgmr.msra.gmra.mxu1 %vm1885_vm9, %v16201_v37  ;;  %v5118_v12 = vshll.u32 %v4856_v19, 16  ;;  %v467_v30 = vsel %vm14536_vm5, 0, %v466_v17  ;;  %v5093_v51 = vrot.slane %v5091_v26, 4  ;;  %v5096_v5 = vrot.slane %v5094_v59, 5  ;;  %v20159_v37 = vld [vmem:[#allocation52_spill] sm:$0xff]  ;;  %v20160_v26 = vld [vmem:[#allocation53_spill] sm:$0xff] }
 0x25a   : > { %13475 = vmatprep.mubr.msk.bf16.mxu1 %vm1885_vm9, %v16243_v56  ;;  %v5115_v56 = vshrl.u32 %v4856_v19, 16  ;;  %v5124_v23 = vshll.u32 %v16078_v39, 16  ;;  %v5128_v25 = vshrl.u32 %v16078_v39, 16  ;;  %468 = vst [vmem:[#allocation2 + $0xd4] sm:$0x1] %v467_v30  ;;  %v2278_v42 = vadd.f32 %v13257_v7, %v20158_v45  ;;  %v13258_v33 = vpop.f32.mrf.mxu1  ;;  %v16439_v8 = vpop.f32.mrf.mxu0 }
 0x25b   : > { %v2270_v41 = vadd.f32 %v2269_v28, %v20159_v37  ;;  %v16441_v19 = vrot.slane %v5086_v36, 5  ;;  %v16443_v55 = vrot.slane %v5100_v2, 5  ;;  %v2281_v59 = vadd.f32 %v13258_v33, %v20160_v26  ;;  %v4859_v28 = vld [vmem:[#allocation2 + $0x9c] sm:$0xf]  ;;  %v20163_v26 = vld [vmem:[#allocation54_spill] sm:$0xff] }
 0x25c   : > { %v20161_v17 = vcombine.low %v16207_v60, %v16211_v54  ;;  %v5106_v7 = vrot.slane %v5104_v44, 4  ;;  %v5110_v37 = vshll.u32 %v16057_v35, 16  ;;  %v2272_v36 = vpop.f32.mrf.mxu1  ;;  %v20162_v2 = vcombine.low %v16223_v32, %v16231_v22  ;;  %v16459_v33 = vpop.f32.mrf.mxu0 }
 0x25d   : > { %v16461_v60 = vrot.slane %v5083_v10, 4  ;;  %v5117_v54 = vrot.slane %v5115_v56, 4  ;;  %v5120_v30 = vrot.slane %v5118_v12, 5  ;;  %v5735_v45 = vrot.slane %v16435_v38, 5 }
 0x25e   : > { %13528 = vmatmul.mubr.msk.bf16.gmra.mxu0 %vm1885_vm9, %v20161_v17  ;;  %v2273_v17 = vadd.f32 %v2272_v36, %v20163_v26  ;;  %v5097_v44 = vor.u32 %v5096_v5, %v5093_v51  ;;  %v16465_v39 = vrot.slane %v5124_v23, 5  ;;  %v5130_v35 = vrot.slane %v5128_v25, 4  ;;  %v13261_v6 = vpop.f32.mrf.mxu1  ;;  %v16469_v32 = vpop.f32.mrf.mxu0  ;;  %v20167_v36 = vld [vmem:[#allocation55_spill] sm:$0xff] }
 0x25f   : > { %13531 = vmatprep.mubr.msk.bf16.mxu0 %vm1885_vm9, %v20162_v2  ;;  %20164 = vst [vmem:[#allocation78_spill] sm:$0xff] %v16469_v32  ;;  %v5139_v22 = vshrl.u32 %v4859_v28, 16  ;;  %v5142_v10 = vshll.u32 %v4859_v28, 16  ;;  %v16472_v56 = vadd.f32 %v16018_v40, %v2278_v42  ;;  %v16475_v12 = vadd.f32 %v16038_v34, %v2270_v41  ;;  %v20170_v26 = vld [vmem:[#allocation87_spill] sm:$0xff] }
 0x260   : > { %v2294_v51 = vadd.f32 %v13261_v6, %v20167_v36  ;;  %v5107_v5 = vor.u32 %v5106_v7, %v16443_v55  ;;  %v5134_v23 = vshll.u32 %v16105_v53, 16  ;;  %v2285_v2 = vpop.f32.mrf.mxu1  ;;  %v16485_v28 = vpop.f32.mrf.mxu0  ;;  %v5121_v40 = vor.u32 %v5120_v30, %v5117_v54  ;;  %v20172_v36 = vld [vmem:[#allocation59_spill] sm:$0xff] }
 0x261   : > { %13476 = vmatmul.mubr.msk.bf16.gmra.mxu1 %vm1885_vm9, %v16264_v43  ;;  %20165 = vst [vmem:[#allocation79_spill] sm:$0xff] %v16472_v56  ;;  %20166 = vst [vmem:[#allocation51_spill] sm:$0xff] %v16475_v12  ;;  %v20168_v43 = vld [vmem:[#allocation85_spill] sm:$0xff]  ;;  %v16487_v42 = vld [vmem:[#allocation2 + $0xd4] sm:$0x1]  ;;  %v12355_v34 = vrot.slane %v5579_v58, 9  ;;  %v16490_v6 = vadd.f32 %v20170_v26, %v2273_v17  ;;  %v5131_v7 = vor.u32 %v5130_v35, %v16465_v39 }
 0x262   : > { %13479 = vmatprep.mubr.msk.bf16.mxu1 %vm1885_vm9, %v16353_v3  ;;  %v16483_v25 = vadd.f32 %v20168_v43, %v2281_v59  ;;  %v5737_v41 = vrot.slane %v5735_v45, 4  ;;  %v2286_v3 = vadd.f32 %v2285_v2, %v20172_v36  ;;  %v5148_v53 = vshll.u32 %v16122_v20, 16  ;;  %v13262_v43 = vpop.f32.mrf.mxu1  ;;  %v16496_v32 = vpop.f32.mrf.mxu0  ;;  %v20173_v58 = vld [vmem:[#allocation89_spill] sm:$0xff]  ;;  %v20174_v17 = vld [vmem:[#allocation63_spill] sm:$0xff] }
 0x263   : > { %20171 = vst [vmem:[#allocation53_spill] sm:$0xff] %v16490_v6  ;;  %v5738_v59 = vrot.slane %v16487_v42, 5  ;;  %v5144_v54 = vrot.slane %v5142_v10, 5  ;;  %v5152_v30 = vshrl.u32 %v16122_v20, 16  ;;  %v16500_v12 = vadd.f32 %v20173_v58, %v2294_v51  ;;  %v4862_v56 = vld [vmem:[#allocation2 + $0xa8] sm:$0xf] }
 0x264   : > { %20169 = vst [vmem:[#allocation52_spill] sm:$0xff] %v16483_v25  ;;  %v5141_v25 = vrot.slane %v5139_v22, 4  ;;  %v2297_v26 = vadd.f32 %v13262_v43, %v20174_v17  ;;  %v20175_v2 = vcombine.low %v16303_v18, %v16357_v31  ;;  %v5098_v35 = vrot.slane %v5097_v44, 4  ;;  %v2288_v0 = vpop.f32.mrf.mxu1  ;;  %v16511_v20 = vpop.f32.mrf.mxu0  ;;  %v20177_v31 = vld [vmem:[#allocation91_spill] sm:$0xff] }
 0x265   : > { %v5108_v36 = vrot.slane %v5107_v5, 4  ;;  %v5112_v6 = vrot.slane %v5110_v37, 5  ;;  %v20176_v22 = vcombine.low %v16367_v27, %v16371_v21  ;;  %v5136_v10 = vrot.slane %v5134_v23, 5  ;;  %v20178_v37 = vld [vmem:[#allocation65_spill] sm:$0xff] }
 0x266   : > { %13532 = vmatmul.mubr.msk.bf16.gmra.mxu0 %vm1885_vm9, %v20175_v2  ;;  %v5736_v51 = vsel %vm15104_vm15, %v12355_v34, %v5735_v45  ;;  %v5739_v18 = vsel %vm15104_vm15, %v5737_v41, %v5738_v59  ;;  %v16518_v44 = vadd.f32 %v20177_v31, %v2286_v3  ;;  %v2289_v5 = vadd.f32 %v2288_v0, %v20178_v37  ;;  %v13265_v21 = vpop.f32.mrf.mxu1  ;;  %v16528_v23 = vpop.f32.mrf.mxu0  ;;  %v20179_v3 = vld [vmem:[#allocation67_spill] sm:$0xff]  ;;  %v20182_v2 = vld [vmem:[#allocation96_spill] sm:$0xff]  ;;  %v20184_v31 = vld [vmem:[#allocation97_spill] sm:$0xff] }
 0x267   : > { %13535 = vmatprep.mubr.msk.bf16.mxu0 %vm1885_vm9, %v20176_v22  ;;  %v5122_v43 = vrot.slane %v5121_v40, 4  ;;  %v16521_v58 = vrot.slane %v5148_v53, 5  ;;  %v16524_v27 = vadd.f32 %v16133_v9, %v2297_v26  ;;  %v5132_v45 = vrot.slane %v5131_v7, 4 }
 0x268   : > { %v5145_v34 = vor.u32 %v5144_v54, %v5141_v25  ;;  %v5154_v41 = vrot.slane %v5152_v30, 4  ;;  %v5163_v59 = vshrl.u32 %v4862_v56, 16  ;;  %v2310_v17 = vadd.f32 %v13265_v21, %v20179_v3  ;;  %v2301_v53 = vpop.f32.mrf.mxu1  ;;  %v16536_v26 = vpop.f32.mrf.mxu0  ;;  %v4865_v3 = vld [vmem:[#allocation2 + $0xb4] sm:$0xf] }
 0x269   : > { %13480 = vmatmul.mubr.msk.bf16.gmra.mxu1 %vm1885_vm9, %v16400_v1  ;;  %v5166_v0 = vshll.u32 %v4862_v56, 16  ;;  %v12371_v40 = vcombine.low %v5736_v51, %v5739_v18  ;;  %v16534_v9 = vadd.f32 %v16161_v15, %v2289_v5  ;;  %v5089_v1 = vsel %vm14584_vm8, %v16461_v60, %v16441_v19  ;;  %v20181_v56 = vld [vmem:[#allocation69_spill] sm:$0xff] }
 0x26a   : > { %13483 = vmatprep.mubr.msk.bf16.mxu1 %vm1885_vm9, %v16411_v4  ;;  %v5103_v25 = vsel %vm14584_vm8, %v5098_v35, %v16443_v55  ;;  %v5172_v7 = vshll.u32 %v16137_v46, 16  ;;  %v5176_v4 = vshrl.u32 %v16137_v46, 16  ;;  %v2302_v54 = vadd.f32 %v2301_v53, %v20181_v56  ;;  %v13266_v51 = vpop.f32.mrf.mxu1  ;;  %v16554_v19 = vpop.f32.mrf.mxu0  ;;  %v20192_v56 = vld [vmem:[#allocation76_spill] sm:$0xff] }
 0x26b   : > { %20180 = vst [vmem:[#allocation54_spill] sm:$0xff] %v16534_v9  ;;  %v5113_v15 = vsel %vm14584_vm8, %v5108_v36, %v5112_v6  ;;  %v5158_v30 = vshll.u32 %v16147_v52, 16  ;;  %v16552_v22 = vadd.f32 %v20182_v2, %v2310_v17  ;;  %v5127_v55 = vsel %vm14584_vm8, %v5122_v43, %v16465_v39  ;;  %v20183_v6 = vld [vmem:[#allocation70_spill] sm:$0xff]  ;;  %v20188_v17 = vld [vmem:[#allocation72_spill] sm:$0xff] }
 0x26c   : > { %v5137_v46 = vsel %vm14584_vm8, %v5132_v45, %v5136_v10  ;;  %v16561_v60 = vrot.slane %v5145_v34, 4  ;;  %v5155_v35 = vor.u32 %v5154_v41, %v16521_v58  ;;  %v2313_v36 = vadd.f32 %v13266_v51, %v20183_v6  ;;  %v2304_v5 = vpop.f32.mrf.mxu1  ;;  %v16584_v34 = vpop.f32.mrf.mxu0  ;;  %v20193_v2 = vld [vmem:[#allocation74_spill] sm:$0xff] }
 0x26d   : > { %v5165_v52 = vrot.slane %v5163_v59, 4  ;;  %v5168_v18 = vrot.slane %v5166_v0, 5  ;;  %v16567_v37 = vadd.f32 %v20184_v31, %v2302_v54  ;;  %v20185_v39 = vsel %vm14584_vm8, %v16383_v16, %v16373_v29 }
 0x26e   : > { %13536 = vmatmul.mubr.msk.bf16.gmra.mxu0 %vm1885_vm9, %v12371_v40  ;;  %v20186_v10 = vsel %vm14584_vm8, %v16381_v48, %v16318_v62  ;;  %v20187_v21 = vsel %vm14584_vm8, %v16425_v11, %v16398_v61  ;;  %v16586_v41 = vrot.slane %v5172_v7, 5  ;;  %v5178_v59 = vrot.slane %v5176_v4, 4  ;;  %v20189_v40 = vld [vmem:[#allocation57_spill] sm:$0xff]  ;;  %v16595_v53 = vpop.f32.mrf.mxu0  ;;  %v20191_v7 = vld [vmem:[#allocation94_spill] sm:$0xff]  ;;  %v4868_v4 = vld [vmem:[#allocation2 + $0xc0] sm:$0xf] }
 0x26f   : > { %v12313_v43 = vcombine.low %v20186_v10, %v20185_v39  ;;  %v12314_v45 = vcombine.low %v20187_v21, %v5089_v1  ;;  %v2305_v29 = vadd.f32 %v2304_v5, %v20188_v17  ;;  %v12315_v16 = vcombine.low %v5103_v25, %v5113_v15  ;;  %v13269_v48 = vpop.f32.mrf.mxu1  ;;  %20190 = vst [vmem:[#allocation55_spill] sm:$0xff] %v16595_v53  ;;  %v20196_v39 = vld [vmem:[#allocation80_spill] sm:$0xff] }
 0x270   : > { %v16589_v0 = vrot.slane %v5158_v30, 5  ;;  %v16592_v62 = vadd.f32 %v20189_v40, %v2313_v36  ;;  %v12316_v61 = vcombine.low %v5127_v55, %v5137_v46  ;;  %v16601_v1 = vrot.slane %v5155_v35, 4  ;;  %v16609_v46 = vpop.f32.mrf.mxu0  ;;  %v20195_v35 = vld [vmem:[#allocation58_spill] sm:$0xff]  ;;  %v20202_v53 = vld [vmem:[#allocation100_spill] sm:$0xff] }
 0x271   : > { %13484 = vmatmul.mubr.msk.bf16.gmra.mxu1 %vm1885_vm9, %v12313_v43  ;;  %v5182_v25 = vshll.u32 %v20191_v7, 16  ;;  %v2326_v54 = vadd.f32 %v13269_v48, %v20192_v56  ;;  %v5169_v15 = vor.u32 %v5168_v18, %v5165_v52  ;;  %v5187_v30 = vshrl.u32 %v4865_v3, 16  ;;  %v2317_v55 = vpop.f32.mrf.mxu1  ;;  %v20199_v7 = vld [vmem:[#allocation82_spill] sm:$0xff] }
 0x272   : > { %13487 = vmatprep.mubr.msk.bf16.mxu1 %vm1885_vm9, %v12314_v45  ;;  %v16607_v51 = vadd.f32 %v20193_v2, %v2305_v29  ;;  %v5179_v6 = vor.u32 %v5178_v59, %v16586_v41  ;;  %v5190_v36 = vshll.u32 %v4865_v3, 16  ;;  %v5196_v31 = vshll.u32 %v20195_v35, 16  ;;  %v20197_v45 = vld [vmem:[#allocation62_spill] sm:$0xff]  ;;  %v16618_v17 = vpop.f32.mrf.mxu0  ;;  %v20198_v29 = vld [vmem:[#allocation61_spill] sm:$0xff] }
 0x273   : > { %v5200_v5 = vshrl.u32 %v20195_v35, 16  ;;  %v2318_v10 = vadd.f32 %v2317_v55, %v20196_v39  ;;  %v5211_v43 = vshrl.u32 %v4868_v4, 16  ;;  %v5214_v21 = vshll.u32 %v4868_v4, 16  ;;  %v13270_v18 = vpop.f32.mrf.mxu1  ;;  %v4871_v55 = vld [vmem:[#allocation2 + $0xcc] sm:$0xf] }
 0x274   : > { %20194 = vst [vmem:[#allocation85_spill] sm:$0xff] %v16607_v51  ;;  %v16616_v52 = vadd.f32 %v20197_v45, %v2326_v54  ;;  %v5161_v59 = vsel %vm14584_vm8, %v16601_v1, %v16589_v0  ;;  %v5184_v3 = vrot.slane %v5182_v25, 5  ;;  %v5220_v40 = vshll.u32 %v20198_v29, 16  ;;  %v20200_v54 = vld [vmem:[#allocation99_spill] sm:$0xff]  ;;  %v16630_v45 = vpop.f32.mrf.mxu0 }
 0x275   : > { %v5224_v48 = vshrl.u32 %v20198_v29, 16  ;;  %v2329_v56 = vadd.f32 %v13270_v18, %v20199_v7  ;;  %v5170_v2 = vrot.slane %v5169_v15, 4  ;;  %v5189_v4 = vrot.slane %v5187_v30, 4  ;;  %v2320_v39 = vpop.f32.mrf.mxu1  ;;  %v20201_v1 = vld [vmem:[#allocation83_spill] sm:$0xff] }
 0x276   : > { %v16628_v35 = vadd.f32 %v20200_v54, %v2318_v10  ;;  %v5180_v11 = vrot.slane %v5179_v6, 4  ;;  %v5192_v47 = vrot.slane %v5190_v36, 5  ;;  %v16632_v51 = vrot.slane %v5196_v31, 5  ;;  %v16639_v30 = vpop.f32.mrf.mxu0  ;;  %v20204_v31 = vld [vmem:[#allocation84_spill] sm:$0xff] }
 0x277   : > { %v5202_v0 = vrot.slane %v5200_v5, 4  ;;  %v2321_v25 = vadd.f32 %v2320_v39, %v20201_v1  ;;  %v5213_v9 = vrot.slane %v5211_v43, 4  ;;  %v5216_v29 = vrot.slane %v5214_v21, 5  ;;  %v13273_v15 = vpop.f32.mrf.mxu1  ;;  %20203 = vst [vmem:[#allocation87_spill] sm:$0xff] %v16639_v30  ;;  %v20207_v39 = vld [vmem:[#allocation86_spill] sm:$0xff] }
 0x278   : > { %v16636_v18 = vadd.f32 %v20202_v53, %v2329_v56  ;;  %v16641_v10 = vrot.slane %v5220_v40, 5  ;;  %v5226_v7 = vrot.slane %v5224_v48, 4  ;;  %v5235_v6 = vshrl.u32 %v4871_v55, 16 }
 0x279   : > { %13488 = vmatmul.mubr.msk.bf16.gmra.mxu1 %vm1885_vm9, %v12315_v16  ;;  %v5238_v36 = vshll.u32 %v4871_v55, 16  ;;  %v2342_v54 = vadd.f32 %v13273_v15, %v20204_v31  ;;  %v5244_v5 = vshll.u32 %v16435_v38, 16  ;;  %v5248_v43 = vshrl.u32 %v16435_v38, 16  ;;  %v2333_v21 = vpop.f32.mrf.mxu1  ;;  %v16650_v16 = vpop.f32.mrf.mxu0  ;;  %v20206_v55 = vld [vmem:[#allocation98_spill] sm:$0xff] }
 0x27a   : > { %13491 = vmatprep.mubr.msk.bf16.mxu1 %vm1885_vm9, %v12316_v61  ;;  %v16648_v53 = vadd.f32 %v16341_v14, %v2321_v25  ;;  %v5175_v40 = vsel %vm14584_vm8, %v5170_v2, %v16586_v41  ;;  %v5185_v48 = vsel %vm14584_vm8, %v5180_v11, %v5184_v3  ;;  %v5193_v56 = vor.u32 %v5192_v47, %v5189_v4  ;;  %v20208_v41 = vld [vmem:[#allocation64_spill] sm:$0xff] }
 0x27b   : > { %v5206_v61 = vshll.u32 %v20206_v55, 16  ;;  %v2334_v1 = vadd.f32 %v2333_v21, %v20207_v39  ;;  %v5203_v38 = vor.u32 %v5202_v0, %v16632_v51  ;;  %v5217_v15 = vor.u32 %v5216_v29, %v5213_v9  ;;  %v13274_v25 = vpop.f32.mrf.mxu1  ;;  %v16663_v31 = vpop.f32.mrf.mxu0  ;;  %v20209_v47 = vld [vmem:[#allocation88_spill] sm:$0xff] }
 0x27c   : > { %20205 = vst [vmem:[#allocation59_spill] sm:$0xff] %v16648_v53  ;;  %v16661_v14 = vadd.f32 %v16349_v57, %v2342_v54  ;;  %v5227_v30 = vor.u32 %v5226_v7, %v16641_v10  ;;  %v5230_v2 = vshll.u32 %v20208_v41, 16  ;;  %v5237_v53 = vrot.slane %v5235_v6, 4 }
 0x27d   : > { %v5240_v11 = vrot.slane %v5238_v36, 5  ;;  %v2345_v3 = vadd.f32 %v13274_v25, %v20209_v47  ;;  %v5246_v4 = vrot.slane %v5244_v5, 5  ;;  %v5250_v55 = vrot.slane %v5248_v43, 4  ;;  %v16671_v9 = vpop.f32.mrf.mxu1  ;;  %v16678_v29 = vpop.f32.mrf.mxu0 }
 0x27e   : > { %v16669_v21 = vadd.f32 %v16361_v63, %v2334_v1  ;;  %v20210_v57 = vsel %vm14584_vm8, %v16561_v60, %v16521_v58  ;;  %v5208_v7 = vrot.slane %v5206_v61, 5  ;;  %v12318_v6 = vcombine.low %v5175_v40, %v5185_v48  ;;  %v20212_v58 = vld [vmem:[#allocation92_spill] sm:$0xff] }
 0x27f   : > { %v12317_v0 = vcombine.low %v20210_v57, %v5161_v59  ;;  %v5194_v36 = vrot.slane %v5193_v56, 4  ;;  %v5204_v54 = vrot.slane %v5203_v38, 4  ;;  %v16681_v5 = vadd.f32 %v16391_v24, %v2345_v3  ;;  %v13277_v43 = vpop.f32.mrf.mxu1  ;;  %v16684_v63 = vpop.f32.mrf.mxu0  ;;  %v20213_v24 = vld [vmem:[#allocation93_spill] sm:$0xff]  ;;  %v20214_v3 = vld [vmem:[#allocation95_spill] sm:$0xff] }
 0x280   : > { %20211 = vst [vmem:[#allocation89_spill] sm:$0xff] %v16684_v63  ;;  %v5218_v39 = vrot.slane %v5217_v15, 4  ;;  %v5228_v1 = vrot.slane %v5227_v30, 4  ;;  %v5232_v25 = vrot.slane %v5230_v2, 5  ;;  %v5241_v41 = vor.u32 %v5240_v11, %v5237_v53 }
 0x281   : > { %13492 = vmatmul.mubr.msk.bf16.gmra.mxu1 %vm1885_vm9, %v12317_v0  ;;  %v2358_v60 = vadd.f32 %v13277_v43, %v20212_v58  ;;  %v5251_v59 = vor.u32 %v5250_v55, %v5246_v4  ;;  %v5254_v40 = vshll.u32 %v16487_v42, 16  ;;  %v2349_v48 = vpop.f32.mrf.mxu1  ;;  %v16689_v56 = vpop.f32.mrf.mxu0  ;;  %v5199_v38 = vsel %vm14584_vm8, %v5194_v36, %v16632_v51  ;;  %v14043_v43 = vld [vmem:[#allocation9 + $0x8] sm:$0xff]  }
 0x282   : > { %13495 = vmatprep.mubr.msk.bf16.mxu1 %vm1885_vm9, %v12318_v6  ;;  %v2350_v61 = vadd.f32 %v2349_v48, %v20213_v24  ;;  %v5209_v30 = vsel %vm14584_vm8, %v5204_v54, %v5208_v7  ;;  %v5223_v42 = vsel %vm14584_vm8, %v5218_v39, %v16641_v10  ;;  %v5233_v11 = vsel %vm14584_vm8, %v5228_v1, %v5232_v25  ;;  %v20216_v25 = vld [vmem:[#allocation73_spill] sm:$0xff] }
 0x283   : > { %v16698_v53 = vadd.f32 %v16428_v50, %v2358_v60  ;;  %v13278_v15 = vpop.f32.mrf.mxu1  ;;  %v16700_v2 = vpop.f32.mrf.mxu0  ;;  %v5242_v47 = vrot.slane %v5241_v41, 4  ;;  %v5252_v51 = vrot.slane %v5251_v59, 4  ;;  %v5256_v57 = vrot.slane %v5254_v40, 5  ;;  %v14042_v50 = vld [vmem:[#allocation9 + $0x18] sm:$0xff]   ;;  %13575 = vmatprep.subr.bf16.mxu0 %v14043_v43 }
 0x284   : > { %v2361_v55 = vadd.f32 %v13278_v15, %v20214_v3  ;;  %v16709_v0 = vadd.f32 %v16439_v8, %v2350_v61  ;;  %v12319_v6 = vcombine.low %v5199_v38, %v5209_v30  ;;  %v12320_v54 = vcombine.low %v5223_v42, %v5233_v11  ;;  %13539 = vmatprep.subr.bf16.mxu1 %v14042_v50  ;;  %v20217_v59 = vld [vmem:[#allocation71_spill] sm:$0xff]  ;;  %v20218_v30 = vld [vmem:[#allocation60_spill] sm:$0xff] }
 0x285   : > { %v16711_v7 = vpop.f32.mrf.mxu1  ;;  %v16713_v36 = vpop.f32.mrf.mxu0  ;;  %v5247_v41 = vsel %vm14584_vm8, %v5242_v47, %v5246_v4  ;;  %v5257_v58 = vsel %vm14584_vm8, %v5252_v51, %v5256_v57  ;;  %13540 = vmatpush3.bf16.msra.mxu1 %v14042_v50  ;;  %13576 = vmatpush3.bf16.msra.mxu0 %v14043_v43  ;;  %v20221_v43 = vld [vmem:[#allocation81_spill] sm:$0xff] }
 0x286   : > { %v16716_v10 = vadd.f32 %v16459_v33, %v2361_v55  ;;  %v12321_v61 = vcombine.low %v5247_v41, %v5257_v58  ;;  %v20220_v55 = vld [vmem:[#allocation77_spill] sm:$0xff]  ;;  %v482_v58 = vld [vmem:[#allocation3 + $0x18] sm:$0x1] }
 0x287   : > { %v13281_v39 = vpop.f32.mrf.mxu1  ;;  %v16719_v1 = vpop.f32.mrf.mxu0 }
 0x288   : > { %20215 = vst [vmem:[#allocation63_spill] sm:$0xff] %v16719_v1  ;;  %v2374_v8 = vadd.f32 %v13281_v39, %v20216_v25  ;;  %v557_v1 = vld [vmem:[#allocation3 + $0x74] sm:$0x1] }
 0x289   : > { %13496 = vmatmul.mubr.msk.bf16.gmra.mxu1 %vm1885_vm9, %v12319_v6  ;;  %v2365_v33 = vpop.f32.mrf.mxu1  ;;  %v16727_v60 = vpop.f32.mrf.mxu0 }
 0x28a   : > { %13499 = vmatprep.mubr.msk.bf16.mxu1 %vm1885_vm9, %v12320_v54  ;;  %v2366_v40 = vadd.f32 %v2365_v33, %v20217_v59  ;;  %v16731_v48 = vadd.f32 %v16485_v28, %v2374_v8  ;;  %v483_v59 = vsel %vm14525_vm2, 0, %v482_v58 }
 0x28b   : > { %v13282_v24 = vpop.f32.mrf.mxu1  ;;  %v16733_v38 = vpop.f32.mrf.mxu0  ;;  %484 = vst [vmem:[#allocation3 + $0x18] sm:$0x1] %v483_v59 }
 0x28c   : > { %v2377_v4 = vadd.f32 %v13282_v24, %v20218_v30  ;;  %v16737_v15 = vadd.f32 %v16496_v32, %v2366_v40  ;;  %v20223_v40 = vld [vmem:[#allocation79_spill] sm:$0xff] }
 0x28d   : > { %v16739_v42 = vpop.f32.mrf.mxu1  ;;  %v16741_v11 = vpop.f32.mrf.mxu0  ;;  %v20225_v30 = vld [vmem:[#allocation51_spill] sm:$0xff] }
 0x28e   : > { %v16744_v47 = vadd.f32 %v16511_v20, %v2377_v4 }
 0x28f   : > { %v13285_v3 = vpop.f32.mrf.mxu1  ;;  %v16747_v28 = vpop.f32.mrf.mxu0 }
 0x290   : > { %20219 = vst [vmem:[#allocation91_spill] sm:$0xff] %v16747_v28  ;;  %v2390_v51 = vadd.f32 %v13285_v3, %v20220_v55 }
 0x291   : > { %13500 = vmatmul.mubr.msk.bf16.gmra.mxu1 %vm1885_vm9, %v12321_v61  ;;  %v2381_v57 = vpop.f32.mrf.mxu1 }
 0x292   : > { %v2382_v50 = vadd.f32 %v2381_v57, %v16347_v13  ;;  %v16752_v32 = vadd.f32 %v16536_v26, %v2390_v51  ;;  %v16754_v54 = vpop.f32.mrf.mxu0  ;;  %v20226_v51 = vld [vmem:[#allocation52_spill] sm:$0xff] }
 0x293   : > { %v13286_v6 = vpop.f32.mrf.mxu1 }
 0x294   : > { %v2393_v39 = vadd.f32 %v13286_v6, %v20221_v43  ;;  %v16758_v20 = vadd.f32 %v16554_v19, %v2382_v50  ;;  %v16762_v8 = vpop.f32.mrf.mxu0 }
 0x295   : > { %v16760_v25 = vpop.f32.mrf.mxu1 }
 0x296   : > { %v16765_v41 = vadd.f32 %v16584_v34, %v2393_v39  ;;  %v16767_v33 = vpop.f32.mrf.mxu0 }
 0x297   : > { %v13329_v13 = vpop.f32.mrf.mxu1 }
 0x298   : > { %v3205_v24 = vadd.f32 %v13329_v13, %v20223_v40  ;;  %v16772_v19 = vpop.f32.mrf.mxu0 }
 0x299   : > { %v3076_v61 = vpop.f32.mrf.mxu1  ;;  %20224 = vst [vmem:[#allocation65_spill] sm:$0xff] %v16772_v19 }
 0x29a   : > { %v3203_v4 = vadd.f32 %v3076_v61, %v20225_v30  ;;  %v16776_v3 = vadd.f32 %v16609_v46, %v3205_v24  ;;  %v16778_v55 = vpop.f32.mrf.mxu0 }
 0x29b   : > { %v13330_v34 = vpop.f32.mrf.mxu1 }
 0x29c   : > { %v3206_v57 = vadd.f32 %v13330_v34, %v20226_v51  ;;  %v16782_v50 = vadd.f32 %v16618_v17, %v3203_v4  ;;  %v16786_v43 = vpop.f32.mrf.mxu0 }
 0x29d   : > { %v16784_v6 = vpop.f32.mrf.mxu1 }
 0x29e   : > { %20227 = vst [vmem:[#allocation67_spill] sm:$0xff] %v16782_v50  ;;  %v16789_v39 = vadd.f32 %v16630_v45, %v3206_v57  ;;  %v16791_v13 = vpop.f32.mrf.mxu0 }
 0x29f   : > { %v13333_v58 = vpop.f32.mrf.mxu1 }
 0x2a0   : > { %20228 = vst [vmem:[#allocation69_spill] sm:$0xff] %v16789_v39  ;;  %v3209_v46 = vadd.f32 %v13333_v58, %v16500_v12  ;;  %v16794_v40 = vpop.f32.mrf.mxu0 }
 0x2a1   : > { %v3092_v59 = vpop.f32.mrf.mxu1  ;;  %20229 = vst [vmem:[#allocation96_spill] sm:$0xff] %v16794_v40  ;;  %v476_v40 = vld [vmem:[#allocation3] sm:$0x1] }
 0x2a2   : > { %v3207_v24 = vadd.f32 %v3092_v59, %v16518_v44  ;;  %v16798_v17 = vadd.f32 %v16650_v16, %v3209_v46 }
 0x2a3   : > { %v13334_v61 = vpop.f32.mrf.mxu1  ;;  %v16801_v4 = vpop.f32.mrf.mxu0 }
 0x2a4   : > { %20230 = vst [vmem:[#allocation70_spill] sm:$0xff] %v16798_v17  ;;  %v3210_v30 = vadd.f32 %v13334_v61, %v16524_v27  ;;  %v16804_v45 = vadd.f32 %v16663_v31, %v3207_v24  ;;  %v479_v24 = vld [vmem:[#allocation3 + $0xc] sm:$0x1] }
 0x2a5   : > { %v16806_v34 = vpop.f32.mrf.mxu1  ;;  %v16808_v51 = vpop.f32.mrf.mxu0 }
 0x2a6   : > { %20231 = vst [vmem:[#allocation97_spill] sm:$0xff] %v16804_v45  ;;  %v16811_v12 = vadd.f32 %v16678_v29, %v3210_v30 }
 0x2a7   : > { %v13337_v57 = vpop.f32.mrf.mxu1  ;;  %v16814_v16 = vpop.f32.mrf.mxu0 }
 0x2a8   : > { %v3213_v44 = vadd.f32 %v13337_v57, %v16552_v22  ;;  %v480_v22 = vsel %vm14525_vm2, 0, %v479_v24 }
 0x2a9   : > { %v3108_v58 = vpop.f32.mrf.mxu1  ;;  %v16817_v46 = vpop.f32.mrf.mxu0  ;;  %481 = vst [vmem:[#allocation3 + $0xc] sm:$0x1] %v480_v22 }
 0x2aa   : > { %v3211_v27 = vadd.f32 %v3108_v58, %v16567_v37  ;;  %20232 = vst [vmem:[#allocation72_spill] sm:$0xff] %v16817_v46  ;;  %v16820_v31 = vadd.f32 %v16689_v56, %v3213_v44  ;;  %v536_v37 = vld [vmem:[#allocation3 + $0x20] sm:$0x1] }
 0x2ab   : > { %v13338_v59 = vpop.f32.mrf.mxu1  ;;  %v16823_v45 = vpop.f32.mrf.mxu0 }
 0x2ac   : > { %v3214_v61 = vadd.f32 %v13338_v59, %v16592_v62  ;;  %v16826_v29 = vadd.f32 %v16700_v2, %v3211_v27  ;;  %v537_v62 = vsel %vm14536_vm5, 0, %v536_v37  ;;  %v533_v59 = vld [vmem:[#allocation3 + $0x14] sm:$0x1] }
 0x2ad   : > { %v16830_v30 = vpop.f32.mrf.mxu1  ;;  %v16832_v57 = vpop.f32.mrf.mxu0  ;;  %538 = vst [vmem:[#allocation3 + $0x20] sm:$0x1] %v537_v62  ;;  %v534_v24 = vsel %vm14536_vm5, 0, %v533_v59 }
 0x2ae   : > { %v16835_v56 = vadd.f32 %v16713_v36, %v3214_v61  ;;  %535 = vst [vmem:[#allocation3 + $0x14] sm:$0x1] %v534_v24  ;;  %v488_v61 = vld [vmem:[#allocation3 + $0x30] sm:$0x1]  ;;  %v485_v24 = vld [vmem:[#allocation3 + $0x24] sm:$0x1] }
 0x2af   : > { %v13341_v58 = vpop.f32.mrf.mxu1  ;;  %v16840_v27 = vpop.f32.mrf.mxu0  ;;  %v489_v62 = vsel %vm14525_vm2, 0, %v488_v61 }
 0x2b0   : > { %v3217_v2 = vadd.f32 %v13341_v58, %v16616_v52  ;;  %490 = vst [vmem:[#allocation3 + $0x30] sm:$0x1] %v489_v62 }
 0x2b1   : > { %v3124_v22 = vpop.f32.mrf.mxu1  ;;  %v16845_v17 = vpop.f32.mrf.mxu0 }
 0x2b2   : > { %v3215_v46 = vadd.f32 %v3124_v22, %v16628_v35  ;;  %20234 = vst [vmem:[#allocation57_spill] sm:$0xff] %v16845_v17  ;;  %v16848_v36 = vadd.f32 %v16727_v60, %v3217_v2  ;;  %v486_v60 = vsel %vm14525_vm2, 0, %v485_v24 }
 0x2b3   : > { %v13342_v37 = vpop.f32.mrf.mxu1  ;;  %v16853_v58 = vpop.f32.mrf.mxu0  ;;  %487 = vst [vmem:[#allocation3 + $0x24] sm:$0x1] %v486_v60  ;;  %v539_v60 = vld [vmem:[#allocation3 + $0x2c] sm:$0x1] }
 0x2b4   : > { %v3218_v52 = vadd.f32 %v13342_v37, %v16636_v18  ;;  %20235 = vst [vmem:[#allocation94_spill] sm:$0xff] %v16853_v58  ;;  %v16856_v59 = vadd.f32 %v16733_v38, %v3215_v46  ;;  %v542_v18 = vld [vmem:[#allocation3 + $0x38] sm:$0x1] }
 0x2b5   : > { %v16858_v35 = vpop.f32.mrf.mxu1  ;;  %v16862_v2 = vpop.f32.mrf.mxu0  ;;  %v543_v38 = vsel %vm14536_vm5, 0, %v542_v18  ;;  %v540_v18 = vsel %vm14536_vm5, 0, %v539_v60 }
 0x2b6   : > { %20236 = vst [vmem:[#allocation76_spill] sm:$0xff] %v16862_v2  ;;  %v16865_v22 = vadd.f32 %v16741_v11, %v3218_v52  ;;  %544 = vst [vmem:[#allocation3 + $0x38] sm:$0x1] %v543_v38  ;;  %v14044_v52 = vld [vmem:[#allocation9 + $0x10] sm:$0xff]  }
 0x2b7   : > { %v13345_v61 = vpop.f32.mrf.mxu1  ;;  %v16868_v17 = vpop.f32.mrf.mxu0  ;;  %13541 = vmatprep.subr.bf16.mxu1 %v14044_v52  ;;  %541 = vst [vmem:[#allocation3 + $0x2c] sm:$0x1] %v540_v18  ;;  %v14045_v18 = vld [vmem:[#allocation9] sm:$0xff]  }
 0x2b8   : > { %v3221_v37 = vadd.f32 %v13345_v61, %v16661_v14  ;;  %20237 = vst [vmem:[#allocation74_spill] sm:$0xff] %v16868_v17  ;;  %13542 = vmatpush3.bf16.msra.mxu1 %v14044_v52  ;;  %13577 = vmatprep.subr.bf16.mxu0 %v14045_v18 }
 0x2b9   : > { %v3140_v46 = vpop.f32.mrf.mxu1  ;;  %v16873_v24 = vpop.f32.mrf.mxu0  ;;  %13578 = vmatpush3.bf16.msra.mxu0 %v14045_v18 }
 0x2ba   : > { %v3219_v62 = vadd.f32 %v3140_v46, %v16669_v21  ;;  %20238 = vst [vmem:[#allocation58_spill] sm:$0xff] %v16873_v24  ;;  %v16876_v2 = vadd.f32 %v16754_v54, %v3221_v37 }
 0x2bb   : > { %v13346_v11 = vpop.f32.mrf.mxu1  ;;  %v16879_v14 = vpop.f32.mrf.mxu0 }
 0x2bc   : > { %v3222_v58 = vadd.f32 %v13346_v11, %v16681_v5  ;;  %20239 = vst [vmem:[#allocation80_spill] sm:$0xff] %v16879_v14  ;;  %v16882_v61 = vadd.f32 %v16762_v8, %v3219_v62  ;;  %v494_v14 = vld [vmem:[#allocation3 + $0x48] sm:$0x1] }
 0x2bd   : > { %v16886_v38 = vpop.f32.mrf.mxu1  ;;  %v16888_v21 = vpop.f32.mrf.mxu0 }
 0x2be   : > { %20240 = vst [vmem:[#allocation62_spill] sm:$0xff] %v16888_v21  ;;  %v16891_v54 = vadd.f32 %v16767_v33, %v3222_v58  ;;  %v495_v33 = vsel %vm14525_vm2, 0, %v494_v14 }
 0x2bf   : > { %v13349_v37 = vpop.f32.mrf.mxu1  ;;  %v16894_v46 = vpop.f32.mrf.mxu0  ;;  %496 = vst [vmem:[#allocation3 + $0x48] sm:$0x1] %v495_v33 }
 0x2c0   : > { %v3225_v5 = vadd.f32 %v13349_v37, %v16698_v53 }
 0x2c1   : > { %v3156_v8 = vpop.f32.mrf.mxu1  ;;  %v16897_v11 = vpop.f32.mrf.mxu0 }
 0x2c2   : > { %v3223_v62 = vadd.f32 %v3156_v8, %v16709_v0  ;;  %20241 = vst [vmem:[#allocation61_spill] sm:$0xff] %v16897_v11  ;;  %v16900_v60 = vadd.f32 %v16778_v55, %v3225_v5  ;;  %v491_v0 = vld [vmem:[#allocation3 + $0x3c] sm:$0x1]  ;;  %v545_v8 = vld [vmem:[#allocation3 + $0x44] sm:$0x1] }
 0x2c3   : > { %v13350_v21 = vpop.f32.mrf.mxu1  ;;  %v16905_v52 = vpop.f32.mrf.mxu0  ;;  %v492_v55 = vsel %vm14525_vm2, 0, %v491_v0  ;;  %v546_v18 = vsel %vm14536_vm5, 0, %v545_v8  ;;  %v500_v0 = vld [vmem:[#allocation3 + $0x60] sm:$0x1] }
 0x2c4   : > { %v3226_v58 = vadd.f32 %v13350_v21, %v16716_v10  ;;  %v16908_v53 = vadd.f32 %v16786_v43, %v3223_v62  ;;  %493 = vst [vmem:[#allocation3 + $0x3c] sm:$0x1] %v492_v55  ;;  %v548_v21 = vld [vmem:[#allocation3 + $0x50] sm:$0x1]  ;;  %547 = vst [vmem:[#allocation3 + $0x44] sm:$0x1] %v546_v18 }
 0x2c5   : > { %v16910_v37 = vpop.f32.mrf.mxu1  ;;  %v16914_v5 = vpop.f32.mrf.mxu0  ;;  %v549_v33 = vsel %vm14536_vm5, 0, %v548_v21 }
 0x2c6   : > { %v16917_v14 = vadd.f32 %v16791_v13, %v3226_v58  ;;  %550 = vst [vmem:[#allocation3 + $0x50] sm:$0x1] %v549_v33  ;;  %v501_v13 = vsel %vm14525_vm2, 0, %v500_v0  ;;  %v497_v33 = vld [vmem:[#allocation3 + $0x54] sm:$0x1] }
 0x2c7   : > { %v13353_v10 = vpop.f32.mrf.mxu1  ;;  %v16920_v62 = vpop.f32.mrf.mxu0  ;;  %502 = vst [vmem:[#allocation3 + $0x60] sm:$0x1] %v501_v13 }
 0x2c8   : > { %v3229_v43 = vadd.f32 %v13353_v10, %v16731_v48 }
 0x2c9   : > { %v3172_v11 = vpop.f32.mrf.mxu1  ;;  %v16929_v55 = vpop.f32.mrf.mxu0 }
 0x2ca   : > { %v3227_v58 = vadd.f32 %v3172_v11, %v16737_v15  ;;  %20242 = vst [vmem:[#allocation82_spill] sm:$0xff] %v16929_v55  ;;  %v16932_v48 = vadd.f32 %v16801_v4, %v3229_v43  ;;  %v498_v15 = vsel %vm14525_vm2, 0, %v497_v33  ;;  %v554_v55 = vld [vmem:[#allocation3 + $0x68] sm:$0x1] }
 0x2cb   : > { %v13354_v10 = vpop.f32.mrf.mxu1  ;;  %v16935_v24 = vpop.f32.mrf.mxu0  ;;  %499 = vst [vmem:[#allocation3 + $0x54] sm:$0x1] %v498_v15 }
 0x2cc   : > { %v3230_v21 = vadd.f32 %v13354_v10, %v16744_v47  ;;  %v16938_v8 = vadd.f32 %v16808_v51, %v3227_v58 }
 0x2cd   : > { %v16940_v18 = vpop.f32.mrf.mxu1  ;;  %v16944_v11 = vpop.f32.mrf.mxu0 }
 0x2ce   : > { %v16947_v4 = vadd.f32 %v16814_v16, %v3230_v21 }
 0x2cf   : > { %v13357_v43 = vpop.f32.mrf.mxu1  ;;  %v16950_v0 = vpop.f32.mrf.mxu0 }
 0x2d0   : > { %v3233_v47 = vadd.f32 %v13357_v43, %v16752_v32  ;;  %v555_v32 = vsel %vm14536_vm5, 0, %v554_v55 }
 0x2d1   : > { %v3188_v13 = vpop.f32.mrf.mxu1  ;;  %v16953_v58 = vpop.f32.mrf.mxu0  ;;  %556 = vst [vmem:[#allocation3 + $0x68] sm:$0x1] %v555_v32  ;;  %v503_v32 = vld [vmem:[#allocation3 + $0x6c] sm:$0x1] }
 0x2d2   : > { %v3231_v51 = vadd.f32 %v3188_v13, %v16758_v20  ;;  %20243 = vst [vmem:[#allocation99_spill] sm:$0xff] %v16953_v58  ;;  %v16956_v10 = vadd.f32 %v16823_v45, %v3233_v47 }
 0x2d3   : > { %v13358_v33 = vpop.f32.mrf.mxu1  ;;  %v16959_v16 = vpop.f32.mrf.mxu0 }
 0x2d4   : > { %v3234_v17 = vadd.f32 %v13358_v33, %v16765_v41  ;;  %v16962_v21 = vadd.f32 %v16832_v57, %v3231_v51  ;;  %v551_v41 = vld [vmem:[#allocation3 + $0x5c] sm:$0x1]  ;;  %v506_v33 = vld [vmem:[#allocation3 + $0x78] sm:$0x1] }
 0x2d5   : > { %v16966_v15 = vpop.f32.mrf.mxu1  ;;  %v16968_v20 = vpop.f32.mrf.mxu0  ;;  %v552_v57 = vsel %vm14536_vm5, 0, %v551_v41  ;;  %v477_v41 = vsel %vm14525_vm2, 0, %v476_v40 }
 0x2d6   : > { %v16971_v45 = vadd.f32 %v16840_v27, %v3234_v17  ;;  %553 = vst [vmem:[#allocation3 + $0x5c] sm:$0x1] %v552_v57  ;;  %v507_v17 = vsel %vm14525_vm2, 0, %v506_v33  ;;  %v504_v27 = vsel %vm14525_vm2, 0, %v503_v32  ;;  %v560_v57 = vld [vmem:[#allocation3 + $0x80] sm:$0x1] }
 0x2d7   : > { %v16973_v43 = vpop.f32.mrf.mxu1  ;;  %v16975_v47 = vpop.f32.mrf.mxu0  ;;  %508 = vst [vmem:[#allocation3 + $0x78] sm:$0x1] %v507_v17  ;;  %505 = vst [vmem:[#allocation3 + $0x6c] sm:$0x1] %v504_v27  ;;  %v561_v28 = vsel %vm14536_vm5, 0, %v560_v57  ;;  %v558_v32 = vsel %vm14536_vm5, 0, %v557_v1 }
 0x2d8   : > { %20244 = vst [vmem:[#allocation83_spill] sm:$0xff] %v16971_v45  ;;  %478 = vst [vmem:[#allocation3] sm:$0x1] %v477_v41  ;;  %v6680_v57 = vld [vmem:[#allocation3 + $0x4] sm:$0xf] }
 0x2d9   : > { %v16977_v13 = vpop.f32.mrf.mxu1  ;;  %v16981_v51 = vpop.f32.mrf.mxu0  ;;  %562 = vst [vmem:[#allocation3 + $0x80] sm:$0x1] %v561_v28  ;;  %559 = vst [vmem:[#allocation3 + $0x74] sm:$0x1] %v558_v32 }
 0x2da   : > { %20245 = vst [vmem:[#allocation100_spill] sm:$0xff] %v16977_v13  ;;  %20246 = vst [vmem:[#allocation84_spill] sm:$0xff] %v16981_v51 }
 0x2db   : > { %v16983_v55 = vpop.f32.mrf.mxu1  ;;  %v16985_v58 = vpop.f32.mrf.mxu0 }
 0x2dc   : > { %20247 = vst [vmem:[#allocation98_spill] sm:$0xff] %v16983_v55 }
 0x2dd   : > { %v16991_v19 = vpop.f32.mrf.mxu1  ;;  %v16995_v51 = vpop.f32.mrf.mxu0 }
 0x2de   : > { %20248 = vst [vmem:[#allocation86_spill] sm:$0xff] %v16991_v19 }
 0x2df   : > { %v16999_v33 = vpop.f32.mrf.mxu1  ;;  %v17003_v19 = vpop.f32.mrf.mxu0 }
 0x2e0   : > { %20249 = vst [vmem:[#allocation64_spill] sm:$0xff] %v16999_v33  ;;  %v6679_v33 = vld [vmem:[#allocation3] sm:$0xf] }
 0x2e1   : > { %v17005_v17 = vpop.f32.mrf.mxu1  ;;  %v17007_v40 = vpop.f32.mrf.mxu0  ;;  %v12458_v32 = vcombine.low %v6679_v33, %v6680_v57  ;;  %v6732_v13 = vshrl.u32 %v6679_v33, 16  ;;  %v6735_v50 = vshll.u32 %v6679_v33, 16 }
 0x2e2   : > { %20250 = vst [vmem:[#allocation88_spill] sm:$0xff] %v17005_v17  ;;  %20251 = vst [vmem:[#allocation92_spill] sm:$0xff] %v17007_v40 }
 0x2e3   : > { %v13406_v27 = vpop.f32.mrf.mxu1  ;;  %v17010_v63 = vpop.f32.mrf.mxu0  ;;  %13579 = vmatprep.mubr.msk.bf16.mxu0 %vm1885_vm9, %v12458_v32  ;;  %v6734_v32 = vrot.slane %v6732_v13, 4  ;;  %v6741_v13 = vshll.u32 %v6680_v57, 16 }
 0x2e4   : > { %v4430_v41 = vadd.f32 %v13406_v27, %v16811_v12 }
 0x2e5   : > { %v17012_v55 = vpop.f32.mrf.mxu1  ;;  %v17014_v28 = vpop.f32.mrf.mxu0 }
 0x2e6   : > { %20252 = vst [vmem:[#allocation93_spill] sm:$0xff] %v17012_v55  ;;  %v17017_v1 = vadd.f32 %v16894_v46, %v4430_v41 }
 0x2e7   : > { %v13409_v39 = vpop.f32.mrf.mxu1  ;;  %v17022_v27 = vpop.f32.mrf.mxu0 }
 0x2e8   : > { %20253 = vst [vmem:[#allocation95_spill] sm:$0xff] %v17017_v1  ;;  %v4433_v17 = vadd.f32 %v13409_v39, %v16820_v31 }
 0x2e9   : > { %v4328_v45 = vpop.f32.mrf.mxu1  ;;  %v17033_v39 = vpop.f32.mrf.mxu0 }
 0x2ea   : > { %v4431_v12 = vadd.f32 %v4328_v45, %v16826_v29  ;;  %v17025_v40 = vadd.f32 %v16905_v52, %v4433_v17  ;;  %20256 = vst [vmem:[#allocation60_spill] sm:$0xff] %v17033_v39  ;;  %v6745_v29 = vshrl.u32 %v6680_v57, 16  ;;  %v6737_v52 = vrot.slane %v6735_v50, 5  ;;  %v512_v17 = vld [vmem:[#allocation3 + $0x90] sm:$0x1] }
 0x2eb   : > { %v13410_v55 = vpop.f32.mrf.mxu1 }
 0x2ec   : > { %20254 = vst [vmem:[#allocation73_spill] sm:$0xff] %v17025_v40  ;;  %v4434_v46 = vadd.f32 %v13410_v55, %v16835_v56  ;;  %v17029_v41 = vadd.f32 %v16914_v5, %v4431_v12  ;;  %v509_v40 = vld [vmem:[#allocation3 + $0x84] sm:$0x1]  ;;  %v513_v56 = vsel %vm14525_vm2, 0, %v512_v17  ;;  %v566_v55 = vld [vmem:[#allocation3 + $0x98] sm:$0x1]  ;;  %v6738_v39 = vor.u32 %v6737_v52, %v6734_v32 }
 0x2ed   : > { %v17031_v1 = vpop.f32.mrf.mxu1  ;;  %v510_v5 = vsel %vm14525_vm2, 0, %v509_v40  ;;  %v530_v12 = vld [vmem:[#allocation3 + $0x8] sm:$0x1]  ;;  %514 = vst [vmem:[#allocation3 + $0x90] sm:$0x1] %v513_v56  ;;  %v6747_v56 = vrot.slane %v6745_v29, 4 }
 0x2ee   : > { %20255 = vst [vmem:[#allocation71_spill] sm:$0xff] %v17029_v41  ;;  %v17036_v31 = vadd.f32 %v16920_v62, %v4434_v46  ;;  %511 = vst [vmem:[#allocation3 + $0x84] sm:$0x1] %v510_v5  ;;  %v567_v62 = vsel %vm14536_vm5, 0, %v566_v55  ;;  %v531_v50 = vsel %vm14536_vm5, 0, %v530_v12  ;;  %v14050_v46 = vld [vmem:[#allocation9 + $0x28] sm:$0xff]  }
 0x2ef   : > { %v13413_v45 = vpop.f32.mrf.mxu1  ;;  %568 = vst [vmem:[#allocation3 + $0x98] sm:$0x1] %v567_v62  ;;  %532 = vst [vmem:[#allocation3 + $0x8] sm:$0x1] %v531_v50  ;;  %13611 = vmatprep.subr.bf16.mxu1 %v14050_v46  ;;  %v6739_v50 = vrot.slane %v6738_v39, 4 }
 0x2f0   : > { %20257 = vst [vmem:[#allocation77_spill] sm:$0xff] %v17036_v31  ;;  %v4437_v33 = vadd.f32 %v13413_v45, %v16848_v36  ;;  %v563_v36 = vld [vmem:[#allocation3 + $0x8c] sm:$0x1]  ;;  %v17047_v45 = vpop.f32.mrf.mxu0  ;;  %v6743_v31 = vrot.slane %v6741_v13, 5 }
 0x2f1   : > { %v4344_v41 = vpop.f32.mrf.mxu1  ;;  %v564_v5 = vsel %vm14536_vm5, 0, %v563_v36 }
 0x2f2   : > { %v4435_v17 = vadd.f32 %v4344_v41, %v16856_v59  ;;  %v17051_v40 = vadd.f32 %v16935_v24, %v4437_v33  ;;  %565 = vst [vmem:[#allocation3 + $0x8c] sm:$0x1] %v564_v5  ;;  %v17061_v24 = vpop.f32.mrf.mxu0  ;;  %v6748_v29 = vor.u32 %v6747_v56, %v6743_v31 }
 0x2f3   : > { %v13414_v55 = vpop.f32.mrf.mxu1 }
 0x2f4   : > { %v4438_v57 = vadd.f32 %v13414_v55, %v16865_v22  ;;  %v17057_v12 = vadd.f32 %v16944_v11, %v4435_v17  ;;  %v17067_v36 = vpop.f32.mrf.mxu0  ;;  %v6749_v32 = vrot.slane %v6748_v29, 4 }
 0x2f5   : > { %v17059_v59 = vpop.f32.mrf.mxu1 }
 0x2f6   : > { %v17064_v41 = vadd.f32 %v16950_v0, %v4438_v57  ;;  %v6715_v46 = vld [vmem:[#allocation3 + $0x8] sm:$0x1]  ;;  %v17081_v55 = vpop.f32.mrf.mxu0 }
 0x2f7   : > { %v13417_v33 = vpop.f32.mrf.mxu1  ;;  %v6751_v52 = vshll.u32 %v6715_v46, 16 }
 0x2f8   : > { %v4441_v62 = vadd.f32 %v13417_v33, %v16876_v2  ;;  %v6744_v2 = vsel %vm14584_vm8, %v6739_v50, %v6743_v31  ;;  %v17090_v33 = vld [vmem:[#allocation9 + $0x38] sm:$0xff]   ;;  %v518_v31 = vld [vmem:[#allocation3 + $0xa8] sm:$0x1] }
 0x2f9   : > { %v4360_v13 = vpop.f32.mrf.mxu1  ;;  %v6753_v39 = vrot.slane %v6751_v52, 5  ;;  %13647 = vmatprep.subr.bf16.mxu0 %v17090_v33  ;;  %v572_v52 = vld [vmem:[#allocation3 + $0xb0] sm:$0x1] }
 0x2fa   : > { %v4439_v22 = vadd.f32 %v4360_v13, %v16882_v61  ;;  %v17071_v11 = vadd.f32 %v16959_v16, %v4441_v62  ;;  %v17092_v62 = vpop.f32.mrf.mxu0  ;;  %v519_v13 = vsel %vm14525_vm2, 0, %v518_v31 }
 0x2fb   : > { %v13418_v17 = vpop.f32.mrf.mxu1  ;;  %v6754_v16 = vsel %vm14584_vm8, %v6749_v32, %v6753_v39  ;;  %520 = vst [vmem:[#allocation3 + $0xa8] sm:$0x1] %v519_v13  ;;  %v515_v32 = vld [vmem:[#allocation3 + $0x9c] sm:$0x1] }
 0x2fc   : > { %v4442_v0 = vadd.f32 %v13418_v17, %v16891_v54  ;;  %v17075_v56 = vadd.f32 %v16968_v20, %v4439_v22  ;;  %v12424_v29 = vcombine.low %v6744_v2, %v6754_v16 }
 0x2fd   : > { %v17079_v5 = vpop.f32.mrf.mxu1 }
 0x2fe   : > { %v17084_v61 = vadd.f32 %v16975_v47, %v4442_v0  ;;  %13543 = vmatprep.mubr.msk.bf16.mxu1 %vm1885_vm9, %v12424_v29  ;;  %v17111_v0 = vpop.f32.mrf.mxu0 }
 0x2ff   : > { %v13421_v57 = vpop.f32.mrf.mxu1 }
 0x300   : > { %v4445_v54 = vadd.f32 %v13421_v57, %v16900_v60  ;;  %v17119_v29 = vpop.f32.mrf.mxu0 }
 0x301   : > { %v4376_v20 = vpop.f32.mrf.mxu1 }
 0x302   : > { %v4443_v50 = vadd.f32 %v4376_v20, %v16908_v53  ;;  %v17096_v47 = vadd.f32 %v16985_v58, %v4445_v54  ;;  %v516_v53 = vsel %vm14525_vm2, 0, %v515_v32  ;;  %v573_v58 = vsel %vm14536_vm5, 0, %v572_v52 }
 0x303   : > { %v13422_v46 = vpop.f32.mrf.mxu1  ;;  %517 = vst [vmem:[#allocation3 + $0x9c] sm:$0x1] %v516_v53  ;;  %574 = vst [vmem:[#allocation3 + $0xb0] sm:$0x1] %v573_v58  ;;  %v17139_v58 = vpop.f32.mrf.mxu0 }
 0x304   : > { %v4446_v60 = vadd.f32 %v13422_v46, %v16917_v14  ;;  %v17103_v22 = vadd.f32 %v16995_v51, %v4443_v50  ;;  %v569_v14 = vld [vmem:[#allocation3 + $0xa4] sm:$0x1]  ;;  %v20259_v50 = vld [vmem:[#allocation56_spill] sm:$0xff] }
 0x305   : > { %v17105_v17 = vpop.f32.mrf.mxu1  ;;  %v570_v39 = vsel %vm14536_vm5, 0, %v569_v14  ;;  %v2353_v13 = vadd.f32 %v16711_v7, %v20259_v50  ;;  %v20263_v7 = vld [vmem:[#allocation68_spill] sm:$0xff] }
 0x306   : > { %v17114_v2 = vadd.f32 %v17003_v19, %v4446_v60  ;;  %571 = vst [vmem:[#allocation3 + $0xa4] sm:$0x1] %v570_v39  ;;  %v20258_v19 = vld [vmem:[#allocation90_spill] sm:$0xff]  ;;  %v20260_v60 = vld [vmem:[#allocation75_spill] sm:$0xff] }
 0x307   : > { %v2337_v31 = vadd.f32 %v16671_v9, %v20258_v19  ;;  %v2369_v32 = vadd.f32 %v16739_v42, %v20260_v60  ;;  %v20264_v39 = vld [vmem:[#allocation78_spill] sm:$0xff]  ;;  %v20269_v60 = vld [vmem:[#allocation59_spill] sm:$0xff] }
 0x308   : > { %v13425_v51 = vpop.f32.mrf.mxu1  ;;  %v2854_v42 = vadd.f32 %v20264_v39, %v2353_v13  ;;  %v20267_v19 = vld [vmem:[#allocation54_spill] sm:$0xff] }
 0x309   : > { %v4449_v16 = vadd.f32 %v13425_v51, %v16932_v48  ;;  %v20261_v48 = vld [vmem:[#allocation66_spill] sm:$0xff]  ;;  %v2850_v14 = vadd.f32 %v20263_v7, %v2337_v31  ;;  %v3208_v50 = vadd.f32 %v16806_v34, %v20267_v19  ;;  %v3216_v31 = vadd.f32 %v16858_v35, %v20269_v60  ;;  %v20271_v7 = vld [vmem:[#allocation100_spill] sm:$0xff] }
 0x30a   : > { %v4392_v57 = vpop.f32.mrf.mxu1  ;;  %v2385_v52 = vadd.f32 %v16760_v25, %v20261_v48  ;;  %v20265_v25 = vld [vmem:[#allocation55_spill] sm:$0xff]  ;;  %v20280_v60 = vld [vmem:[#allocation96_spill] sm:$0xff] }
 0x30b   : > { %v4447_v54 = vadd.f32 %v4392_v57, %v16938_v8  ;;  %v17123_v20 = vadd.f32 %v17010_v63, %v4449_v16  ;;  %v2858_v16 = vadd.f32 %v16528_v23, %v2369_v32  ;;  %v3220_v13 = vadd.f32 %v16886_v38, %v2850_v14  ;;  %v17161_v32 = vpop.f32.mrf.mxu0  ;;  %v20273_v38 = vld [vmem:[#allocation69_spill] sm:$0xff]  ;;  %v20274_v14 = vld [vmem:[#allocation98_spill] sm:$0xff] }
 0x30c   : > { %v13426_v46 = vpop.f32.mrf.mxu1  ;;  %v2862_v57 = vadd.f32 %v20265_v25, %v2385_v52  ;;  %v3224_v23 = vadd.f32 %v16910_v37, %v2854_v42  ;;  %v4426_v37 = vadd.f32 %v20274_v14, %v20273_v38  ;;  %v20275_v42 = vld [vmem:[#allocation87_spill] sm:$0xff]  ;;  %v20283_v38 = vld [vmem:[#allocation70_spill] sm:$0xff]  ;;  %v20284_v14 = vld [vmem:[#allocation64_spill] sm:$0xff] }
 0x30d   : > { %v4450_v53 = vadd.f32 %v13426_v46, %v16947_v4  ;;  %v17135_v8 = vadd.f32 %v17014_v28, %v4447_v54  ;;  %v20266_v28 = vld [vmem:[#allocation53_spill] sm:$0xff]  ;;  %v3228_v34 = vadd.f32 %v16940_v18, %v2858_v16 }
 0x30e   : > { %v17137_v63 = vpop.f32.mrf.mxu1  ;;  %v3204_v54 = vadd.f32 %v16784_v6, %v20266_v28  ;;  %v20268_v46 = vld [vmem:[#allocation85_spill] sm:$0xff]  ;;  %v3232_v52 = vadd.f32 %v16966_v15, %v2862_v57  ;;  %v20277_v28 = vld [vmem:[#allocation63_spill] sm:$0xff]  ;;  %v17176_v57 = vpop.f32.mrf.mxu0 }
 0x30f   : > { %v17142_v9 = vadd.f32 %v17022_v27, %v4450_v53  ;;  %v3212_v27 = vadd.f32 %v16830_v30, %v20268_v46  ;;  %v20270_v53 = vld [vmem:[#allocation67_spill] sm:$0xff]  ;;  %v20279_v16 = vld [vmem:[#allocation65_spill] sm:$0xff] }
 0x310   : > { %v4423_v35 = vadd.f32 %v20271_v7, %v20270_v53  ;;  %v3942_v25 = vadd.f32 %v20275_v42, %v3204_v54  ;;  %v20278_v46 = vld [vmem:[#allocation91_spill] sm:$0xff]  ;;  %v3958_v15 = vadd.f32 %v20279_v16, %v3220_v13  ;;  %v20281_v53 = vld [vmem:[#allocation94_spill] sm:$0xff]  ;;  %v4429_v54 = vadd.f32 %v20284_v14, %v20283_v38  ;;  %v20285_v42 = vld [vmem:[#allocation72_spill] sm:$0xff] }
 0x311   : > { %20262 = vst [vmem:[#allocation81_spill] sm:$0xff] %v17142_v9  ;;  %v13429_v51 = vpop.f32.mrf.mxu1  ;;  %v3950_v19 = vadd.f32 %v20277_v28, %v3212_v27  ;;  %v3954_v18 = vadd.f32 %v20278_v46, %v3216_v31  ;;  %v20282_v7 = vld [vmem:[#allocation86_spill] sm:$0xff]  ;;  %v20287_v9 = vld [vmem:[#allocation97_spill] sm:$0xff]  ;;  %v20288_v31 = vld [vmem:[#allocation88_spill] sm:$0xff] }
 0x312   : > { %v4453_v4 = vadd.f32 %v13429_v51, %v16956_v10  ;;  %v4425_v10 = vadd.f32 %v16973_v43, %v16776_v3  ;;  %v20272_v51 = vld [vmem:[#allocation83_spill] sm:$0xff]  ;;  %v20276_v3 = vld [vmem:[#allocation89_spill] sm:$0xff]  ;;  %v4427_v46 = vadd.f32 %v20288_v31, %v20287_v9  ;;  %v17190_v13 = vld [vmem:[%s19879_s1 + $0x4] ss:$0 sm:$0xff] }
 0x313   : > { %v4408_v48 = vpop.f32.mrf.mxu1  ;;  %v3946_v43 = vadd.f32 %v20276_v3, %v3208_v50  ;;  %v3966_v50 = vadd.f32 %v20285_v42, %v3228_v34  ;;  %v20286_v3 = vld [vmem:[#allocation57_spill] sm:$0xff]  ;;  %v20290_v34 = vld [vmem:[#allocation74_spill] sm:$0xff]  ;;  %v578_v14 = vld [vmem:[#allocation3 + $0xc8] sm:$0x1] }
 0x314   : > { %v4451_v6 = vadd.f32 %v4408_v48, %v16962_v21  ;;  %v3962_v48 = vadd.f32 %v20280_v60, %v3224_v23  ;;  %v3970_v27 = vadd.f32 %v20286_v3, %v3232_v52  ;;  %v17194_v60 = vadd.f32 %v17047_v45, %v4453_v4  ;;  %v521_v38 = vld [vmem:[#allocation3 + $0xb4] sm:$0x1]  ;;  %v20293_v31 = vld [vmem:[#allocation80_spill] sm:$0xff] }
 0x315   : > { %v13430_v30 = vpop.f32.mrf.mxu1  ;;  %v522_v4 = vsel %vm14525_vm2, 0, %v521_v38  ;;  %v20291_v3 = vld [vmem:[#allocation93_spill] sm:$0xff] }
 0x316   : > { %v4454_v39 = vadd.f32 %v13430_v30, %v20272_v51  ;;  %v4796_v30 = vadd.f32 %v20281_v53, %v4425_v10  ;;  %v4424_v51 = vadd.f32 %v20282_v7, %v3942_v25  ;;  %v20289_v10 = vld [vmem:[#allocation76_spill] sm:$0xff]  ;;  %v524_v25 = vld [vmem:[#allocation3 + $0xc0] sm:$0x1]  ;;  %v4797_v7 = vadd.f32 %v20290_v34, %v4426_v37  ;;  %523 = vst [vmem:[#allocation3 + $0xb4] sm:$0x1] %v522_v4 }
 0x317   : > { %v4411_v21 = vpop.f32.mrf.mxu1  ;;  %v4794_v16 = vadd.f32 %v20289_v10, %v4423_v35  ;;  %v525_v52 = vsel %vm14525_vm2, 0, %v524_v25  ;;  %v17200_v9 = vadd.f32 %v17061_v24, %v4451_v6  ;;  %v579_v37 = vsel %vm14536_vm5, 0, %v578_v14 }
 0x318   : > { %v17203_v42 = vadd.f32 %v17067_v36, %v4454_v39  ;;  %526 = vst [vmem:[#allocation3 + $0xc0] sm:$0x1] %v525_v52  ;;  %v4432_v24 = vadd.f32 %v17031_v1, %v3950_v19  ;;  %v17217_v36 = vld [vmem:[%s19879_s1 + $0x5] ss:$0 sm:$0xff]  ;;  %v20292_v39 = vld [vmem:[#allocation58_spill] sm:$0xff]  ;;  %v4436_v19 = vadd.f32 %v17059_v59, %v3954_v18  ;;  %v4440_v34 = vadd.f32 %v17079_v5, %v3958_v15  ;;  %v20295_v15 = vld [vmem:[#allocation61_spill] sm:$0xff] }
 0x319   : > { %v13473_v28 = vpop.f32.mrf.mxu1  ;;  %580 = vst [vmem:[#allocation3 + $0xc8] sm:$0x1] %v579_v37  ;;  %v575_v1 = vld [vmem:[#allocation3 + $0xbc] sm:$0x1]  ;;  %v4444_v52 = vadd.f32 %v17105_v17, %v3962_v48  ;;  %v4448_v59 = vadd.f32 %v17137_v63, %v3966_v50  ;;  %v4452_v18 = vadd.f32 %v4411_v21, %v3970_v27  ;;  %v20298_v63 = vld [vmem:[#allocation84_spill] sm:$0xff] }
 0x31a   : > { %v5534_v23 = vadd.f32 %v13473_v28, %v4796_v30  ;;  %v17205_v30 = vpop.f32.mrf.mxu0  ;;  %v4428_v28 = vadd.f32 %v20291_v3, %v3946_v43  ;;  %v20294_v43 = vld [vmem:[#allocation62_spill] sm:$0xff]  ;;  %v17248_v21 = vadd.f32 %v20298_v63, %v4440_v34  ;;  %v20299_v50 = vld [vmem:[#allocation92_spill] sm:$0xff] }
 0x31b   : > { %v5405_v53 = vpop.f32.mrf.mxu1  ;;  %v20296_v48 = vld [vmem:[#allocation82_spill] sm:$0xff]  ;;  %v17251_v27 = vadd.f32 %v20299_v50, %v4444_v52  ;;  %v6567_v50 = vld [vmem:[#allocation3 + $0xc] sm:$0xf] }
 0x31c   : > { %v6016_v35 = vadd.f32 %v17092_v62, %v5534_v23  ;;  %v5532_v45 = vadd.f32 %v5405_v53, %v4794_v16  ;;  %v4795_v62 = vadd.f32 %v20292_v39, %v4424_v51  ;;  %v4800_v23 = vadd.f32 %v20293_v31, %v4429_v54  ;;  %v17229_v54 = vpop.f32.mrf.mxu0  ;;  %v20297_v39 = vld [vmem:[#allocation99_spill] sm:$0xff] }
 0x31d   : > { %v13474_v6 = vpop.f32.mrf.mxu1  ;;  %v4798_v53 = vadd.f32 %v20294_v43, %v4427_v46  ;;  %v576_v51 = vsel %vm14536_vm5, 0, %v575_v1  ;;  %v17236_v17 = vadd.f32 %v20295_v15, %v4428_v28  ;;  %v20300_v43 = vld [vmem:[#allocation60_spill] sm:$0xff] }
 0x31e   : > { %v6052_v10 = vmul.f32 %v17190_v13, %v6016_v35  ;;  %v6014_v16 = vadd.f32 %v17111_v0, %v5532_v45  ;;  %v5535_v25 = vadd.f32 %v13474_v6, %v4797_v7  ;;  %577 = vst [vmem:[#allocation3 + $0xbc] sm:$0x1] %v576_v51  ;;  %v17239_v35 = vadd.f32 %v20296_v48, %v4432_v24  ;;  %v17253_v28 = vpop.f32.mrf.mxu0 }
 0x31f   : > { %v5408_v38 = vpop.f32.mrf.mxu1  ;;  %v17259_v1 = vadd.f32 %v20300_v43, %v4448_v59 }
 0x320   : > { %v6088_v14 = vadd.f32 %v17217_v36, %v6052_v10  ;;  %v6050_v0 = vmul.f32 %v17190_v13, %v6014_v16  ;;  %v6017_v7 = vadd.f32 %v17119_v29, %v5535_v25  ;;  %v5533_v46 = vadd.f32 %v5408_v38, %v4795_v62 }
 0x321   : > { %v13477_v5 = vpop.f32.mrf.mxu1  ;;  %v17245_v62 = vadd.f32 %v20297_v39, %v4436_v19  ;;  %v17262_v19 = vadd.f32 %v17081_v55, %v4452_v18  ;;  %v6574_v18 = vld [vmem:[#allocation3 + $0x18] sm:$0xf] }
 0x322   : > { %v6120_v45 = vmax.f32 %v6088_v14, 0.0  ;;  %v6086_v4 = vadd.f32 %v17217_v36, %v6050_v0  ;;  %v6053_v37 = vmul.f32 %v17190_v13, %v6017_v7  ;;  %v6015_v3 = vadd.f32 %v17139_v58, %v5533_v46  ;;  %v20301_v46 = vld [vmem:[#allocation95_spill] sm:$0xff] }
 0x323   : > { %v5538_v29 = vadd.f32 %v13477_v5, %v4800_v23  ;;  %v5421_v6 = vpop.f32.mrf.mxu1  ;;  %v17268_v5 = vpop.f32.mrf.mxu0 }
 0x324   : > { %v12842_v24 = vpack.c.bf16 %v6120_v45, %v6120_v45  ;;  %v6118_v31 = vmax.f32 %v6086_v4, 0.0  ;;  %v6089_v10 = vadd.f32 %v17217_v36, %v6053_v37  ;;  %v6051_v16 = vmul.f32 %v17190_v13, %v6015_v3 }
 0x325   : > { %v6020_v58 = vadd.f32 %v17161_v32, %v5538_v29  ;;  %v5536_v23 = vadd.f32 %v5421_v6, %v4798_v53  ;;  %v13478_v25 = vpop.f32.mrf.mxu1 }
 0x326   : > { %v6264_v34 = vshrl.u32 %v12842_v24, 16  ;;  %v6267_v52 = vshll.u32 %v12842_v24, 16  ;;  %v12840_v38 = vpack.c.bf16 %v6118_v31, %v6118_v31  ;;  %v6121_v51 = vmax.f32 %v6089_v10, 0.0 }
 0x327   : > { %v6087_v14 = vadd.f32 %v17217_v36, %v6051_v16  ;;  %v6056_v0 = vmul.f32 %v17190_v13, %v6020_v58  ;;  %v6018_v7 = vadd.f32 %v17176_v57, %v5536_v23  ;;  %v5539_v32 = vadd.f32 %v13478_v25, %v20301_v46  ;;  %v5424_v53 = vpop.f32.mrf.mxu1  ;;  %v17274_v23 = vpop.f32.mrf.mxu0 }
 0x328   : > { %v6266_v59 = vrot.slane %v6264_v34, 7  ;;  %v6247_v15 = vshrl.u32 %v12840_v38, 16  ;;  %v6250_v48 = vshll.u32 %v12840_v38, 16  ;;  %v12843_v55 = vpack.c.bf16 %v6121_v51, %v6121_v51 }
 0x329   : > { %v6119_v45 = vmax.f32 %v6087_v14, 0.0  ;;  %v6092_v4 = vadd.f32 %v17217_v36, %v6056_v0  ;;  %v6054_v37 = vmul.f32 %v17190_v13, %v6018_v7  ;;  %v6021_v3 = vadd.f32 %v17205_v30, %v5539_v32  ;;  %v13481_v29 = vpop.f32.mrf.mxu1 }
 0x32a   : > { %v6269_v6 = vor.u32 %v6267_v52, %v6266_v59  ;;  %v6270_v57 = vrot.slane %v6266_v59, 4  ;;  %v6249_v39 = vrot.slane %v6247_v15, 7  ;;  %v6272_v63 = vshrl.u32 %v12843_v55, 16  ;;  %v6578_v52 = vld [vmem:[#allocation3 + $0x20] sm:$0x1] }
 0x32b   : > { %v6275_v24 = vshll.u32 %v12843_v55, 16  ;;  %v12841_v31 = vpack.c.bf16 %v6119_v45, %v6119_v45  ;;  %v6124_v10 = vmax.f32 %v6092_v4, 0.0  ;;  %v6090_v16 = vadd.f32 %v17217_v36, %v6054_v37  ;;  %v5437_v58 = vpop.f32.mrf.mxu1 }
 0x32c   : > { %v6575_v43 = vsel %vm14691_vm10, %v6269_v6, %v6574_v18  ;;  %v6252_v34 = vor.u32 %v6250_v48, %v6249_v39  ;;  %v6253_v38 = vrot.slane %v6249_v39, 4  ;;  %v6274_v30 = vrot.slane %v6272_v63, 7  ;;  %v5922_v6 = vpop.f32.mrf.mxu0 }
 0x32d   : > { %6576 = vst [vmem:[#allocation3 + $0x18] sm:$0xf] %v6575_v43  ;;  %v6255_v51 = vshrl.u32 %v12841_v31, 16  ;;  %v6258_v14 = vshll.u32 %v12841_v31, 16  ;;  %v12846_v0 = vpack.c.bf16 %v6124_v10, %v6124_v10  ;;  %v6122_v7 = vmax.f32 %v6090_v16, 0.0  ;;  %v13482_v46 = vpop.f32.mrf.mxu1 }
 0x32e   : > { %v6568_v32 = vsel %vm14691_vm10, %v6252_v34, %v6567_v50  ;;  %v6277_v59 = vor.u32 %v6275_v24, %v6274_v30  ;;  %v6279_v15 = vrot.slane %v6274_v30, 4  ;;  %v6057_v55 = vmul.f32 %v17190_v13, %v6021_v3  ;;  %v6571_v10 = vld [vmem:[#allocation3 + $0x14] sm:$0x1] }
 0x32f   : > { %6569 = vst [vmem:[#allocation3 + $0xc] sm:$0xf] %v6568_v32  ;;  %v6257_v45 = vrot.slane %v6255_v51, 7  ;;  %v6298_v18 = vshrl.u32 %v12846_v0, 16  ;;  %v6301_v48 = vshll.u32 %v12846_v0, 16  ;;  %v12844_v4 = vpack.c.bf16 %v6122_v7, %v6122_v7  ;;  %v5440_v37 = vpop.f32.mrf.mxu1  ;;  %v20304_v32 = vld [vmem:[#allocation73_spill] sm:$0xff] }
 0x330   : > { %v6278_v63 = vsel %vm14713_vm12, %v6270_v57, %v6277_v59  ;;  %v6579_v31 = vsel %vm14525_vm2, %v6279_v15, %v6578_v52  ;;  %v6093_v50 = vadd.f32 %v17217_v36, %v6057_v55  ;;  %v5537_v24 = vadd.f32 %v5424_v53, %v17236_v17  ;;  %v6588_v51 = vld [vmem:[#allocation3 + $0x30] sm:$0xf] }
 0x331   : > { %6577 = vst.msk [vmem:[#allocation3 + $0x1c] sm:$0xf] %vm347_vm3, %v6278_v63  ;;  %6580 = vst [vmem:[#allocation3 + $0x20] sm:$0x1] %v6579_v31  ;;  %v6260_v3 = vor.u32 %v6258_v14, %v6257_v45  ;;  %v6262_v16 = vrot.slane %v6257_v45, 4  ;;  %v6300_v43 = vrot.slane %v6298_v18, 7  ;;  %v13485_v30 = vpop.f32.mrf.mxu1  ;;  %v5542_v52 = vadd.f32 %v13481_v29, %v20304_v32  ;;  %v13521_v14 = vpop.f32.mrf.mxu0 }
 0x332   : > { %v6281_v34 = vshrl.u32 %v12844_v4, 16  ;;  %v6284_v0 = vshll.u32 %v12844_v4, 16  ;;  %v6125_v7 = vmax.f32 %v6093_v50, 0.0  ;;  %v6019_v57 = vadd.f32 %v17229_v54, %v5537_v24  ;;  %v6581_v4 = vld [vmem:[#allocation3 + $0x24] sm:$0xf] }
 0x333   : > { %v6261_v59 = vsel %vm14713_vm12, %v6253_v38, %v6260_v3  ;;  %v6572_v17 = vsel %vm14525_vm2, %v6262_v16, %v6571_v10  ;;  %v6303_v53 = vor.u32 %v6301_v48, %v6300_v43  ;;  %v6304_v15 = vrot.slane %v6300_v43, 4  ;;  %v5453_v29 = vpop.f32.mrf.mxu1  ;;  %v20305_v63 = vld [vmem:[#allocation71_spill] sm:$0xff]  ;;  %v20306_v48 = vld [vmem:[#allocation77_spill] sm:$0xff] }
 0x334   : > { %6570 = vst.msk [vmem:[#allocation3 + $0x10] sm:$0xf] %vm347_vm3, %v6261_v59  ;;  %6573 = vst [vmem:[#allocation3 + $0x14] sm:$0x1] %v6572_v17  ;;  %v17295_v55 = vrot.slane %v6281_v34, 7  ;;  %v12847_v45 = vpack.c.bf16 %v6125_v7, %v6125_v7  ;;  %v6055_v18 = vmul.f32 %v17190_v13, %v6019_v57  ;;  %v6024_v54 = vadd.f32 %v17253_v28, %v5542_v52 }
 0x335   : > { %v6589_v38 = vsel %vm14691_vm10, %v6303_v53, %v6588_v51  ;;  %v5540_v31 = vadd.f32 %v5437_v58, %v20305_v63  ;;  %v5543_v10 = vadd.f32 %v13482_v46, %v20306_v48  ;;  %v5541_v50 = vadd.f32 %v5440_v37, %v17239_v35  ;;  %v5935_v58 = vpop.f32.mrf.mxu0  ;;  %v6592_v37 = vld [vmem:[#allocation3 + $0x38] sm:$0x1]  ;;  %v17313_v32 = vpop.f32.mrf.mxu1 }
 0x336   : > { %6590 = vst [vmem:[#allocation3 + $0x30] sm:$0xf] %v6589_v38  ;;  %v6286_v24 = vor.u32 %v6284_v0, %v17295_v55  ;;  %v6287_v3 = vrot.slane %v17295_v55, 4  ;;  %v6306_v16 = vshrl.u32 %v12847_v45, 16  ;;  %v6309_v43 = vshll.u32 %v12847_v45, 16 }
 0x337   : > { %v6091_v28 = vadd.f32 %v17217_v36, %v6055_v18  ;;  %v6060_v34 = vmul.f32 %v17190_v13, %v6024_v54  ;;  %v6022_v51 = vadd.f32 %v17268_v5, %v5540_v31  ;;  %v6025_v7 = vadd.f32 %v17274_v23, %v5543_v10  ;;  %v17329_v10 = vpop.f32.mrf.mxu1 }
 0x338   : > { %v6582_v46 = vsel %vm14691_vm10, %v6286_v24, %v6581_v4  ;;  %v6308_v35 = vrot.slane %v6306_v16, 7  ;;  %v6023_v57 = vadd.f32 %v5922_v6, %v5541_v50  ;;  %v5546_v0 = vadd.f32 %v13485_v30, %v17051_v40  ;;  %v17321_v30 = vpop.f32.mrf.mxu0 }
 0x339   : > { %6583 = vst [vmem:[#allocation3 + $0x24] sm:$0xf] %v6582_v46  ;;  %v6123_v52 = vmax.f32 %v6091_v28, 0.0  ;;  %v6096_v59 = vadd.f32 %v17217_v36, %v6060_v34  ;;  %v6058_v17 = vmul.f32 %v17190_v13, %v6022_v51  ;;  %v6061_v5 = vmul.f32 %v17190_v13, %v6025_v7 }
 0x33a   : > { %v6311_v23 = vor.u32 %v6309_v43, %v6308_v35  ;;  %v6313_v53 = vrot.slane %v6308_v35, 4  ;;  %v6059_v45 = vmul.f32 %v17190_v13, %v6023_v57  ;;  %v6028_v18 = vadd.f32 %v13521_v14, %v5546_v0  ;;  %v6585_v57 = vld [vmem:[#allocation3 + $0x2c] sm:$0x1] }
 0x33b   : > { %v12845_v54 = vpack.c.bf16 %v6123_v52, %v6123_v52  ;;  %v6128_v38 = vmax.f32 %v6096_v59, 0.0  ;;  %v6094_v6 = vadd.f32 %v17217_v36, %v6058_v17  ;;  %v6097_v40 = vadd.f32 %v17217_v36, %v6061_v5  ;;  %v13489_v5 = vpop.f32.mrf.mxu1 }
 0x33c   : > { %v6312_v4 = vsel %vm14713_vm12, %v6304_v15, %v6311_v23  ;;  %v6593_v63 = vsel %vm14525_vm2, %v6313_v53, %v6592_v37  ;;  %v6095_v31 = vadd.f32 %v17217_v36, %v6059_v45  ;;  %v6064_v48 = vmul.f32 %v17190_v13, %v6028_v18  ;;  %v17334_v37 = vpop.f32.mrf.mxu0 }
 0x33d   : > { %6591 = vst.msk [vmem:[#allocation3 + $0x34] sm:$0xf] %vm347_vm3, %v6312_v4  ;;  %6594 = vst [vmem:[#allocation3 + $0x38] sm:$0x1] %v6593_v63  ;;  %v6289_v14 = vshrl.u32 %v12845_v54, 16  ;;  %v6292_v50 = vshll.u32 %v12845_v54, 16  ;;  %v12850_v24 = vpack.c.bf16 %v6128_v38, %v6128_v38  ;;  %v5544_v34 = vadd.f32 %v5453_v29, %v17057_v12 }
 0x33e   : > { %v6126_v16 = vmax.f32 %v6094_v6, 0.0  ;;  %v6129_v43 = vmax.f32 %v6097_v40, 0.0  ;;  %v6127_v28 = vmax.f32 %v6095_v31, 0.0  ;;  %v6100_v15 = vadd.f32 %v17217_v36, %v6064_v48  ;;  %v6602_v54 = vld [vmem:[#allocation3 + $0x48] sm:$0xf]  ;;  %v13525_v31 = vpop.f32.mrf.mxu0 }
 0x33f   : > { %v6291_v51 = vrot.slane %v6289_v14, 7  ;;  %v6332_v7 = vshrl.u32 %v12850_v24, 16  ;;  %v6335_v46 = vshll.u32 %v12850_v24, 16  ;;  %v6026_v17 = vadd.f32 %v5935_v58, %v5544_v34  ;;  %v6595_v14 = vld [vmem:[#allocation3 + $0x3c] sm:$0xf] }
 0x340   : > { %v12848_v35 = vpack.c.bf16 %v6126_v16, %v6126_v16  ;;  %v12851_v0 = vpack.c.bf16 %v6129_v43, %v6129_v43  ;;  %v12849_v52 = vpack.c.bf16 %v6127_v28, %v6127_v28  ;;  %v6132_v59 = vmax.f32 %v6100_v15, 0.0  ;;  %v5469_v43 = vpop.f32.mrf.mxu1  ;;  %v6606_v28 = vld [vmem:[#allocation3 + $0x50] sm:$0x1] }
 0x341   : > { %v6294_v23 = vor.u32 %v6292_v50, %v6291_v51  ;;  %v6296_v53 = vrot.slane %v6291_v51, 4  ;;  %v6334_v45 = vrot.slane %v6332_v7, 7  ;;  %v6062_v15 = vmul.f32 %v17190_v13, %v6026_v17 }
 0x342   : > { %v6315_v18 = vshrl.u32 %v12848_v35, 16  ;;  %v6318_v38 = vshll.u32 %v12848_v35, 16  ;;  %v6340_v6 = vshrl.u32 %v12851_v0, 16  ;;  %v6343_v12 = vshll.u32 %v12851_v0, 16  ;;  %v13490_v17 = vpop.f32.mrf.mxu1 }
 0x343   : > { %v6323_v29 = vshrl.u32 %v12849_v52, 16  ;;  %v6295_v40 = vsel %vm14713_vm12, %v6287_v3, %v6294_v23  ;;  %v6586_v4 = vsel %vm14525_vm2, %v6296_v53, %v6585_v57  ;;  %v6337_v63 = vor.u32 %v6335_v46, %v6334_v45  ;;  %v6599_v57 = vld [vmem:[#allocation3 + $0x44] sm:$0x1] }
 0x344   : > { %v6338_v58 = vrot.slane %v6334_v45, 4  ;;  %6584 = vst.msk [vmem:[#allocation3 + $0x28] sm:$0xf] %vm347_vm3, %v6295_v40  ;;  %6587 = vst [vmem:[#allocation3 + $0x2c] sm:$0x1] %v6586_v4  ;;  %v6317_v48 = vrot.slane %v6315_v18, 7  ;;  %v12854_v3 = vpack.c.bf16 %v6132_v59, %v6132_v59  ;;  %v5547_v34 = vadd.f32 %v17313_v32, %v17064_v41  ;;  %v5951_v45 = vpop.f32.mrf.mxu0 }
 0x345   : > { %v6342_v50 = vrot.slane %v6340_v6, 7  ;;  %v6325_v24 = vrot.slane %v6323_v29, 7  ;;  %v6326_v16 = vshll.u32 %v12849_v52, 16  ;;  %v6603_v55 = vsel %vm14691_vm10, %v6337_v63, %v6602_v54  ;;  %v6616_v29 = vld [vmem:[#allocation3 + $0x60] sm:$0xf] }
 0x346   : > { %6604 = vst [vmem:[#allocation3 + $0x48] sm:$0xf] %v6603_v55  ;;  %v6320_v51 = vor.u32 %v6318_v38, %v6317_v48  ;;  %v6321_v7 = vrot.slane %v6317_v48, 4  ;;  %v6366_v52 = vshrl.u32 %v12854_v3, 16  ;;  %v6369_v53 = vshll.u32 %v12854_v3, 16 }
 0x347   : > { %v6345_v46 = vor.u32 %v6343_v12, %v6342_v50  ;;  %v6347_v35 = vrot.slane %v6342_v50, 4  ;;  %v6328_v0 = vor.u32 %v6326_v16, %v6325_v24  ;;  %v6330_v23 = vrot.slane %v6325_v24, 4  ;;  %v17368_v48 = vld [vmem:[#allocation3 + $0xc] sm:$0xf]  ;;  %v13526_v16 = vpop.f32.mrf.mxu0 }
 0x348   : > { %v6596_v18 = vsel %vm14691_vm10, %v6320_v51, %v6595_v14  ;;  %v6098_v32 = vadd.f32 %v17217_v36, %v6062_v15  ;;  %v17360_v6 = vrot.slane %v6366_v52, 7  ;;  %v6029_v12 = vadd.f32 %v17321_v30, %v5547_v34  ;;  %v17381_v51 = vld [vmem:[#allocation3 + $0x10] sm:$0xf]  ;;  %v17392_v52 = vpop.f32.mrf.mxu1 }
 0x349   : > { %v6346_v59 = vsel %vm14713_vm12, %v6338_v58, %v6345_v46  ;;  %v6607_v41 = vsel %vm14525_vm2, %v6347_v35, %v6606_v28  ;;  %6597 = vst [vmem:[#allocation3 + $0x3c] sm:$0xf] %v6596_v18  ;;  %v6329_v54 = vsel %vm14713_vm12, %v6321_v7, %v6328_v0  ;;  %v6600_v38 = vsel %vm14525_vm2, %v6330_v23, %v6599_v57 }
 0x34a   : > { %6605 = vst.msk [vmem:[#allocation3 + $0x4c] sm:$0xf] %vm347_vm3, %v6346_v59  ;;  %6608 = vst [vmem:[#allocation3 + $0x50] sm:$0x1] %v6607_v41  ;;  %v6130_v40 = vmax.f32 %v6098_v32, 0.0  ;;  %v5545_v4 = vadd.f32 %v17329_v10, %v17245_v62  ;;  %v5550_v63 = vadd.f32 %v13489_v5, %v17071_v11  ;;  %v5548_v58 = vadd.f32 %v5469_v43, %v17075_v56 }
 0x34b   : > { %6598 = vst.msk [vmem:[#allocation3 + $0x40] sm:$0xf] %vm347_vm3, %v6329_v54  ;;  %6601 = vst [vmem:[#allocation3 + $0x44] sm:$0x1] %v6600_v38  ;;  %v6371_v14 = vor.u32 %v6369_v53, %v17360_v6  ;;  %v6372_v50 = vrot.slane %v17360_v6, 4  ;;  %v6065_v30 = vmul.f32 %v17190_v13, %v6029_v12  ;;  %v5551_v24 = vadd.f32 %v13490_v17, %v17084_v61 }
 0x34c   : > { %v12852_v55 = vpack.c.bf16 %v6130_v40, %v6130_v40  ;;  %v6027_v28 = vadd.f32 %v17334_v37, %v5545_v4  ;;  %v6032_v3 = vadd.f32 %v13525_v31, %v5550_v63  ;;  %v6030_v62 = vadd.f32 %v5951_v45, %v5548_v58  ;;  %v6609_v53 = vld [vmem:[#allocation3 + $0x54] sm:$0xf]  ;;  %v17399_v63 = vpop.f32.mrf.mxu0  ;;  %v17423_v6 = vld [vmem:[#allocation3 + $0x1c] sm:$0xf] }
 0x34d   : > { %v6617_v11 = vsel %vm14691_vm10, %v6371_v14, %v6616_v29  ;;  %v6101_v56 = vadd.f32 %v17217_v36, %v6065_v30  ;;  %v6033_v10 = vadd.f32 %v13526_v16, %v5551_v24  ;;  %v6756_v5 = vshrl.u32 %v17368_v48, 16  ;;  %v6620_v14 = vld [vmem:[#allocation3 + $0x68] sm:$0x1] }
 0x34e   : > { %6618 = vst [vmem:[#allocation3 + $0x60] sm:$0xf] %v6617_v11  ;;  %v6349_v43 = vshrl.u32 %v12852_v55, 16  ;;  %v6352_v15 = vshll.u32 %v12852_v55, 16  ;;  %v6063_v34 = vmul.f32 %v17190_v13, %v6027_v28  ;;  %v6068_v61 = vmul.f32 %v17190_v13, %v6032_v3  ;;  %v17405_v55 = vpop.f32.mrf.mxu1 }
 0x34f   : > { %v6133_v37 = vmax.f32 %v6101_v56, 0.0  ;;  %v6066_v31 = vmul.f32 %v17190_v13, %v6030_v62  ;;  %v6069_v7 = vmul.f32 %v17190_v13, %v6033_v10  ;;  %v17385_v46 = vrot.slane %v6756_v5, 4  ;;  %v17409_v56 = vld [vmem:[#allocation3 + $0x18] sm:$0xf] }
 0x350   : > { %v17387_v35 = vrot.slane %v6349_v43, 7  ;;  %v6099_v57 = vadd.f32 %v17217_v36, %v6063_v34  ;;  %v6104_v0 = vadd.f32 %v17217_v36, %v6068_v61  ;;  %v6759_v23 = vshll.u32 %v17368_v48, 16  ;;  %v14062_v10 = vld [vmem:[#allocation9 + $0x30] sm:$0xff]  }
 0x351   : > { %v12855_v45 = vpack.c.bf16 %v6133_v37, %v6133_v37  ;;  %v6102_v18 = vadd.f32 %v17217_v36, %v6066_v31  ;;  %v6105_v59 = vadd.f32 %v17217_v36, %v6069_v7  ;;  %v6769_v41 = vshrl.u32 %v17381_v51, 16  ;;  %v6613_v31 = vld [vmem:[#allocation3 + $0x5c] sm:$0x1]  ;;  %v6630_v7 = vld [vmem:[#allocation3 + $0x78] sm:$0xf] }
 0x352   : > { %v6354_v32 = vor.u32 %v6352_v15, %v17387_v35  ;;  %v6355_v17 = vrot.slane %v17387_v35, 4  ;;  %v6131_v54 = vmax.f32 %v6099_v57, 0.0  ;;  %v6136_v38 = vmax.f32 %v6104_v0, 0.0  ;;  %v13529_v0 = vpop.f32.mrf.mxu0 }
 0x353   : > { %v6374_v12 = vshrl.u32 %v12855_v45, 16  ;;  %v6377_v29 = vshll.u32 %v12855_v45, 16  ;;  %v6134_v40 = vmax.f32 %v6102_v18, 0.0  ;;  %v6137_v4 = vmax.f32 %v6105_v59, 0.0  ;;  %v5485_v18 = vpop.f32.mrf.mxu1 }
 0x354   : > { %v6610_v58 = vsel %vm14691_vm10, %v6354_v32, %v6609_v53  ;;  %v12853_v30 = vpack.c.bf16 %v6131_v54, %v6131_v54  ;;  %v12858_v24 = vpack.c.bf16 %v6136_v38, %v6136_v38  ;;  %v17403_v16 = vrot.slane %v6759_v23, 5  ;;  %v6623_v38 = vld [vmem:[#allocation3 + $0x6c] sm:$0xf] }
 0x355   : > { %6611 = vst [vmem:[#allocation3 + $0x54] sm:$0xf] %v6610_v58  ;;  %v6376_v28 = vrot.slane %v6374_v12, 7  ;;  %v12856_v3 = vpack.c.bf16 %v6134_v40, %v6134_v40  ;;  %v12859_v62 = vpack.c.bf16 %v6137_v4, %v6137_v4  ;;  %v12459_v11 = vcombine.low %v17368_v48, %v17381_v51  ;;  %v14072_v58 = vld [vmem:[#allocation9 + $0x58] sm:$0xff]  }
 0x356   : > { %v6357_v5 = vshrl.u32 %v12853_v30, 16  ;;  %v6360_v43 = vshll.u32 %v12853_v30, 16  ;;  %v6400_v15 = vshrl.u32 %v12858_v24, 16  ;;  %v6403_v34 = vshll.u32 %v12858_v24, 16  ;;  %v6634_v24 = vld [vmem:[#allocation3 + $0x80] sm:$0x1] }
 0x357   : > { %v6379_v61 = vor.u32 %v6377_v29, %v6376_v28  ;;  %v6381_v37 = vrot.slane %v6376_v28, 4  ;;  %v6383_v35 = vshrl.u32 %v12856_v3, 16  ;;  %v6386_v57 = vshll.u32 %v12856_v3, 16  ;;  %13580 = vmatmul.mubr.msk.bf16.vlgmr.msra.gmra.mxu0 %vm1885_vm9, %v12459_v11  ;;  %v5967_v3 = vpop.f32.mrf.mxu0 }
 0x358   : > { %v6359_v23 = vrot.slane %v6357_v5, 7  ;;  %v6402_v53 = vrot.slane %v6400_v15, 7  ;;  %v6408_v45 = vshrl.u32 %v12859_v62, 16  ;;  %v6411_v48 = vshll.u32 %v12859_v62, 16  ;;  %13648 = vmatpush3.bf16.msra.mxu0 %v17090_v33  ;;  %v13494_v15 = vpop.f32.mrf.mxu1 }
 0x359   : > { %v6380_v59 = vsel %vm14713_vm12, %v6372_v50, %v6379_v61  ;;  %v6621_v32 = vsel %vm14525_vm2, %v6381_v37, %v6620_v14  ;;  %v17419_v54 = vrot.slane %v6383_v35, 7  ;;  %v6780_v12 = vshrl.u32 %v17409_v56, 16  ;;  %13649 = vmatprep.subr.bf16.mxu0 %v14062_v10 }
 0x35a   : > { %6619 = vst.msk [vmem:[#allocation3 + $0x64] sm:$0xf] %vm347_vm3, %v6380_v59  ;;  %6622 = vst [vmem:[#allocation3 + $0x68] sm:$0x1] %v6621_v32  ;;  %v6362_v29 = vor.u32 %v6360_v43, %v6359_v23  ;;  %v6364_v40 = vrot.slane %v6359_v23, 4  ;;  %v6405_v33 = vor.u32 %v6403_v34, %v6402_v53  ;;  %v6406_v4 = vrot.slane %v6402_v53, 4  ;;  %v13530_v32 = vpop.f32.mrf.mxu0 }
 0x35b   : > { %v6388_v50 = vor.u32 %v6386_v57, %v17419_v54  ;;  %v6389_v14 = vrot.slane %v17419_v54, 4  ;;  %v6410_v30 = vrot.slane %v6408_v45, 7  ;;  %v17427_v28 = vrot.slane %v6780_v12, 4  ;;  %v6685_v34 = vld [vmem:[#allocation3 + $0x24] sm:$0xf] }
 0x35c   : > { %v6363_v62 = vsel %vm14713_vm12, %v6355_v17, %v6362_v29  ;;  %v6614_v11 = vsel %vm14525_vm2, %v6364_v40, %v6613_v31  ;;  %v6631_v5 = vsel %vm14691_vm10, %v6405_v33, %v6630_v7  ;;  %v6783_v43 = vshll.u32 %v17409_v56, 16  ;;  %13650 = vmatpush3.bf16.msra.mxu0 %v14062_v10  ;;  %v17448_v23 = vld [vmem:[#allocation3 + $0x28] sm:$0xf] }
 0x35d   : > { %6612 = vst.msk [vmem:[#allocation3 + $0x58] sm:$0xf] %vm347_vm3, %v6363_v62  ;;  %6615 = vst [vmem:[#allocation3 + $0x5c] sm:$0x1] %v6614_v11  ;;  %v6624_v61 = vsel %vm14691_vm10, %v6388_v50, %v6623_v38  ;;  %v6413_v37 = vor.u32 %v6411_v48, %v6410_v30  ;;  %v6415_v17 = vrot.slane %v6410_v30, 4  ;;  %v6793_v35 = vshrl.u32 %v17423_v6, 16  ;;  %13719 = vmatprep.subr.bf16.mxu0 %v14072_v58  ;;  %v17477_v11 = vpop.f32.mrf.mxu1 }
 0x35e   : > { %6632 = vst [vmem:[#allocation3 + $0x78] sm:$0xf] %v6631_v5  ;;  %6625 = vst [vmem:[#allocation3 + $0x6c] sm:$0xf] %v6624_v61  ;;  %v17440_v31 = vrot.slane %v6783_v43, 5  ;;  %v12460_v7 = vcombine.low %v17409_v56, %v17423_v6  ;;  %v5549_v10 = vadd.f32 %v17392_v52, %v17248_v21  ;;  %v5554_v57 = vadd.f32 %v17405_v55, %v17096_v47 }
 0x35f   : > { %v6414_v53 = vsel %vm14713_vm12, %v6406_v4, %v6413_v37  ;;  %v6635_v45 = vsel %vm14525_vm2, %v6415_v17, %v6634_v24  ;;  %v5552_v48 = vadd.f32 %v5485_v18, %v17103_v22  ;;  %v5555_v59 = vadd.f32 %v13494_v15, %v17114_v2  ;;  %v6716_v22 = vld [vmem:[#allocation3 + $0x14] sm:$0x1]  ;;  %v6687_v50 = vld [vmem:[#allocation3 + $0x30] sm:$0xf] }
 0x360   : > { %6633 = vst.msk [vmem:[#allocation3 + $0x7c] sm:$0xf] %vm347_vm3, %v6414_v53  ;;  %6636 = vst [vmem:[#allocation3 + $0x80] sm:$0x1] %v6635_v45  ;;  %13583 = vmatprep.mubr.msk.bf16.mxu0 %vm1885_vm9, %v12460_v7  ;;  %v6031_v47 = vadd.f32 %v17399_v63, %v5549_v10  ;;  %v6036_v21 = vadd.f32 %v13529_v0, %v5554_v57  ;;  %v6804_v52 = vshrl.u32 %v6685_v34, 16  ;;  %v6807_v55 = vshll.u32 %v6685_v34, 16  ;;  %v17485_v10 = vpop.f32.mrf.mxu0 }
 0x361   : > { %v6034_v56 = vadd.f32 %v5967_v3, %v5552_v48  ;;  %v6037_v38 = vadd.f32 %v13530_v32, %v5555_v59  ;;  %v6817_v12 = vshrl.u32 %v17448_v23, 16  ;;  %v12461_v29 = vcombine.low %v6685_v34, %v17448_v23  ;;  %v17489_v48 = vpop.f32.mrf.mxu1 }
 0x362   : > { %v6067_v2 = vmul.f32 %v17190_v13, %v6031_v47  ;;  %v6072_v18 = vmul.f32 %v17190_v13, %v6036_v21  ;;  %v17463_v40 = vrot.slane %v6804_v52, 4  ;;  %v17465_v33 = vrot.slane %v6807_v55, 5 }
 0x363   : > { %v6070_v63 = vmul.f32 %v17190_v13, %v6034_v56  ;;  %v6073_v0 = vmul.f32 %v17190_v13, %v6037_v38  ;;  %13584 = vmatmul.mubr.msk.bf16.gmra.mxu0 %vm1885_vm9, %v12461_v29  ;;  %v6762_v4 = vor.u32 %v17403_v16, %v17385_v46  ;;  %v6765_v58 = vshll.u32 %v17381_v51, 16  ;;  %v17481_v46 = vld [vmem:[#allocation3 + $0x34] sm:$0xf] }
 0x364   : > { %v6103_v30 = vadd.f32 %v17217_v36, %v6067_v2  ;;  %v6108_v24 = vadd.f32 %v17217_v36, %v6072_v18  ;;  %v6771_v3 = vrot.slane %v6769_v41, 4  ;;  %v6775_v62 = vshll.u32 %v6716_v22, 16  ;;  %v6627_v29 = vld [vmem:[#allocation3 + $0x74] sm:$0x1]  ;;  %v6644_v22 = vld [vmem:[#allocation3 + $0x90] sm:$0xf] }
 0x365   : > { %v6106_v13 = vadd.f32 %v17217_v36, %v6070_v63  ;;  %v6109_v5 = vadd.f32 %v17217_v36, %v6073_v0  ;;  %v6763_v43 = vrot.slane %v6762_v4, 4  ;;  %v6767_v15 = vrot.slane %v6765_v58, 5  ;;  %v13533_v4 = vpop.f32.mrf.mxu0 }
 0x366   : > { %v6135_v16 = vmax.f32 %v6103_v30, 0.0  ;;  %v6140_v34 = vmax.f32 %v6108_v24, 0.0  ;;  %v6777_v61 = vrot.slane %v6775_v62, 5  ;;  %v6828_v37 = vshrl.u32 %v6687_v50, 16  ;;  %v6637_v24 = vld [vmem:[#allocation3 + $0x84] sm:$0xf] }
 0x367   : > { %v6138_v17 = vmax.f32 %v6106_v13, 0.0  ;;  %v6141_v7 = vmax.f32 %v6109_v5, 0.0  ;;  %v6768_v51 = vsel %vm14584_vm8, %v6763_v43, %v6767_v15  ;;  %v6772_v41 = vor.u32 %v6771_v3, %v6767_v15  ;;  %v6648_v3 = vld [vmem:[#allocation3 + $0x98] sm:$0x1]  ;;  %v5501_v5 = vpop.f32.mrf.mxu1  ;;  %v14060_v43 = vld [vmem:[#allocation9 + $0x20] sm:$0xff]  }
 0x368   : > { %v12857_v57 = vpack.c.bf16 %v6135_v16, %v6135_v16  ;;  %v12862_v53 = vpack.c.bf16 %v6140_v34, %v6140_v34  ;;  %v17487_v45 = vrot.slane %v6828_v37, 4  ;;  %v6831_v36 = vshll.u32 %v6687_v50, 16 }
 0x369   : > { %v12860_v59 = vpack.c.bf16 %v6138_v17, %v6138_v17  ;;  %v12863_v32 = vpack.c.bf16 %v6141_v7, %v6141_v7  ;;  %v6773_v47 = vrot.slane %v6772_v41, 4  ;;  %v6841_v21 = vshrl.u32 %v17481_v46, 16 }
 0x36a   : > { %v6391_v52 = vshrl.u32 %v12857_v57, 16  ;;  %v6394_v55 = vshll.u32 %v12857_v57, 16  ;;  %v6434_v56 = vshrl.u32 %v12862_v53, 16  ;;  %v6437_v38 = vshll.u32 %v12862_v53, 16 }
 0x36b   : > { %v6417_v2 = vshrl.u32 %v12860_v59, 16  ;;  %v6420_v18 = vshll.u32 %v12860_v59, 16  ;;  %v6442_v63 = vshrl.u32 %v12863_v32, 16  ;;  %v6445_v0 = vshll.u32 %v12863_v32, 16 }
 0x36c   : > { %v6393_v58 = vrot.slane %v6391_v52, 7  ;;  %v6436_v30 = vrot.slane %v6434_v56, 7  ;;  %v6778_v62 = vsel %vm14584_vm8, %v6773_v47, %v6777_v61  ;;  %v17494_v13 = vrot.slane %v6831_v36, 5  ;;  %v17503_v36 = vld [vmem:[#allocation3 + $0x20] sm:$0x1]  ;;  %v5983_v47 = vpop.f32.mrf.mxu0 }
 0x36d   : > { %v17496_v15 = vrot.slane %v6417_v2, 7  ;;  %v6444_v16 = vrot.slane %v6442_v63, 7  ;;  %v12425_v34 = vcombine.low %v6768_v51, %v6778_v62  ;;  %v12462_v37 = vcombine.low %v6687_v50, %v17481_v46  ;;  %v6689_v2 = vld [vmem:[#allocation3 + $0x3c] sm:$0xf] }
 0x36e   : > { %v6396_v17 = vor.u32 %v6394_v55, %v6393_v58  ;;  %v6398_v7 = vrot.slane %v6393_v58, 4  ;;  %v6439_v41 = vor.u32 %v6437_v38, %v6436_v30  ;;  %v6440_v57 = vrot.slane %v6436_v30, 4  ;;  %v14161_v55 = vld [vmem:[#allocation9 + $0x28] sm:$0xff]   ;;  %v13498_v38 = vpop.f32.mrf.mxu1 }
 0x36f   : > { %v6422_v53 = vor.u32 %v6420_v18, %v17496_v15  ;;  %v6423_v59 = vrot.slane %v17496_v15, 4  ;;  %v6447_v32 = vor.u32 %v6445_v0, %v6444_v16  ;;  %v6449_v61 = vrot.slane %v6444_v16, 4  ;;  %13544 = vmatmul.mubr.msk.bf16.vlgmr.msra.gmra.mxu1 %vm1885_vm9, %v12425_v34  ;;  %13587 = vmatprep.mubr.msk.bf16.mxu0 %vm1885_vm9, %v12462_v37  ;;  %v20307_v30 = vld [vmem:[#allocation81_spill] sm:$0xff] }
 0x370   : > { %v6397_v50 = vsel %vm14713_vm12, %v6389_v14, %v6396_v17  ;;  %v6628_v51 = vsel %vm14525_vm2, %v6398_v7, %v6627_v29  ;;  %v6645_v52 = vsel %vm14691_vm10, %v6439_v41, %v6644_v22  ;;  %13612 = vmatpush3.bf16.msra.mxu1 %v14161_v55  ;;  %v5553_v56 = vadd.f32 %v17477_v11, %v17251_v27  ;;  %v14070_v27 = vld [vmem:[#allocation9 + $0x48] sm:$0xff]  }
 0x371   : > { %6626 = vst.msk [vmem:[#allocation3 + $0x70] sm:$0xf] %vm347_vm3, %v6397_v50  ;;  %6629 = vst [vmem:[#allocation3 + $0x74] sm:$0x1] %v6628_v51  ;;  %v6638_v54 = vsel %vm14691_vm10, %v6422_v53, %v6637_v24  ;;  %v6448_v14 = vsel %vm14713_vm12, %v6440_v57, %v6447_v32  ;;  %v6649_v29 = vsel %vm14525_vm2, %v6449_v61, %v6648_v3  ;;  %13613 = vmatprep.subr.bf16.mxu1 %v14060_v43  ;;  %v13534_v3 = vpop.f32.mrf.mxu0 }
 0x372   : > { %6646 = vst [vmem:[#allocation3 + $0x90] sm:$0xf] %v6645_v52  ;;  %v6786_v22 = vor.u32 %v17440_v31, %v17427_v28  ;;  %6639 = vst [vmem:[#allocation3 + $0x84] sm:$0xf] %v6638_v54  ;;  %v6035_v11 = vadd.f32 %v17485_v10, %v5553_v56  ;;  %v6789_v18 = vshll.u32 %v17423_v6, 16  ;;  %v6795_v63 = vrot.slane %v6793_v35, 4  ;;  %v17564_v54 = vpop.f32.mrf.mxu1 }
 0x373   : > { %6647 = vst.msk [vmem:[#allocation3 + $0x94] sm:$0xf] %vm347_vm3, %v6448_v14  ;;  %6650 = vst [vmem:[#allocation3 + $0x98] sm:$0x1] %v6649_v29  ;;  %v6799_v0 = vshll.u32 %v17503_v36, 16  ;;  %v5558_v28 = vadd.f32 %v17489_v48, %v17123_v20  ;;  %v5556_v31 = vadd.f32 %v5501_v5, %v17135_v8  ;;  %v5559_v24 = vadd.f32 %v13498_v38, %v20307_v30 }
 0x374   : > { %v6787_v58 = vrot.slane %v6786_v22, 4  ;;  %v17537_v10 = vld [vmem:[%s19879_s1 + $0x4] ss:$0 sm:$0xff]  ;;  %v6791_v6 = vrot.slane %v6789_v18, 5  ;;  %v6852_v16 = vshrl.u32 %v6689_v2, 16  ;;  %13614 = vmatpush3.bf16.msra.mxu1 %v14060_v43  ;;  %v6855_v8 = vshll.u32 %v6689_v2, 16 }
 0x375   : > { %v6071_v62 = vmul.f32 %v17537_v10, %v6035_v11  ;;  %v6801_v35 = vrot.slane %v6799_v0, 5  ;;  %v6040_v34 = vadd.f32 %v13533_v4, %v5558_v28  ;;  %v6038_v37 = vadd.f32 %v5983_v47, %v5556_v31  ;;  %v17540_v20 = vld [vmem:[#allocation3 + $0x40] sm:$0xf]  ;;  %13683 = vmatprep.subr.bf16.mxu1 %v14070_v27  ;;  %v17545_v48 = vld [vmem:[%s19879_s1 + $0x5] ss:$0 sm:$0xff] }
 0x376   : > { %v6041_v17 = vadd.f32 %v13534_v3, %v5559_v24  ;;  %v6792_v7 = vsel %vm14584_vm8, %v6787_v58, %v6791_v6  ;;  %v6796_v41 = vor.u32 %v6795_v63, %v6791_v6  ;;  %v17550_v57 = vrot.slane %v6852_v16, 4  ;;  %v17569_v22 = vld [vmem:[#allocation3 + $0x2c] sm:$0x1]  ;;  %v17574_v11 = vld [vmem:[#allocation3 + $0x48] sm:$0xf]  ;;  %v13501_v6 = vpop.f32.mrf.mxu1 }
 0x377   : > { %v6107_v5 = vadd.f32 %v17545_v48, %v6071_v62  ;;  %v6076_v4 = vmul.f32 %v17537_v10, %v6040_v34  ;;  %v6074_v43 = vmul.f32 %v17537_v10, %v6038_v37  ;;  %v17555_v32 = vrot.slane %v6855_v8, 5  ;;  %v5986_v37 = vpop.f32.mrf.mxu0 }
 0x378   : > { %v6077_v53 = vmul.f32 %v17537_v10, %v6041_v17  ;;  %v6797_v47 = vrot.slane %v6796_v41, 4  ;;  %v6865_v50 = vshrl.u32 %v17540_v20, 16  ;;  %v12463_v51 = vcombine.low %v6689_v2, %v17540_v20  ;;  %v17687_v25 = vld [vmem:[#allocation3 + $0x70] sm:$0xf] }
 0x379   : > { %v6139_v61 = vmax.f32 %v6107_v5, 0.0  ;;  %v6112_v52 = vadd.f32 %v17545_v48, %v6076_v4  ;;  %v6110_v55 = vadd.f32 %v17545_v48, %v6074_v43  ;;  %v6810_v38 = vor.u32 %v17465_v33, %v17463_v40  ;;  %v6658_v43 = vld [vmem:[#allocation3 + $0xa8] sm:$0xf] }
 0x37a   : > { %v6113_v56 = vadd.f32 %v17545_v48, %v6077_v53  ;;  %v6802_v29 = vsel %vm14584_vm8, %v6797_v47, %v6801_v35  ;;  %13588 = vmatmul.mubr.msk.bf16.gmra.mxu0 %vm1885_vm9, %v12463_v51  ;;  %v6813_v2 = vshll.u32 %v17448_v23, 16  ;;  %v6819_v27 = vrot.slane %v6817_v12, 4  ;;  %v6641_v12 = vld [vmem:[#allocation3 + $0x8c] sm:$0x1]  ;;  %v6651_v53 = vld [vmem:[#allocation3 + $0x9c] sm:$0xf] }
 0x37b   : > { %v12861_v14 = vpack.c.bf16 %v6139_v61, %v6139_v61  ;;  %v12426_v18 = vcombine.low %v6792_v7, %v6802_v29  ;;  %v6144_v63 = vmax.f32 %v6112_v52, 0.0  ;;  %v6142_v40 = vmax.f32 %v6110_v55, 0.0  ;;  %v13537_v55 = vpop.f32.mrf.mxu0  ;;  %v5517_v29 = vpop.f32.mrf.mxu1 }
 0x37c   : > { %v6145_v33 = vmax.f32 %v6113_v56, 0.0  ;;  %v6811_v28 = vrot.slane %v6810_v38, 4  ;;  %v6815_v31 = vrot.slane %v6813_v2, 5  ;;  %v6823_v62 = vshll.u32 %v17569_v22, 16 }
 0x37d   : > { %v6425_v0 = vshrl.u32 %v12861_v14, 16  ;;  %v6428_v58 = vshll.u32 %v12861_v14, 16  ;;  %13547 = vmatprep.mubr.msk.bf16.mxu1 %vm1885_vm9, %v12426_v18  ;;  %v12866_v30 = vpack.c.bf16 %v6144_v63, %v6144_v63  ;;  %v12864_v24 = vpack.c.bf16 %v6142_v40, %v6142_v40  ;;  %v17583_v14 = vld [vmem:[#allocation3 + $0x4c] sm:$0xf] }
 0x37e   : > { %v12867_v3 = vpack.c.bf16 %v6145_v33, %v6145_v33  ;;  %v6816_v35 = vsel %vm14584_vm8, %v6811_v28, %v6815_v31  ;;  %v6820_v16 = vor.u32 %v6819_v27, %v6815_v31  ;;  %v6876_v34 = vshrl.u32 %v17574_v11, 16  ;;  %v6662_v28 = vld [vmem:[#allocation3 + $0xb0] sm:$0x1] }
 0x37f   : > { %v6427_v23 = vrot.slane %v6425_v0, 7  ;;  %v6468_v17 = vshrl.u32 %v12866_v30, 16  ;;  %v6471_v8 = vshll.u32 %v12866_v30, 16  ;;  %v6451_v5 = vshrl.u32 %v12864_v24, 16 }
 0x380   : > { %v6454_v7 = vshll.u32 %v12864_v24, 16  ;;  %v6476_v61 = vshrl.u32 %v12867_v3, 16  ;;  %v6479_v47 = vshll.u32 %v12867_v3, 16  ;;  %v6821_v56 = vrot.slane %v6820_v16, 4  ;;  %v17604_v16 = vld [vmem:[#allocation3 + $0x38] sm:$0x1] }
 0x381   : > { %v6430_v41 = vor.u32 %v6428_v58, %v6427_v23  ;;  %v6432_v4 = vrot.slane %v6427_v23, 4  ;;  %v6470_v51 = vrot.slane %v6468_v17, 7  ;;  %v17581_v52 = vrot.slane %v6451_v5, 7 }
 0x382   : > { %v6825_v38 = vrot.slane %v6823_v62, 5  ;;  %v6478_v18 = vrot.slane %v6476_v61, 7  ;;  %v17591_v63 = vrot.slane %v6876_v34, 4  ;;  %v6879_v30 = vshll.u32 %v17574_v11, 16  ;;  %v13502_v34 = vpop.f32.mrf.mxu1 }
 0x383   : > { %v6431_v2 = vsel %vm14713_vm12, %v6423_v59, %v6430_v41  ;;  %v6642_v27 = vsel %vm14525_vm2, %v6432_v4, %v6641_v12  ;;  %v6473_v40 = vor.u32 %v6471_v8, %v6470_v51  ;;  %v6474_v33 = vrot.slane %v6470_v51, 4  ;;  %v5999_v12 = vpop.f32.mrf.mxu0 }
 0x384   : > { %6640 = vst.msk [vmem:[#allocation3 + $0x88] sm:$0xf] %vm347_vm3, %v6431_v2  ;;  %6643 = vst [vmem:[#allocation3 + $0x8c] sm:$0x1] %v6642_v27  ;;  %v6456_v0 = vor.u32 %v6454_v7, %v17581_v52  ;;  %v6457_v58 = vrot.slane %v17581_v52, 4  ;;  %v6481_v15 = vor.u32 %v6479_v47, %v6478_v18  ;;  %v6483_v31 = vrot.slane %v6478_v18, 4 }
 0x385   : > { %v6826_v59 = vsel %vm14584_vm8, %v6821_v56, %v6825_v38  ;;  %v6659_v24 = vsel %vm14691_vm10, %v6473_v40, %v6658_v43  ;;  %v6889_v23 = vshrl.u32 %v17583_v14, 16  ;;  %v17610_v5 = vrot.slane %v6879_v30, 5  ;;  %v13538_v38 = vpop.f32.mrf.mxu0 }
 0x386   : > { %v6652_v3 = vsel %vm14691_vm10, %v6456_v0, %v6651_v53  ;;  %v12427_v62 = vcombine.low %v6816_v35, %v6826_v59  ;;  %6660 = vst [vmem:[#allocation3 + $0xa8] sm:$0xf] %v6659_v24  ;;  %v6482_v17 = vsel %vm14713_vm12, %v6474_v33, %v6481_v15  ;;  %v6663_v8 = vsel %vm14525_vm2, %v6483_v31, %v6662_v28  ;;  %v6693_v35 = vld [vmem:[#allocation3 + $0x54] sm:$0xf]  ;;  %v17646_v24 = vld [vmem:[#allocation3 + $0x44] sm:$0x1] }
 0x387   : > { %6653 = vst [vmem:[#allocation3 + $0x9c] sm:$0xf] %v6652_v3  ;;  %v12464_v7 = vcombine.low %v17574_v11, %v17583_v14  ;;  %6661 = vst.msk [vmem:[#allocation3 + $0xac] sm:$0xf] %vm347_vm3, %v6482_v17  ;;  %v5557_v41 = vadd.f32 %v17564_v54, %v17259_v1  ;;  %v6834_v4 = vor.u32 %v17494_v13, %v17487_v45  ;;  %v6837_v43 = vshll.u32 %v17481_v46, 16 }
 0x388   : > { %6664 = vst [vmem:[#allocation3 + $0xb0] sm:$0x1] %v6663_v8  ;;  %13548 = vmatmul.mubr.msk.bf16.gmra.mxu1 %vm1885_vm9, %v12427_v62  ;;  %v6843_v53 = vrot.slane %v6841_v21, 4  ;;  %v6847_v11 = vshll.u32 %v17604_v16, 16  ;;  %v5562_v61 = vadd.f32 %v13501_v6, %v17194_v60  ;;  %v5560_v47 = vadd.f32 %v5517_v29, %v17200_v9  ;;  %v17628_v21 = vld [vmem:[#allocation3 + $0x58] sm:$0xf] }
 0x389   : > { %13591 = vmatprep.mubr.msk.bf16.mxu0 %vm1885_vm9, %v12464_v7  ;;  %v5563_v51 = vadd.f32 %v13502_v34, %v17203_v42  ;;  %v6039_v56 = vadd.f32 %v5986_v37, %v5557_v41  ;;  %v6835_v1 = vrot.slane %v6834_v4, 4  ;;  %v6839_v54 = vrot.slane %v6837_v43, 5 }
 0x38a   : > { %v6900_v45 = vshrl.u32 %v6693_v35, 16  ;;  %v6849_v13 = vrot.slane %v6847_v11, 5  ;;  %v6044_v2 = vadd.f32 %v13537_v55, %v5562_v61  ;;  %v6042_v27 = vadd.f32 %v5999_v12, %v5560_v47 }
 0x38b   : > { %v6045_v46 = vadd.f32 %v13538_v38, %v5563_v51  ;;  %v6075_v18 = vmul.f32 %v17537_v10, %v6039_v56  ;;  %v6840_v60 = vsel %vm14584_vm8, %v6835_v1, %v6839_v54  ;;  %v6844_v6 = vor.u32 %v6843_v53, %v6839_v54  ;;  %v6695_v54 = vld [vmem:[#allocation3 + $0x60] sm:$0xf] }
 0x38c   : > { %v17633_v9 = vrot.slane %v6900_v45, 4  ;;  %v6080_v42 = vmul.f32 %v17537_v10, %v6044_v2  ;;  %v6078_v37 = vmul.f32 %v17537_v10, %v6042_v27  ;;  %v6903_v40 = vshll.u32 %v6693_v35, 16 }
 0x38d   : > { %v6081_v29 = vmul.f32 %v17537_v10, %v6045_v46  ;;  %v6111_v55 = vadd.f32 %v17545_v48, %v6075_v18  ;;  %v6845_v33 = vrot.slane %v6844_v6, 4  ;;  %v6913_v0 = vshrl.u32 %v17628_v21, 16 }
 0x38e   : > { %v12465_v28 = vcombine.low %v6693_v35, %v17628_v21  ;;  %v6116_v15 = vadd.f32 %v17545_v48, %v6080_v42  ;;  %v6114_v31 = vadd.f32 %v17545_v48, %v6078_v37  ;;  %v17644_v30 = vrot.slane %v6903_v40, 5  ;;  %v6672_v42 = vld [vmem:[#allocation3 + $0xc0] sm:$0xf]  ;;  %v6705_v39 = vld [vmem:[#allocation3 + $0x9c] sm:$0xf] }
 0x38f   : > { %v6117_v59 = vadd.f32 %v17545_v48, %v6081_v29  ;;  %v6143_v3 = vmax.f32 %v6111_v55, 0.0  ;;  %v6850_v62 = vsel %vm14584_vm8, %v6845_v33, %v6849_v13  ;;  %v6858_v12 = vor.u32 %v17555_v32, %v17550_v57 }
 0x390   : > { %13592 = vmatmul.mubr.msk.bf16.gmra.mxu0 %vm1885_vm9, %v12465_v28  ;;  %v6861_v34 = vshll.u32 %v17540_v20, 16  ;;  %v12428_v17 = vcombine.low %v6840_v60, %v6850_v62  ;;  %v6148_v8 = vmax.f32 %v6116_v15, 0.0  ;;  %v6146_v7 = vmax.f32 %v6114_v31, 0.0  ;;  %v6665_v28 = vld [vmem:[#allocation3 + $0xb4] sm:$0xf] }
 0x391   : > { %v6149_v35 = vmax.f32 %v6117_v59, 0.0  ;;  %v12865_v41 = vpack.c.bf16 %v6143_v3, %v6143_v3  ;;  %v6859_v4 = vrot.slane %v6858_v12, 4  ;;  %v6867_v53 = vrot.slane %v6865_v50, 4  ;;  %v6655_v50 = vld [vmem:[#allocation3 + $0xa4] sm:$0x1] }
 0x392   : > { %v6863_v43 = vrot.slane %v6861_v34, 5  ;;  %13551 = vmatprep.mubr.msk.bf16.mxu1 %vm1885_vm9, %v12428_v17  ;;  %v12870_v11 = vpack.c.bf16 %v6148_v8, %v6148_v8  ;;  %v12868_v61 = vpack.c.bf16 %v6146_v7, %v6146_v7  ;;  %v6871_v51 = vshll.u32 %v17646_v24, 16  ;;  %v6676_v34 = vld [vmem:[#allocation3 + $0xc8] sm:$0x1] }
 0x393   : > { %v12871_v47 = vpack.c.bf16 %v6149_v35, %v6149_v35  ;;  %v6459_v57 = vshrl.u32 %v12865_v41, 16  ;;  %v6462_v32 = vshll.u32 %v12865_v41, 16  ;;  %v6924_v40 = vshrl.u32 %v6695_v54, 16  ;;  %v17670_v41 = vld [vmem:[#allocation3 + $0x64] sm:$0xf] }
 0x394   : > { %v6864_v56 = vsel %vm14584_vm8, %v6859_v4, %v6863_v43  ;;  %v6868_v1 = vor.u32 %v6867_v53, %v6863_v43  ;;  %v6502_v38 = vshrl.u32 %v12870_v11, 16  ;;  %v6505_v45 = vshll.u32 %v12870_v11, 16  ;;  %v5520_v4 = vpop.f32.mrf.mxu1  ;;  %v17681_v11 = vld [vmem:[#allocation3 + $0x50] sm:$0x1] }
 0x395   : > { %v6485_v13 = vshrl.u32 %v12868_v61, 16  ;;  %v6488_v2 = vshll.u32 %v12868_v61, 16  ;;  %v6461_v27 = vrot.slane %v6459_v57, 7  ;;  %v6510_v46 = vshrl.u32 %v12871_v47, 16  ;;  %v6697_v61 = vld [vmem:[#allocation3 + $0x6c] sm:$0xf] }
 0x396   : > { %v6513_v18 = vshll.u32 %v12871_v47, 16  ;;  %v6869_v60 = vrot.slane %v6868_v1, 4  ;;  %v6504_v6 = vrot.slane %v6502_v38, 7  ;;  %v6873_v29 = vrot.slane %v6871_v51, 5 }
 0x397   : > { %v17660_v37 = vrot.slane %v6485_v13, 7  ;;  %v6464_v55 = vor.u32 %v6462_v32, %v6461_v27  ;;  %v6466_v33 = vrot.slane %v6461_v27, 4  ;;  %v6512_v15 = vrot.slane %v6510_v46, 7  ;;  %v6002_v27 = vpop.f32.mrf.mxu0 }
 0x398   : > { %v6927_v31 = vshll.u32 %v6695_v54, 16  ;;  %v6507_v59 = vor.u32 %v6505_v45, %v6504_v6  ;;  %v6508_v3 = vrot.slane %v6504_v6, 4  ;;  %v17679_v53 = vrot.slane %v6924_v40, 4 }
 0x399   : > { %v6490_v62 = vor.u32 %v6488_v2, %v17660_v37  ;;  %v6491_v12 = vrot.slane %v17660_v37, 4  ;;  %v6465_v17 = vsel %vm14713_vm12, %v6457_v58, %v6464_v55  ;;  %v6656_v8 = vsel %vm14525_vm2, %v6466_v33, %v6655_v50  ;;  %v17695_v2 = vld [vmem:[#allocation3 + $0x5c] sm:$0x1] }
 0x39a   : > { %v6515_v7 = vor.u32 %v6513_v18, %v6512_v15  ;;  %v6517_v35 = vrot.slane %v6512_v15, 4  ;;  %6654 = vst.msk [vmem:[#allocation3 + $0xa0] sm:$0xf] %vm347_vm3, %v6465_v17  ;;  %6657 = vst [vmem:[#allocation3 + $0xa4] sm:$0x1] %v6656_v8  ;;  %v6673_v43 = vsel %vm14691_vm10, %v6507_v59, %v6672_v42  ;;  %v6874_v58 = vsel %vm14584_vm8, %v6869_v60, %v6873_v29 }
 0x39b   : > { %v6666_v52 = vsel %vm14691_vm10, %v6490_v62, %v6665_v28  ;;  %6674 = vst [vmem:[#allocation3 + $0xc0] sm:$0xf] %v6673_v43  ;;  %v12429_v57 = vcombine.low %v6864_v56, %v6874_v58  ;;  %v6929_v32 = vrot.slane %v6927_v31, 5  ;;  %v6937_v1 = vshrl.u32 %v17670_v41, 16  ;;  %v6699_v60 = vld [vmem:[#allocation3 + $0x78] sm:$0xf] }
 0x39c   : > { %6667 = vst [vmem:[#allocation3 + $0xb4] sm:$0xf] %v6666_v52  ;;  %v6516_v47 = vsel %vm14713_vm12, %v6508_v3, %v6515_v7  ;;  %v6677_v51 = vsel %vm14525_vm2, %v6517_v35, %v6676_v34  ;;  %v12466_v38 = vcombine.low %v6695_v54, %v17670_v41  ;;  %v5561_v45 = vadd.f32 %v5520_v4, %v17262_v19  ;;  %v17720_v7 = vld [vmem:[#allocation3 + $0x68] sm:$0x1] }
 0x39d   : > { %6675 = vst.msk [vmem:[#allocation3 + $0xc4] sm:$0xf] %vm347_vm3, %v6516_v47  ;;  %6678 = vst [vmem:[#allocation3 + $0xc8] sm:$0x1] %v6677_v51  ;;  %v6882_v13 = vor.u32 %v17610_v5, %v17591_v63  ;;  %13552 = vmatmul.mubr.msk.bf16.gmra.mxu1 %vm1885_vm9, %v12429_v57  ;;  %v6885_v56 = vshll.u32 %v17583_v14, 16  ;;  %v6891_v50 = vrot.slane %v6889_v23, 4  ;;  %v12467_v55 = vcombine.low %v6697_v61, %v17687_v25 }
 0x39e   : > { %v6895_v46 = vshll.u32 %v17681_v11, 16  ;;  %v6948_v18 = vshrl.u32 %v6697_v61, 16  ;;  %13595 = vmatprep.mubr.msk.bf16.mxu0 %vm1885_vm9, %v12466_v38  ;;  %v6043_v19 = vadd.f32 %v6002_v27, %v5561_v45  ;;  %v6951_v6 = vshll.u32 %v6697_v61, 16  ;;  %v17704_v5 = vld [vmem:[#allocation3 + $0x7c] sm:$0xf] }
 0x39f   : > { %v6883_v54 = vrot.slane %v6882_v13, 4  ;;  %v6961_v63 = vshrl.u32 %v17687_v25, 16  ;;  %v6887_v42 = vrot.slane %v6885_v56, 5  ;;  %v6906_v28 = vor.u32 %v17644_v30, %v17633_v9  ;;  %13596 = vmatmul.mubr.msk.bf16.gmra.mxu0 %vm1885_vm9, %v12467_v55  ;;  %v6701_v9 = vld [vmem:[#allocation3 + $0x84] sm:$0xf] }
 0x3a0   : > { %v6897_v29 = vrot.slane %v6895_v46, 5  ;;  %v17706_v40 = vrot.slane %v6948_v18, 4  ;;  %v6079_v23 = vmul.f32 %v17537_v10, %v6043_v19  ;;  %v6953_v33 = vrot.slane %v6951_v6, 5  ;;  %v17736_v18 = vld [vmem:[#allocation3 + $0x88] sm:$0xf] }
 0x3a1   : > { %v6909_v15 = vshll.u32 %v17628_v21, 16  ;;  %v6888_v31 = vsel %vm14584_vm8, %v6883_v54, %v6887_v42  ;;  %v6892_v59 = vor.u32 %v6891_v50, %v6887_v42  ;;  %v6915_v3 = vrot.slane %v6913_v0, 4 }
 0x3a2   : > { %v6919_v62 = vshll.u32 %v17695_v2, 16  ;;  %v6115_v34 = vadd.f32 %v17545_v48, %v6079_v23  ;;  %v6907_v10 = vrot.slane %v6906_v28, 4  ;;  %v6972_v8 = vshrl.u32 %v6699_v60, 16 }
 0x3a3   : > { %v6911_v17 = vrot.slane %v6909_v15, 5  ;;  %v6893_v30 = vrot.slane %v6892_v59, 4  ;;  %v6975_v4 = vshll.u32 %v6699_v60, 16  ;;  %v6985_v43 = vshrl.u32 %v17704_v5, 16  ;;  %v6703_v59 = vld [vmem:[#allocation3 + $0x90] sm:$0xf] }
 0x3a4   : > { %v6921_v35 = vrot.slane %v6919_v62, 5  ;;  %v6147_v52 = vmax.f32 %v6115_v34, 0.0  ;;  %v17725_v61 = vrot.slane %v6972_v8, 4  ;;  %v12468_v51 = vcombine.low %v6699_v60, %v17704_v5 }
 0x3a5   : > { %v6912_v58 = vsel %vm14584_vm8, %v6907_v10, %v6911_v17  ;;  %v6916_v0 = vor.u32 %v6915_v3, %v6911_v17  ;;  %v6898_v48 = vsel %vm14584_vm8, %v6893_v30, %v6897_v29  ;;  %v17729_v47 = vrot.slane %v6975_v4, 5  ;;  %v6669_v3 = vld [vmem:[#allocation3 + $0xbc] sm:$0x1] }
 0x3a6   : > { %v6930_v57 = vor.u32 %v6929_v32, %v17679_v53  ;;  %v12869_v38 = vpack.c.bf16 %v6147_v52, %v6147_v52  ;;  %v12430_v45 = vcombine.low %v6888_v31, %v6898_v48  ;;  %v6933_v27 = vshll.u32 %v17670_v41, 16  ;;  %13599 = vmatprep.mubr.msk.bf16.mxu0 %vm1885_vm9, %v12468_v51  ;;  %v17746_v31 = vld [vmem:[#allocation3 + $0x74] sm:$0x1] }
 0x3a7   : > { %v6917_v13 = vrot.slane %v6916_v0, 4  ;;  %v6939_v50 = vrot.slane %v6937_v1, 4  ;;  %v6943_v46 = vshll.u32 %v17720_v7, 16  ;;  %v6996_v19 = vshrl.u32 %v6701_v9, 16  ;;  %v17758_v48 = vld [vmem:[#allocation3 + $0x94] sm:$0xf] }
 0x3a8   : > { %v6931_v56 = vrot.slane %v6930_v57, 4  ;;  %v6493_v54 = vshrl.u32 %v12869_v38, 16  ;;  %v6496_v6 = vshll.u32 %v12869_v38, 16  ;;  %13555 = vmatprep.mubr.msk.bf16.mxu1 %vm1885_vm9, %v12430_v45  ;;  %v6935_v32 = vrot.slane %v6933_v27, 5  ;;  %v17768_v57 = vld [vmem:[#allocation3 + $0x80] sm:$0x1] }
 0x3a9   : > { %v6922_v53 = vsel %vm14584_vm8, %v6917_v13, %v6921_v35  ;;  %v6945_v42 = vrot.slane %v6943_v46, 5  ;;  %v17741_v29 = vrot.slane %v6996_v19, 4  ;;  %v6999_v55 = vshll.u32 %v6701_v9, 16 }
 0x3aa   : > { %v12431_v60 = vcombine.low %v6912_v58, %v6922_v53  ;;  %v6495_v23 = vrot.slane %v6493_v54, 7  ;;  %v6936_v1 = vsel %vm14584_vm8, %v6931_v56, %v6935_v32  ;;  %v6940_v28 = vor.u32 %v6939_v50, %v6935_v32 }
 0x3ab   : > { %v7009_v15 = vshrl.u32 %v17736_v18, 16  ;;  %v17749_v62 = vrot.slane %v6999_v55, 5  ;;  %v12469_v34 = vcombine.low %v6701_v9, %v17736_v18  ;;  %v6954_v10 = vor.u32 %v6953_v33, %v17706_v40 }
 0x3ac   : > { %13556 = vmatmul.mubr.msk.bf16.gmra.mxu1 %vm1885_vm9, %v12431_v60  ;;  %v6957_v17 = vshll.u32 %v17687_v25, 16  ;;  %v6498_v8 = vor.u32 %v6496_v6, %v6495_v23  ;;  %v6500_v30 = vrot.slane %v6495_v23, 4  ;;  %v6941_v35 = vrot.slane %v6940_v28, 4 }
 0x3ad   : > { %v6963_v4 = vrot.slane %v6961_v63, 4  ;;  %13600 = vmatmul.mubr.msk.bf16.gmra.mxu0 %vm1885_vm9, %v12469_v34  ;;  %v6955_v52 = vrot.slane %v6954_v10, 4  ;;  %v6967_v0 = vshll.u32 %v17746_v31, 16  ;;  %v7020_v51 = vshrl.u32 %v6703_v59, 16 }
 0x3ae   : > { %v6959_v58 = vrot.slane %v6957_v17, 5  ;;  %v6499_v40 = vsel %vm14713_vm12, %v6491_v12, %v6498_v8  ;;  %v6670_v33 = vsel %vm14525_vm2, %v6500_v30, %v6669_v3  ;;  %v6946_v63 = vsel %vm14584_vm8, %v6941_v35, %v6945_v42  ;;  %v17773_v12 = vld [vmem:[#allocation3 + $0xa0] sm:$0xf]  ;;  %v17791_v17 = vld [vmem:[#allocation3 + $0xac] sm:$0xf] }
 0x3af   : > { %v7023_v9 = vshll.u32 %v6703_v59, 16  ;;  %6668 = vst.msk [vmem:[#allocation3 + $0xb8] sm:$0xf] %vm347_vm3, %v6499_v40  ;;  %6671 = vst [vmem:[#allocation3 + $0xbc] sm:$0x1] %v6670_v33  ;;  %v12432_v38 = vcombine.low %v6936_v1, %v6946_v63  ;;  %v6969_v13 = vrot.slane %v6967_v0, 5  ;;  %v12470_v46 = vcombine.low %v6703_v59, %v17758_v48 }
 0x3b0   : > { %v6960_v45 = vsel %vm14584_vm8, %v6955_v52, %v6959_v58  ;;  %v6964_v37 = vor.u32 %v6963_v4, %v6959_v58  ;;  %v7022_v27 = vrot.slane %v7020_v51, 4  ;;  %v7033_v50 = vshrl.u32 %v17758_v48, 16  ;;  %v6707_v59 = vld [vmem:[#allocation3 + $0xa8] sm:$0xf]  ;;  %v17803_v40 = vld [vmem:[#allocation3 + $0x98] sm:$0x1] }
 0x3b1   : > { %v7025_v56 = vrot.slane %v7023_v9, 5  ;;  %13559 = vmatprep.mubr.msk.bf16.mxu1 %vm1885_vm9, %v12432_v38  ;;  %v6978_v54 = vor.u32 %v17729_v47, %v17725_v61  ;;  %v6981_v6 = vshll.u32 %v17704_v5, 16  ;;  %v6987_v53 = vrot.slane %v6985_v43, 4  ;;  %13603 = vmatprep.mubr.msk.bf16.mxu0 %vm1885_vm9, %v12470_v46  ;;  %v17789_v47 = vld [vmem:[#allocation3 + $0x8c] sm:$0x1] }
 0x3b2   : > { %v6965_v19 = vrot.slane %v6964_v37, 4  ;;  %v6991_v32 = vshll.u32 %v17768_v57, 16  ;;  %v7044_v60 = vshrl.u32 %v6705_v39, 16  ;;  %v7047_v42 = vshll.u32 %v6705_v39, 16 }
 0x3b3   : > { %v7057_v55 = vshrl.u32 %v17773_v12, 16  ;;  %v6979_v1 = vrot.slane %v6978_v54, 4  ;;  %v6983_v28 = vrot.slane %v6981_v6, 5  ;;  %v12471_v61 = vcombine.low %v6705_v39, %v17773_v12 }
 0x3b4   : > { %v6970_v23 = vsel %vm14584_vm8, %v6965_v19, %v6969_v13  ;;  %v6993_v43 = vrot.slane %v6991_v32, 5  ;;  %v7046_v34 = vrot.slane %v7044_v60, 4  ;;  %v7049_v10 = vrot.slane %v7047_v42, 5 }
 0x3b5   : > { %v12433_v3 = vcombine.low %v6960_v45, %v6970_v23  ;;  %v6984_v8 = vsel %vm14584_vm8, %v6979_v1, %v6983_v28  ;;  %v6988_v30 = vor.u32 %v6987_v53, %v6983_v28  ;;  %13604 = vmatmul.mubr.msk.bf16.gmra.mxu0 %vm1885_vm9, %v12471_v61  ;;  %v7002_v35 = vor.u32 %v17749_v62, %v17741_v29  ;;  %v6709_v45 = vld [vmem:[#allocation3 + $0xb4] sm:$0xf] }
 0x3b6   : > { %v7005_v4 = vshll.u32 %v17736_v18, 16  ;;  %v7011_v52 = vrot.slane %v7009_v15, 4  ;;  %v7015_v58 = vshll.u32 %v17789_v47, 16  ;;  %v7068_v0 = vshrl.u32 %v6707_v59, 16  ;;  %v17811_v54 = vld [vmem:[#allocation3 + $0xb8] sm:$0xf] }
 0x3b7   : > { %13560 = vmatmul.mubr.msk.bf16.gmra.mxu1 %vm1885_vm9, %v12433_v3  ;;  %v7071_v51 = vshll.u32 %v6707_v59, 16  ;;  %v6989_v33 = vrot.slane %v6988_v30, 4  ;;  %v7003_v63 = vrot.slane %v7002_v35, 4  ;;  %v7081_v38 = vshrl.u32 %v17791_v17, 16  ;;  %v17819_v3 = vld [vmem:[#allocation3 + $0xa4] sm:$0x1] }
 0x3b8   : > { %v7007_v9 = vrot.slane %v7005_v4, 5  ;;  %v7017_v29 = vrot.slane %v7015_v58, 5  ;;  %v7070_v62 = vrot.slane %v7068_v0, 4  ;;  %v12472_v13 = vcombine.low %v6707_v59, %v17791_v17  ;;  %v14066_v35 = vld [vmem:[#allocation3 + $0xc] sm:$0xff]  }
 0x3b9   : > { %v7073_v37 = vrot.slane %v7071_v51, 5  ;;  %v6994_v15 = vsel %vm14584_vm8, %v6989_v33, %v6993_v43  ;;  %v7026_v19 = vor.u32 %v7025_v56, %v7022_v27  ;;  %v7029_v53 = vshll.u32 %v17758_v48, 16  ;;  %v17827_v51 = vld [vmem:[#allocation3 + $0xb0] sm:$0x1] }
 0x3ba   : > { %v7008_v39 = vsel %vm14584_vm8, %v7003_v63, %v7007_v9  ;;  %v7012_v46 = vor.u32 %v7011_v52, %v7007_v9  ;;  %v12434_v6 = vcombine.low %v6984_v8, %v6994_v15  ;;  %13607 = vmatprep.mubr.msk.bf16.mxu0 %vm1885_vm9, %v12472_v13  ;;  %v7035_v32 = vrot.slane %v7033_v50, 4 }
 0x3bb   : > { %v7039_v60 = vshll.u32 %v17803_v40, 16  ;;  %v7027_v23 = vrot.slane %v7026_v19, 4  ;;  %v7092_v1 = vshrl.u32 %v6709_v45, 16  ;;  %v7095_v28 = vshll.u32 %v6709_v45, 16 }
 0x3bc   : > { %v7013_v42 = vrot.slane %v7012_v46, 4  ;;  %13563 = vmatprep.mubr.msk.bf16.mxu1 %vm1885_vm9, %v12434_v6  ;;  %v7031_v61 = vrot.slane %v7029_v53, 5  ;;  %v7105_v27 = vshrl.u32 %v17811_v54, 16  ;;  %v12473_v56 = vcombine.low %v6709_v45, %v17811_v54 }
 0x3bd   : > { %v7041_v59 = vrot.slane %v7039_v60, 5  ;;  %v7094_v50 = vrot.slane %v7092_v1, 4  ;;  %v7097_v8 = vrot.slane %v7095_v28, 5  ;;  %v7050_v30 = vor.u32 %v7049_v10, %v7046_v34  ;;  %v7691_v1 = vld [vmem:[#allocation3 + $0xc] sm:$0xe] }
 0x3be   : > { %v7018_v43 = vsel %vm14584_vm8, %v7013_v42, %v7017_v29  ;;  %v7032_v52 = vsel %vm14584_vm8, %v7027_v23, %v7031_v61  ;;  %v7036_v58 = vor.u32 %v7035_v32, %v7031_v61  ;;  %13608 = vmatmul.mubr.msk.bf16.gmra.mxu0 %vm1885_vm9, %v12473_v56  ;;  %v7053_v0 = vshll.u32 %v17773_v12, 16  ;;  %v7690_v32 = vld [vmem:[#allocation3] sm:$0xe] }
 0x3bf   : > { %v12435_v4 = vcombine.low %v7008_v39, %v7018_v43  ;;  %v7051_v33 = vrot.slane %v7050_v30, 4  ;;  %v7059_v63 = vrot.slane %v7057_v55, 4  ;;  %v7063_v9 = vshll.u32 %v17819_v3, 16  ;;  %13651 = vmatprep.mubr.msk.bf16.mxu0 %vm1885_vm9, %v14066_v35  ;;  %v14068_v35 = vld [vmem:[#allocation3 + $0x24] sm:$0xff]  }
 0x3c0   : > { %v7074_v34 = vor.u32 %v7073_v37, %v7070_v62  ;;  %v7037_v10 = vrot.slane %v7036_v58, 4  ;;  %v7055_v45 = vrot.slane %v7053_v0, 5  ;;  %v7077_v29 = vshll.u32 %v17791_v17, 16  ;;  %v17840_v37 = vld [vmem:[#allocation3 + $0xbc] sm:$0x1] }
 0x3c1   : > { %13564 = vmatmul.mubr.msk.bf16.gmra.mxu1 %vm1885_vm9, %v12435_v4  ;;  %v7083_v13 = vrot.slane %v7081_v38, 4  ;;  %v7065_v15 = vrot.slane %v7063_v9, 5  ;;  %v7087_v46 = vshll.u32 %v17827_v51, 16  ;;  %v7098_v19 = vor.u32 %v7097_v8, %v7094_v50  ;;  %v14082_v50 = vld [vmem:[#allocation9 + $0x50] sm:$0xff]  }
 0x3c2   : > { %v7075_v39 = vrot.slane %v7074_v34, 4  ;;  %v7042_v55 = vsel %vm14584_vm8, %v7037_v10, %v7041_v59  ;;  %v7056_v6 = vsel %vm14584_vm8, %v7051_v33, %v7055_v45  ;;  %v7060_v53 = vor.u32 %v7059_v63, %v7055_v45  ;;  %v14067_v59 = vld [vmem:[#allocation3 + $0x18] sm:$0xff]   ;;  %v14165_v63 = vld [vmem:[#allocation3 + $0x8] sm:$0x1] }
 0x3c3   : > { %v7079_v62 = vrot.slane %v7077_v29, 5  ;;  %v12436_v60 = vcombine.low %v7032_v52, %v7042_v55  ;;  %v7089_v42 = vrot.slane %v7087_v46, 5  ;;  %v7099_v23 = vrot.slane %v7098_v19, 4  ;;  %v14164_v52 = vld [vmem:[#allocation3 + $0x4] sm:$0xf] }
 0x3c4   : > { %v7101_v38 = vshll.u32 %v17811_v54, 16  ;;  %v7061_v28 = vrot.slane %v7060_v53, 4  ;;  %v7107_v43 = vrot.slane %v7105_v27, 4  ;;  %v7111_v30 = vshll.u32 %v17840_v37, 16  ;;  %v7692_v27 = vld [vmem:[#allocation3 + $0x18] sm:$0xe] }
 0x3c5   : > { %v7080_v61 = vsel %vm14584_vm8, %v7075_v39, %v7079_v62  ;;  %v7084_v56 = vor.u32 %v7083_v13, %v7079_v62  ;;  %13567 = vmatprep.mubr.msk.bf16.mxu1 %vm1885_vm9, %v12436_v60  ;;  %v12492_v4 = vrot.slane %v7690_v32, 9  ;;  %v7740_v58 = vrot.slane %v14164_v52, 5  ;;  %v14166_v39 = vld [vmem:[#allocation9 + $0x58] sm:$0xff]   ;;  %v14167_v53 = vld [vmem:[#allocation3 + $0x10] sm:$0xf] }
 0x3c6   : > { %v7103_v8 = vrot.slane %v7101_v38, 5  ;;  %v7066_v0 = vsel %vm14584_vm8, %v7061_v28, %v7065_v15  ;;  %13652 = vmatmul.mubr.msk.bf16.vlgmr.msra.gmra.mxu0 %vm1885_vm9, %v14067_v59  ;;  %v7743_v9 = vrot.slane %v14165_v63, 5  ;;  %v12493_v34 = vrot.slane %v7691_v1, 9  ;;  %v7693_v32 = vld [vmem:[#allocation3 + $0x24] sm:$0xe]  ;;  %v14069_v63 = vld [vmem:[#allocation3 + $0x30] sm:$0xff]  }
 0x3c7   : > { %v7085_v33 = vrot.slane %v7084_v56, 4  ;;  %v12437_v10 = vcombine.low %v7056_v6, %v7066_v0  ;;  %v7113_v13 = vrot.slane %v7111_v30, 5  ;;  %13655 = vmatprep.mubr.msk.bf16.mxu0 %vm1885_vm9, %v14068_v35  ;;  %13720 = vmatpush3.bf16.msra.mxu0 %v14166_v39  ;;  %v7741_v19 = vsel %vm15104_vm15, %v12492_v4, %v7740_v58  ;;  %v17857_v6 = vld [vmem:[#allocation9 + $0x78] sm:$0xff]   ;;  %v14168_v38 = vld [vmem:[#allocation3 + $0x14] sm:$0x1] }
 0x3c8   : > { %v7104_v45 = vsel %vm14584_vm8, %v7099_v23, %v7103_v8  ;;  %v7108_v29 = vor.u32 %v7107_v43, %v7103_v8  ;;  %v7742_v55 = vrot.slane %v7740_v58, 4  ;;  %v7747_v62 = vrot.slane %v14167_v53, 5  ;;  %13721 = vmatprep.subr.bf16.mxu0 %v14082_v50  ;;  %v14169_v43 = vld [vmem:[#allocation3 + $0x1c] sm:$0xf]  ;;  %v7694_v30 = vld [vmem:[#allocation3 + $0x30] sm:$0xe] }
 0x3c9   : > { %v7090_v15 = vsel %vm14584_vm8, %v7085_v33, %v7089_v42  ;;  %13568 = vmatmul.mubr.msk.bf16.gmra.mxu1 %vm1885_vm9, %v12437_v10  ;;  %v7750_v1 = vrot.slane %v14168_v38, 5  ;;  %v12494_v28 = vrot.slane %v7692_v27, 9  ;;  %v7754_v8 = vrot.slane %v14169_v43, 5  ;;  %v7695_v35 = vld [vmem:[#allocation3 + $0x3c] sm:$0xe] }
 0x3ca   : > { %v12438_v60 = vcombine.low %v7080_v61, %v7090_v15  ;;  %v7109_v23 = vrot.slane %v7108_v29, 4  ;;  %v7744_v42 = vsel %vm15104_vm15, %v7742_v55, %v7743_v9  ;;  %v17864_v56 = vsel %vm15104_vm15, %v12493_v34, %v7747_v62  ;;  %v7696_v0 = vld [vmem:[#allocation3 + $0x48] sm:$0xe]  ;;  %v14171_v15 = vld [vmem:[#allocation3 + $0x34] sm:$0xf] }
 0x3cb   : > { %v7749_v59 = vrot.slane %v7747_v62, 4  ;;  %v12508_v4 = vcombine.low %v7741_v19, %v7744_v42  ;;  %v7757_v52 = vrot.slane %v17503_v36, 5  ;;  %v12495_v58 = vrot.slane %v7693_v32, 9  ;;  %13722 = vmatpush3.bf16.msra.mxu0 %v14082_v50  ;;  %v14071_v36 = vld [vmem:[#allocation3 + $0x3c] sm:$0xff]   ;;  %v14170_v29 = vld [vmem:[#allocation3 + $0x28] sm:$0xf] }
 0x3cc   : > { %13571 = vmatprep.mubr.msk.bf16.mxu1 %vm1885_vm9, %v12438_v60  ;;  %v7114_v61 = vsel %vm14584_vm8, %v7109_v23, %v7113_v13  ;;  %v17876_v34 = vsel %vm15104_vm15, %v12494_v28, %v7754_v8  ;;  %v7756_v27 = vrot.slane %v7754_v8, 4  ;;  %13791 = vmatprep.subr.bf16.mxu0 %v17857_v6  ;;  %v7761_v13 = vrot.slane %v14170_v29, 5  ;;  %v7697_v23 = vld [vmem:[#allocation3 + $0x54] sm:$0xe]  ;;  %v7698_v8 = vld [vmem:[#allocation3 + $0x60] sm:$0xe] }
 0x3cd   : > { %v12439_v33 = vcombine.low %v7104_v45, %v7114_v61  ;;  %v17872_v9 = vsel %vm15104_vm15, %v7749_v59, %v7750_v1  ;;  %v7764_v50 = vrot.slane %v17569_v22, 5  ;;  %v12496_v45 = vrot.slane %v7694_v30, 9  ;;  %v14074_v29 = vld [vmem:[#allocation3 + $0x54] sm:$0xff]  }
 0x3ce   : > { %v12509_v10 = vcombine.low %v17864_v56, %v17872_v9  ;;  %13656 = vmatmul.mubr.msk.bf16.gmra.mxu0 %vm1885_vm9, %v14069_v63  ;;  %v17885_v39 = vsel %vm15104_vm15, %v7756_v27, %v7757_v52  ;;  %v7768_v19 = vrot.slane %v14171_v15, 5  ;;  %v7771_v55 = vrot.slane %v17604_v16, 5  ;;  %v7699_v52 = vld [vmem:[#allocation3 + $0x6c] sm:$0xe] }
 0x3cf   : > { %v12497_v53 = vrot.slane %v7695_v35, 9  ;;  %13659 = vmatprep.mubr.msk.bf16.mxu0 %vm1885_vm9, %v14071_v36  ;;  %v12510_v62 = vcombine.low %v17876_v34, %v17885_v39  ;;  %v17893_v22 = vsel %vm15104_vm15, %v12495_v58, %v7761_v13  ;;  %v7763_v32 = vrot.slane %v7761_v13, 4  ;;  %v7700_v36 = vld [vmem:[#allocation3 + $0x78] sm:$0xe] }
 0x3d0   : > { %v7775_v60 = vrot.slane %v17540_v20, 5  ;;  %v17898_v38 = vsel %vm15104_vm15, %v12496_v45, %v7768_v19  ;;  %v7770_v1 = vrot.slane %v7768_v19, 4  ;;  %v7778_v16 = vrot.slane %v17646_v24, 5 }
 0x3d1   : > { %v12498_v28 = vrot.slane %v7696_v0, 9  ;;  %13572 = vmatmul.mubr.msk.bf16.gmra.mxu1 %vm1885_vm9, %v12439_v33  ;;  %v17904_v42 = vsel %vm15104_vm15, %v7763_v32, %v7764_v50  ;;  %v7782_v43 = vrot.slane %v17583_v14, 5  ;;  %v7785_v35 = vrot.slane %v17681_v11, 5  ;;  %v14073_v33 = vld [vmem:[#allocation3 + $0x48] sm:$0xff]  }
 0x3d2   : > { %v17908_v59 = vsel %vm15104_vm15, %v12497_v53, %v7775_v60  ;;  %v7777_v20 = vrot.slane %v7775_v60, 4  ;;  %13615 = vmatprep.mubr.msk.bf16.mxu1 %vm1885_vm9, %v12508_v4  ;;  %v12511_v24 = vcombine.low %v17893_v22, %v17904_v42  ;;  %v17916_v30 = vsel %vm15104_vm15, %v7770_v1, %v7771_v55  ;;  %v7701_v55 = vld [vmem:[#allocation3 + $0x84] sm:$0xe]  ;;  %v14080_v53 = vld [vmem:[#allocation9 + $0x40] sm:$0xff]   ;;  %v14079_v22 = vld [vmem:[#allocation3 + $0x90] sm:$0xff]  }
 0x3d3   : > { %v12499_v61 = vrot.slane %v7697_v23, 9  ;;  %v12512_v58 = vcombine.low %v17898_v38, %v17916_v30  ;;  %v17927_v4 = vsel %vm15104_vm15, %v12498_v28, %v7782_v43  ;;  %v7784_v0 = vrot.slane %v7782_v43, 4  ;;  %v7702_v28 = vld [vmem:[#allocation3 + $0x90] sm:$0xe] }
 0x3d4   : > { %v17923_v14 = vsel %vm15104_vm15, %v7777_v20, %v7778_v16  ;;  %v7789_v11 = vrot.slane %v17628_v21, 5  ;;  %v7792_v34 = vrot.slane %v17695_v2, 5  ;;  %v12500_v27 = vrot.slane %v7698_v8, 9 }
 0x3d5   : > { %v12513_v63 = vcombine.low %v17908_v59, %v17923_v14  ;;  %v17935_v13 = vsel %vm15104_vm15, %v7784_v0, %v7785_v35  ;;  %v7796_v50 = vrot.slane %v17670_v41, 5  ;;  %v7799_v45 = vrot.slane %v17720_v7, 5  ;;  %v7703_v35 = vld [vmem:[#allocation3 + $0x9c] sm:$0xe] }
 0x3d6   : > { %v12501_v39 = vrot.slane %v7699_v52, 9  ;;  %13660 = vmatmul.mubr.msk.bf16.gmra.mxu0 %vm1885_vm9, %v14073_v33  ;;  %v12514_v15 = vcombine.low %v17927_v4, %v17935_v13  ;;  %v17944_v21 = vsel %vm15104_vm15, %v12499_v61, %v7789_v11  ;;  %v7791_v2 = vrot.slane %v7789_v11, 4  ;;  %v14172_v61 = vld [vmem:[#allocation9 + $0x48] sm:$0xff]   ;;  %v9264_v11 = vld [vmem:[#allocation3 + $0xc] sm:$0xe] }
 0x3d7   : > { %v7803_v19 = vrot.slane %v17687_v25, 5  ;;  %13663 = vmatprep.mubr.msk.bf16.mxu0 %vm1885_vm9, %v14074_v29  ;;  %v17950_v41 = vsel %vm15104_vm15, %v12500_v27, %v7796_v50  ;;  %v7798_v7 = vrot.slane %v7796_v50, 4  ;;  %v7806_v32 = vrot.slane %v17746_v31, 5  ;;  %v14076_v27 = vld [vmem:[#allocation3 + $0x6c] sm:$0xff]  }
 0x3d8   : > { %v12502_v60 = vrot.slane %v7700_v36, 9  ;;  %v17955_v23 = vsel %vm15104_vm15, %v7791_v2, %v7792_v34  ;;  %v7810_v16 = vrot.slane %v17704_v5, 5  ;;  %v7813_v43 = vrot.slane %v17768_v57, 5  ;;  %v14075_v5 = vld [vmem:[#allocation3 + $0x60] sm:$0xff]   ;;  %v17988_v34 = vld [vmem:[#allocation9 + $0x68] sm:$0xff]  }
 0x3d9   : > { %v17959_v1 = vsel %vm15104_vm15, %v12501_v39, %v7803_v19  ;;  %v7805_v25 = vrot.slane %v7803_v19, 4  ;;  %13616 = vmatmul.mubr.msk.bf16.vlgmr.msra.gmra.mxu1 %vm1885_vm9, %v12509_v10  ;;  %v12515_v31 = vcombine.low %v17944_v21, %v17955_v23  ;;  %v17970_v20 = vsel %vm15104_vm15, %v7798_v7, %v7799_v45  ;;  %v17996_v39 = vld [vmem:[#allocation3 + $0x10] sm:$0xf]  ;;  %v7704_v7 = vld [vmem:[#allocation3 + $0xa8] sm:$0xe] }
 0x3da   : > { %v12503_v8 = vrot.slane %v7701_v55, 9  ;;  %13684 = vmatpush3.bf16.msra.mxu1 %v14172_v61  ;;  %13619 = vmatprep.mubr.msk.bf16.mxu1 %vm1885_vm9, %v12510_v62  ;;  %v12516_v56 = vcombine.low %v17950_v41, %v17970_v20  ;;  %v17982_v10 = vsel %vm15104_vm15, %v12502_v60, %v7810_v16  ;;  %v7812_v52 = vrot.slane %v7810_v16, 4  ;;  %v18005_v55 = vld [vmem:[#allocation3 + $0x14] sm:$0x1] }
 0x3db   : > { %v17978_v9 = vsel %vm15104_vm15, %v7805_v25, %v7806_v32  ;;  %13685 = vmatprep.subr.bf16.mxu1 %v14080_v53  ;;  %v7817_v0 = vrot.slane %v17736_v18, 5  ;;  %v7820_v62 = vrot.slane %v17789_v47, 5  ;;  %v12504_v33 = vrot.slane %v7702_v28, 9  ;;  %v18023_v28 = vld [vmem:[#allocation3 + $0x1c] sm:$0xf] }
 0x3dc   : > { %v12517_v57 = vcombine.low %v17959_v1, %v17978_v9  ;;  %v17992_v36 = vsel %vm15104_vm15, %v7812_v52, %v7813_v43  ;;  %v7824_v29 = vrot.slane %v17758_v48, 5  ;;  %v7827_v50 = vrot.slane %v17803_v40, 5  ;;  %v9265_v43 = vld [vmem:[#allocation3 + $0x18] sm:$0xe]  ;;  %v7705_v52 = vld [vmem:[#allocation3 + $0xb4] sm:$0xe] }
 0x3dd   : > { %v12505_v45 = vrot.slane %v7703_v35, 9  ;;  %v12518_v18 = vcombine.low %v17982_v10, %v17992_v36  ;;  %v18002_v47 = vsel %vm15104_vm15, %v12503_v8, %v7817_v0  ;;  %v7819_v2 = vrot.slane %v7817_v0, 4  ;;  %v18136_v0 = vld [vmem:[#allocation3 + $0x40] sm:$0xf] }
 0x3de   : > { %v7831_v19 = vrot.slane %v17773_v12, 5  ;;  %13664 = vmatmul.mubr.msk.bf16.gmra.mxu0 %vm1885_vm9, %v14075_v5  ;;  %13686 = vmatpush3.bf16.msra.mxu1 %v14080_v53  ;;  %v18010_v48 = vsel %vm15104_vm15, %v12504_v33, %v7824_v29  ;;  %v7826_v40 = vrot.slane %v7824_v29, 4  ;;  %v7834_v32 = vrot.slane %v17819_v3, 5  ;;  %v18033_v5 = vld [vmem:[#allocation3 + $0x20] sm:$0x1] }
 0x3df   : > { %v12610_v60 = vrot.slane %v9264_v11, 9  ;;  %13667 = vmatprep.mubr.msk.bf16.mxu0 %vm1885_vm9, %v14076_v27  ;;  %v18016_v25 = vsel %vm15104_vm15, %v7819_v2, %v7820_v62  ;;  %v9330_v53 = vrot.slane %v17996_v39, 5  ;;  %13755 = vmatprep.subr.bf16.mxu1 %v17988_v34  ;;  %v9333_v35 = vrot.slane %v18005_v55, 5  ;;  %v9266_v29 = vld [vmem:[#allocation3 + $0x24] sm:$0xe] }
 0x3e0   : > { %v18020_v12 = vsel %vm15104_vm15, %v12505_v45, %v7831_v19  ;;  %v7833_v16 = vrot.slane %v7831_v19, 4  ;;  %v18030_v8 = vsel %vm15104_vm15, %v7826_v40, %v7827_v50  ;;  %v12506_v61 = vrot.slane %v7704_v7, 9  ;;  %v14077_v50 = vld [vmem:[#allocation3 + $0x78] sm:$0xff]   ;;  %v18072_v40 = vld [vmem:[#allocation3 + $0x2c] sm:$0x1]  ;;  %v14085_v10 = vld [vmem:[#allocation3 + $0xc0] sm:$0xff]  }
 0x3e1   : > { %13620 = vmatmul.mubr.msk.bf16.gmra.mxu1 %vm1885_vm9, %v12511_v24  ;;  %v18047_v33 = vsel %vm15104_vm15, %v12610_v60, %v9330_v53  ;;  %v9332_v11 = vrot.slane %v9330_v53, 4  ;;  %v7838_v42 = vrot.slane %v17791_v17, 5  ;;  %v7841_v24 = vrot.slane %v17827_v51, 5  ;;  %v14078_v60 = vld [vmem:[#allocation3 + $0x84] sm:$0xff]  }
 0x3e2   : > { %v18043_v62 = vsel %vm15104_vm15, %v7833_v16, %v7834_v32  ;;  %13623 = vmatprep.mubr.msk.bf16.mxu1 %vm1885_vm9, %v12512_v58  ;;  %v12611_v27 = vrot.slane %v9265_v43, 9  ;;  %v9337_v2 = vrot.slane %v18023_v28, 5  ;;  %v9340_v38 = vrot.slane %v18033_v5, 5  ;;  %v18063_v58 = vld [vmem:[#allocation3 + $0x28] sm:$0xf] }
 0x3e3   : > { %v18059_v45 = vsel %vm15104_vm15, %v9332_v11, %v9333_v35  ;;  %v12507_v30 = vrot.slane %v7705_v52, 9  ;;  %v18069_v17 = vsel %vm15104_vm15, %v12506_v61, %v7838_v42  ;;  %v7840_v51 = vrot.slane %v7838_v42, 4  ;;  %v8526_v32 = vld [vmem:[#allocation3 + $0xc] sm:$0xf]  ;;  %v8529_v42 = vld [vmem:[#allocation3 + $0x18] sm:$0xf] }
 0x3e4   : > { %v12626_v19 = vcombine.low %v18047_v33, %v18059_v45  ;;  %v7845_v7 = vrot.slane %v17811_v54, 5  ;;  %v18076_v16 = vsel %vm15104_vm15, %v12611_v27, %v9337_v2  ;;  %v9339_v53 = vrot.slane %v9337_v2, 4 }
 0x3e5   : > { %v7848_v43 = vrot.slane %v17840_v37, 5  ;;  %v12612_v35 = vrot.slane %v9266_v29, 9  ;;  %v18082_v61 = vsel %vm15104_vm15, %v7840_v51, %v7841_v24  ;;  %v9344_v11 = vrot.slane %v18063_v58, 5  ;;  %v9267_v29 = vld [vmem:[#allocation3 + $0x30] sm:$0xe] }
 0x3e6   : > { %13668 = vmatmul.mubr.msk.bf16.gmra.mxu0 %vm1885_vm9, %v14077_v50  ;;  %v18086_v54 = vsel %vm15104_vm15, %v12507_v30, %v7845_v7  ;;  %v7847_v52 = vrot.slane %v7845_v7, 4  ;;  %v18094_v37 = vsel %vm15104_vm15, %v9339_v53, %v9340_v38  ;;  %v9347_v27 = vrot.slane %v18072_v40, 5  ;;  %v18107_v7 = vld [vmem:[#allocation3 + $0x34] sm:$0xf]  ;;  %v18109_v38 = vld [vmem:[#allocation3 + $0x38] sm:$0x1] }
 0x3e7   : > { %13671 = vmatprep.mubr.msk.bf16.mxu0 %vm1885_vm9, %v14078_v60  ;;  %v8575_v24 = vshrl.u32 %v8526_v32, 16  ;;  %v18105_v30 = vsel %vm15104_vm15, %v12612_v35, %v9344_v11  ;;  %v9346_v51 = vrot.slane %v9344_v11, 4  ;;  %v8588_v59 = vshrl.u32 %v17996_v39, 16 }
 0x3e8   : > { %v18101_v2 = vsel %vm15104_vm15, %v7847_v52, %v7848_v43  ;;  %v8578_v43 = vshll.u32 %v8526_v32, 16  ;;  %v8584_v52 = vshll.u32 %v17996_v39, 16  ;;  %v8594_v14 = vshll.u32 %v18005_v55, 16  ;;  %v9268_v32 = vld [vmem:[#allocation3 + $0x3c] sm:$0xe] }
 0x3e9   : > { %13624 = vmatmul.mubr.msk.bf16.gmra.mxu1 %vm1885_vm9, %v12513_v63  ;;  %v8577_v53 = vrot.slane %v8575_v24, 4  ;;  %v18124_v35 = vsel %vm15104_vm15, %v9346_v51, %v9347_v27  ;;  %v12613_v63 = vrot.slane %v9267_v29, 9  ;;  %v9351_v60 = vrot.slane %v18107_v7, 5  ;;  %v14081_v27 = vld [vmem:[#allocation3 + $0x9c] sm:$0xff]  }
 0x3ea   : > { %13627 = vmatprep.mubr.msk.bf16.mxu1 %vm1885_vm9, %v12514_v15  ;;  %v8580_v11 = vrot.slane %v8578_v43, 5  ;;  %v8586_v24 = vrot.slane %v8584_v52, 5  ;;  %v8590_v4 = vrot.slane %v8588_v59, 4  ;;  %v8596_v13 = vrot.slane %v8594_v14, 5 }
 0x3eb   : > { %v9354_v15 = vrot.slane %v18109_v38, 5  ;;  %v8599_v50 = vshrl.u32 %v8529_v42, 16  ;;  %v18134_v39 = vsel %vm15104_vm15, %v12613_v63, %v9351_v60  ;;  %v9353_v55 = vrot.slane %v9351_v60, 4 }
 0x3ec   : > { %v8581_v51 = vor.u32 %v8580_v11, %v8577_v53  ;;  %v8602_v29 = vshll.u32 %v8529_v42, 16  ;;  %v8591_v43 = vor.u32 %v8590_v4, %v8586_v24  ;;  %v8608_v59 = vshll.u32 %v18023_v28, 16  ;;  %v18147_v11 = vld [vmem:[#allocation3 + $0x44] sm:$0x1] }
 0x3ed   : > { %v8601_v52 = vrot.slane %v8599_v50, 4  ;;  %v8612_v14 = vshrl.u32 %v18023_v28, 16  ;;  %v18144_v63 = vsel %vm15104_vm15, %v9353_v55, %v9354_v15  ;;  %v8618_v42 = vshll.u32 %v18033_v5, 16  ;;  %v8532_v28 = vld [vmem:[#allocation3 + $0x24] sm:$0xf] }
 0x3ee   : > { %13672 = vmatmul.mubr.msk.bf16.gmra.mxu0 %vm1885_vm9, %v14079_v22  ;;  %v8582_v53 = vrot.slane %v8581_v51, 4  ;;  %v8604_v60 = vrot.slane %v8602_v29, 5  ;;  %v8592_v22 = vrot.slane %v8591_v43, 4  ;;  %v12629_v50 = vcombine.low %v18134_v39, %v18144_v63 }
 0x3ef   : > { %13675 = vmatprep.mubr.msk.bf16.mxu0 %vm1885_vm9, %v14081_v27  ;;  %v8610_v4 = vrot.slane %v8608_v59, 5  ;;  %v8614_v3 = vrot.slane %v8612_v14, 4  ;;  %v8620_v51 = vrot.slane %v8618_v42, 5  ;;  %v12614_v5 = vrot.slane %v9268_v32, 9  ;;  %v18167_v59 = vld [vmem:[#allocation3 + $0x4c] sm:$0xf] }
 0x3f0   : > { %v8587_v15 = vsel %vm14584_vm8, %v8582_v53, %v8586_v24  ;;  %v8605_v27 = vor.u32 %v8604_v60, %v8601_v52  ;;  %v8597_v55 = vsel %vm14584_vm8, %v8592_v22, %v8596_v13  ;;  %v9358_v43 = vrot.slane %v18136_v0, 5  ;;  %v14083_v32 = vld [vmem:[#allocation3 + $0xa8] sm:$0xff]   ;;  %v14084_v13 = vld [vmem:[#allocation3 + $0xb4] sm:$0xff]  }
 0x3f1   : > { %13628 = vmatmul.mubr.msk.bf16.gmra.mxu1 %vm1885_vm9, %v12515_v31  ;;  %v8615_v29 = vor.u32 %v8614_v3, %v8610_v4  ;;  %v9361_v21 = vrot.slane %v18147_v11, 5  ;;  %v18165_v23 = vcombine.low %v8587_v15, %v8597_v55  ;;  %v8623_v24 = vshrl.u32 %v8532_v28, 16  ;;  %v18174_v3 = vld [vmem:[#allocation3 + $0x50] sm:$0x1] }
 0x3f2   : > { %13631 = vmatprep.mubr.msk.bf16.mxu1 %vm1885_vm9, %v12516_v56  ;;  %v8606_v31 = vrot.slane %v8605_v27, 4  ;;  %v8626_v52 = vshll.u32 %v8532_v28, 16  ;;  %v18171_v41 = vsel %vm15104_vm15, %v12614_v5, %v9358_v43  ;;  %v9360_v20 = vrot.slane %v9358_v43, 4  ;;  %v9269_v28 = vld [vmem:[#allocation3 + $0x48] sm:$0xe] }
 0x3f3   : > { %v8616_v14 = vrot.slane %v8615_v29, 4  ;;  %v8632_v56 = vshll.u32 %v18063_v58, 16  ;;  %v8625_v60 = vrot.slane %v8623_v24, 4  ;;  %v8636_v22 = vshrl.u32 %v18063_v58, 16  ;;  %v8535_v29 = vld [vmem:[#allocation3 + $0x30] sm:$0xf] }
 0x3f4   : > { %v8611_v53 = vsel %vm14584_vm8, %v8606_v31, %v8610_v4  ;;  %v8628_v42 = vrot.slane %v8626_v52, 5  ;;  %v18184_v27 = vsel %vm15104_vm15, %v9360_v20, %v9361_v21  ;;  %v8642_v55 = vshll.u32 %v18072_v40, 16 }
 0x3f5   : > { %v8621_v15 = vsel %vm14584_vm8, %v8616_v14, %v8620_v51  ;;  %v8634_v5 = vrot.slane %v8632_v56, 5  ;;  %v12630_v58 = vcombine.low %v18171_v41, %v18184_v27  ;;  %v8638_v31 = vrot.slane %v8636_v22, 4  ;;  %v18198_v56 = vld [vmem:[#allocation3 + $0x58] sm:$0xf] }
 0x3f6   : > { %13676 = vmatmul.mubr.msk.bf16.gmra.mxu0 %vm1885_vm9, %v14083_v32  ;;  %v18188_v4 = vcombine.low %v8611_v53, %v8621_v15  ;;  %v8629_v43 = vor.u32 %v8628_v42, %v8625_v60  ;;  %v8644_v24 = vrot.slane %v8642_v55, 5  ;;  %v12615_v52 = vrot.slane %v9269_v28, 9  ;;  %v18212_v15 = vld [vmem:[#allocation3 + $0x5c] sm:$0x1] }
 0x3f7   : > { %13679 = vmatprep.mubr.msk.bf16.mxu0 %vm1885_vm9, %v14084_v13  ;;  %v9365_v51 = vrot.slane %v18167_v59, 5  ;;  %v9368_v21 = vrot.slane %v18174_v3, 5  ;;  %v8639_v32 = vor.u32 %v8638_v31, %v8634_v5  ;;  %v8647_v14 = vshrl.u32 %v8535_v29, 16 }
 0x3f8   : > { %v8630_v40 = vrot.slane %v8629_v43, 4  ;;  %v8650_v20 = vshll.u32 %v8535_v29, 16  ;;  %v8656_v1 = vshll.u32 %v18107_v7, 16  ;;  %v8660_v9 = vshrl.u32 %v18107_v7, 16  ;;  %v8538_v43 = vld [vmem:[#allocation3 + $0x3c] sm:$0xf] }
 0x3f9   : > { %13632 = vmatmul.mubr.msk.bf16.gmra.mxu1 %vm1885_vm9, %v12517_v57  ;;  %v18206_v13 = vsel %vm15104_vm15, %v12615_v52, %v9365_v51  ;;  %v9367_v53 = vrot.slane %v9365_v51, 4  ;;  %v9270_v57 = vld [vmem:[#allocation3 + $0x54] sm:$0xe]  ;;  %v8640_v42 = vrot.slane %v8639_v32, 4  ;;  %v8649_v22 = vrot.slane %v8647_v14, 4 }
 0x3fa   : > { %13635 = vmatprep.mubr.msk.bf16.mxu1 %vm1885_vm9, %v12518_v18  ;;  %v8635_v60 = vsel %vm14584_vm8, %v8630_v40, %v8634_v5  ;;  %v8652_v28 = vrot.slane %v8650_v20, 5  ;;  %v8658_v18 = vrot.slane %v8656_v1, 5  ;;  %v8662_v55 = vrot.slane %v8660_v9, 4 }
 0x3fb   : > { %v18216_v36 = vsel %vm15104_vm15, %v9367_v53, %v9368_v21  ;;  %v8666_v29 = vshll.u32 %v18109_v38, 16  ;;  %v8645_v7 = vsel %vm14584_vm8, %v8640_v42, %v8644_v24  ;;  %v12616_v52 = vrot.slane %v9270_v57, 9  ;;  %v18232_v53 = vld [vmem:[#allocation3 + $0x64] sm:$0xf]  ;;  %v18239_v42 = vld [vmem:[#allocation3 + $0x68] sm:$0x1] }
 0x3fc   : > { %v12631_v5 = vcombine.low %v18206_v13, %v18216_v36  ;;  %v8653_v31 = vor.u32 %v8652_v28, %v8649_v22  ;;  %v18224_v51 = vcombine.low %v8635_v60, %v8645_v7  ;;  %v8663_v40 = vor.u32 %v8662_v55, %v8658_v18  ;;  %v14088_v13 = vld [vmem:[#allocation9 + $0x60] sm:$0xff]  }
 0x3fd   : > { %v8668_v21 = vrot.slane %v8666_v29, 5  ;;  %v9372_v32 = vrot.slane %v18198_v56, 5  ;;  %v9375_v24 = vrot.slane %v18212_v15, 5  ;;  %v8671_v14 = vshrl.u32 %v8538_v43, 16 }
 0x3fe   : > { %13680 = vmatmul.mubr.msk.bf16.gmra.mxu0 %vm1885_vm9, %v14085_v10  ;;  %v8654_v38 = vrot.slane %v8653_v31, 4  ;;  %v8674_v20 = vshll.u32 %v8538_v43, 16  ;;  %v8664_v1 = vrot.slane %v8663_v40, 4  ;;  %v8680_v60 = vshll.u32 %v18136_v0, 16  ;;  %v9271_v10 = vld [vmem:[#allocation3 + $0x60] sm:$0xe] }
 0x3ff   : > { %13723 = vmatprep.mubr.msk.bf16.mxu0 %vm1885_vm9, %v12626_v19  ;;  %v18236_v9 = vsel %vm15104_vm15, %v12616_v52, %v9372_v32  ;;  %v9374_v57 = vrot.slane %v9372_v32, 4  ;;  %v20309_v33 = vcombine.low %v18002_v47, %v18016_v25  ;;  %v8673_v19 = vrot.slane %v8671_v14, 4  ;;  %v8541_v43 = vld [vmem:[#allocation3 + $0x48] sm:$0xf]  ;;  %v14089_v32 = vld [vmem:[#allocation9 + $0x70] sm:$0xff]  }
 0x400   : > { %v8659_v45 = vsel %vm14584_vm8, %v8654_v38, %v8658_v18  ;;  %v8676_v22 = vrot.slane %v8674_v20, 5  ;;  %v8684_v28 = vshrl.u32 %v18136_v0, 16  ;;  %v20310_v55 = vcombine.low %v18010_v48, %v18030_v8 }
 0x401   : > { %13636 = vmatmul.mubr.msk.bf16.gmra.mxu1 %vm1885_vm9, %v20309_v33  ;;  %v8669_v29 = vsel %vm14584_vm8, %v8664_v1, %v8668_v21  ;;  %v18256_v47 = vsel %vm15104_vm15, %v9374_v57, %v9375_v24  ;;  %v8682_v25 = vrot.slane %v8680_v60, 5  ;;  %v8690_v18 = vshll.u32 %v18147_v11, 16  ;;  %v18265_v11 = vld [vmem:[#allocation3 + $0x70] sm:$0xf] }
 0x402   : > { %13639 = vmatprep.mubr.msk.bf16.mxu1 %vm1885_vm9, %v20310_v55  ;;  %v18259_v7 = vcombine.low %v8659_v45, %v8669_v29  ;;  %v12632_v0 = vcombine.low %v18236_v9, %v18256_v47  ;;  %v8677_v31 = vor.u32 %v8676_v22, %v8673_v19  ;;  %v8686_v48 = vrot.slane %v8684_v28, 4  ;;  %v9272_v19 = vld [vmem:[#allocation3 + $0x6c] sm:$0xe]  ;;  %v18284_v55 = vld [vmem:[#allocation3 + $0x74] sm:$0x1] }
 0x403   : > { %v8692_v8 = vrot.slane %v8690_v18, 5  ;;  %v12617_v52 = vrot.slane %v9271_v10, 9  ;;  %v9379_v40 = vrot.slane %v18232_v53, 5  ;;  %v9382_v21 = vrot.slane %v18239_v42, 5 }
 0x404   : > { %v8678_v38 = vrot.slane %v8677_v31, 4  ;;  %v8687_v24 = vor.u32 %v8686_v48, %v8682_v25  ;;  %v8695_v14 = vshrl.u32 %v8541_v43, 16  ;;  %v8698_v20 = vshll.u32 %v8541_v43, 16 }
 0x405   : > { %v20311_v1 = vcombine.low %v18076_v16, %v18094_v37  ;;  %v18273_v57 = vsel %vm15104_vm15, %v12617_v52, %v9379_v40  ;;  %v9381_v60 = vrot.slane %v9379_v40, 4  ;;  %v8704_v33 = vshll.u32 %v18167_v59, 16 }
 0x406   : > { %v8708_v45 = vshrl.u32 %v18167_v59, 16  ;;  %v20312_v22 = vcombine.low %v18105_v30, %v18124_v35  ;;  %v8683_v16 = vsel %vm14584_vm8, %v8678_v38, %v8682_v25  ;;  %v8688_v37 = vrot.slane %v8687_v24, 4  ;;  %v8544_v35 = vld [vmem:[#allocation3 + $0x54] sm:$0xf] }
 0x407   : > { %13724 = vmatmul.mubr.msk.bf16.vlgmr.msra.gmra.mxu0 %vm1885_vm9, %v20311_v1  ;;  %v8697_v28 = vrot.slane %v8695_v14, 4  ;;  %v8700_v10 = vrot.slane %v8698_v20, 5  ;;  %v18288_v29 = vsel %vm15104_vm15, %v9381_v60, %v9382_v21  ;;  %v8706_v59 = vrot.slane %v8704_v33, 5  ;;  %v18312_v20 = vld [vmem:[#allocation3 + $0x7c] sm:$0xf] }
 0x408   : > { %13727 = vmatprep.mubr.msk.bf16.mxu0 %vm1885_vm9, %v20312_v22  ;;  %13792 = vmatpush3.bf16.msra.mxu0 %v17857_v6  ;;  %v8710_v18 = vrot.slane %v8708_v45, 4  ;;  %v8714_v30 = vshll.u32 %v18174_v3, 16  ;;  %v18294_v6 = vld [vmem:[%s19884_s6 + $0x8] sm:$0xff]   ;;  %v20313_v25 = vcombine.low %v18020_v12, %v18043_v62  ;;  %v8693_v43 = vsel %vm14584_vm8, %v8688_v37, %v8692_v8  ;;  %v18319_v33 = vld [vmem:[#allocation3 + $0x80] sm:$0x1] }
 0x409   : > { %13793 = vmatprep.subr.bf16.mxu0 %v14089_v32  ;;  %v12633_v31 = vcombine.low %v18273_v57, %v18288_v29  ;;  %v8701_v48 = vor.u32 %v8700_v10, %v8697_v28  ;;  %v12618_v3 = vrot.slane %v9272_v19, 9  ;;  %v20314_v52 = vcombine.low %v18069_v17, %v18082_v61 }
 0x40a   : > { %13640 = vmatmul.mubr.msk.bf16.gmra.mxu1 %vm1885_vm9, %v20313_v25  ;;  %v18308_v40 = vcombine.low %v8683_v16, %v8693_v43  ;;  %v8711_v21 = vor.u32 %v8710_v18, %v8706_v59  ;;  %v8716_v38 = vrot.slane %v8714_v30, 5  ;;  %v9386_v12 = vrot.slane %v18265_v11, 5  ;;  %v8547_v18 = vld [vmem:[#allocation3 + $0x60] sm:$0xf] }
 0x40b   : > { %13643 = vmatprep.mubr.msk.bf16.mxu1 %vm1885_vm9, %v20314_v52  ;;  %v8702_v62 = vrot.slane %v8701_v48, 4  ;;  %v9389_v24 = vrot.slane %v18284_v55, 5  ;;  %v8719_v8 = vshrl.u32 %v8544_v35, 16  ;;  %v8722_v14 = vshll.u32 %v8544_v35, 16 }
 0x40c   : > { %13794 = vmatpush3.bf16.msra.mxu0 %v14089_v32  ;;  %v8712_v1 = vrot.slane %v8711_v21, 4  ;;  %v18316_v17 = vsel %vm15104_vm15, %v12618_v3, %v9386_v12  ;;  %v9388_v61 = vrot.slane %v9386_v12, 4  ;;  %v8728_v60 = vshll.u32 %v18198_v56, 16  ;;  %v9273_v32 = vld [vmem:[#allocation3 + $0x78] sm:$0xe] }
 0x40d   : > { %13863 = vmatprep.subr.bf16.mxu0 %v18294_v6  ;;  %v8707_v45 = vsel %vm14584_vm8, %v8702_v62, %v8706_v59  ;;  %v8721_v19 = vrot.slane %v8719_v8, 4  ;;  %v8724_v22 = vrot.slane %v8722_v14, 5  ;;  %v8732_v16 = vshrl.u32 %v18198_v56, 16  ;;  %v18350_v3 = vld [vmem:[#allocation3 + $0x88] sm:$0xf] }
 0x40e   : > { %v8717_v37 = vsel %vm14584_vm8, %v8712_v1, %v8716_v38  ;;  %v18333_v28 = vsel %vm15104_vm15, %v9388_v61, %v9389_v24  ;;  %v8730_v10 = vrot.slane %v8728_v60, 5  ;;  %v8738_v59 = vshll.u32 %v18212_v15, 16  ;;  %v18362_v14 = vld [vmem:[#allocation3 + $0x8c] sm:$0x1] }
 0x40f   : > { %13728 = vmatmul.mubr.msk.bf16.gmra.mxu0 %vm1885_vm9, %v12629_v50  ;;  %v18340_v56 = vcombine.low %v8707_v45, %v8717_v37  ;;  %v12634_v39 = vcombine.low %v18316_v17, %v18333_v28  ;;  %v8725_v63 = vor.u32 %v8724_v22, %v8721_v19  ;;  %v8734_v50 = vrot.slane %v8732_v16, 4  ;;  %v8550_v45 = vld [vmem:[#allocation3 + $0x6c] sm:$0xf]  ;;  %v8556_v28 = vld [vmem:[#allocation3 + $0x84] sm:$0xf] }
 0x410   : > { %13731 = vmatprep.mubr.msk.bf16.mxu0 %vm1885_vm9, %v12630_v58  ;;  %v8740_v30 = vrot.slane %v8738_v59, 5  ;;  %v12619_v35 = vrot.slane %v9273_v32, 9  ;;  %v9393_v25 = vrot.slane %v18312_v20, 5  ;;  %v9396_v43 = vrot.slane %v18319_v33, 5 }
 0x411   : > { %v20315_v15 = vcombine.low %v18086_v54, %v18101_v2  ;;  %v8726_v41 = vrot.slane %v8725_v63, 4  ;;  %v8735_v27 = vor.u32 %v8734_v50, %v8730_v10  ;;  %v8743_v58 = vshrl.u32 %v8547_v18, 16  ;;  %v9274_v2 = vld [vmem:[#allocation3 + $0x84] sm:$0xe] }
 0x412   : > { %v8746_v48 = vshll.u32 %v8547_v18, 16  ;;  %v18356_v52 = vsel %vm15104_vm15, %v12619_v35, %v9393_v25  ;;  %v9395_v21 = vrot.slane %v9393_v25, 4  ;;  %v8752_v38 = vshll.u32 %v18232_v53, 16 }
 0x413   : > { %13644 = vmatmul.mubr.msk.bf16.gmra.mxu1 %vm1885_vm9, %v20315_v15  ;;  %v8756_v54 = vshrl.u32 %v18232_v53, 16  ;;  %v8731_v12 = vsel %vm14584_vm8, %v8726_v41, %v8730_v10  ;;  %v8736_v62 = vrot.slane %v8735_v27, 4  ;;  %v8745_v24 = vrot.slane %v8743_v58, 4  ;;  %v9275_v41 = vld [vmem:[#allocation3 + $0x90] sm:$0xe] }
 0x414   : > { %13687 = vmatprep.mubr.msk.bf16.mxu1 %vm1885_vm9, %v18165_v23  ;;  %v8748_v8 = vrot.slane %v8746_v48, 5  ;;  %v18366_v23 = vsel %vm15104_vm15, %v9395_v21, %v9396_v43  ;;  %v8754_v1 = vrot.slane %v8752_v38, 5  ;;  %v8762_v60 = vshll.u32 %v18239_v42, 16  ;;  %v18392_v43 = vld [vmem:[#allocation3 + $0x98] sm:$0x1] }
 0x415   : > { %v8758_v61 = vrot.slane %v8756_v54, 4  ;;  %v8741_v53 = vsel %vm14584_vm8, %v8736_v62, %v8740_v30  ;;  %v12635_v19 = vcombine.low %v18356_v52, %v18366_v23  ;;  %v12620_v16 = vrot.slane %v9274_v2, 9  ;;  %v18385_v30 = vld [vmem:[#allocation3 + $0x94] sm:$0xf]  ;;  %v8553_v21 = vld [vmem:[#allocation3 + $0x78] sm:$0xf] }
 0x416   : > { %v8749_v22 = vor.u32 %v8748_v8, %v8745_v24  ;;  %v18377_v32 = vcombine.low %v8731_v12, %v8741_v53  ;;  %v8764_v10 = vrot.slane %v8762_v60, 5  ;;  %v9400_v42 = vrot.slane %v18350_v3, 5  ;;  %v18417_v60 = vld [vmem:[#allocation3 + $0xa0] sm:$0xf] }
 0x417   : > { %13732 = vmatmul.mubr.msk.bf16.gmra.mxu0 %vm1885_vm9, %v12631_v5  ;;  %v8759_v37 = vor.u32 %v8758_v61, %v8754_v1  ;;  %v9403_v18 = vrot.slane %v18362_v14, 5  ;;  %v8767_v63 = vshrl.u32 %v8550_v45, 16  ;;  %v8770_v50 = vshll.u32 %v8550_v45, 16 }
 0x418   : > { %13735 = vmatprep.mubr.msk.bf16.mxu0 %vm1885_vm9, %v12632_v0  ;;  %v8750_v59 = vrot.slane %v8749_v22, 4  ;;  %v18389_v5 = vsel %vm15104_vm15, %v12620_v16, %v9400_v42  ;;  %v9402_v35 = vrot.slane %v9400_v42, 4  ;;  %v8776_v25 = vshll.u32 %v18265_v11, 16  ;;  %v18435_v42 = vld [vmem:[#allocation3 + $0xa4] sm:$0x1] }
 0x419   : > { %v8760_v36 = vrot.slane %v8759_v37, 4  ;;  %v8769_v47 = vrot.slane %v8767_v63, 4  ;;  %v8772_v0 = vrot.slane %v8770_v50, 5  ;;  %v8780_v15 = vshrl.u32 %v18265_v11, 16  ;;  %v9276_v37 = vld [vmem:[#allocation3 + $0x9c] sm:$0xe] }
 0x41a   : > { %v8755_v9 = vsel %vm14584_vm8, %v8750_v59, %v8754_v1  ;;  %v18406_v58 = vsel %vm15104_vm15, %v9402_v35, %v9403_v18  ;;  %v8786_v48 = vshll.u32 %v18284_v55, 16  ;;  %v12621_v12 = vrot.slane %v9275_v41, 9  ;;  %v18457_v41 = vld [vmem:[#allocation3 + $0xac] sm:$0xf] }
 0x41b   : > { %13688 = vmatmul.mubr.msk.bf16.vlgmr.msra.gmra.mxu1 %vm1885_vm9, %v18188_v4  ;;  %v8765_v27 = vsel %vm14584_vm8, %v8760_v36, %v8764_v10  ;;  %v8778_v4 = vrot.slane %v8776_v25, 5  ;;  %v12636_v11 = vcombine.low %v18389_v5, %v18406_v58  ;;  %v8782_v54 = vrot.slane %v8780_v15, 4  ;;  %v18449_v36 = vpop.f32.mrf.mxu0  ;;  %v18488_v58 = vld [vmem:[#allocation3 + $0xb8] sm:$0xf] }
 0x41c   : > { %13756 = vmatpush3.bf16.msra.mxu1 %v17988_v34  ;;  %13691 = vmatprep.mubr.msk.bf16.mxu1 %vm1885_vm9, %v18224_v51  ;;  %v18409_v38 = vcombine.low %v8755_v9, %v8765_v27  ;;  %v8773_v34 = vor.u32 %v8772_v0, %v8769_v47  ;;  %v18413_v51 = vld [vmem:[#allocation9 + $0x88] sm:$0xff]   ;;  %v8788_v2 = vrot.slane %v8786_v48, 5  ;;  %v9407_v62 = vrot.slane %v18385_v30, 5 }
 0x41d   : > { %13757 = vmatprep.subr.bf16.mxu1 %v14088_v13  ;;  %v9410_v24 = vrot.slane %v18392_v43, 5  ;;  %v8783_v1 = vor.u32 %v8782_v54, %v8778_v4  ;;  %v8791_v55 = vshrl.u32 %v8553_v21, 16  ;;  %v8794_v61 = vshll.u32 %v8553_v21, 16  ;;  %v18462_v21 = vld [vmem:[#allocation3 + $0xb0] sm:$0x1] }
 0x41e   : > { %v8774_v8 = vrot.slane %v8773_v34, 4  ;;  %v18425_v45 = vsel %vm15104_vm15, %v12621_v12, %v9407_v62  ;;  %v9409_v53 = vrot.slane %v9407_v62, 4  ;;  %v8800_v22 = vshll.u32 %v18312_v20, 16  ;;  %v9277_v62 = vld [vmem:[#allocation3 + $0xa8] sm:$0xe] }
 0x41f   : > { %13736 = vmatmul.mubr.msk.bf16.gmra.mxu0 %vm1885_vm9, %v12633_v31  ;;  %v8804_v16 = vshrl.u32 %v18312_v20, 16  ;;  %v8784_v29 = vrot.slane %v8783_v1, 4  ;;  %v8793_v31 = vrot.slane %v8791_v55, 4  ;;  %v8796_v10 = vrot.slane %v8794_v61, 5 }
 0x420   : > { %13758 = vmatpush3.bf16.msra.mxu1 %v14088_v13  ;;  %13739 = vmatprep.mubr.msk.bf16.mxu0 %vm1885_vm9, %v12634_v39  ;;  %v8779_v57 = vsel %vm14584_vm8, %v8774_v8, %v8778_v4  ;;  %v18440_v20 = vsel %vm15104_vm15, %v9409_v53, %v9410_v24  ;;  %v8802_v59 = vrot.slane %v8800_v22, 5  ;;  %v8810_v17 = vshll.u32 %v18319_v33, 16  ;;  %v18467_v24 = vpop.f32.mrf.mxu0  ;;  %v8559_v53 = vld [vmem:[#allocation3 + $0x90] sm:$0xf] }
 0x421   : > { %13827 = vmatprep.subr.bf16.mxu1 %v18413_v51  ;;  %v8806_v18 = vrot.slane %v8804_v16, 4  ;;  %v8789_v39 = vsel %vm14584_vm8, %v8784_v29, %v8788_v2  ;;  %v12637_v63 = vcombine.low %v18425_v45, %v18440_v20  ;;  %v8797_v50 = vor.u32 %v8796_v10, %v8793_v31 }
 0x422   : > { %v12622_v13 = vrot.slane %v9276_v37, 9  ;;  %v18453_v35 = vcombine.low %v8779_v57, %v8789_v39  ;;  %v8812_v25 = vrot.slane %v8810_v17, 5  ;;  %v9414_v9 = vrot.slane %v18417_v60, 5  ;;  %v9278_v17 = vld [vmem:[#allocation3 + $0xb4] sm:$0xe] }
 0x423   : > { %13692 = vmatmul.mubr.msk.bf16.gmra.mxu1 %vm1885_vm9, %v18259_v7  ;;  %v8807_v33 = vor.u32 %v8806_v18, %v8802_v59  ;;  %v8798_v7 = vrot.slane %v8797_v50, 4  ;;  %v9417_v47 = vrot.slane %v18435_v42, 5  ;;  %v8815_v0 = vshrl.u32 %v8556_v28, 16 }
 0x424   : > { %13695 = vmatprep.mubr.msk.bf16.mxu1 %vm1885_vm9, %v18308_v40  ;;  %v8818_v15 = vshll.u32 %v8556_v28, 16  ;;  %v9415_v4 = vsel %vm15104_vm15, %v12622_v13, %v9414_v9  ;;  %v9416_v48 = vrot.slane %v9414_v9, 4  ;;  %v8824_v40 = vshll.u32 %v18350_v3, 16 }
 0x425   : > { %v8808_v27 = vrot.slane %v8807_v33, 4  ;;  %v8803_v34 = vsel %vm14584_vm8, %v8798_v7, %v8802_v59  ;;  %v8817_v54 = vrot.slane %v8815_v0, 4  ;;  %v8828_v12 = vshrl.u32 %v18350_v3, 16  ;;  %v18502_v33 = vld [vmem:[#allocation3 + $0xbc] sm:$0x1] }
 0x426   : > { %v8820_v2 = vrot.slane %v8818_v15, 5  ;;  %v9418_v1 = vsel %vm15104_vm15, %v9416_v48, %v9417_v47  ;;  %v8826_v55 = vrot.slane %v8824_v40, 5  ;;  %v8834_v61 = vshll.u32 %v18362_v14, 16  ;;  %v8562_v47 = vld [vmem:[#allocation3 + $0x9c] sm:$0xf] }
 0x427   : > { %13740 = vmatmul.mubr.msk.bf16.gmra.mxu0 %vm1885_vm9, %v12635_v19  ;;  %v8813_v8 = vsel %vm14584_vm8, %v8808_v27, %v8812_v25  ;;  %v12638_v52 = vcombine.low %v9415_v4, %v9418_v1  ;;  %v8830_v19 = vrot.slane %v8828_v12, 4  ;;  %v12623_v16 = vrot.slane %v9277_v62, 9 }
 0x428   : > { %13743 = vmatprep.mubr.msk.bf16.mxu0 %vm1885_vm9, %v12636_v11  ;;  %v18482_v3 = vcombine.low %v8803_v34, %v8813_v8  ;;  %v8821_v23 = vor.u32 %v8820_v2, %v8817_v54  ;;  %v8836_v22 = vrot.slane %v8834_v61, 5  ;;  %v9421_v37 = vrot.slane %v18457_v41, 5  ;;  %v18490_v11 = vpop.f32.mrf.mxu0  ;;  %v18521_v8 = vld [vmem:[#allocation3 + $0xc4] sm:$0xf] }
 0x429   : > { %v9424_v57 = vrot.slane %v18462_v21, 5  ;;  %v8831_v29 = vor.u32 %v8830_v19, %v8826_v55  ;;  %v8839_v31 = vshrl.u32 %v8559_v53, 16  ;;  %v8842_v5 = vshll.u32 %v8559_v53, 16  ;;  %v9279_v19 = vld [vmem:[#allocation3 + $0xc0] sm:$0xe] }
 0x42a   : > { %v8822_v14 = vrot.slane %v8821_v23, 4  ;;  %v18496_v10 = vsel %vm15104_vm15, %v12623_v16, %v9421_v37  ;;  %v9423_v59 = vrot.slane %v9421_v37, 4  ;;  %v8848_v18 = vshll.u32 %v18385_v30, 16  ;;  %v18510_v4 = vpop.f32.mrf.mxu0 }
 0x42b   : > { %13696 = vmatmul.mubr.msk.bf16.gmra.mxu1 %vm1885_vm9, %v18340_v56  ;;  %v8852_v56 = vshrl.u32 %v18385_v30, 16  ;;  %v8832_v39 = vrot.slane %v8831_v29, 4  ;;  %v8841_v50 = vrot.slane %v8839_v31, 4  ;;  %v8844_v13 = vrot.slane %v8842_v5, 5 }
 0x42c   : > { %13699 = vmatprep.mubr.msk.bf16.mxu1 %vm1885_vm9, %v18377_v32  ;;  %v8827_v28 = vsel %vm14584_vm8, %v8822_v14, %v8826_v55  ;;  %v9425_v32 = vsel %vm15104_vm15, %v9423_v59, %v9424_v57  ;;  %v8850_v25 = vrot.slane %v8848_v18, 5  ;;  %v8858_v7 = vshll.u32 %v18392_v43, 16  ;;  %v18526_v55 = vld [vmem:[#allocation3 + $0xc8] sm:$0x1] }
 0x42d   : > { %v8854_v9 = vrot.slane %v8852_v56, 4  ;;  %v8837_v30 = vsel %vm14584_vm8, %v8832_v39, %v8836_v22  ;;  %v12639_v0 = vcombine.low %v18496_v10, %v9425_v32  ;;  %v8845_v15 = vor.u32 %v8844_v13, %v8841_v50  ;;  %v18533_v22 = vpop.f32.mrf.mxu0  ;;  %v8565_v14 = vld [vmem:[#allocation3 + $0xa8] sm:$0xf] }
 0x42e   : > { %v12624_v27 = vrot.slane %v9278_v17, 9  ;;  %v18516_v48 = vcombine.low %v8827_v28, %v8837_v30  ;;  %v8860_v34 = vrot.slane %v8858_v7, 5  ;;  %v9428_v43 = vrot.slane %v18488_v58, 5 }
 0x42f   : > { %13744 = vmatmul.mubr.msk.bf16.gmra.mxu0 %vm1885_vm9, %v12637_v63  ;;  %v8855_v40 = vor.u32 %v8854_v9, %v8850_v25  ;;  %v8846_v54 = vrot.slane %v8845_v15, 4  ;;  %v9431_v2 = vrot.slane %v18502_v33, 5  ;;  %v8863_v12 = vshrl.u32 %v8562_v47, 16  ;;  %v18546_v50 = vpop.f32.mrf.mxu0  ;;  %v10117_v9 = vld [vmem:[#allocation3 + $0x18] sm:$0xf] }
 0x430   : > { %13747 = vmatprep.mubr.msk.bf16.mxu0 %vm1885_vm9, %v12638_v52  ;;  %v8866_v62 = vshll.u32 %v8562_v47, 16  ;;  %v9429_v45 = vsel %vm15104_vm15, %v12624_v27, %v9428_v43  ;;  %v9430_v20 = vrot.slane %v9428_v43, 4  ;;  %v8872_v63 = vshll.u32 %v18417_v60, 16  ;;  %v18559_v43 = vld [vmem:[#allocation3 + $0x1c] sm:$0xf] }
 0x431   : > { %v8856_v1 = vrot.slane %v8855_v40, 4  ;;  %v8851_v61 = vsel %vm14584_vm8, %v8846_v54, %v8850_v25  ;;  %v8865_v53 = vrot.slane %v8863_v12, 4  ;;  %v8876_v23 = vshrl.u32 %v18417_v60, 16  ;;  %v18565_v12 = vld [vmem:[#allocation3 + $0x20] sm:$0x1] }
 0x432   : > { %v8868_v52 = vrot.slane %v8866_v62, 5  ;;  %v9432_v37 = vsel %vm15104_vm15, %v9430_v20, %v9431_v2  ;;  %v8882_v57 = vshll.u32 %v18435_v42, 16  ;;  %v12625_v59 = vrot.slane %v9279_v19, 9 }
 0x433   : > { %13700 = vmatmul.mubr.msk.bf16.gmra.mxu1 %vm1885_vm9, %v18409_v38  ;;  %v8861_v16 = vsel %vm14584_vm8, %v8856_v1, %v8860_v34  ;;  %v8874_v38 = vrot.slane %v8872_v63, 5  ;;  %v12640_v31 = vcombine.low %v9429_v45, %v9432_v37  ;;  %v8878_v5 = vrot.slane %v8876_v23, 4  ;;  %v8568_v1 = vld [vmem:[#allocation3 + $0xb4] sm:$0xf]  ;;  %v18567_v45 = vpop.f32.mrf.mxu0 }
 0x434   : > { %13703 = vmatprep.mubr.msk.bf16.mxu1 %vm1885_vm9, %v18453_v35  ;;  %v18542_v29 = vcombine.low %v8851_v61, %v8861_v16  ;;  %v8869_v60 = vor.u32 %v8868_v52, %v8865_v53  ;;  %v8884_v10 = vrot.slane %v8882_v57, 5  ;;  %v9435_v18 = vrot.slane %v18521_v8, 5 }
 0x435   : > { %v9438_v35 = vrot.slane %v18526_v55, 5  ;;  %v8879_v17 = vor.u32 %v8878_v5, %v8874_v38  ;;  %v8887_v28 = vshrl.u32 %v8565_v14, 16  ;;  %v8890_v39 = vshll.u32 %v8565_v14, 16  ;;  %v18576_v5 = vpop.f32.mrf.mxu1 }
 0x436   : > { %v8870_v56 = vrot.slane %v8869_v60, 4  ;;  %v9436_v42 = vsel %vm15104_vm15, %v12625_v59, %v9435_v18  ;;  %v9437_v13 = vrot.slane %v9435_v18, 4  ;;  %v8896_v32 = vshll.u32 %v18457_v41, 16  ;;  %v10120_v60 = vld [vmem:[#allocation3 + $0x24] sm:$0xf] }
 0x437   : > { %13748 = vmatmul.mubr.msk.bf16.gmra.mxu0 %vm1885_vm9, %v12639_v0  ;;  %v8900_v25 = vshrl.u32 %v18457_v41, 16  ;;  %v8880_v47 = vrot.slane %v8879_v17, 4  ;;  %v8889_v30 = vrot.slane %v8887_v28, 4  ;;  %v8892_v15 = vrot.slane %v8890_v39, 5 }
 0x438   : > { %13751 = vmatprep.mubr.msk.bf16.mxu0 %vm1885_vm9, %v12640_v31  ;;  %v8875_v7 = vsel %vm14584_vm8, %v8870_v56, %v8874_v38  ;;  %v9439_v0 = vsel %vm15104_vm15, %v9437_v13, %v9438_v35  ;;  %v8898_v27 = vrot.slane %v8896_v32, 5  ;;  %v8906_v34 = vshll.u32 %v18462_v21, 16 }
 0x439   : > { %v8902_v40 = vrot.slane %v8900_v25, 4  ;;  %v8885_v41 = vsel %vm14584_vm8, %v8880_v47, %v8884_v10  ;;  %v12641_v54 = vcombine.low %v9436_v42, %v9439_v0  ;;  %v8893_v2 = vor.u32 %v8892_v15, %v8889_v30  ;;  %v18578_v10 = vpop.f32.mrf.mxu0  ;;  %v18590_v0 = vld [vmem:[#allocation3 + $0x2c] sm:$0x1] }
 0x43a   : > { %v10166_v62 = vshrl.u32 %v10117_v9, 16  ;;  %v12588_v21 = vcombine.low %v8875_v7, %v8885_v41  ;;  %v8908_v63 = vrot.slane %v8906_v34, 5  ;;  %v10169_v61 = vshll.u32 %v10117_v9, 16  ;;  %v18586_v9 = vld [vmem:[#allocation3 + $0x28] sm:$0xf] }
 0x43b   : > { %13704 = vmatmul.mubr.msk.bf16.gmra.mxu1 %vm1885_vm9, %v18482_v3  ;;  %v8903_v20 = vor.u32 %v8902_v40, %v8898_v27  ;;  %v8894_v53 = vrot.slane %v8893_v2, 4  ;;  %v10175_v52 = vshll.u32 %v18559_v43, 16  ;;  %v10179_v23 = vshrl.u32 %v18559_v43, 16  ;;  %v18592_v40 = vpop.f32.mrf.mxu1  ;;  %v18594_v34 = vpop.f32.mrf.mxu0  ;;  %v8571_v2 = vld [vmem:[#allocation3 + $0xc0] sm:$0xf] }
 0x43c   : > { %13707 = vmatprep.mubr.msk.bf16.mxu1 %vm1885_vm9, %v18516_v48  ;;  %v10168_v3 = vrot.slane %v10166_v62, 4  ;;  %v10171_v16 = vrot.slane %v10169_v61, 5  ;;  %v10185_v37 = vshll.u32 %v18565_v12, 16  ;;  %v8911_v38 = vshrl.u32 %v8568_v1, 16 }
 0x43d   : > { %v8904_v19 = vrot.slane %v8903_v20, 4  ;;  %v8899_v57 = vsel %vm14584_vm8, %v8894_v53, %v8898_v27  ;;  %v10177_v14 = vrot.slane %v10175_v52, 5  ;;  %v10181_v48 = vrot.slane %v10179_v23, 4 }
 0x43e   : > { %v8914_v31 = vshll.u32 %v8568_v1, 16  ;;  %v10172_v18 = vor.u32 %v10171_v16, %v10168_v3  ;;  %v10187_v35 = vrot.slane %v10185_v37, 5  ;;  %v8913_v56 = vrot.slane %v8911_v38, 4  ;;  %v18606_v16 = vpop.f32.mrf.mxu1  ;;  %v18608_v37 = vpop.f32.mrf.mxu0 }
 0x43f   : > { %13752 = vmatmul.mubr.msk.bf16.gmra.mxu0 %vm1885_vm9, %v12641_v54  ;;  %v8909_v59 = vsel %vm14584_vm8, %v8904_v19, %v8908_v63  ;;  %v10182_v28 = vor.u32 %v10181_v48, %v10177_v14  ;;  %v8920_v42 = vshll.u32 %v18488_v58, 16  ;;  %v8924_v32 = vshrl.u32 %v18488_v58, 16 }
 0x440   : > { %v12589_v17 = vcombine.low %v8899_v57, %v8909_v59  ;;  %v8916_v39 = vrot.slane %v8914_v31, 5  ;;  %v10173_v13 = vrot.slane %v10172_v18, 4  ;;  %v8930_v25 = vshll.u32 %v18502_v33, 16 }
 0x441   : > { %v10190_v7 = vshrl.u32 %v10120_v60, 16  ;;  %v10183_v47 = vrot.slane %v10182_v28, 4  ;;  %v8922_v15 = vrot.slane %v8920_v42, 5  ;;  %v10193_v27 = vshll.u32 %v10120_v60, 16 }
 0x442   : > { %v8917_v30 = vor.u32 %v8916_v39, %v8913_v56  ;;  %v10178_v58 = vsel %vm14584_vm8, %v10173_v13, %v10177_v14  ;;  %v8926_v33 = vrot.slane %v8924_v32, 4  ;;  %v8932_v41 = vrot.slane %v8930_v25, 5  ;;  %v18616_v13 = vld [vmem:[#allocation3 + $0x34] sm:$0xf] }
 0x443   : > { %13708 = vmatmul.mubr.msk.bf16.gmra.mxu1 %vm1885_vm9, %v18542_v29  ;;  %v10192_v54 = vrot.slane %v10190_v7, 4  ;;  %v10188_v29 = vsel %vm14584_vm8, %v10183_v47, %v10187_v35  ;;  %v10195_v1 = vrot.slane %v10193_v27, 5  ;;  %v10199_v20 = vshll.u32 %v18586_v9, 16  ;;  %v10123_v35 = vld [vmem:[#allocation3 + $0x30] sm:$0xf] }
 0x444   : > { %13711 = vmatprep.mubr.msk.bf16.mxu1 %vm1885_vm9, %v12588_v21  ;;  %v8918_v62 = vrot.slane %v8917_v30, 4  ;;  %v12694_v63 = vcombine.low %v10178_v58, %v10188_v29  ;;  %v8927_v61 = vor.u32 %v8926_v33, %v8922_v15  ;;  %v10203_v53 = vshrl.u32 %v18586_v9, 16  ;;  %v18621_v30 = vld [vmem:[#allocation3 + $0x38] sm:$0x1]  ;;  %v10126_v29 = vld [vmem:[#allocation3 + $0x3c] sm:$0xf] }
 0x445   : > { %v10209_v21 = vshll.u32 %v18590_v0, 16  ;;  %v10196_v52 = vor.u32 %v10195_v1, %v10192_v54  ;;  %v10201_v23 = vrot.slane %v10199_v20, 5  ;;  %v8935_v19 = vshrl.u32 %v8571_v2, 16 }
 0x446   : > { %v8923_v3 = vsel %vm14584_vm8, %v8918_v62, %v8922_v15  ;;  %13795 = vmatprep.mubr.msk.bf16.mxu0 %vm1885_vm9, %v12694_v63  ;;  %v8928_v38 = vrot.slane %v8927_v61, 4  ;;  %v10205_v57 = vrot.slane %v10203_v53, 4  ;;  %v8938_v48 = vshll.u32 %v8571_v2, 16  ;;  %v18625_v15 = vpop.f32.mrf.mxu0  ;;  %v18633_v61 = vld [vmem:[#allocation3 + $0x40] sm:$0xf] }
 0x447   : > { %v10211_v14 = vrot.slane %v10209_v21, 5  ;;  %v10197_v31 = vrot.slane %v10196_v52, 4  ;;  %v8937_v60 = vrot.slane %v8935_v19, 4  ;;  %v8944_v59 = vshll.u32 %v18521_v8, 16 }
 0x448   : > { %v8948_v18 = vshrl.u32 %v18521_v8, 16  ;;  %v8933_v56 = vsel %vm14584_vm8, %v8928_v38, %v8932_v41  ;;  %v10206_v28 = vor.u32 %v10205_v57, %v10201_v23  ;;  %v8940_v39 = vrot.slane %v8938_v48, 5  ;;  %v18623_v8 = vpop.f32.mrf.mxu1  ;;  %v18637_v19 = vpop.f32.mrf.mxu0  ;;  %v14104_v38 = vld [vmem:[%s19884_s6] sm:$0xff]  }
 0x449   : > { %v8954_v42 = vshll.u32 %v18526_v55, 16  ;;  %v12590_v32 = vcombine.low %v8923_v3, %v8933_v56  ;;  %v10202_v25 = vsel %vm14584_vm8, %v10197_v31, %v10201_v23  ;;  %v8946_v7 = vrot.slane %v8944_v59, 5  ;;  %v18644_v31 = vld [vmem:[#allocation3 + $0x44] sm:$0x1] }
 0x44a   : > { %v8950_v47 = vrot.slane %v8948_v18, 4  ;;  %v10207_v27 = vrot.slane %v10206_v28, 4  ;;  %v8941_v58 = vor.u32 %v8940_v39, %v8937_v60  ;;  %v10214_v55 = vshrl.u32 %v10123_v35, 16  ;;  %v18635_v23 = vpop.f32.mrf.mxu1  ;;  %v10129_v28 = vld [vmem:[#allocation3 + $0x48] sm:$0xf] }
 0x44b   : > { %13712 = vmatmul.mubr.msk.bf16.gmra.mxu1 %vm1885_vm9, %v12589_v17  ;;  %v8956_v33 = vrot.slane %v8954_v42, 5  ;;  %v10217_v17 = vshll.u32 %v10123_v35, 16  ;;  %v10223_v54 = vshll.u32 %v18616_v13, 16  ;;  %v10227_v2 = vshrl.u32 %v18616_v13, 16 }
 0x44c   : > { %13715 = vmatprep.mubr.msk.bf16.mxu1 %vm1885_vm9, %v12590_v32  ;;  %v8951_v41 = vor.u32 %v8950_v47, %v8946_v7  ;;  %v10212_v62 = vsel %vm14584_vm8, %v10207_v27, %v10211_v14  ;;  %v8942_v1 = vrot.slane %v8941_v58, 4  ;;  %v10216_v20 = vrot.slane %v10214_v55, 4  ;;  %v14090_v32 = vld [vmem:[#allocation3 + $0x18] sm:$0xff]  }
 0x44d   : > { %v10233_v63 = vshll.u32 %v18621_v30, 16  ;;  %v12695_v53 = vcombine.low %v10202_v25, %v10212_v62  ;;  %v10219_v3 = vrot.slane %v10217_v17, 5  ;;  %v10225_v52 = vrot.slane %v10223_v54, 5 }
 0x44e   : > { %v8952_v21 = vrot.slane %v8951_v41, 4  ;;  %v8947_v57 = vsel %vm14584_vm8, %v8942_v1, %v8946_v7  ;;  %v10229_v14 = vrot.slane %v10227_v2, 4  ;;  %v10238_v60 = vshrl.u32 %v10126_v29, 16  ;;  %v18653_v41 = vld [vmem:[#allocation3 + $0x4c] sm:$0xf] }
 0x44f   : > { %v10235_v48 = vrot.slane %v10233_v63, 5  ;;  %13796 = vmatmul.mubr.msk.bf16.vlgmr.msra.gmra.mxu0 %vm1885_vm9, %v12695_v53  ;;  %v10220_v18 = vor.u32 %v10219_v3, %v10216_v20  ;;  %v10241_v35 = vshll.u32 %v10126_v29, 16  ;;  %v10247_v56 = vshll.u32 %v18633_v61, 16  ;;  %v18667_v63 = vld [vmem:[#allocation3 + $0x50] sm:$0x1] }
 0x450   : > { %v8957_v59 = vsel %vm14584_vm8, %v8952_v21, %v8956_v33  ;;  %v10230_v42 = vor.u32 %v10229_v14, %v10225_v52  ;;  %v10240_v25 = vrot.slane %v10238_v60, 4  ;;  %v10251_v7 = vshrl.u32 %v18633_v61, 16  ;;  %13864 = vmatpush3.bf16.msra.mxu0 %v18294_v6  ;;  %v18655_v33 = vpop.f32.mrf.mxu1  ;;  %v18657_v17 = vpop.f32.mrf.mxu0 }
 0x451   : > { %v12591_v39 = vcombine.low %v8947_v57, %v8957_v59  ;;  %v10221_v47 = vrot.slane %v10220_v18, 4  ;;  %v10243_v27 = vrot.slane %v10241_v35, 5  ;;  %v10249_v58 = vrot.slane %v10247_v56, 5  ;;  %13865 = vmatprep.subr.bf16.mxu0 %v14104_v38  ;;  %v10132_v59 = vld [vmem:[#allocation3 + $0x54] sm:$0xf] }
 0x452   : > { %v10257_v55 = vshll.u32 %v18644_v31, 16  ;;  %v10231_v54 = vrot.slane %v10230_v42, 4  ;;  %v10253_v2 = vrot.slane %v10251_v7, 4  ;;  %v18662_v29 = vadd.f32 %v18449_v36, %v18576_v5  ;;  %v18673_v18 = vpop.f32.mrf.mxu1  ;;  %v18675_v35 = vpop.f32.mrf.mxu0  ;;  %v18689_v7 = vld [vmem:[#allocation3 + $0x5c] sm:$0x1] }
 0x453   : > { %13716 = vmatmul.mubr.msk.bf16.gmra.mxu1 %vm1885_vm9, %v12591_v39  ;;  %v10262_v6 = vshrl.u32 %v10129_v28, 16  ;;  %v10226_v62 = vsel %vm14584_vm8, %v10221_v47, %v10225_v52  ;;  %v10244_v1 = vor.u32 %v10243_v27, %v10240_v25  ;;  %v10265_v53 = vshll.u32 %v10129_v28, 16  ;;  %v18687_v25 = vld [vmem:[#allocation3 + $0x58] sm:$0xf] }
 0x454   : > { %13759 = vmatprep.mubr.msk.bf16.mxu1 %vm1885_vm9, %v14090_v32  ;;  %v10259_v20 = vrot.slane %v10257_v55, 5  ;;  %v10236_v21 = vsel %vm14584_vm8, %v10231_v54, %v10235_v48  ;;  %v10254_v3 = vor.u32 %v10253_v2, %v10249_v58  ;;  %v10271_v14 = vshll.u32 %v18653_v41, 16  ;;  %13866 = vmatpush3.bf16.msra.mxu0 %v14104_v38  ;;  %v14101_v54 = vld [vmem:[#allocation9 + $0x80] sm:$0xff]  }
 0x455   : > { %v10264_v57 = vrot.slane %v10262_v6, 4  ;;  %v12696_v36 = vcombine.low %v10226_v62, %v10236_v21  ;;  %v10245_v5 = vrot.slane %v10244_v1, 4  ;;  %v10267_v60 = vrot.slane %v10265_v53, 5  ;;  %v14093_v1 = vld [vmem:[#allocation3 + $0x30] sm:$0xff]   ;;  %v18695_v53 = vpop.f32.mrf.mxu1  ;;  %v18697_v21 = vpop.f32.mrf.mxu0 }
 0x456   : > { %v10275_v52 = vshrl.u32 %v18653_v41, 16  ;;  %v10255_v56 = vrot.slane %v10254_v3, 4  ;;  %v10273_v28 = vrot.slane %v10271_v14, 5  ;;  %v10281_v39 = vshll.u32 %v18667_v63, 16  ;;  %v18703_v14 = vld [vmem:[#allocation3 + $0x64] sm:$0xf] }
 0x457   : > { %v18680_v48 = vadd.f32 %v18467_v24, %v18592_v40  ;;  %13799 = vmatprep.mubr.msk.bf16.mxu0 %vm1885_vm9, %v12696_v36  ;;  %v10268_v38 = vor.u32 %v10267_v60, %v10264_v57  ;;  %v18685_v32 = vadd.f32 %v18490_v11, %v18606_v16  ;;  %v10250_v47 = vsel %vm14584_vm8, %v10245_v5, %v10249_v58  ;;  %v14092_v24 = vld [vmem:[#allocation3 + $0x24] sm:$0xff]   ;;  %v10135_v16 = vld [vmem:[#allocation3 + $0x60] sm:$0xf] }
 0x458   : > { %v10277_v42 = vrot.slane %v10275_v52, 4  ;;  %v10260_v27 = vsel %vm14584_vm8, %v10255_v56, %v10259_v20  ;;  %v10283_v40 = vrot.slane %v10281_v39, 5  ;;  %v10286_v55 = vshrl.u32 %v10132_v59, 16 }
 0x459   : > { %v12697_v2 = vcombine.low %v10250_v47, %v10260_v27  ;;  %v10269_v6 = vrot.slane %v10268_v38, 4  ;;  %v10289_v11 = vshll.u32 %v10132_v59, 16  ;;  %v10295_v3 = vshll.u32 %v18687_v25, 16  ;;  %v18714_v38 = vld [vmem:[#allocation3 + $0x68] sm:$0x1] }
 0x45a   : > { %v10278_v62 = vor.u32 %v10277_v42, %v10273_v28  ;;  %v10288_v58 = vrot.slane %v10286_v55, 4  ;;  %v10299_v20 = vshrl.u32 %v18687_v25, 16  ;;  %v10305_v57 = vshll.u32 %v18689_v7, 16  ;;  %v18719_v55 = vpop.f32.mrf.mxu0 }
 0x45b   : > { %13760 = vmatmul.mubr.msk.bf16.vlgmr.msra.gmra.mxu1 %vm1885_vm9, %v14092_v24  ;;  %13800 = vmatmul.mubr.msk.bf16.gmra.mxu0 %vm1885_vm9, %v12697_v2  ;;  %v10274_v36 = vsel %vm14584_vm8, %v10269_v6, %v10273_v28  ;;  %v10291_v60 = vrot.slane %v10289_v11, 5  ;;  %v18711_v52 = vadd.f32 %v18533_v22, %v18635_v23  ;;  %v10297_v59 = vrot.slane %v10295_v3, 5 }
 0x45c   : > { %v10279_v5 = vrot.slane %v10278_v62, 4  ;;  %13828 = vmatpush3.bf16.msra.mxu1 %v18413_v51  ;;  %13763 = vmatprep.mubr.msk.bf16.mxu1 %vm1885_vm9, %v14093_v1  ;;  %v10301_v56 = vrot.slane %v10299_v20, 4  ;;  %v10307_v39 = vrot.slane %v10305_v57, 5  ;;  %v10310_v42 = vshrl.u32 %v10135_v16, 16  ;;  %v10138_v20 = vld [vmem:[#allocation3 + $0x6c] sm:$0xf] }
 0x45d   : > { %20316 = vst [vmem:[#allocation14_spill] sm:$0xff] %v18711_v52  ;;  %13829 = vmatprep.subr.bf16.mxu1 %v14101_v54  ;;  %v10292_v47 = vor.u32 %v10291_v60, %v10288_v58  ;;  %v10313_v27 = vshll.u32 %v10135_v16, 16  ;;  %v10319_v51 = vshll.u32 %v18703_v14, 16  ;;  %v13553_v24 = vpop.f32.mrf.mxu1  ;;  %v10323_v6 = vshrl.u32 %v18703_v14, 16  ;;  %v14095_v16 = vld [vmem:[#allocation3 + $0x3c] sm:$0xff]   ;;  %v14097_v52 = vld [vmem:[#allocation3 + $0x54] sm:$0xff]  }
 0x45e   : > { %v10284_v28 = vsel %vm14584_vm8, %v10279_v5, %v10283_v40  ;;  %v10302_v23 = vor.u32 %v10301_v56, %v10297_v59  ;;  %v10312_v2 = vrot.slane %v10310_v42, 4  ;;  %v10329_v3 = vshll.u32 %v18714_v38, 16  ;;  %v18732_v60 = vld [vmem:[#allocation3 + $0x70] sm:$0xf] }
 0x45f   : > { %v12698_v22 = vcombine.low %v10274_v36, %v10284_v28  ;;  %v10293_v62 = vrot.slane %v10292_v47, 4  ;;  %v10315_v1 = vrot.slane %v10313_v27, 5  ;;  %v10321_v11 = vrot.slane %v10319_v51, 5  ;;  %v7294_v57 = vpop.f32.mrf.mxu1  ;;  %v14096_v28 = vld [vmem:[#allocation3 + $0x48] sm:$0xff]   ;;  %v18736_v47 = vld [vmem:[#allocation3 + $0x74] sm:$0x1]  ;;  %v18738_v27 = vpop.f32.mrf.mxu0 }
 0x460   : > { %13830 = vmatpush3.bf16.msra.mxu1 %v14101_v54  ;;  %v10303_v40 = vrot.slane %v10302_v23, 4  ;;  %v10325_v58 = vrot.slane %v10323_v6, 4  ;;  %v18726_v36 = vadd.f32 %v18546_v50, %v18655_v33  ;;  %v18730_v5 = vadd.f32 %v18567_v45, %v18673_v18  ;;  %20319 = vst [vmem:[#allocation52_spill] sm:$0xff] %v18736_v47 }
 0x461   : > { %13803 = vmatprep.mubr.msk.bf16.mxu0 %vm1885_vm9, %v12698_v22  ;;  %v10298_v56 = vsel %vm14584_vm8, %v10293_v62, %v10297_v59  ;;  %v10316_v42 = vor.u32 %v10315_v1, %v10312_v2  ;;  %v10331_v54 = vrot.slane %v10329_v3, 5  ;;  %v10334_v45 = vshrl.u32 %v10138_v20, 16  ;;  %v10141_v2 = vld [vmem:[#allocation3 + $0x78] sm:$0xf]  ;;  %v13554_v6 = vpop.f32.mrf.mxu1  ;;  %v18746_v62 = vpop.f32.mrf.mxu0 }
 0x462   : > { %20317 = vst [vmem:[#allocation79_spill] sm:$0xff] %v18726_v36  ;;  %20318 = vst [vmem:[#allocation51_spill] sm:$0xff] %v18730_v5  ;;  %v10308_v50 = vsel %vm14584_vm8, %v10303_v40, %v10307_v39  ;;  %v10326_v33 = vor.u32 %v10325_v58, %v10321_v11  ;;  %v10337_v18 = vshll.u32 %v10138_v20, 16  ;;  %v10343_v59 = vshll.u32 %v18732_v60, 16 }
 0x463   : > { %13764 = vmatmul.mubr.msk.bf16.gmra.mxu1 %vm1885_vm9, %v14095_v16  ;;  %v12699_v51 = vcombine.low %v10298_v56, %v10308_v50  ;;  %v10317_v22 = vrot.slane %v10316_v42, 4  ;;  %v10347_v23 = vshrl.u32 %v18732_v60, 16  ;;  %v10336_v3 = vrot.slane %v10334_v45, 4  ;;  %v18749_v16 = vld [vmem:[#allocation3 + $0x7c] sm:$0xf]  ;;  %v18759_v50 = vpop.f32.mrf.mxu0 }
 0x464   : > { %13767 = vmatprep.mubr.msk.bf16.mxu1 %vm1885_vm9, %v14096_v28  ;;  %v10327_v1 = vrot.slane %v10326_v33, 4  ;;  %v10339_v39 = vrot.slane %v10337_v18, 5  ;;  %v10353_v40 = vshll.u32 %v18736_v47, 16  ;;  %20320 = vst [vmem:[#allocation15_spill] sm:$0xff] %v18749_v16  ;;  %v10345_v58 = vrot.slane %v10343_v59, 5 }
 0x465   : > { %13804 = vmatmul.mubr.msk.bf16.gmra.mxu0 %vm1885_vm9, %v12699_v51  ;;  %v10322_v20 = vsel %vm14584_vm8, %v10317_v22, %v10321_v11  ;;  %v10349_v56 = vrot.slane %v10347_v23, 4  ;;  %v18755_v42 = vadd.f32 %v18594_v34, %v13553_v24  ;;  %v18757_v28 = vld [vmem:[#allocation3 + $0x80] sm:$0x1]  ;;  %v10358_v5 = vshrl.u32 %v10141_v2, 16  ;;  %v7297_v22 = vpop.f32.mrf.mxu1 }
 0x466   : > { %20322 = vst [vmem:[#allocation56_spill] sm:$0xff] %v18757_v28  ;;  %v10332_v33 = vsel %vm14584_vm8, %v10327_v1, %v10331_v54  ;;  %v10340_v45 = vor.u32 %v10339_v39, %v10336_v3  ;;  %v10355_v18 = vrot.slane %v10353_v40, 5  ;;  %v10361_v47 = vshll.u32 %v10141_v2, 16  ;;  %v14098_v39 = vld [vmem:[#allocation3 + $0x60] sm:$0xff]   ;;  %v18770_v2 = vld [vmem:[#allocation3 + $0x88] sm:$0xf] }
 0x467   : > { %20321 = vst [vmem:[#allocation90_spill] sm:$0xff] %v18755_v42  ;;  %v12700_v36 = vcombine.low %v10322_v20, %v10332_v33  ;;  %v10350_v51 = vor.u32 %v10349_v56, %v10345_v58  ;;  %v10367_v11 = vshll.u32 %v18749_v16, 16  ;;  %v10360_v34 = vrot.slane %v10358_v5, 4  ;;  %v10144_v42 = vld [vmem:[#allocation3 + $0x84] sm:$0xf]  ;;  %20324 = vst [vmem:[#allocation66_spill] sm:$0xff] %v18770_v2  ;;  %v18772_v20 = vpop.f32.mrf.mxu0 }
 0x468   : > { %v10341_v59 = vrot.slane %v10340_v45, 4  ;;  %v10371_v24 = vshrl.u32 %v18749_v16, 16  ;;  %v10377_v23 = vshll.u32 %v18757_v28, 16  ;;  %v10363_v1 = vrot.slane %v10361_v47, 5  ;;  %v18780_v47 = vld [vmem:[#allocation3 + $0x8c] sm:$0x1] }
 0x469   : > { %13807 = vmatprep.mubr.msk.bf16.mxu0 %vm1885_vm9, %v12700_v36  ;;  %v10351_v54 = vrot.slane %v10350_v51, 4  ;;  %v10369_v3 = vrot.slane %v10367_v11, 5  ;;  %v18768_v40 = vadd.f32 %v18608_v37, %v7294_v57  ;;  %v18778_v36 = vadd.f32 %v18625_v15, %v13554_v6  ;;  %20326 = vst [vmem:[#allocation78_spill] sm:$0xff] %v18780_v47  ;;  %v10147_v15 = vld [vmem:[#allocation3 + $0x90] sm:$0xf] }
 0x46a   : > { %v10346_v5 = vsel %vm14584_vm8, %v10341_v59, %v10345_v58  ;;  %v10373_v56 = vrot.slane %v10371_v24, 4  ;;  %v10379_v33 = vrot.slane %v10377_v23, 5  ;;  %v10364_v57 = vor.u32 %v10363_v1, %v10360_v34  ;;  %v18791_v34 = vld [vmem:[#allocation3 + $0x94] sm:$0xf] }
 0x46b   : > { %20323 = vst [vmem:[#allocation75_spill] sm:$0xff] %v18768_v40  ;;  %13768 = vmatmul.mubr.msk.bf16.gmra.mxu1 %vm1885_vm9, %v14097_v52  ;;  %20325 = vst [vmem:[#allocation68_spill] sm:$0xff] %v18778_v36  ;;  %v10356_v37 = vsel %vm14584_vm8, %v10351_v54, %v10355_v18  ;;  %v18786_v45 = vadd.f32 %v18637_v19, %v7297_v22  ;;  %v10382_v51 = vshrl.u32 %v10144_v42, 16  ;;  %v10385_v59 = vshll.u32 %v10144_v42, 16 }
 0x46c   : > { %13771 = vmatprep.mubr.msk.bf16.mxu1 %vm1885_vm9, %v14098_v39  ;;  %v13557_v58 = vpop.f32.mrf.mxu1  ;;  %v12701_v11 = vcombine.low %v10346_v5, %v10356_v37  ;;  %v10374_v52 = vor.u32 %v10373_v56, %v10369_v3  ;;  %v10391_v24 = vshll.u32 %v18770_v2, 16  ;;  %v10365_v6 = vrot.slane %v10364_v57, 4  ;;  %20328 = vst [vmem:[#allocation53_spill] sm:$0xff] %v18791_v34  ;;  %v18801_v57 = vld [vmem:[#allocation3 + $0x98] sm:$0x1] }
 0x46d   : > { %20327 = vst [vmem:[#allocation55_spill] sm:$0xff] %v18786_v45  ;;  %v10384_v23 = vrot.slane %v10382_v51, 4  ;;  %v10395_v36 = vshrl.u32 %v18770_v2, 16  ;;  %v10401_v18 = vshll.u32 %v18780_v47, 16  ;;  %v18793_v1 = vpop.f32.mrf.mxu0  ;;  %v10387_v22 = vrot.slane %v10385_v59, 5  ;;  %20330 = vst [vmem:[#allocation85_spill] sm:$0xff] %v18801_v57 }
 0x46e   : > { %v7310_v54 = vpop.f32.mrf.mxu1  ;;  %13808 = vmatmul.mubr.msk.bf16.gmra.mxu0 %vm1885_vm9, %v12701_v11  ;;  %v10375_v19 = vrot.slane %v10374_v52, 4  ;;  %v10393_v39 = vrot.slane %v10391_v24, 5  ;;  %v18797_v42 = vadd.f32 %v18657_v17, %v13557_v58  ;;  %v10370_v5 = vsel %vm14584_vm8, %v10365_v6, %v10369_v3  ;;  %v14099_v59 = vld [vmem:[#allocation3 + $0x6c] sm:$0xff]  }
 0x46f   : > { %v10397_v56 = vrot.slane %v10395_v36, 4  ;;  %v10403_v37 = vrot.slane %v10401_v18, 5  ;;  %v10406_v51 = vshrl.u32 %v10147_v15, 16  ;;  %v18803_v40 = vpop.f32.mrf.mxu0  ;;  %v10388_v52 = vor.u32 %v10387_v22, %v10384_v23  ;;  %v14100_v36 = vld [vmem:[#allocation3 + $0x78] sm:$0xff]  }
 0x470   : > { %20329 = vst [vmem:[#allocation54_spill] sm:$0xff] %v18797_v42  ;;  %v13558_v45 = vpop.f32.mrf.mxu1  ;;  %v10380_v11 = vsel %vm14584_vm8, %v10375_v19, %v10379_v33  ;;  %v10409_v24 = vshll.u32 %v10147_v15, 16  ;;  %v10415_v17 = vshll.u32 %v18791_v34, 16  ;;  %v10419_v3 = vshrl.u32 %v18791_v34, 16  ;;  %v10150_v23 = vld [vmem:[#allocation3 + $0x9c] sm:$0xf] }
 0x471   : > { %v12702_v58 = vcombine.low %v10370_v5, %v10380_v11  ;;  %v10398_v42 = vor.u32 %v10397_v56, %v10393_v39  ;;  %v10408_v47 = vrot.slane %v10406_v51, 4  ;;  %v18809_v18 = vpop.f32.mrf.mxu0  ;;  %v10389_v2 = vrot.slane %v10388_v52, 4  ;;  %v18821_v56 = vld [vmem:[#allocation3 + $0xa0] sm:$0xf] }
 0x472   : > { %v7313_v6 = vpop.f32.mrf.mxu1  ;;  %v10411_v28 = vrot.slane %v10409_v24, 5  ;;  %v10417_v16 = vrot.slane %v10415_v17, 5  ;;  %v10425_v33 = vshll.u32 %v18801_v57, 16  ;;  %v10421_v19 = vrot.slane %v10419_v3, 4  ;;  %20333 = vst [vmem:[#allocation100_spill] sm:$0xff] %v18821_v56 }
 0x473   : > { %13772 = vmatmul.mubr.msk.bf16.gmra.mxu1 %vm1885_vm9, %v14099_v59  ;;  %13811 = vmatprep.mubr.msk.bf16.mxu0 %vm1885_vm9, %v12702_v58  ;;  %v10399_v15 = vrot.slane %v10398_v42, 4  ;;  %v18816_v22 = vadd.f32 %v18675_v35, %v7310_v54  ;;  %v18819_v5 = vadd.f32 %v18697_v21, %v13558_v45  ;;  %v18823_v51 = vpop.f32.mrf.mxu0  ;;  %v10394_v11 = vsel %vm14584_vm8, %v10389_v2, %v10393_v39  ;;  %v18830_v24 = vld [vmem:[#allocation3 + $0xa4] sm:$0x1] }
 0x474   : > { %13775 = vmatprep.mubr.msk.bf16.mxu1 %vm1885_vm9, %v14100_v36  ;;  %v10412_v52 = vor.u32 %v10411_v28, %v10408_v47  ;;  %v10427_v59 = vrot.slane %v10425_v33, 5  ;;  %v18828_v42 = vadd.f32 %v18719_v55, %v7313_v6  ;;  %20335 = vst [vmem:[#allocation69_spill] sm:$0xff] %v18830_v24  ;;  %v10422_v54 = vor.u32 %v10421_v19, %v10417_v16  ;;  %v10153_v47 = vld [vmem:[#allocation3 + $0xa8] sm:$0xf] }
 0x475   : > { %20331 = vst [vmem:[#allocation59_spill] sm:$0xff] %v18816_v22  ;;  %20332 = vst [vmem:[#allocation67_spill] sm:$0xff] %v18819_v5  ;;  %v10404_v35 = vsel %vm14584_vm8, %v10399_v15, %v10403_v37  ;;  %v10430_v21 = vshrl.u32 %v10150_v23, 16  ;;  %v10433_v45 = vshll.u32 %v10150_v23, 16  ;;  %v18834_v17 = vpop.f32.mrf.mxu0  ;;  %v10439_v36 = vshll.u32 %v18821_v56, 16 }
 0x476   : > { %20334 = vst [vmem:[#allocation83_spill] sm:$0xff] %v18828_v42  ;;  %v12703_v58 = vcombine.low %v10394_v11, %v10404_v35  ;;  %v10413_v3 = vrot.slane %v10412_v52, 4  ;;  %v10443_v28 = vshrl.u32 %v18821_v56, 16  ;;  %v10423_v55 = vrot.slane %v10422_v54, 4  ;;  %v18839_v42 = vld [vmem:[#allocation3 + $0xac] sm:$0xf] }
 0x477   : > { %v13561_v2 = vpop.f32.mrf.mxu1  ;;  %v10432_v39 = vrot.slane %v10430_v21, 4  ;;  %v10435_v6 = vrot.slane %v10433_v45, 5  ;;  %v10449_v33 = vshll.u32 %v18830_v24, 16  ;;  %20336 = vst [vmem:[#allocation98_spill] sm:$0xff] %v18839_v42  ;;  %v18841_v37 = vpop.f32.mrf.mxu0  ;;  %v10441_v15 = vrot.slane %v10439_v36, 5  ;;  %v14102_v52 = vld [vmem:[#allocation3 + $0x84] sm:$0xff]  }
 0x478   : > { %13812 = vmatmul.mubr.msk.bf16.gmra.mxu0 %vm1885_vm9, %v12703_v58  ;;  %v10418_v23 = vsel %vm14584_vm8, %v10413_v3, %v10417_v16  ;;  %v10445_v19 = vrot.slane %v10443_v28, 4  ;;  %v18847_v11 = vadd.f32 %v18738_v27, %v13561_v2  ;;  %v18849_v35 = vld [vmem:[#allocation3 + $0xb0] sm:$0x1]  ;;  %v10428_v21 = vsel %vm14584_vm8, %v10423_v55, %v10427_v59  ;;  %v10156_v55 = vld [vmem:[#allocation3 + $0xb4] sm:$0xf] }
 0x479   : > { %20338 = vst [vmem:[#allocation89_spill] sm:$0xff] %v18849_v35  ;;  %v7326_v54 = vpop.f32.mrf.mxu1  ;;  %v10436_v45 = vor.u32 %v10435_v6, %v10432_v39  ;;  %v10451_v5 = vrot.slane %v10449_v33, 5  ;;  %v10454_v22 = vshrl.u32 %v10153_v47, 16  ;;  %v14103_v24 = vld [vmem:[#allocation3 + $0x90] sm:$0xff]   ;;  %v18853_v58 = vpop.f32.mrf.mxu0  ;;  %v12704_v56 = vcombine.low %v10418_v23, %v10428_v21 }
 0x47a   : > { %20337 = vst [vmem:[#allocation87_spill] sm:$0xff] %v18847_v11  ;;  %v10446_v16 = vor.u32 %v10445_v19, %v10441_v15  ;;  %v10457_v3 = vshll.u32 %v10153_v47, 16  ;;  %v10463_v27 = vshll.u32 %v18839_v42, 16  ;;  %v10467_v11 = vshrl.u32 %v18839_v42, 16 }
 0x47b   : > { %13776 = vmatmul.mubr.msk.bf16.gmra.mxu1 %vm1885_vm9, %v14102_v52  ;;  %v13562_v36 = vpop.f32.mrf.mxu1  ;;  %v10437_v28 = vrot.slane %v10436_v45, 4  ;;  %v10456_v2 = vrot.slane %v10454_v22, 4  ;;  %v10473_v59 = vshll.u32 %v18849_v35, 16  ;;  %v18860_v39 = vpop.f32.mrf.mxu0  ;;  %13815 = vmatprep.mubr.msk.bf16.mxu0 %vm1885_vm9, %v12704_v56  ;;  %v18864_v47 = vadd.f32 %v18746_v62, %v7326_v54  ;;  %v18866_v52 = vld [vmem:[#allocation3 + $0xb8] sm:$0xf] }
 0x47c   : > { %13779 = vmatprep.mubr.msk.bf16.mxu1 %vm1885_vm9, %v14103_v24  ;;  %v10447_v6 = vrot.slane %v10446_v16, 4  ;;  %v10459_v33 = vrot.slane %v10457_v3, 5  ;;  %v10465_v23 = vrot.slane %v10463_v27, 5  ;;  %20340 = vst [vmem:[#allocation91_spill] sm:$0xff] %v18866_v52  ;;  %v10469_v21 = vrot.slane %v10467_v11, 4 }
 0x47d   : > { %20339 = vst [vmem:[#allocation63_spill] sm:$0xff] %v18864_v47  ;;  %v7329_v19 = vpop.f32.mrf.mxu1  ;;  %v10442_v22 = vsel %vm14584_vm8, %v10437_v28, %v10441_v15  ;;  %v10475_v45 = vrot.slane %v10473_v59, 5  ;;  %v18871_v24 = vadd.f32 %v18759_v50, %v13562_v36  ;;  %v18873_v35 = vld [vmem:[#allocation3 + $0xbc] sm:$0x1]  ;;  %v10478_v54 = vshrl.u32 %v10156_v55, 16 }
 0x47e   : > { %20342 = vst [vmem:[#allocation96_spill] sm:$0xff] %v18873_v35  ;;  %v10452_v56 = vsel %vm14584_vm8, %v10447_v6, %v10451_v5  ;;  %v10460_v16 = vor.u32 %v10459_v33, %v10456_v2  ;;  %v18878_v62 = vadd.f32 %v18772_v20, %v7329_v19  ;;  %v18880_v3 = vpop.f32.mrf.mxu0  ;;  %v10470_v47 = vor.u32 %v10469_v21, %v10465_v23  ;;  %v14105_v28 = vld [vmem:[#allocation3 + $0x9c] sm:$0xff]   ;;  %v18885_v6 = vld [vmem:[#allocation3 + $0xc4] sm:$0xf]  ;;  %v14106_v21 = vld [vmem:[#allocation3 + $0xa8] sm:$0xff]  }
 0x47f   : > { %20341 = vst [vmem:[#allocation65_spill] sm:$0xff] %v18871_v24  ;;  %v12705_v27 = vcombine.low %v10442_v22, %v10452_v56  ;;  %v10481_v15 = vshll.u32 %v10156_v55, 16  ;;  %v10487_v11 = vshll.u32 %v18866_v52, 16  ;;  %v10159_v50 = vld [vmem:[#allocation3 + $0xc0] sm:$0xf]  ;;  %v10480_v59 = vrot.slane %v10478_v54, 4 }
 0x480   : > { %20343 = vst [vmem:[#allocation94_spill] sm:$0xff] %v18878_v62  ;;  %v10461_v36 = vrot.slane %v10460_v16, 4  ;;  %v10491_v24 = vshrl.u32 %v18866_v52, 16  ;;  %v10497_v5 = vshll.u32 %v18873_v35, 16  ;;  %v18887_v20 = vpop.f32.mrf.mxu0  ;;  %v10471_v33 = vrot.slane %v10470_v47, 4 }
 0x481   : > { %v13565_v2 = vpop.f32.mrf.mxu1  ;;  %13816 = vmatmul.mubr.msk.bf16.gmra.mxu0 %vm1885_vm9, %v12705_v27  ;;  %v10483_v19 = vrot.slane %v10481_v15, 5  ;;  %v10489_v55 = vrot.slane %v10487_v11, 5  ;;  %v18896_v62 = vld [vmem:[#allocation3 + $0xc8] sm:$0x1]  ;;  %v10502_v35 = vshrl.u32 %v10159_v50, 16  ;;  %v10511_v15 = vshll.u32 %v18885_v6, 16 }
 0x482   : > { %v18891_v22 = vadd.f32 %v18793_v1, %v13565_v2  ;;  %v10466_v56 = vsel %vm14584_vm8, %v10461_v36, %v10465_v23  ;;  %v10493_v16 = vrot.slane %v10491_v24, 4  ;;  %v10499_v54 = vrot.slane %v10497_v5, 5  ;;  %v18898_v42 = vpop.f32.mrf.mxu0  ;;  %v527_v5 = vld [vmem:[#allocation3 + $0xcc] sm:$0x1] }
 0x483   : > { %13780 = vmatmul.mubr.msk.bf16.gmra.mxu1 %vm1885_vm9, %v14105_v28  ;;  %v7342_v52 = vpop.f32.mrf.mxu1  ;;  %v10476_v47 = vsel %vm14584_vm8, %v10471_v33, %v10475_v45  ;;  %v10484_v27 = vor.u32 %v10483_v19, %v10480_v59  ;;  %v10505_v1 = vshll.u32 %v10159_v50, 16  ;;  %v10504_v11 = vrot.slane %v10502_v35, 4  ;;  %v581_v59 = vld [vmem:[#allocation3 + $0xd4] sm:$0x1] }
 0x484   : > { %20344 = vst [vmem:[#allocation86_spill] sm:$0xff] %v18891_v22  ;;  %13783 = vmatprep.mubr.msk.bf16.mxu1 %vm1885_vm9, %v14106_v21  ;;  %v12706_v23 = vcombine.low %v10466_v56, %v10476_v47  ;;  %v10494_v24 = vor.u32 %v10493_v16, %v10489_v55  ;;  %v10515_v28 = vshrl.u32 %v18885_v6, 16  ;;  %v18905_v2 = vpop.f32.mrf.mxu0  ;;  %v10513_v34 = vrot.slane %v10511_v15, 5  ;;  %v18915_v56 = vld [vmem:[#allocation3 + $0xd0] sm:$0xf] }
 0x485   : > { %v13566_v36 = vpop.f32.mrf.mxu1  ;;  %v10485_v22 = vrot.slane %v10484_v27, 4  ;;  %v10507_v57 = vrot.slane %v10505_v1, 5  ;;  %v10521_v45 = vshll.u32 %v18896_v62, 16  ;;  %v18910_v19 = vadd.f32 %v18803_v40, %v7342_v52 }
 0x486   : > { %13819 = vmatprep.mubr.msk.bf16.mxu0 %vm1885_vm9, %v12706_v23  ;;  %v10495_v50 = vrot.slane %v10494_v24, 4  ;;  %v10517_v33 = vrot.slane %v10515_v28, 4  ;;  %v18913_v35 = vadd.f32 %v18809_v18, %v13566_v36  ;;  %v18917_v16 = vpop.f32.mrf.mxu0  ;;  %v528_v18 = vsel %vm14525_vm2, 0, %v527_v5  ;;  %v14107_v23 = vld [vmem:[#allocation3 + $0xb4] sm:$0xff]  }
 0x487   : > { %v7345_v21 = vpop.f32.mrf.mxu1  ;;  %v10490_v47 = vsel %vm14584_vm8, %v10485_v22, %v10489_v55  ;;  %v10508_v27 = vor.u32 %v10507_v57, %v10504_v11  ;;  %v582_v52 = vsel %vm14536_vm5, 0, %v581_v59  ;;  %529 = vst [vmem:[#allocation3 + $0xcc] sm:$0x1] %v528_v18  ;;  %v10535_v57 = vshll.u32 %v18915_v56, 16  ;;  %v14108_v22 = vld [vmem:[#allocation3 + $0xc0] sm:$0xff]  }
 0x488   : > { %v18922_v1 = vadd.f32 %v18823_v51, %v7345_v21  ;;  %v10500_v15 = vsel %vm14584_vm8, %v10495_v50, %v10499_v54  ;;  %v10518_v40 = vor.u32 %v10517_v33, %v10513_v34  ;;  %v18930_v24 = vpop.f32.mrf.mxu0  ;;  %583 = vst [vmem:[#allocation3 + $0xd4] sm:$0x1] %v582_v52  ;;  %v10539_v51 = vshrl.u32 %v18915_v56, 16  ;;  %v10855_v21 = vld [vmem:[#allocation3 + $0x18] sm:$0xe] }
 0x489   : > { %v12707_v28 = vcombine.low %v10490_v47, %v10500_v15  ;;  %v10509_v36 = vrot.slane %v10508_v27, 4  ;;  %v13569_v55 = vpop.f32.mrf.mxu1  ;;  %v10523_v11 = vrot.slane %v10521_v45, 5  ;;  %v10921_v44 = vrot.slane %v18559_v43, 5 }
 0x48a   : > { %20345 = vst [vmem:[#allocation70_spill] sm:$0xff] %v18922_v1  ;;  %v10519_v54 = vrot.slane %v10518_v40, 4  ;;  %v18935_v26 = vadd.f32 %v18834_v17, %v13569_v55  ;;  %v18939_v5 = vpop.f32.mrf.mxu0  ;;  %v18944_v50 = vrot.slane %v10535_v57, 5  ;;  %v10541_v33 = vrot.slane %v10539_v51, 4  ;;  %v10856_v17 = vld [vmem:[#allocation3 + $0x24] sm:$0xe] }
 0x48b   : > { %13784 = vmatmul.mubr.msk.bf16.gmra.mxu1 %vm1885_vm9, %v14107_v23  ;;  %13820 = vmatmul.mubr.msk.bf16.gmra.mxu0 %vm1885_vm9, %v12707_v28  ;;  %v10514_v59 = vsel %vm14584_vm8, %v10509_v36, %v10513_v34  ;;  %v7358_v45 = vpop.f32.mrf.mxu1  ;;  %v10923_v27 = vrot.slane %v10921_v44, 4  ;;  %v10924_v15 = vrot.slane %v18565_v12, 5  ;;  %v10857_v34 = vld [vmem:[#allocation3 + $0x30] sm:$0xe]  ;;  %v10928_v28 = vrot.slane %v18586_v9, 5 }
 0x48c   : > { %20346 = vst [vmem:[#allocation64_spill] sm:$0xff] %v18935_v26  ;;  %13787 = vmatprep.mubr.msk.bf16.mxu1 %vm1885_vm9, %v14108_v22  ;;  %v10524_v47 = vsel %vm14584_vm8, %v10519_v54, %v10523_v11  ;;  %v18950_v43 = vadd.f32 %v18841_v37, %v7358_v45  ;;  %v18953_v40 = vpop.f32.mrf.mxu0  ;;  %v10542_v52 = vor.u32 %v10541_v33, %v18944_v50  ;;  %v12728_v57 = vrot.slane %v10855_v21, 9  ;;  %v20378_v26 = vld [vmem:[#allocation91_spill] sm:$0xff] }
 0x48d   : > { %v12708_v18 = vcombine.low %v10514_v59, %v10524_v47  ;;  %v13570_v23 = vpop.f32.mrf.mxu1  ;;  %v10925_v37 = vsel %vm15104_vm15, %v10923_v27, %v10924_v15  ;;  %v12729_v55 = vrot.slane %v10856_v17, 9  ;;  %v10930_v54 = vrot.slane %v10928_v28, 4 }
 0x48e   : > { %20347 = vst [vmem:[#allocation72_spill] sm:$0xff] %v18950_v43  ;;  %v18958_v36 = vadd.f32 %v18853_v58, %v13570_v23  ;;  %v18962_v51 = vpop.f32.mrf.mxu0  ;;  %v18965_v12 = vrot.slane %v10542_v52, 4  ;;  %v10931_v11 = vrot.slane %v18590_v0, 5  ;;  %v12730_v59 = vrot.slane %v10857_v34, 9  ;;  %v10162_v33 = vld [vmem:[#allocation3 + $0xcc] sm:$0xf] }
 0x48f   : > { %13823 = vmatprep.mubr.msk.bf16.mxu0 %vm1885_vm9, %v12708_v18  ;;  %v7361_v22 = vpop.f32.mrf.mxu1  ;;  %v18970_v9 = vadd.f32 %v18510_v4, %v18623_v8  ;;  %v18974_v58 = vadd.f32 %v18578_v10, %v18695_v53  ;;  %v18976_v45 = vld [vmem:[#allocation3 + $0xd4] sm:$0x1]  ;;  %v10922_v17 = vsel %vm15104_vm15, %v12728_v57, %v10921_v44  ;;  %v10526_v0 = vshrl.u32 %v10162_v33, 16  ;;  %v14109_v15 = vld [vmem:[#allocation3 + $0xcc] sm:$0xff]   ;;  %v10858_v52 = vld [vmem:[#allocation3 + $0x3c] sm:$0xe] }
 0x490   : > { %20348 = vst [vmem:[#allocation57_spill] sm:$0xff] %v18958_v36  ;;  %20349 = vst [vmem:[#allocation97_spill] sm:$0xff] %v18976_v45  ;;  %v18979_v21 = vadd.f32 %v18860_v39, %v7361_v22  ;;  %v18983_v47 = vpop.f32.mrf.mxu0  ;;  %v10529_v27 = vshll.u32 %v10162_v33, 16  ;;  %v10545_v4 = vshll.u32 %v18976_v45, 16  ;;  %v10932_v10 = vsel %vm15104_vm15, %v10930_v54, %v10931_v11  ;;  %v10859_v54 = vld [vmem:[#allocation3 + $0x48] sm:$0xe] }
 0x491   : > { %v13573_v8 = vpop.f32.mrf.mxu1  ;;  %v12744_v34 = vcombine.low %v10922_v17, %v10925_v37  ;;  %v10929_v39 = vsel %vm15104_vm15, %v12729_v55, %v10928_v28  ;;  %v10935_v44 = vrot.slane %v18616_v13, 5  ;;  %v10528_v23 = vrot.slane %v10526_v0, 4 }
 0x492   : > { %20350 = vst [vmem:[#allocation88_spill] sm:$0xff] %v18979_v21  ;;  %v18989_v53 = vadd.f32 %v18880_v3, %v13573_v8  ;;  %v18994_v18 = vpop.f32.mrf.mxu0  ;;  %v10531_v57 = vrot.slane %v10529_v27, 5  ;;  %v10547_v22 = vrot.slane %v10545_v4, 5  ;;  %v12745_v21 = vcombine.low %v10929_v39, %v10932_v10  ;;  %v10860_v10 = vld [vmem:[#allocation3 + $0x54] sm:$0xe] }
 0x493   : > { %13788 = vmatmul.mubr.msk.bf16.gmra.mxu1 %vm1885_vm9, %v14109_v15  ;;  %v7374_v33 = vpop.f32.mrf.mxu1  ;;  %v10937_v37 = vrot.slane %v10935_v44, 4  ;;  %v10938_v28 = vrot.slane %v18621_v30, 5  ;;  %v10942_v13 = vrot.slane %v18633_v61, 5  ;;  %v10936_v27 = vsel %vm15104_vm15, %v12730_v59, %v10935_v44 }
 0x494   : > { %20351 = vst [vmem:[#allocation76_spill] sm:$0xff] %v18989_v53  ;;  %13831 = vmatprep.mubr.msk.bf16.mxu1 %vm1885_vm9, %v12744_v34  ;;  %v18999_v3 = vadd.f32 %v18887_v20, %v7374_v33  ;;  %v19002_v55 = vpop.f32.mrf.mxu0  ;;  %v10532_v11 = vor.u32 %v10531_v57, %v10528_v23  ;;  %v10548_v17 = vsel %vm14584_vm8, %v18965_v12, %v10547_v22  ;;  %v12731_v4 = vrot.slane %v10858_v52, 9  ;;  %v20376_v53 = vld [vmem:[#allocation98_spill] sm:$0xff] }
 0x495   : > { %v13574_v0 = vpop.f32.mrf.mxu1  ;;  %v10939_v30 = vsel %vm15104_vm15, %v10937_v37, %v10938_v28  ;;  %v10944_v61 = vrot.slane %v10942_v13, 4  ;;  %v10945_v15 = vrot.slane %v18644_v31, 5  ;;  %v12732_v59 = vrot.slane %v10859_v54, 9 }
 0x496   : > { %20352 = vst [vmem:[#allocation74_spill] sm:$0xff] %v18999_v3  ;;  %v19011_v20 = vadd.f32 %v18898_v42, %v13574_v0  ;;  %v19015_v8 = vpop.f32.mrf.mxu0  ;;  %v10533_v34 = vrot.slane %v10532_v11, 4  ;;  %v19020_v12 = vsel %vm15104_vm15, %v12731_v4, %v10942_v13  ;;  %v10949_v44 = vrot.slane %v18653_v41, 5  ;;  %v20374_v3 = vld [vmem:[#allocation51_spill] sm:$0xff] }
 0x497   : > { %v7377_v39 = vpop.f32.mrf.mxu1  ;;  %v12746_v52 = vcombine.low %v10936_v27, %v10939_v30  ;;  %v19028_v23 = vsel %vm15104_vm15, %v10944_v61, %v10945_v15  ;;  %v10956_v31 = vrot.slane %v18687_v25, 5  ;;  %v10952_v41 = vrot.slane %v18667_v63, 5  ;;  %v10862_v27 = vld [vmem:[#allocation3 + $0x6c] sm:$0xe] }
 0x498   : > { %20353 = vst [vmem:[#allocation93_spill] sm:$0xff] %v19011_v20  ;;  %v19024_v42 = vadd.f32 %v18905_v2, %v7377_v39  ;;  %v19030_v57 = vpop.f32.mrf.mxu0  ;;  %v10538_v22 = vsel %vm14584_vm8, %v10533_v34, %v18944_v50  ;;  %v10951_v37 = vrot.slane %v10949_v44, 4  ;;  %v12733_v28 = vrot.slane %v10860_v10, 9  ;;  %v10861_v2 = vld [vmem:[#allocation3 + $0x60] sm:$0xe]  ;;  %v20355_v10 = vld [vmem:[#allocation17_spill] sm:$0xff] }
 0x499   : > { %v13617_v33 = vpop.f32.mrf.mxu1  ;;  %v12709_v13 = vcombine.low %v10538_v22, %v10548_v17  ;;  %v12747_v11 = vcombine.low %v19020_v12, %v19028_v23  ;;  %v10958_v25 = vrot.slane %v10956_v31, 4  ;;  %v10950_v50 = vsel %vm15104_vm15, %v12732_v59, %v10949_v44  ;;  %v10863_v44 = vld [vmem:[#allocation3 + $0x78] sm:$0xe]  ;;  %v10867_v20 = vld [vmem:[#allocation3 + $0xa8] sm:$0xe] }
 0x49a   : > { %20354 = vst [vmem:[#allocation58_spill] sm:$0xff] %v19024_v42  ;;  %v19038_v54 = vadd.f32 %v13617_v33, %v18662_v29  ;;  %v19042_v0 = vpop.f32.mrf.mxu0  ;;  %v10953_v63 = vsel %vm15104_vm15, %v10951_v37, %v10952_v41  ;;  %v10959_v17 = vrot.slane %v18689_v7, 5  ;;  %v10963_v29 = vrot.slane %v18703_v14, 5  ;;  %v20356_v7 = vld [vmem:[#allocation16_spill] sm:$0xff] }
 0x49b   : > { %13832 = vmatmul.mubr.msk.bf16.vlgmr.msra.gmra.mxu1 %vm1885_vm9, %v12745_v21  ;;  %v7997_v49 = vpop.f32.mrf.mxu1  ;;  %13824 = vmatmul.mubr.msk.bf16.gmra.mxu0 %vm1885_vm9, %v12709_v13  ;;  %v12748_v21 = vcombine.low %v10950_v50, %v10953_v63  ;;  %v19060_v61 = vsel %vm15104_vm15, %v12733_v28, %v10956_v31  ;;  %v12734_v15 = vrot.slane %v10861_v2, 9  ;;  %v20357_v34 = vpack.c.bf16 %v20355_v10, %v20356_v7  ;;  %v20358_v41 = vld [vmem:[#allocation52_spill] sm:$0xff]  ;;  %v10864_v13 = vld [vmem:[#allocation3 + $0x84] sm:$0xe] }
 0x49c   : > { %13835 = vmatprep.mubr.msk.bf16.mxu1 %vm1885_vm9, %v12746_v52  ;;  %v19054_v4 = vadd.f32 %v7997_v49, %v18680_v48  ;;  %v19056_v30 = vpop.f32.mrf.mxu0  ;;  %v19068_v39 = vsel %vm15104_vm15, %v10958_v25, %v10959_v17  ;;  %v10965_v48 = vrot.slane %v10963_v29, 4  ;;  %v10966_v12 = vrot.slane %v18714_v38, 5  ;;  %v20360_v10 = vld [vmem:[#allocation56_spill] sm:$0xff]  ;;  %v20365_v50 = vld [vmem:[#allocation23_spill] sm:$0xff] }
 0x49d   : > { %13867 = vmatprep.mubr.msk.bf16.mxu0 %vm1885_vm9, %v20357_v34  ;;  %v13618_v14 = vpop.f32.mrf.mxu1  ;;  %v10970_v59 = vrot.slane %v18732_v60, 5  ;;  %v19081_v22 = vsel %vm15104_vm15, %v12734_v15, %v10963_v29  ;;  %v12735_v33 = vrot.slane %v10862_v27, 9  ;;  %v10973_v28 = vrot.slane %v20358_v41, 5  ;;  %v20373_v42 = vld [vmem:[#allocation100_spill] sm:$0xff] }
 0x49e   : > { %v19073_v52 = vadd.f32 %v13618_v14, %v18685_v32  ;;  %v19075_v23 = vpop.f32.mrf.mxu0  ;;  %v19085_v38 = vsel %vm15104_vm15, %v10965_v48, %v10966_v12  ;;  %v20359_v32 = vld [vmem:[#allocation15_spill] sm:$0xff]  ;;  %v12736_v17 = vrot.slane %v10863_v44, 9  ;;  %v10980_v7 = vrot.slane %v20360_v10, 5  ;;  %v10865_v14 = vld [vmem:[#allocation3 + $0x90] sm:$0xe]  ;;  %v20362_v48 = vld [vmem:[#allocation14_spill] sm:$0xff] }
 0x49f   : > { %v8000_v37 = vpop.f32.mrf.mxu1  ;;  %v10972_v60 = vrot.slane %v10970_v59, 4  ;;  %v10977_v2 = vrot.slane %v20359_v32, 5  ;;  %v19098_v63 = vsel %vm15104_vm15, %v12735_v33, %v10970_v59  ;;  %v12737_v33 = vrot.slane %v10864_v13, 9  ;;  %v20363_v32 = vld [vmem:[#allocation78_spill] sm:$0xff]  ;;  %v20364_v10 = vld [vmem:[#allocation53_spill] sm:$0xff]  ;;  %v20434_v46 = vld [vmem:[#allocation88_spill] sm:$0xff] }
 0x4a0   : > { %v19090_v25 = vadd.f32 %v8000_v37, %v18970_v9  ;;  %v19092_v49 = vpop.f32.mrf.mxu0  ;;  %v20361_v9 = vld [vmem:[#allocation66_spill] sm:$0xff]  ;;  %v20366_v59 = vld [vmem:[#allocation21_spill] sm:$0xff] }
 0x4a1   : > { %v13621_v29 = vpop.f32.mrf.mxu1  ;;  %v19102_v27 = vsel %vm15104_vm15, %v10972_v60, %v10973_v28  ;;  %v10979_v15 = vrot.slane %v10977_v2, 4  ;;  %v10984_v34 = vrot.slane %v20361_v9, 5  ;;  %v19115_v44 = vsel %vm15104_vm15, %v12736_v17, %v10977_v2  ;;  %v20368_v2 = vld [vmem:[#allocation79_spill] sm:$0xff] }
 0x4a2   : > { %v19107_v12 = vadd.f32 %v13621_v29, %v20362_v48  ;;  %v19109_v37 = vpop.f32.mrf.mxu0  ;;  %v10987_v29 = vrot.slane %v20363_v32, 5  ;;  %v10991_v9 = vrot.slane %v20364_v10, 5  ;;  %v10866_v48 = vld [vmem:[#allocation3 + $0x9c] sm:$0xe]  ;;  %v20367_v31 = vpack.c.bf16 %v20365_v50, %v20366_v59  ;;  %v20369_v32 = vld [vmem:[#allocation25_spill] sm:$0xff]  ;;  %v20370_v10 = vld [vmem:[#allocation24_spill] sm:$0xff] }
 0x4a3   : > { %13836 = vmatmul.mubr.msk.bf16.gmra.mxu1 %vm1885_vm9, %v12747_v11  ;;  %v8013_v60 = vpop.f32.mrf.mxu1  ;;  %v19120_v41 = vsel %vm15104_vm15, %v10979_v15, %v10980_v7  ;;  %v10986_v28 = vrot.slane %v10984_v34, 4  ;;  %v19138_v15 = vsel %vm15104_vm15, %v12737_v33, %v10984_v34  ;;  %v12738_v7 = vrot.slane %v10865_v14, 9 }
 0x4a4   : > { %13868 = vmatmul.mubr.msk.bf16.vlgmr.msra.gmra.mxu0 %vm1885_vm9, %v20367_v31  ;;  %13839 = vmatprep.mubr.msk.bf16.mxu1 %vm1885_vm9, %v12748_v21  ;;  %v19130_v11 = vadd.f32 %v8013_v60, %v20368_v2  ;;  %v19132_v13 = vpop.f32.mrf.mxu0  ;;  %v20371_v50 = vpack.c.bf16 %v20369_v32, %v20370_v10  ;;  %v10993_v59 = vrot.slane %v10991_v9, 4  ;;  %v20372_v60 = vld [vmem:[#allocation85_spill] sm:$0xff]  ;;  %v10998_v17 = vrot.slane %v20373_v42, 5 }
 0x4a5   : > { %v13622_v31 = vpop.f32.mrf.mxu1  ;;  %v19146_v21 = vsel %vm15104_vm15, %v10986_v28, %v10987_v29  ;;  %v10994_v2 = vrot.slane %v20372_v60, 5  ;;  %v19157_v32 = vsel %vm15104_vm15, %v12738_v7, %v10991_v9  ;;  %v12739_v10 = vrot.slane %v10866_v48, 9  ;;  %v20375_v42 = vld [vmem:[#allocation69_spill] sm:$0xff]  ;;  %v20383_v9 = vld [vmem:[#allocation26_spill] sm:$0xff] }
 0x4a6   : > { %13871 = vmatprep.mubr.msk.bf16.mxu0 %vm1885_vm9, %v20371_v50  ;;  %v8131_v34 = vadd.f32 %v13622_v31, %v20374_v3  ;;  %v19151_v33 = vpop.f32.mrf.mxu0  ;;  %v11000_v50 = vrot.slane %v10998_v17, 4  ;;  %v11001_v60 = vrot.slane %v20375_v42, 5  ;;  %v11005_v3 = vrot.slane %v20376_v53, 5  ;;  %v10868_v31 = vld [vmem:[#allocation3 + $0xb4] sm:$0xe] }
 0x4a7   : > { %v8016_v28 = vpop.f32.mrf.mxu1  ;;  %v19161_v29 = vsel %vm15104_vm15, %v10993_v59, %v10994_v2  ;;  %v19172_v48 = vsel %vm15104_vm15, %v12739_v10, %v10998_v17  ;;  %v12740_v7 = vrot.slane %v10867_v20, 9  ;;  %v20377_v53 = vld [vmem:[#allocation89_spill] sm:$0xff]  ;;  %v12741_v17 = vrot.slane %v10868_v31, 9 }
 0x4a8   : > { %v8129_v36 = vadd.f32 %v8016_v28, %v18974_v58  ;;  %v19166_v43 = vpop.f32.mrf.mxu0  ;;  %v19176_v2 = vsel %vm15104_vm15, %v11000_v50, %v11001_v60  ;;  %v11007_v42 = vrot.slane %v11005_v3, 4  ;;  %v11008_v14 = vrot.slane %v20377_v53, 5  ;;  %v20379_v28 = vld [vmem:[#allocation90_spill] sm:$0xff] }
 0x4a9   : > { %v13625_v59 = vpop.f32.mrf.mxu1  ;;  %v11012_v58 = vrot.slane %v20378_v26, 5  ;;  %v20380_v20 = vcombine.low %v19060_v61, %v19068_v39  ;;  %v19191_v50 = vsel %vm15104_vm15, %v12740_v7, %v11005_v3  ;;  %v20385_v61 = vcombine.low %v19081_v22, %v19085_v38  ;;  %v20386_v39 = vld [vmem:[#allocation75_spill] sm:$0xff]  ;;  %v20390_v38 = vld [vmem:[#allocation68_spill] sm:$0xff] }
 0x4aa   : > { %v8134_v45 = vadd.f32 %v13625_v59, %v20379_v28  ;;  %v19181_v1 = vpop.f32.mrf.mxu0  ;;  %v19195_v26 = vsel %vm15104_vm15, %v11007_v42, %v11008_v14  ;;  %v20381_v59 = vld [vmem:[#allocation96_spill] sm:$0xff]  ;;  %v20382_v28 = vld [vmem:[#allocation27_spill] sm:$0xff]  ;;  %v20387_v42 = vld [vmem:[#allocation30_spill] sm:$0xff] }
 0x4ab   : > { %13840 = vmatmul.mubr.msk.bf16.gmra.mxu1 %vm1885_vm9, %v20380_v20  ;;  %v8029_v10 = vpop.f32.mrf.mxu1  ;;  %v11014_v60 = vrot.slane %v11012_v58, 4  ;;  %v11015_v53 = vrot.slane %v20381_v59, 5  ;;  %v20384_v31 = vpack.c.bf16 %v20382_v28, %v20383_v9  ;;  %v12756_v14 = vcombine.low %v19191_v50, %v19195_v26  ;;  %v20388_v20 = vld [vmem:[#allocation29_spill] sm:$0xff] }
 0x4ac   : > { %13843 = vmatprep.mubr.msk.bf16.mxu1 %vm1885_vm9, %v20385_v61  ;;  %v8132_v3 = vadd.f32 %v8029_v10, %v20386_v39  ;;  %v19207_v7 = vpop.f32.mrf.mxu0  ;;  %v20389_v59 = vpack.c.bf16 %v20387_v42, %v20388_v20  ;;  %v19217_v28 = vsel %vm15104_vm15, %v12741_v17, %v11012_v58  ;;  %v19230_v39 = vadd.f32 %v18917_v16, %v19038_v54  ;;  %v20391_v17 = vld [vmem:[#allocation55_spill] sm:$0xff] }
 0x4ad   : > { %13872 = vmatmul.mubr.msk.bf16.gmra.mxu0 %vm1885_vm9, %v20384_v31  ;;  %v13626_v9 = vpop.f32.mrf.mxu1  ;;  %v19221_v22 = vsel %vm15104_vm15, %v11014_v60, %v11015_v53  ;;  %v19234_v58 = vadd.f32 %v18930_v24, %v19054_v4  ;;  %v19241_v53 = vadd.f32 %v18939_v5, %v19073_v52  ;;  %v19249_v16 = vadd.f32 %v18962_v51, %v19107_v12  ;;  %v19261_v5 = vld [vmem:[%s19879_s1 + $0x2] ss:$0 sm:$0xff]  ;;  %v20392_v4 = vld [vmem:[#allocation41_spill] sm:$0xff]  ;;  %v20393_v52 = vld [vmem:[#allocation54_spill] sm:$0xff] }
 0x4ae   : > { %13875 = vmatprep.mubr.msk.bf16.mxu0 %vm1885_vm9, %v20389_v59  ;;  %v8135_v10 = vadd.f32 %v13626_v9, %v20390_v38  ;;  %v19224_v31 = vpop.f32.mrf.mxu0  ;;  %v12757_v61 = vcombine.low %v19217_v28, %v19221_v22  ;;  %v19245_v59 = vadd.f32 %v18953_v40, %v19090_v25  ;;  %v19253_v24 = vadd.f32 %v18983_v47, %v19130_v11  ;;  %v20430_v22 = vld [vmem:[#allocation43_spill] sm:$0xff] }
 0x4af   : > { %v8032_v42 = vpop.f32.mrf.mxu1  ;;  %v19256_v54 = vadd.f32 %v18994_v18, %v8131_v34  ;;  %v1312_v40 = vmul.f32 %v19261_v5, %v20392_v4  ;;  %v19269_v51 = vadd.f32 %v19002_v55, %v8129_v36  ;;  %v19272_v47 = vadd.f32 %v19015_v8, %v8134_v45  ;;  %v20395_v36 = vld [vmem:[#allocation40_spill] sm:$0xff]  ;;  %v20396_v45 = vld [vmem:[#allocation34_spill] sm:$0xff] }
 0x4b0   : > { %v8133_v20 = vadd.f32 %v8032_v42, %v20391_v17  ;;  %v19237_v60 = vpop.f32.mrf.mxu0  ;;  %v20394_v18 = vcombine.low %v19098_v63, %v19102_v27  ;;  %v19279_v11 = vadd.f32 %v19030_v57, %v8132_v3  ;;  %v19282_v34 = vadd.f32 %v19042_v0, %v8135_v10  ;;  %v20397_v8 = vld [vmem:[#allocation32_spill] sm:$0xff]  ;;  %v20400_v57 = vld [vmem:[#allocation59_spill] sm:$0xff]  ;;  %v20401_v3 = vld [vmem:[#allocation38_spill] sm:$0xff] }
 0x4b1   : > { %v13629_v9 = vpop.f32.mrf.mxu1  ;;  %v1311_v55 = vmul.f32 %v19261_v5, %v20395_v36  ;;  %v20398_v17 = vpack.c.bf16 %v20396_v45, %v20397_v8  ;;  %v20399_v63 = vcombine.low %v19115_v44, %v19120_v41  ;;  %v20402_v10 = vld [vmem:[#allocation36_spill] sm:$0xff]  ;;  %v20404_v41 = vld [vmem:[#allocation67_spill] sm:$0xff]  ;;  %v11022_v50 = vrot.slane %v18896_v62, 5 }
 0x4b2   : > { %v8138_v25 = vadd.f32 %v13629_v9, %v20393_v52  ;;  %v19266_v38 = vpop.f32.mrf.mxu0  ;;  %v19285_v42 = vadd.f32 %v19056_v30, %v8133_v20  ;;  %v20403_v20 = vpack.c.bf16 %v20401_v3, %v20402_v10  ;;  %v19310_v4 = vld [vmem:[%s19879_s1 + $0x3] ss:$0 sm:$0xff]  ;;  %v20405_v36 = vld [vmem:[#allocation83_spill] sm:$0xff] }
 0x4b3   : > { %13844 = vmatmul.mubr.msk.bf16.gmra.mxu1 %vm1885_vm9, %v20394_v18  ;;  %v8045_v12 = vpop.f32.mrf.mxu1  ;;  %v1348_v44 = vadd.f32 %v19310_v4, %v1312_v40  ;;  %v20406_v40 = vld [vmem:[#allocation87_spill] sm:$0xff] }
 0x4b4   : > { %13847 = vmatprep.mubr.msk.bf16.mxu1 %vm1885_vm9, %v20399_v63  ;;  %v8136_v27 = vadd.f32 %v8045_v12, %v20400_v57  ;;  %v19298_v0 = vpop.f32.mrf.mxu0  ;;  %v19301_v30 = vadd.f32 %v19075_v23, %v8138_v25  ;;  %v1347_v12 = vadd.f32 %v19310_v4, %v1311_v55 }
 0x4b5   : > { %13876 = vmatmul.mubr.msk.bf16.gmra.mxu0 %vm1885_vm9, %v20398_v17  ;;  %v13630_v9 = vpop.f32.mrf.mxu1 }
 0x4b6   : > { %13879 = vmatprep.mubr.msk.bf16.mxu0 %vm1885_vm9, %v20403_v20  ;;  %v8139_v52 = vadd.f32 %v13630_v9, %v20404_v41  ;;  %v19314_v18 = vpop.f32.mrf.mxu0  ;;  %v19317_v23 = vadd.f32 %v19092_v49, %v8136_v27  ;;  %v1372_v57 = vpack.c.bf16 %v1348_v44, %v1347_v12  ;;  %v20407_v49 = vcombine.low %v19138_v15, %v19146_v21  ;;  %v20409_v27 = vld [vmem:[#allocation63_spill] sm:$0xff] }
 0x4b7   : > { %v8048_v25 = vpop.f32.mrf.mxu1  ;;  %v20410_v41 = vld [vmem:[#allocation19_spill] sm:$0xff] }
 0x4b8   : > { %v8137_v45 = vadd.f32 %v8048_v25, %v20405_v36  ;;  %v19321_v8 = vpop.f32.mrf.mxu0  ;;  %v19324_v17 = vadd.f32 %v19109_v37, %v8139_v52  ;;  %v20408_v37 = vcombine.low %v19157_v32, %v19161_v29  ;;  %v20411_v52 = vld [vmem:[#allocation18_spill] sm:$0xff]  ;;  %v20413_v25 = vld [vmem:[#allocation65_spill] sm:$0xff] }
 0x4b9   : > { %v13633_v63 = vpop.f32.mrf.mxu1  ;;  %v20412_v15 = vpack.c.bf16 %v20410_v41, %v20411_v52  ;;  %v20417_v41 = vld [vmem:[#allocation31_spill] sm:$0xff]  ;;  %v20418_v52 = vld [vmem:[#allocation28_spill] sm:$0xff] }
 0x4ba   : > { %v8142_v3 = vadd.f32 %v13633_v63, %v20406_v40  ;;  %v19327_v10 = vpop.f32.mrf.mxu0  ;;  %v19330_v20 = vadd.f32 %v19132_v13, %v8137_v45  ;;  %v11019_v45 = vrot.slane %v18885_v6, 5  ;;  %v20414_v63 = vld [vmem:[#allocation94_spill] sm:$0xff] }
 0x4bb   : > { %13848 = vmatmul.mubr.msk.bf16.gmra.mxu1 %vm1885_vm9, %v20407_v49  ;;  %v8061_v55 = vpop.f32.mrf.mxu1  ;;  %v20415_v49 = vld [vmem:[#allocation86_spill] sm:$0xff] }
 0x4bc   : > { %13851 = vmatprep.mubr.msk.bf16.mxu1 %vm1885_vm9, %v20408_v37  ;;  %v8140_v9 = vadd.f32 %v8061_v55, %v20409_v27  ;;  %v19342_v44 = vpop.f32.mrf.mxu0  ;;  %v19345_v13 = vadd.f32 %v19151_v33, %v8142_v3 }
 0x4bd   : > { %13880 = vmatmul.mubr.msk.bf16.gmra.mxu0 %vm1885_vm9, %v1372_v57  ;;  %v13634_v21 = vpop.f32.mrf.mxu1 }
 0x4be   : > { %13883 = vmatprep.mubr.msk.bf16.mxu0 %vm1885_vm9, %v20412_v15  ;;  %v8143_v12 = vadd.f32 %v13634_v21, %v20413_v25  ;;  %v19352_v36 = vpop.f32.mrf.mxu0  ;;  %v19355_v32 = vadd.f32 %v19166_v43, %v8140_v9  ;;  %v20416_v43 = vcombine.low %v19172_v48, %v19176_v2  ;;  %v11021_v9 = vrot.slane %v11019_v45, 4  ;;  %v10870_v48 = vld [vmem:[#allocation3 + $0xcc] sm:$0xe] }
 0x4bf   : > { %v8064_v29 = vpop.f32.mrf.mxu1  ;;  %v20419_v15 = vpack.c.bf16 %v20417_v41, %v20418_v52  ;;  %v11026_v2 = vrot.slane %v18915_v56, 5  ;;  %v20424_v41 = vld [vmem:[#allocation97_spill] sm:$0xff] }
 0x4c0   : > { %v8141_v57 = vadd.f32 %v8064_v29, %v20414_v63  ;;  %v19359_v33 = vpop.f32.mrf.mxu0  ;;  %v19362_v40 = vadd.f32 %v19181_v1, %v8143_v12  ;;  %v20420_v12 = vld [vmem:[#allocation35_spill] sm:$0xff]  ;;  %v20421_v29 = vld [vmem:[#allocation33_spill] sm:$0xff]  ;;  %v11029_v52 = vrot.slane %v20424_v41, 5 }
 0x4c1   : > { %v13637_v3 = vpop.f32.mrf.mxu1  ;;  %v20422_v63 = vpack.c.bf16 %v20420_v12, %v20421_v29 }
 0x4c2   : > { %v8146_v55 = vadd.f32 %v13637_v3, %v20415_v49  ;;  %v19365_v37 = vpop.f32.mrf.mxu0  ;;  %v19368_v27 = vadd.f32 %v19207_v7, %v8141_v57  ;;  %v10869_v7 = vld [vmem:[#allocation3 + $0xc0] sm:$0xe]  ;;  %v12743_v49 = vrot.slane %v10870_v48, 9 }
 0x4c3   : > { %13852 = vmatmul.mubr.msk.bf16.gmra.mxu1 %vm1885_vm9, %v20416_v43  ;;  %v8077_v6 = vpop.f32.mrf.mxu1  ;;  %v12742_v56 = vrot.slane %v10869_v7, 9 }
 0x4c4   : > { %13855 = vmatprep.mubr.msk.bf16.mxu1 %vm1885_vm9, %v12756_v14  ;;  %v8144_v1 = vadd.f32 %v8077_v6, %v18910_v19  ;;  %v19383_v21 = vpop.f32.mrf.mxu0  ;;  %v19387_v25 = vadd.f32 %v19224_v31, %v8146_v55  ;;  %v11023_v31 = vsel %vm15104_vm15, %v11021_v9, %v11022_v50  ;;  %v20423_v55 = vld [vmem:[#allocation70_spill] sm:$0xff]  ;;  %v11028_v6 = vrot.slane %v11026_v2, 4 }
 0x4c5   : > { %13884 = vmatmul.mubr.msk.bf16.gmra.mxu0 %vm1885_vm9, %v20419_v15  ;;  %v13638_v57 = vpop.f32.mrf.mxu1 }
 0x4c6   : > { %13887 = vmatprep.mubr.msk.bf16.mxu0 %vm1885_vm9, %v20422_v63  ;;  %v8147_v26 = vadd.f32 %v13638_v57, %v18913_v35  ;;  %v19398_v14 = vadd.f32 %v19237_v60, %v8144_v1  ;;  %v11020_v60 = vsel %vm15104_vm15, %v12742_v56, %v11019_v45  ;;  %v20425_v1 = vld [vmem:[#allocation64_spill] sm:$0xff]  ;;  %v20426_v63 = vld [vmem:[#allocation39_spill] sm:$0xff]  ;;  %v20427_v57 = vld [vmem:[#allocation37_spill] sm:$0xff] }
 0x4c7   : > { %v19395_v19 = vpop.f32.mrf.mxu0  ;;  %v8080_v3 = vpop.f32.mrf.mxu1  ;;  %v12758_v12 = vcombine.low %v11020_v60, %v11023_v31  ;;  %v20428_v50 = vpack.c.bf16 %v20426_v63, %v20427_v57  ;;  %v20429_v45 = vld [vmem:[#allocation72_spill] sm:$0xff]  ;;  %v20433_v31 = vld [vmem:[#allocation57_spill] sm:$0xff] }
 0x4c8   : > { %v8145_v43 = vadd.f32 %v8080_v3, %v20423_v55  ;;  %v19407_v62 = vadd.f32 %v19266_v38, %v8147_v26  ;;  %v11027_v38 = vsel %vm15104_vm15, %v12743_v49, %v11026_v2  ;;  %v20437_v63 = vld [vmem:[#allocation76_spill] sm:$0xff] }
 0x4c9   : > { %v19404_v15 = vpop.f32.mrf.mxu0 }
 0x4ca   : > { %v13641_v35 = vpop.f32.mrf.mxu1  ;;  %v19413_v9 = vadd.f32 %v19298_v0, %v8145_v43  ;;  %v11030_v0 = vsel %vm15104_vm15, %v11028_v6, %v11029_v52 }
 0x4cb   : > { %v8150_v7 = vadd.f32 %v13641_v35, %v20425_v1  ;;  %v13726_v29 = vpop.f32.mrf.mxu0  ;;  %13856 = vmatmul.mubr.msk.bf16.gmra.mxu1 %vm1885_vm9, %v12757_v61  ;;  %v20431_v61 = vld [vmem:[#allocation42_spill] sm:$0xff]  ;;  %v12759_v35 = vcombine.low %v11027_v38, %v11030_v0  ;;  %v20435_v1 = vld [vmem:[#allocation49_spill] sm:$0xff] }
 0x4cc   : > { %v8093_v48 = vpop.f32.mrf.mxu1  ;;  %13859 = vmatprep.mubr.msk.bf16.mxu1 %vm1885_vm9, %v12758_v12  ;;  %v20432_v56 = vpack.c.bf16 %v20430_v22, %v20431_v61  ;;  %v20436_v12 = vld [vmem:[#allocation50_spill] sm:$0xff] }
 0x4cd   : > { %13888 = vmatmul.mubr.msk.bf16.gmra.mxu0 %vm1885_vm9, %v20428_v50  ;;  %v8148_v26 = vadd.f32 %v8093_v48, %v20429_v45  ;;  %v9590_v3 = vpop.f32.mrf.mxu0  ;;  %v19430_v28 = vadd.f32 %v19314_v18, %v8150_v7  ;;  %v1327_v7 = vmul.f32 %v19261_v5, %v20435_v1  ;;  %v1328_v48 = vmul.f32 %v19261_v5, %v20436_v12  ;;  %v20438_v45 = vld [vmem:[#allocation45_spill] sm:$0xff]  ;;  %v20441_v0 = vld [vmem:[#allocation74_spill] sm:$0xff]  ;;  %v20442_v5 = vld [vmem:[#allocation47_spill] sm:$0xff] }
 0x4ce   : > { %13891 = vmatprep.mubr.msk.bf16.mxu0 %vm1885_vm9, %v20432_v56  ;;  %v13642_v2 = vpop.f32.mrf.mxu1  ;;  %v20446_v12 = vld [vmem:[#allocation58_spill] sm:$0xff] }
 0x4cf   : > { %v8151_v49 = vadd.f32 %v13642_v2, %v20433_v31  ;;  %v13729_v55 = vpop.f32.mrf.mxu0  ;;  %v19438_v43 = vadd.f32 %v19321_v8, %v8148_v26  ;;  %v20439_v26 = vld [vmem:[#allocation44_spill] sm:$0xff]  ;;  %v20443_v2 = vld [vmem:[#allocation46_spill] sm:$0xff] }
 0x4d0   : > { %v8096_v41 = vpop.f32.mrf.mxu1  ;;  %v20444_v31 = vpack.c.bf16 %v20442_v5, %v20443_v2 }
 0x4d1   : > { %v8149_v6 = vadd.f32 %v8096_v41, %v20434_v46  ;;  %v9603_v52 = vpop.f32.mrf.mxu0  ;;  %v19442_v18 = vadd.f32 %v19327_v10, %v8151_v49  ;;  %v20440_v10 = vpack.c.bf16 %v20438_v45, %v20439_v26  ;;  %v1363_v49 = vadd.f32 %v19310_v4, %v1327_v7 }
 0x4d2   : > { %v1364_v41 = vadd.f32 %v19310_v4, %v1328_v48 }
 0x4d3   : > { %v13645_v60 = vpop.f32.mrf.mxu1  ;;  %v13730_v50 = vpop.f32.mrf.mxu0  ;;  %v19450_v8 = vadd.f32 %v19342_v44, %v8149_v6  ;;  %13860 = vmatmul.mubr.msk.bf16.gmra.mxu1 %vm1885_vm9, %v12759_v35  ;;  %v20445_v35 = vld [vmem:[#allocation93_spill] sm:$0xff] }
 0x4d4   : > { %v8154_v57 = vadd.f32 %v13645_v60, %v20437_v63  ;;  %v1380_v45 = vpack.c.bf16 %v1364_v41, %v1363_v49 }
 0x4d5   : > { %v8109_v38 = vpop.f32.mrf.mxu1  ;;  %13892 = vmatmul.mubr.msk.bf16.gmra.mxu0 %vm1885_vm9, %v20440_v10  ;;  %v9606_v61 = vpop.f32.mrf.mxu0 }
 0x4d6   : > { %v8152_v22 = vadd.f32 %v8109_v38, %v20441_v0  ;;  %v19459_v56 = vadd.f32 %v19352_v36, %v8154_v57  ;;  %13895 = vmatprep.mubr.msk.bf16.mxu0 %vm1885_vm9, %v20444_v31 }
 0x4d7   : > { %v13646_v44 = vpop.f32.mrf.mxu1  ;;  %v13733_v6 = vpop.f32.mrf.mxu0 }
 0x4d8   : > { %v8155_v46 = vadd.f32 %v13646_v44, %v20445_v35  ;;  %v19469_v60 = vadd.f32 %v19359_v33, %v8152_v22 }
 0x4d9   : > { %v8112_v1 = vpop.f32.mrf.mxu1  ;;  %v9619_v63 = vpop.f32.mrf.mxu0 }
 0x4da   : > { %v8153_v36 = vadd.f32 %v8112_v1, %v20446_v12  ;;  %v19473_v57 = vadd.f32 %v19365_v37, %v8155_v46 }
 0x4db   : > { %v13689_v38 = vpop.f32.mrf.mxu1  ;;  %v13734_v7 = vpop.f32.mrf.mxu0 }
 0x4dc   : > { %v9234_v26 = vadd.f32 %v13689_v38, %v19230_v39  ;;  %v19477_v4 = vadd.f32 %v19383_v21, %v8153_v36 }
 0x4dd   : > { %v9105_v48 = vpop.f32.mrf.mxu1  ;;  %13896 = vmatmul.mubr.msk.bf16.gmra.mxu0 %vm1885_vm9, %v1380_v45  ;;  %v9622_v10 = vpop.f32.mrf.mxu0 }
 0x4de   : > { %v9232_v33 = vadd.f32 %v9105_v48, %v19234_v58  ;;  %v19482_v0 = vadd.f32 %v19395_v19, %v9234_v26 }
 0x4df   : > { %v13690_v22 = vpop.f32.mrf.mxu1  ;;  %v13737_v5 = vpop.f32.mrf.mxu0 }
 0x4e0   : > { %v9235_v37 = vadd.f32 %v13690_v22, %v19241_v53  ;;  %v19486_v2 = vadd.f32 %v19404_v15, %v9232_v33 }
 0x4e1   : > { %v9108_v39 = vpop.f32.mrf.mxu1  ;;  %v9635_v31 = vpop.f32.mrf.mxu0 }
 0x4e2   : > { %v9233_v21 = vadd.f32 %v9108_v39, %v19245_v59  ;;  %v19489_v44 = vadd.f32 %v13726_v29, %v9235_v37 }
 0x4e3   : > { %v13693_v49 = vpop.f32.mrf.mxu1  ;;  %v13738_v41 = vpop.f32.mrf.mxu0 }
 0x4e4   : > { %v9238_v58 = vadd.f32 %v13693_v49, %v19249_v16  ;;  %v19492_v35 = vadd.f32 %v9590_v3, %v9233_v21 }
 0x4e5   : > { %v9121_v19 = vpop.f32.mrf.mxu1  ;;  %v9638_v53 = vpop.f32.mrf.mxu0 }
 0x4e6   : > { %v9236_v46 = vadd.f32 %v9121_v19, %v19253_v24  ;;  %v19495_v1 = vadd.f32 %v13729_v55, %v9238_v58 }
 0x4e7   : > { %v13694_v15 = vpop.f32.mrf.mxu1  ;;  %v13741_v36 = vpop.f32.mrf.mxu0 }
 0x4e8   : > { %v9239_v12 = vadd.f32 %v13694_v15, %v19256_v54  ;;  %v19498_v59 = vadd.f32 %v9603_v52, %v9236_v46 }
 0x4e9   : > { %v9124_v29 = vpop.f32.mrf.mxu1  ;;  %v9651_v45 = vpop.f32.mrf.mxu0 }
 0x4ea   : > { %v9237_v38 = vadd.f32 %v9124_v29, %v19269_v51  ;;  %v19501_v16 = vadd.f32 %v13730_v50, %v9239_v12 }
 0x4eb   : > { %v13697_v3 = vpop.f32.mrf.mxu1  ;;  %v13742_v48 = vpop.f32.mrf.mxu0 }
 0x4ec   : > { %v9242_v26 = vadd.f32 %v13697_v3, %v19272_v47  ;;  %v19504_v24 = vadd.f32 %v9606_v61, %v9237_v38 }
 0x4ed   : > { %v9137_v55 = vpop.f32.mrf.mxu1  ;;  %v9654_v22 = vpop.f32.mrf.mxu0 }
 0x4ee   : > { %v9240_v33 = vadd.f32 %v9137_v55, %v19279_v11  ;;  %v19507_v54 = vadd.f32 %v13733_v6, %v9242_v26 }
 0x4ef   : > { %v13698_v52 = vpop.f32.mrf.mxu1  ;;  %v13745_v39 = vpop.f32.mrf.mxu0 }
 0x4f0   : > { %v9243_v37 = vadd.f32 %v13698_v52, %v19282_v34  ;;  %v19510_v51 = vadd.f32 %v9619_v63, %v9240_v33 }
 0x4f1   : > { %v9140_v50 = vpop.f32.mrf.mxu1  ;;  %v9667_v49 = vpop.f32.mrf.mxu0 }
 0x4f2   : > { %v9241_v21 = vadd.f32 %v9140_v50, %v19285_v42  ;;  %v19513_v47 = vadd.f32 %v13734_v7, %v9243_v37 }
 0x4f3   : > { %v13701_v61 = vpop.f32.mrf.mxu1  ;;  %v13746_v19 = vpop.f32.mrf.mxu0 }
 0x4f4   : > { %v9246_v58 = vadd.f32 %v13701_v61, %v19301_v30  ;;  %v19516_v11 = vadd.f32 %v9622_v10, %v9241_v21 }
 0x4f5   : > { %v9153_v6 = vpop.f32.mrf.mxu1  ;;  %v9670_v15 = vpop.f32.mrf.mxu0 }
 0x4f6   : > { %v9244_v46 = vadd.f32 %v9153_v6, %v19317_v23  ;;  %v19519_v34 = vadd.f32 %v13737_v5, %v9246_v58 }
 0x4f7   : > { %v13702_v63 = vpop.f32.mrf.mxu1  ;;  %v13749_v29 = vpop.f32.mrf.mxu0 }
 0x4f8   : > { %v9247_v12 = vadd.f32 %v13702_v63, %v19324_v17  ;;  %v19522_v42 = vadd.f32 %v9635_v31, %v9244_v46 }
 0x4f9   : > { %v9156_v7 = vpop.f32.mrf.mxu1  ;;  %v9683_v3 = vpop.f32.mrf.mxu0 }
 0x4fa   : > { %v9245_v38 = vadd.f32 %v9156_v7, %v19330_v20  ;;  %v19525_v30 = vadd.f32 %v13738_v41, %v9247_v12 }
 0x4fb   : > { %v13705_v10 = vpop.f32.mrf.mxu1  ;;  %v13750_v55 = vpop.f32.mrf.mxu0 }
 0x4fc   : > { %v9250_v26 = vadd.f32 %v13705_v10, %v19345_v13  ;;  %v19528_v23 = vadd.f32 %v9638_v53, %v9245_v38 }
 0x4fd   : > { %v9169_v5 = vpop.f32.mrf.mxu1  ;;  %v9686_v52 = vpop.f32.mrf.mxu0 }
 0x4fe   : > { %v9248_v33 = vadd.f32 %v9169_v5, %v19355_v32  ;;  %v19531_v17 = vadd.f32 %v13741_v36, %v9250_v26 }
 0x4ff   : > { %v13706_v31 = vpop.f32.mrf.mxu1  ;;  %v13753_v41 = vpop.f32.mrf.mxu0 }
 0x500   : > { %v9251_v37 = vadd.f32 %v13706_v31, %v19362_v40  ;;  %v19534_v50 = vadd.f32 %v9651_v45, %v9248_v33 }
 0x501   : > { %v9172_v20 = vpop.f32.mrf.mxu1  ;;  %v9699_v6 = vpop.f32.mrf.mxu0 }
 0x502   : > { %v9249_v21 = vadd.f32 %v9172_v20, %v19368_v27  ;;  %v19537_v61 = vadd.f32 %v13742_v48, %v9251_v37 }
 0x503   : > { %v13709_v13 = vpop.f32.mrf.mxu1  ;;  %v13754_v27 = vpop.f32.mrf.mxu0 }
 0x504   : > { %v9254_v53 = vadd.f32 %v13709_v13, %v19387_v25  ;;  %v19540_v58 = vadd.f32 %v9654_v22, %v9249_v21 }
 0x505   : > { %v9185_v32 = vpop.f32.mrf.mxu1 }
 0x506   : > { %v9252_v36 = vadd.f32 %v9185_v32, %v19398_v14  ;;  %v19543_v46 = vadd.f32 %v13745_v39, %v9254_v53  ;;  %v9702_v14 = vpop.f32.mrf.mxu0 }
 0x507   : > { %v13710_v40 = vpop.f32.mrf.mxu1 }
 0x508   : > { %v9255_v45 = vadd.f32 %v13710_v40, %v19407_v62  ;;  %v19546_v63 = vadd.f32 %v9667_v49, %v9252_v36 }
 0x509   : > { %v9188_v12 = vpop.f32.mrf.mxu1 }
 0x50a   : > { %v9253_v48 = vadd.f32 %v9188_v12, %v19413_v9  ;;  %v19549_v7 = vadd.f32 %v13746_v19, %v9255_v45 }
 0x50b   : > { %v13713_v25 = vpop.f32.mrf.mxu1 }
 0x50c   : > { %v9258_v22 = vadd.f32 %v13713_v25, %v19430_v28  ;;  %v19552_v38 = vadd.f32 %v9670_v15, %v9253_v48 }
 0x50d   : > { %v9201_v10 = vpop.f32.mrf.mxu1 }
 0x50e   : > { %v9256_v39 = vadd.f32 %v9201_v10, %v19438_v43  ;;  %v19555_v26 = vadd.f32 %v13749_v29, %v9258_v22 }
 0x50f   : > { %v13714_v62 = vpop.f32.mrf.mxu1  ;;  %v13797_v9 = vpop.f32.mrf.mxu0 }
 0x510   : > { %v9259_v49 = vadd.f32 %v13714_v62, %v19442_v18  ;;  %v19558_v5 = vadd.f32 %v9683_v3, %v9256_v39 }
 0x511   : > { %v9204_v33 = vpop.f32.mrf.mxu1  ;;  %v19563_v28 = vpop.f32.mrf.mxu0 }
 0x512   : > { %v9257_v19 = vadd.f32 %v9204_v33, %v19450_v8  ;;  %v19561_v31 = vadd.f32 %v13750_v55, %v9259_v49 }
 0x513   : > { %v13717_v15 = vpop.f32.mrf.mxu1  ;;  %v13798_v29 = vpop.f32.mrf.mxu0 }
 0x514   : > { %v19565_v37 = vadd.f32 %v9686_v52, %v9257_v19  ;;  %v9262_v43 = vadd.f32 %v13717_v15, %v19459_v56 }
 0x515   : > { %v9217_v20 = vpop.f32.mrf.mxu1  ;;  %v19572_v53 = vpop.f32.mrf.mxu0 }
 0x516   : > { %v9260_v21 = vadd.f32 %v9217_v20, %v19469_v60  ;;  %v19569_v18 = vadd.f32 %v13753_v41, %v9262_v43 }
 0x517   : > { %v13718_v3 = vpop.f32.mrf.mxu1 }
 0x518   : > { %v9263_v13 = vadd.f32 %v13718_v3, %v19473_v57  ;;  %v19574_v8 = vadd.f32 %v9699_v6, %v9260_v21 }
 0x519   : > { %v9220_v55 = vpop.f32.mrf.mxu1 }
 0x51a   : > { %v9261_v32 = vadd.f32 %v9220_v55, %v19477_v4  ;;  %v19577_v52 = vadd.f32 %v13754_v27, %v9263_v13 }
 0x51b   : > { %v13761_v36 = vpop.f32.mrf.mxu1  ;;  %v13801_v56 = vpop.f32.mrf.mxu0 }
 0x51c   : > { %v10087_v40 = vadd.f32 %v13761_v36, %v19482_v0  ;;  %v19580_v45 = vadd.f32 %v9702_v14, %v9261_v32 }
 0x51d   : > { %v19582_v60 = vpop.f32.mrf.mxu1  ;;  %v10712_v41 = vpop.f32.mrf.mxu0 }
 0x51e   : > { %v19584_v12 = vadd.f32 %v13797_v9, %v10087_v40 }
 0x51f   : > { %v13762_v57 = vpop.f32.mrf.mxu1  ;;  %v13802_v48 = vpop.f32.mrf.mxu0 }
 0x520   : > { %v10088_v6 = vadd.f32 %v13762_v57, %v19489_v44 }
 0x521   : > { %v19587_v25 = vpop.f32.mrf.mxu1  ;;  %v10715_v4 = vpop.f32.mrf.mxu0 }
 0x522   : > { %v19589_v27 = vadd.f32 %v13798_v29, %v10088_v6 }
 0x523   : > { %v13765_v22 = vpop.f32.mrf.mxu1 }
 0x524   : > { %v10091_v10 = vadd.f32 %v13765_v22, %v19495_v1 }
 0x525   : > { %v9974_v0 = vpop.f32.mrf.mxu1  ;;  %v13805_v14 = vpop.f32.mrf.mxu0 }
 0x526   : > { %v10089_v39 = vadd.f32 %v9974_v0, %v19498_v59  ;;  %v19593_v62 = vadd.f32 %v13801_v56, %v10091_v10 }
 0x527   : > { %v13766_v49 = vpop.f32.mrf.mxu1  ;;  %v10728_v33 = vpop.f32.mrf.mxu0 }
 0x528   : > { %v10092_v9 = vadd.f32 %v13766_v49, %v19501_v16  ;;  %v19596_v19 = vadd.f32 %v10712_v41, %v10089_v39 }
 0x529   : > { %v9977_v44 = vpop.f32.mrf.mxu1  ;;  %v13806_v15 = vpop.f32.mrf.mxu0 }
 0x52a   : > { %v10090_v43 = vadd.f32 %v9977_v44, %v19504_v24  ;;  %v19599_v29 = vadd.f32 %v13802_v48, %v10092_v9 }
 0x52b   : > { %v13769_v20 = vpop.f32.mrf.mxu1  ;;  %v10731_v1 = vpop.f32.mrf.mxu0 }
 0x52c   : > { %v10095_v21 = vadd.f32 %v13769_v20, %v19507_v54  ;;  %v19602_v3 = vadd.f32 %v10715_v4, %v10090_v43 }
 0x52d   : > { %v9990_v59 = vpop.f32.mrf.mxu1 }
 0x52e   : > { %v10093_v13 = vadd.f32 %v9990_v59, %v19510_v51  ;;  %v19605_v55 = vadd.f32 %v13805_v14, %v10095_v21  ;;  %v13809_v16 = vpop.f32.mrf.mxu0 }
 0x52f   : > { %v13770_v32 = vpop.f32.mrf.mxu1 }
 0x530   : > { %v10096_v36 = vadd.f32 %v13770_v32, %v19513_v47  ;;  %v19608_v56 = vadd.f32 %v10728_v33, %v10093_v13  ;;  %v10744_v24 = vpop.f32.mrf.mxu0 }
 0x531   : > { %v9993_v40 = vpop.f32.mrf.mxu1 }
 0x532   : > { %v10094_v41 = vadd.f32 %v9993_v40, %v19516_v11  ;;  %v19611_v57 = vadd.f32 %v13806_v15, %v10096_v36  ;;  %v13810_v54 = vpop.f32.mrf.mxu0 }
 0x533   : > { %v13773_v48 = vpop.f32.mrf.mxu1 }
 0x534   : > { %v10099_v6 = vadd.f32 %v13773_v48, %v19519_v34  ;;  %v19614_v4 = vadd.f32 %v10731_v1, %v10094_v41  ;;  %v10747_v51 = vpop.f32.mrf.mxu0 }
 0x535   : > { %v10006_v22 = vpop.f32.mrf.mxu1 }
 0x536   : > { %v10097_v10 = vadd.f32 %v10006_v22, %v19522_v42  ;;  %v19617_v0 = vadd.f32 %v13809_v16, %v10099_v6 }
 0x537   : > { %v13774_v47 = vpop.f32.mrf.mxu1 }
 0x538   : > { %v10100_v14 = vadd.f32 %v13774_v47, %v19525_v30  ;;  %v19620_v39 = vadd.f32 %v10744_v24, %v10097_v10  ;;  %v13813_v11 = vpop.f32.mrf.mxu0 }
 0x539   : > { %v10009_v49 = vpop.f32.mrf.mxu1 }
 0x53a   : > { %v10098_v33 = vadd.f32 %v10009_v49, %v19528_v23  ;;  %v19623_v9 = vadd.f32 %v13810_v54, %v10100_v14  ;;  %v19625_v34 = vpop.f32.mrf.mxu0 }
 0x53b   : > { %v13777_v44 = vpop.f32.mrf.mxu1 }
 0x53c   : > { %v10103_v15 = vadd.f32 %v13777_v44, %v19531_v17  ;;  %v19628_v43 = vadd.f32 %v10747_v51, %v10098_v33  ;;  %v13814_v42 = vpop.f32.mrf.mxu0 }
 0x53d   : > { %v19630_v20 = vpop.f32.mrf.mxu1 }
 0x53e   : > { %v19632_v1 = vadd.f32 %v13813_v11, %v10103_v15  ;;  %v19634_v30 = vpop.f32.mrf.mxu0 }
 0x53f   : > { %v13778_v21 = vpop.f32.mrf.mxu1 }
 0x540   : > { %v10104_v59 = vadd.f32 %v13778_v21, %v19537_v61 }
 0x541   : > { %v19637_v23 = vpop.f32.mrf.mxu1  ;;  %v13817_v13 = vpop.f32.mrf.mxu0 }
 0x542   : > { %v19639_v16 = vadd.f32 %v13814_v42, %v10104_v59 }
 0x543   : > { %v13781_v32 = vpop.f32.mrf.mxu1  ;;  %v10776_v36 = vpop.f32.mrf.mxu0 }
 0x544   : > { %v10107_v17 = vadd.f32 %v13781_v32, %v19543_v46 }
 0x545   : > { %v10038_v24 = vpop.f32.mrf.mxu1  ;;  %v13818_v40 = vpop.f32.mrf.mxu0 }
 0x546   : > { %v10105_v41 = vadd.f32 %v10038_v24, %v19546_v63  ;;  %v19643_v54 = vadd.f32 %v13817_v13, %v10107_v17 }
 0x547   : > { %v13782_v48 = vpop.f32.mrf.mxu1  ;;  %v10779_v6 = vpop.f32.mrf.mxu0 }
 0x548   : > { %v10108_v51 = vadd.f32 %v13782_v48, %v19549_v7  ;;  %v19646_v61 = vadd.f32 %v10776_v36, %v10105_v41 }
 0x549   : > { %v10041_v22 = vpop.f32.mrf.mxu1 }
 0x54a   : > { %v10106_v10 = vadd.f32 %v10041_v22, %v19552_v38  ;;  %v19649_v47 = vadd.f32 %v13818_v40, %v10108_v51 }
 0x54b   : > { %v13785_v14 = vpop.f32.mrf.mxu1  ;;  %v13821_v11 = vpop.f32.mrf.mxu0 }
 0x54c   : > { %v10111_v46 = vadd.f32 %v13785_v14, %v19555_v26  ;;  %v19652_v49 = vadd.f32 %v10779_v6, %v10106_v10 }
 0x54d   : > { %v10054_v63 = vpop.f32.mrf.mxu1  ;;  %v10792_v33 = vpop.f32.mrf.mxu0 }
 0x54e   : > { %v10109_v44 = vadd.f32 %v10054_v63, %v19558_v5  ;;  %v19655_v15 = vadd.f32 %v13821_v11, %v10111_v46 }
 0x54f   : > { %v13786_v7 = vpop.f32.mrf.mxu1  ;;  %v13822_v42 = vpop.f32.mrf.mxu0 }
 0x550   : > { %v10112_v21 = vadd.f32 %v13786_v7, %v19561_v31  ;;  %v19658_v59 = vadd.f32 %v10792_v33, %v10109_v44 }
 0x551   : > { %v10057_v38 = vpop.f32.mrf.mxu1  ;;  %v10795_v26 = vpop.f32.mrf.mxu0 }
 0x552   : > { %v10110_v13 = vadd.f32 %v10057_v38, %v19565_v37  ;;  %v19661_v32 = vadd.f32 %v13822_v42, %v10112_v21  ;;  %v10085_v37 = vadd.f32 %v19582_v60, %v19486_v2 }
 0x553   : > { %v13789_v36 = vpop.f32.mrf.mxu1 }
 0x554   : > { %v19663_v17 = vadd.f32 %v10795_v26, %v10110_v13  ;;  %v10115_v24 = vadd.f32 %v13789_v36, %v19569_v18 }
 0x555   : > { %v10070_v5 = vpop.f32.mrf.mxu1 }
 0x556   : > { %v10113_v40 = vadd.f32 %v10070_v5, %v19574_v8  ;;  %v10086_v8 = vadd.f32 %v19587_v25, %v19492_v35 }
 0x557   : > { %v13790_v41 = vpop.f32.mrf.mxu1 }
 0x558   : > { %v10116_v48 = vadd.f32 %v13790_v41, %v19577_v52  ;;  %v10823_v52 = vadd.f32 %v19563_v28, %v10085_v37  ;;  %v10824_v21 = vadd.f32 %v19572_v53, %v10086_v8 }
 0x559   : > { %v10073_v31 = vpop.f32.mrf.mxu1 }
 0x55a   : > { %v10114_v6 = vadd.f32 %v10073_v31, %v19580_v45 }
 0x55b   : > { %v13833_v51 = vpop.f32.mrf.mxu1  ;;  %v13825_v22 = vpop.f32.mrf.mxu0 }
 0x55c   : > { %v19671_v14 = vadd.f32 %v13825_v22, %v10115_v24  ;;  %v11307_v35 = vadd.f32 %v13833_v51, %v19584_v12 }
 0x55d   : > { %v11178_v10 = vpop.f32.mrf.mxu1  ;;  %v10808_v11 = vpop.f32.mrf.mxu0 }
 0x55e   : > { %v19673_v18 = vadd.f32 %v10808_v11, %v10113_v40  ;;  %v11305_v7 = vadd.f32 %v11178_v10, %v10823_v52 }
 0x55f   : > { %v13834_v46 = vpop.f32.mrf.mxu1  ;;  %v13826_v63 = vpop.f32.mrf.mxu0 }
 0x560   : > { %v19678_v45 = vadd.f32 %v13826_v63, %v10116_v48  ;;  %v11308_v22 = vadd.f32 %v13834_v46, %v19589_v27 }
 0x561   : > { %v11181_v33 = vpop.f32.mrf.mxu1  ;;  %v10811_v44 = vpop.f32.mrf.mxu0 }
 0x562   : > { %v19680_v2 = vadd.f32 %v10811_v44, %v10114_v6  ;;  %v11306_v26 = vadd.f32 %v11181_v33, %v10824_v21 }
 0x563   : > { %v13837_v42 = vpop.f32.mrf.mxu1 }
 0x564   : > { %v13869_v60 = vpop.f32.mrf.mxu0 }
 0x565   : > { %v11194_v38 = vpop.f32.mrf.mxu1  ;;  %v11564_v6 = vadd.f32 %v13869_v60, %v11307_v35 }
 0x566   : > { %v11435_v13 = vpop.f32.mrf.mxu0  ;;  %v11309_v12 = vadd.f32 %v11194_v38, %v19596_v19 }
 0x567   : > { %v11562_v36 = vadd.f32 %v11435_v13, %v11305_v7  ;;  %v13838_v24 = vpop.f32.mrf.mxu1  ;;  %v11596_v8 = vmax.f32 %v11564_v6, 0.0 }
 0x568   : > { %v13870_v5 = vpop.f32.mrf.mxu0  ;;  %v11312_v6 = vadd.f32 %v13838_v24, %v19599_v29 }
 0x569   : > { %v11594_v28 = vmax.f32 %v11562_v36, 0.0  ;;  %v11197_v25 = vpop.f32.mrf.mxu1  ;;  %v11565_v52 = vadd.f32 %v13870_v5, %v11308_v22  ;;  %v11311_v5 = vadd.f32 %v13837_v42, %v19593_v62 }
 0x56a   : > { %v11438_v40 = vpop.f32.mrf.mxu0  ;;  %v11310_v27 = vadd.f32 %v11197_v25, %v19602_v3 }
 0x56b   : > { %v11563_v41 = vadd.f32 %v11438_v40, %v11306_v26  ;;  %11626 = vxpose.xlu0.b32.start [1/16] (narrow) %v11594_v28, 32  ;;  %v13841_v48 = vpop.f32.mrf.mxu1  ;;  %v11597_v60 = vmax.f32 %v11565_v52, 0.0  ;;  %v10102_v52 = vadd.f32 %v19637_v23, %v19540_v58 }
 0x56c   : > { %v11315_v23 = vadd.f32 %v13841_v48, %v19605_v55 }
 0x56d   : > { %v13873_v31 = vpop.f32.mrf.mxu0  ;;  %v11595_v37 = vmax.f32 %v11563_v41, 0.0  ;;  %v11210_v53 = vpop.f32.mrf.mxu1  ;;  %v10101_v41 = vadd.f32 %v19630_v20, %v19534_v50 }
 0x56e   : > { %v11568_v25 = vadd.f32 %v13873_v31, %v11311_v5  ;;  %v11313_v50 = vadd.f32 %v11210_v53, %v19608_v56  ;;  %v10840_v5 = vadd.f32 %v19634_v30, %v10102_v52 }
 0x56f   : > { %v11451_v10 = vpop.f32.mrf.mxu0  ;;  %11627 = vxpose.xlu0.b32.cont [2/16] (narrow) %v11595_v37, 32  ;;  %v19685_v11 = vpop.f32.mrf.mxu1 }
 0x570   : > { %v11566_v21 = vadd.f32 %v11451_v10, %v11309_v12  ;;  %v11600_v12 = vmax.f32 %v11568_v25, 0.0  ;;  %v11316_v30 = vadd.f32 %v19685_v11, %v19611_v57 }
 0x571   : > { %v13874_v63 = vpop.f32.mrf.mxu0  ;;  %v11213_v51 = vpop.f32.mrf.mxu1 }
 0x572   : > { %v11598_v19 = vmax.f32 %v11566_v21, 0.0 }
 0x573   : > { %v11454_v33 = vpop.f32.mrf.mxu0  ;;  %11628 = vxpose.xlu0.b32.cont [3/16] (narrow) %v11596_v8, 32  ;;  %v19688_v44 = vpop.f32.mrf.mxu1  ;;  %v10839_v8 = vadd.f32 %v19625_v34, %v10101_v41 }
 0x574   : > { %v11567_v38 = vadd.f32 %v11454_v33, %v11310_v27  ;;  %v11569_v33 = vadd.f32 %v13874_v63, %v11312_v6  ;;  %v11314_v27 = vadd.f32 %v11213_v51, %v19614_v4 }
 0x575   : > { %v13877_v7 = vpop.f32.mrf.mxu0  ;;  %v19691_v46 = vpop.f32.mrf.mxu1 }
 0x576   : > { %v11599_v22 = vmax.f32 %v11567_v38, 0.0  ;;  %v11572_v4 = vadd.f32 %v13877_v7, %v11315_v23 }
 0x577   : > { %v11467_v13 = vpop.f32.mrf.mxu0  ;;  %11629 = vxpose.xlu0.b32.cont [4/16] (narrow) %v11597_v60, 32  ;;  %v19693_v26 = vpop.f32.mrf.mxu1  ;;  %v11601_v60 = vmax.f32 %v11569_v33, 0.0 }
 0x578   : > { %v11570_v21 = vadd.f32 %v11467_v13, %v11313_v50 }
 0x579   : > { %v13878_v36 = vpop.f32.mrf.mxu0  ;;  %v19696_v35 = vpop.f32.mrf.mxu1 }
 0x57a   : > { %v11602_v56 = vmax.f32 %v11570_v21, 0.0 }
 0x57b   : > { %v11470_v28 = vpop.f32.mrf.mxu0  ;;  %11630 = vxpose.xlu0.b32.cont [5/16] (narrow) %v11598_v19, 32  ;;  %v13849_v40 = vpop.f32.mrf.mxu1 }
 0x57c   : > { %v11571_v53 = vadd.f32 %v11470_v28, %v11314_v27  ;;  %v11323_v41 = vadd.f32 %v13849_v40, %v19632_v1  ;;  %v11604_v1 = vmax.f32 %v11572_v4, 0.0  ;;  %v11317_v28 = vadd.f32 %v19691_v46, %v19620_v39 }
 0x57d   : > { %v19700_v3 = vpop.f32.mrf.mxu0  ;;  %v11242_v37 = vpop.f32.mrf.mxu1  ;;  %v11319_v46 = vadd.f32 %v19688_v44, %v19617_v0 }
 0x57e   : > { %v11321_v29 = vadd.f32 %v11242_v37, %v10839_v8  ;;  %v11603_v37 = vmax.f32 %v11571_v53, 0.0 }
 0x57f   : > { %v11483_v10 = vpop.f32.mrf.mxu0  ;;  %11631 = vxpose.xlu0.b32.cont [6/16] (narrow) %v11599_v22, 32  ;;  %v13850_v62 = vpop.f32.mrf.mxu1 }
 0x580   : > { %v11324_v55 = vadd.f32 %v13850_v62, %v19639_v16  ;;  %v11574_v11 = vadd.f32 %v11483_v10, %v11317_v28  ;;  %v11318_v16 = vadd.f32 %v19696_v35, %v19628_v43  ;;  %v11576_v35 = vadd.f32 %v19700_v3, %v11319_v46 }
 0x581   : > { %v19703_v42 = vpop.f32.mrf.mxu0  ;;  %v11245_v31 = vpop.f32.mrf.mxu1 }
 0x582   : > { %v11322_v38 = vadd.f32 %v11245_v31, %v10840_v5 }
 0x583   : > { %v11486_v20 = vpop.f32.mrf.mxu0  ;;  %11632 = vxpose.xlu0.b32.cont [7/16] (narrow) %v11600_v12, 32  ;;  %v13853_v34 = vpop.f32.mrf.mxu1  ;;  %v11573_v12 = vadd.f32 %v13878_v36, %v11316_v30 }
 0x584   : > { %v11575_v21 = vadd.f32 %v11486_v20, %v11318_v16  ;;  %v11327_v10 = vadd.f32 %v13853_v34, %v19643_v54  ;;  %v11608_v54 = vmax.f32 %v11576_v35, 0.0  ;;  %v339_v35 = vld [vmem:[%s19881_s3 + $0x8] sm:$0xff] }
 0x585   : > { %v13885_v24 = vpop.f32.mrf.mxu0  ;;  %v11258_v22 = vpop.f32.mrf.mxu1  ;;  %v11605_v31 = vmax.f32 %v11573_v12, 0.0 }
 0x586   : > { %v11580_v8 = vadd.f32 %v13885_v24, %v11323_v41  ;;  %v11325_v50 = vadd.f32 %v11258_v22, %v19646_v61  ;;  %v11606_v61 = vmax.f32 %v11574_v11, 0.0 }
 0x587   : > { %v11499_v19 = vpop.f32.mrf.mxu0  ;;  %11633 = vxpose.xlu0.b32.cont [8/16] (narrow) %v11601_v60, 32  ;;  %v13854_v52 = vpop.f32.mrf.mxu1 }
 0x588   : > { %v11578_v58 = vadd.f32 %v11499_v19, %v11321_v29  ;;  %v11612_v33 = vmax.f32 %v11580_v8, 0.0  ;;  %v11328_v0 = vadd.f32 %v13854_v52, %v19649_v47 }
 0x589   : > { %v13886_v63 = vpop.f32.mrf.mxu0  ;;  %v11261_v57 = vpop.f32.mrf.mxu1 }
 0x58a   : > { %v11610_v25 = vmax.f32 %v11578_v58, 0.0  ;;  %v11581_v7 = vadd.f32 %v13886_v63, %v11324_v55  ;;  %v11326_v60 = vadd.f32 %v11261_v57, %v19652_v49  ;;  %v11320_v49 = vadd.f32 %v19693_v26, %v19623_v9 }
 0x58b   : > { %v11502_v6 = vpop.f32.mrf.mxu0  ;;  %11634 = vxpose.xlu0.b32.cont [9/16] (narrow) %v11602_v56, 32  ;;  %v13857_v39 = vpop.f32.mrf.mxu1 }
 0x58c   : > { %v11579_v13 = vadd.f32 %v11502_v6, %v11322_v38  ;;  %11658 = vxpose.xlu1.b32.start [1/16] (narrow) %v11610_v25, 32  ;;  %v11613_v29 = vmax.f32 %v11581_v7, 0.0  ;;  %v11607_v38 = vmax.f32 %v11575_v21, 0.0  ;;  %v11577_v34 = vadd.f32 %v19703_v42, %v11320_v49 }
 0x58d   : > { %v13889_v51 = vpop.f32.mrf.mxu0  ;;  %v11274_v43 = vpop.f32.mrf.mxu1 }
 0x58e   : > { %v11611_v48 = vmax.f32 %v11579_v13, 0.0  ;;  %v11584_v58 = vadd.f32 %v13889_v51, %v11327_v10  ;;  %v11329_v3 = vadd.f32 %v11274_v43, %v19658_v59  ;;  %v11609_v26 = vmax.f32 %v11577_v34, 0.0 }
 0x58f   : > { %11635 = vxpose.xlu0.b32.cont [10/16] (narrow) %v11603_v37, 32  ;;  %v11515_v40 = vpop.f32.mrf.mxu0  ;;  %v13858_v23 = vpop.f32.mrf.mxu1  ;;  %v11331_v13 = vadd.f32 %v13857_v39, %v19655_v15 }
 0x590   : > { %11659 = vxpose.xlu1.b32.cont [2/16] (narrow) %v11611_v48, 32  ;;  %v11582_v24 = vadd.f32 %v11515_v40, %v11325_v50  ;;  %v11616_v63 = vmax.f32 %v11584_v58, 0.0  ;;  %v11332_v37 = vadd.f32 %v13858_v23, %v19661_v32  ;;  %v338_v58 = vld [vmem:[%s19881_s3] sm:$0xff] }
 0x591   : > { %v13890_v62 = vpop.f32.mrf.mxu0  ;;  %v11277_v53 = vpop.f32.mrf.mxu1 }
 0x592   : > { %v11614_v27 = vmax.f32 %v11582_v24, 0.0  ;;  %v11585_v56 = vadd.f32 %v13890_v62, %v11328_v0  ;;  %v11330_v47 = vadd.f32 %v11277_v53, %v19663_v17  ;;  %v20447_v24 = vmov 0  }
 0x593   : > { %11636 = vxpose.xlu0.b32.cont [11/16] (narrow) %v11604_v1, 32  ;;  %v11518_v36 = vpop.f32.mrf.mxu0  ;;  %v13861_v6 = vpop.f32.mrf.mxu1 }
 0x594   : > { %11660 = vxpose.xlu1.b32.cont [3/16] (narrow) %v11612_v33, 32  ;;  %v11583_v5 = vadd.f32 %v11518_v36, %v11326_v60  ;;  %v11617_v41 = vmax.f32 %v11585_v56, 0.0  ;;  %v11335_v50 = vadd.f32 %v13861_v6, %v19671_v14  ;;  %v341_v56 = vld [vmem:[%s19881_s3 + $0x18] sm:$0xff] }
 0x595   : > { %v13893_v19 = vpop.f32.mrf.mxu0  ;;  %v11290_v30 = vpop.f32.mrf.mxu1 }
 0x596   : > { %v11615_v44 = vmax.f32 %v11583_v5, 0.0  ;;  %v11588_v51 = vadd.f32 %v13893_v19, %v11331_v13  ;;  %v11333_v1 = vadd.f32 %v11290_v30, %v19673_v18  ;;  %v11727_v30 = vlaneseq }
 0x597   : > { %11637 = vxpose.xlu0.b32.cont [12/16] (narrow) %v11605_v31, 32  ;;  %v11531_v20 = vpop.f32.mrf.mxu0  ;;  %v13862_v55 = vpop.f32.mrf.mxu1 }
 0x598   : > { %11661 = vxpose.xlu1.b32.cont [4/16] (narrow) %v11613_v29, 32  ;;  %v11586_v25 = vadd.f32 %v11531_v20, %v11329_v3  ;;  %v11620_v52 = vmax.f32 %v11588_v51, 0.0  ;;  %v11336_v16 = vadd.f32 %v13862_v55, %v19678_v45 }
 0x599   : > { %v13894_v9 = vpop.f32.mrf.mxu0  ;;  %v11293_v28 = vpop.f32.mrf.mxu1 }
 0x59a   : > { %v11618_v42 = vmax.f32 %v11586_v25, 0.0  ;;  %v11589_v17 = vadd.f32 %v13894_v9, %v11332_v37  ;;  %v11334_v33 = vadd.f32 %v11293_v28, %v19680_v2  ;;  %v11728_v37 = vshrl.u32 %v11727_v30, 7  ;;  %v11996_v28 = vld [vmem:[%s19881_s3 + $0x20] sm:$0xff] }
 0x59b   : > { %11638 = vxpose.xlu0.b32.cont [13/16] (narrow) %v11606_v61, 32  ;;  %v11534_v22 = vpop.f32.mrf.mxu0 }
 0x59c   : > { %11662 = vxpose.xlu1.b32.cont [5/16] (narrow) %v11614_v27, 32  ;;  %v11587_v4 = vadd.f32 %v11534_v22, %v11330_v47  ;;  %v11621_v15 = vmax.f32 %v11589_v17, 0.0 }
 0x59d   : > { %v13897_v59 = vpop.f32.mrf.mxu0 }
 0x59e   : > { %v11619_v8 = vmax.f32 %v11587_v4, 0.0  ;;  %v11592_v11 = vadd.f32 %v13897_v59, %v11335_v50 }
 0x59f   : > { %11639 = vxpose.xlu0.b32.cont [14/16] (narrow) %v11607_v38, 32  ;;  %v11547_v48 = vpop.f32.mrf.mxu0 }
 0x5a0   : > { %11663 = vxpose.xlu1.b32.cont [6/16] (narrow) %v11615_v44, 32  ;;  %v11590_v12 = vadd.f32 %v11547_v48, %v11333_v1  ;;  %v11624_v18 = vmax.f32 %v11592_v11, 0.0  ;;  %v340_v44 = vld [vmem:[%s19881_s3 + $0x10] sm:$0xff]  ;;  %v11997_v1 = vld [vmem:[%s19881_s3 + $0x28] sm:$0xff] }
 0x5a1   : > { %v13898_v40 = vpop.f32.mrf.mxu0 }
 0x5a2   : > { %v11622_v32 = vmax.f32 %v11590_v12, 0.0  ;;  %v11593_v31 = vadd.f32 %v13898_v40, %v11336_v16  ;;  %v11998_v12 = vld [vmem:[%s19881_s3 + $0x30] sm:$0xff] }
 0x5a3   : > { %11640 = vxpose.xlu0.b32.cont [15/16] (narrow) %v11608_v54, 32  ;;  %v11550_v7 = vpop.f32.mrf.mxu0 }
 0x5a4   : > { %11664 = vxpose.xlu1.b32.cont [7/16] (narrow) %v11616_v63, 32  ;;  %v11591_v57 = vadd.f32 %v11550_v7, %v11334_v33  ;;  %v11625_v29 = vmax.f32 %v11593_v31, 0.0  ;;  %v336_v31 = vld [vmem:[%s19880_s2 + $0x10] sm:$0xff] }
 0x5a6   : > { %v11623_v62 = vmax.f32 %v11591_v57, 0.0 }
 0x5a7   : > { %11641 = vxpose.xlu0.b32.end [16/16] (narrow) %v11609_v26, 32 }
 0x5a8   : > { %11665 = vxpose.xlu1.b32.cont [8/16] (narrow) %v11617_v41, 32 }
 0x5ac   : > { %11666 = vxpose.xlu1.b32.cont [9/16] (narrow) %v11618_v42, 32 }
 0x5b0   : > { %11667 = vxpose.xlu1.b32.cont [10/16] (narrow) %v11619_v8, 32  ;;  %v333_v8 = vld [vmem:[%s19879_s1 + $0x6] sm:$0x1] }
 0x5b4   : > { %11668 = vxpose.xlu1.b32.cont [11/16] (narrow) %v11620_v52, 32  ;;  %v11729_v52 = vsub.s32 0, %v11728_v37 }
 0x5b8   : > { %11669 = vxpose.xlu1.b32.cont [12/16] (narrow) %v11621_v15, 32  ;;  %v11999_v15 = vld [vmem:[%s19881_s3 + $0x38] sm:$0xff] }
 0x5bc   : > { %11670 = vxpose.xlu1.b32.cont [13/16] (narrow) %v11622_v32, 32 }
 0x5c0   : > { %11671 = vxpose.xlu1.b32.cont [14/16] (narrow) %v11623_v62, 32 }
 0x5c4   : > { %11672 = vxpose.xlu1.b32.cont [15/16] (narrow) %v11624_v18, 32  ;;  %v335_v18 = vld [vmem:[%s19880_s2 + $0x8] sm:$0xff] }
 0x5c8   : > { %11673 = vxpose.xlu1.b32.end [16/16] (narrow) %v11625_v29, 32  ;;  %v334_v29 = vld [vmem:[%s19880_s2] sm:$0xff] }
 0x5d0   : > { %13979 = vset.pattern.permute.xlu0 %v20447_v24 }
 0x5e6   : > { %13980 = vset.pattern.permute.xlu1 %v20447_v24  ;;  %v337_v24 = vld [vmem:[%s19880_s2 + $0x18] sm:$0xff] }
 0x5e7   : > { %v19740_v2 = vpop.trf.xlu0 }
 0x5eb   : > { %v19742_v14 = vpop.trf.xlu0 }
 0x5ef   : > { %v19750_v46 = vpop.trf.xlu0 }
 0x5f3   : > { %v19758_v10 = vpop.trf.xlu0 }
 0x608   : > { %v19744_v60 = vpop.trf.xlu1 }
 0x609   : > { %v11690_v45 = vadd.f32 %v19744_v60, %v19740_v2 }
 0x60b   : > { %11691 = vadd.xlane.f32.xlu0 %v11690_v45  ;;  %v14333_v45 = vmov 1  }
 0x60c   : > { %v19748_v39 = vpop.trf.xlu1 }
 0x60d   : > { %v11693_v61 = vadd.f32 %v19748_v39, %v19742_v14 }
 0x60f   : > { %11694 = vadd.xlane.f32.xlu1 %v11693_v61 }
 0x610   : > { %v19754_v36 = vpop.trf.xlu1 }
 0x611   : > { %v11696_v21 = vadd.f32 %v19754_v36, %v19750_v46 }
 0x613   : > { %11697 = vadd.xlane.f32.xlu1 %v11696_v21 }
 0x614   : > { %v19760_v27 = vpop.trf.xlu1 }
 0x615   : > { %v11699_v5 = vadd.f32 %v19760_v27, %v19758_v10 }
 0x617   : > { %11700 = vadd.xlane.f32.xlu1 %v11699_v5 }
 0x694   : > { %v11692_v43 = vpop.xlane.xlu0 %11691 }
 0x695   : > { %v11703_v19 = vmul.f32 0.00390625, %v11692_v43 }
 0x697   : > { %v11707_v54 = vmul.f32 %v11703_v19, %v338_v58 }
 0x698   : > { %v11695_v49 = vpop.xlane.xlu1 %11694 }
 0x699   : > { %v11704_v38 = vmul.f32 0.00390625, %v11695_v49  ;;  %v11712_v53 = vsel %vm11711_vm0, %v11707_v54, 0.0 }
 0x69b   : > { %v11708_v0 = vmul.f32 %v11704_v38, %v339_v35 }
 0x69c   : > { %v11698_v23 = vpop.xlane.xlu1 %11697 }
 0x69d   : > { %v11705_v20 = vmul.f32 0.00390625, %v11698_v23  ;;  %v11713_v34 = vsel %vm11711_vm0, %v11708_v0, 0.0 }
 0x69e   : > { %v11714_v41 = vadd.f32 %v11713_v34, %v11712_v53 }
 0x69f   : > { %v11709_v63 = vmul.f32 %v11705_v20, %v340_v44 }
 0x6a0   : > { %v11701_v3 = vpop.xlane.xlu1 %11700 }
 0x6a1   : > { %v11715_v9 = vsel %vm11711_vm0, %v11709_v63, 0.0  ;;  %v11706_v26 = vmul.f32 0.00390625, %v11701_v3 }
 0x6a2   : > { %v11716_v47 = vadd.f32 %v11715_v9, %v11714_v41 }
 0x6a3   : > { %v11710_v25 = vmul.f32 %v11706_v26, %v341_v56 }
 0x6a5   : > { %v11717_v6 = vsel %vm11711_vm0, %v11710_v25, 0.0 }
 0x6a6   : > { %v11718_v22 = vadd.f32 %v11717_v6, %v11716_v47 }
 0x6a8   : > { %v11719_v13 = vrot.slane %v11718_v22, 4 }
 0x6aa   : > { %v11720_v42 = vadd.f32 %v11719_v13, %v11718_v22 }
 0x6ac   : > { %v11721_v4 = vrot.slane %v11720_v42, 2 }
 0x6ae   : > { %v11722_v59 = vadd.f32 %v11721_v4, %v11720_v42 }
 0x6b0   : > { %v11723_v51 = vrot.slane %v11722_v59, 1 }
 0x6b2   : > { %v11724_v55 = vadd.f32 %v11723_v51, %v11722_v59 }
 0x6b4   : > { %v11725_v48 = vadd.f32 %v11724_v55, %v333_v8 }
 0x6b6   : > { %v11726_v17 = vmax.f32 %v11725_v48, 0.0 }
 0x6b8   : > { %v11730_v40 = vrot.slane %v11726_v17, %v11729_v52 }
 0x6ba   : > { %v11732_v33 = vmul.f32 %v11997_v1, %v11730_v40  ;;  %v11731_v7 = vmul.f32 %v11996_v28, %v11730_v40  ;;  %v11734_v57 = vmul.f32 %v11999_v15, %v11730_v40  ;;  %v11733_v11 = vmul.f32 %v11998_v12, %v11730_v40 }
 0x6bc   : > { %v11738_v50 = vsel %vm11711_vm0, %v11732_v33, 0.0  ;;  %v11735_v32 = vsel %vm11711_vm0, %v11731_v7, 0.0  ;;  %v11744_v16 = vsel %vm11711_vm0, %v11734_v57, 0.0  ;;  %v11741_v62 = vsel %vm11711_vm0, %v11733_v11, 0.0 }
 0x6bd   : > { %11739 = vadd.xlane.f32.xlu1 %v11738_v50  ;;  %11736 = vadd.xlane.f32.xlu0 %v11735_v32 }
 0x6c1   : > { %11745 = vadd.xlane.f32.xlu1 %v11744_v16  ;;  %11742 = vadd.xlane.f32.xlu0 %v11741_v62 }
 0x6d2   : > { %11782 = vperm.xlu1 %13980, %v335_v18  }
 0x6d6   : > { %11787 = vperm.xlu1 %13980, %v336_v31  }
 0x6d7   : > { %11777 = vperm.xlu0 %13979, %v334_v29  }
 0x6da   : > { %11792 = vperm.xlu1 %13980, %v337_v24  }
 0x6db   : > { %13982 = vset.pattern.permute.xlu0 %v14333_v45 }
 0x6de   : > { %13981 = vset.pattern.permute.xlu1 %v14333_v45 }
 0x746   : > { %v11740_v61 = vpop.xlane.xlu1 %11739  ;;  %v11737_v21 = vpop.xlane.xlu0 %11736 }
 0x747   : > { %v11748_v5 = vadd.f32 %v11740_v61, %v335_v18  ;;  %v11747_v43 = vadd.f32 %v11737_v21, %v334_v29 }
 0x749   : > { %v12797_v35 = vmul.f32 -1.442695, %v11748_v5  ;;  %v12796_v49 = vmul.f32 -1.442695, %v11747_v43 }
 0x74a   : > { %v11746_v19 = vpop.xlane.xlu1 %11745  ;;  %v11743_v38 = vpop.xlane.xlu0 %11742 }
 0x74b   : > { %14110 = vpow2.f32 %v12797_v35  ;;  %v11749_v58 = vadd.f32 %v11743_v38, %v336_v31  ;;  %v11750_v0 = vadd.f32 %v11746_v19, %v337_v24 }
 0x74c   : > { %14112 = vpow2.f32 %v12796_v49 }
 0x74d   : > { %v12798_v44 = vmul.f32 -1.442695, %v11749_v58  ;;  %v12799_v23 = vmul.f32 -1.442695, %v11750_v0 }
 0x74e   : > { %v11783_v6 = vpop.permute.xlu1 %11782 }
 0x74f   : > { %14114 = vpow2.f32 %v12798_v44  ;;  %v11797_v30 = vmul.f32 %v11783_v6, %v19742_v14  ;;  %v11798_v59 = vmul.f32 %v11783_v6, %v19748_v39 }
 0x750   : > { %14116 = vpow2.f32 %v12799_v23 }
 0x752   : > { %v11778_v22 = vpop.permute.xlu0 %11777  ;;  %v11788_v13 = vpop.permute.xlu1 %11787 }
 0x753   : > { %v11795_v42 = vmul.f32 %v11778_v22, %v19740_v2  ;;  %v11796_v4 = vmul.f32 %v11778_v22, %v19744_v60  ;;  %v11799_v55 = vmul.f32 %v11788_v13, %v19750_v46  ;;  %v11800_v48 = vmul.f32 %v11788_v13, %v19754_v36 }
 0x755   : > { %v11803_v51 = vadd.f32 %v11797_v30, %v11795_v42  ;;  %v11812_v37 = vadd.f32 %v11798_v59, %v11796_v4 }
 0x756   : > { %v11793_v8 = vpop.permute.xlu1 %11792 }
 0x757   : > { %v11804_v52 = vadd.f32 %v11803_v51, %v11799_v55  ;;  %v11801_v17 = vmul.f32 %v11793_v8, %v19758_v10  ;;  %v11813_v1 = vadd.f32 %v11812_v37, %v11800_v48  ;;  %v11802_v28 = vmul.f32 %v11793_v8, %v19760_v27 }
 0x758   : > { %v14111_v54 = vpop.eup %14110 }
 0x759   : > { %v14113_v20 = vpop.eup %14112  ;;  %v11764_v63 = vadd.f32 1.0, %v14111_v54  ;;  %v11805_v40 = vadd.f32 %v11804_v52, %v11801_v17  ;;  %v11814_v15 = vadd.f32 %v11813_v1, %v11802_v28 }
 0x75a   : > { %v11763_v34 = vadd.f32 1.0, %v14113_v20 }
 0x75b   : > { %v11806_v12 = vrot.slane %v11805_v40, 4  ;;  %v11815_v33 = vrot.slane %v11814_v15, 4 }
 0x75c   : > { %14118 = vrcp.f32 %v11763_v34  ;;  %v14115_v56 = vpop.eup %14114 }
 0x75d   : > { %14120 = vrcp.f32 %v11764_v63  ;;  %v11765_v3 = vadd.f32 1.0, %v14115_v56  ;;  %v14117_v53 = vpop.eup %14116  ;;  %v11807_v7 = vadd.f32 %v11806_v12, %v11805_v40  ;;  %v11816_v50 = vadd.f32 %v11815_v33, %v11814_v15 }
 0x75e   : > { %v11766_v9 = vadd.f32 1.0, %v14117_v53 }
 0x75f   : > { %14122 = vrcp.f32 %v11765_v3  ;;  %v11808_v32 = vrot.slane %v11807_v7, 2  ;;  %v11817_v57 = vrot.slane %v11816_v50, 2 }
 0x760   : > { %14124 = vrcp.f32 %v11766_v9 }
 0x761   : > { %v11809_v11 = vadd.f32 %v11808_v32, %v11807_v7  ;;  %v11818_v16 = vadd.f32 %v11817_v57, %v11816_v50 }
 0x763   : > { %v11810_v62 = vrot.slane %v11809_v11, 1  ;;  %v11819_v18 = vrot.slane %v11818_v16, 1 }
 0x765   : > { %v11811_v31 = vadd.f32 %v11810_v62, %v11809_v11  ;;  %v11820_v29 = vadd.f32 %v11819_v18, %v11818_v16 }
 0x767   : > { %v12800_v24 = vmul.f32 -1.442695, %v11811_v31  ;;  %v12801_v45 = vmul.f32 -1.442695, %v11820_v29 }
 0x769   : > { %v14119_v26 = vpop.eup %14118  ;;  %14126 = vpow2.f32 %v12800_v24 }
 0x76a   : > { %11835 = vperm.xlu1 %13981, %v14119_v26   ;;  %v14121_v41 = vpop.eup %14120  ;;  %14128 = vpow2.f32 %v12801_v45 }
 0x76c   : > { %v14123_v25 = vpop.eup %14122 }
 0x76d   : > { %v14125_v47 = vpop.eup %14124 }
 0x76e   : > { %11840 = vperm.xlu1 %13981, %v14121_v41  }
 0x772   : > { %11845 = vperm.xlu1 %13981, %v14123_v25  }
 0x776   : > { %11850 = vperm.xlu1 %13981, %v14125_v47   ;;  %v14127_v61 = vpop.eup %14126 }
 0x777   : > { %v14129_v21 = vpop.eup %14128  ;;  %v11827_v5 = vadd.f32 1.0, %v14127_v61 }
 0x778   : > { %v11828_v43 = vadd.f32 1.0, %v14129_v21 }
 0x779   : > { %14130 = vrcp.f32 %v11827_v5 }
 0x77a   : > { %14132 = vrcp.f32 %v11828_v43 }
 0x786   : > { %v14131_v35 = vpop.eup %14130 }
 0x787   : > { %v14133_v49 = vpop.eup %14132 }
 0x7e5   : > { %v11836_v19 = vpop.permute.xlu1 %11835 }
 0x7e6   : > { %v11853_v38 = vadd.f32 %v14131_v35, %v11836_v19  ;;  %v11854_v58 = vadd.f32 %v14133_v49, %v11836_v19 }
 0x7e8   : > { %v11861_v0 = vmul.f32 %v11853_v38, %v19740_v2  ;;  %v11862_v44 = vmul.f32 %v11854_v58, %v19744_v60 }
 0x7e9   : > { %v11841_v23 = vpop.permute.xlu1 %11840 }
 0x7ea   : > { %11869 = vst [vmem:[%s325_s14] sm:$0xff] %v11861_v0  ;;  %11870 = vst [vmem:[%s325_s14 + $0x8] sm:$0xff] %v11862_v44  ;;  %v11855_v54 = vadd.f32 %v14131_v35, %v11841_v23  ;;  %v11856_v20 = vadd.f32 %v14133_v49, %v11841_v23 }
 0x7ec   : > { %v11863_v34 = vmul.f32 %v11855_v54, %v19742_v14  ;;  %v11864_v63 = vmul.f32 %v11856_v20, %v19748_v39 }
 0x7ed   : > { %v11846_v56 = vpop.permute.xlu1 %11845 }
 0x7ee   : > { %11871 = vst [vmem:[%s325_s14 + $0x10] sm:$0xff] %v11863_v34  ;;  %11872 = vst [vmem:[%s325_s14 + $0x18] sm:$0xff] %v11864_v63  ;;  %v11857_v3 = vadd.f32 %v14131_v35, %v11846_v56  ;;  %v11858_v53 = vadd.f32 %v14133_v49, %v11846_v56 }
 0x7f0   : > { %v11865_v2 = vmul.f32 %v11857_v3, %v19750_v46  ;;  %v11866_v60 = vmul.f32 %v11858_v53, %v19754_v36 }
 0x7f1   : > { %v11851_v9 = vpop.permute.xlu1 %11850 }
 0x7f2   : > { %11873 = vst [vmem:[%s325_s14 + $0x20] sm:$0xff] %v11865_v2  ;;  %11874 = vst [vmem:[%s325_s14 + $0x28] sm:$0xff] %v11866_v60  ;;  %v11859_v26 = vadd.f32 %v14131_v35, %v11851_v9  ;;  %v11860_v14 = vadd.f32 %v14133_v49, %v11851_v9 }
 0x7f4   : > { %v11867_v39 = vmul.f32 %v11859_v26, %v19758_v10  ;;  %v11868_v46 = vmul.f32 %v11860_v14, %v19760_v27 }
 0x7f6   : > { %11875 = vst [vmem:[%s325_s14 + $0x30] sm:$0xff] %v11867_v39  ;;  %11876 = vst [vmem:[%s325_s14 + $0x38] sm:$0xff] %v11868_v46 }
 0x7f7   : > { %14268 = shalt.err (!%p14265_p9)
}
 0x7f8   : > { %s14269_s13 = scalar_lea.hbm %s19831_s9, 1024  ;;  %s14273_s29 = scalar_lea.hbm %s19885_s7, 2048 }
 0x7f9   : > { %p14270_p13 = scmp.ne.s32.totalorder %s19831_s9, %s14269_s13  ;;  %p14274_p4 = scmp.lt.s32.totalorder %s19831_s9, %s19885_s7 }
 0x7fa   : > { %p14275_p8 = scmp.lt.s32.totalorder %s14273_s29, %s14269_s13 }
 0x7fb   : > { %p14271_p5 = pnand %p14270_p13, %p20448_p10 }
 0x7fc   : > { %p14276_p3 = por %p14275_p8, %p14274_p4 }
 0x7fd   : > { %p14272_p0 = pneg %p14271_p5 }
 0x7ff   : > { %p14277_p11 = pnand %p14276_p3, %p14272_p0 }
 0x801   : > { %14280 = shalt.err (!%p14277_p11)
}
 0x802   : > { %s14335_s17 = smov 256   ;;  %s14336_s30 = smov 16  }
 0x803   : > { %13913 = dma.vmem_to_hbm [thread:$0]  (%p20448_p10), %s19833_s4, 1024, %s19831_s9, %s11878_s28, %s14335_s17, %s14335_s17, %s14336_s30  }
 0x804 PF: > { %s11906_s18 = sand.u32 1, %s14311_s24   ;;  %p20449_p1 = scmp.ne.s32.totalorder %s19979_s8, 0 }
 0x805   : > { %p20450_p2 = scmp.ge.s32.totalorder %s14323_s27, 2  ;;  %s11907_s20 = scalar_lea.sflag [#allocation6], %s11906_s18 }
 0x807   : > { %p13927_p6 = pnand %p20450_p2, %p20449_p1 }
 0x809   : > { %p13928_p12 = pneg %p13927_p6 }
 0x80b   : > { %14306 = dma.done.wait (%p13928_p12), %s11907_s20, 1024  }
 0x80c   : > { %14308 = vsyncadd (%p13928_p12), %s11907_s20, 4294966272  ;;  %p21_p7 = scmp.ge.s32.totalorder %s14449_s23, 4   ;;  %s20451_s24 = smov %s14315_s25 }
 0x80d   : > { %s20452_s25 = smov %s14319_s26  ;;  %s20453_s26 = smov %s14465_s12 }
 0x80e   : > { %s20454_s27 = smov %s14449_s23  ;;  %23 = sbr.rel (!%p21_p7) target bundleno = 8 (0x8), region = 124 }
 0x813   :  { %11912 = vsyncpa [#allocation5], 1 }
 0x814   :  { %11914 = vsyncpa [#allocation5 + $0x1], 1 }
 0x815   :  { %11915 = vsyncpa [#allocation8], 1 }
 0x816   :  { %11916 = vsyncpa [#allocation6], 1 }
 0x817   :  { %11918 = vsyncpa [#allocation6 + $0x1], 1 }

</bundles_post_ra>
